<compile_context>
chip_gen: v5e
topology: v5e:2x2
jax: 0.10.0
libtpu: 0.0.40
codegen_flags: <defaults>
</compile_context>

<pallas_src>
import functools
import math

import jax
import jax.numpy as jnp
from jax import lax
from jax.experimental import pallas as pl
from jax.experimental.pallas import tpu as pltpu


# ----------------------------------------------------------------- VMEM sizing
def _vmem_capacity_bytes():
    try:
        return int(pltpu.get_tpu_info().vmem_capacity_bytes)
    except Exception:
        return 64 * 1024 * 1024  # conservative fallback: v7x per-TC VMEM


_VMEM_CAP = _vmem_capacity_bytes()
_VMEM_LIMIT = (_VMEM_CAP * 3) // 4       # scoped VMEM limit requested from Mosaic
_TILE_BUDGET = (_VMEM_CAP * 2) // 5      # ~40% of physical VMEM for our own blocks


def _pick_tile_rows(rows, per_row_bytes, fixed_bytes):
    """Largest row tile (multiple of 8) whose double-buffered blocks fit the budget,
    while keeping >= 2 grid steps so both TensorCores (v7x) have work."""
    avail = _TILE_BUDGET - 2 * fixed_bytes
    avail = max(avail, 2 * 8 * per_row_bytes)
    tr = int(avail // (2 * per_row_bytes))
    tr = max(8, min(tr, rows))
    tr -= tr % 8
    if tr >= rows and rows > 8:           # keep at least 2 grid steps (megacore)
        half = (rows + 1) // 2
        tr = max(8, ((half + 7) // 8) * 8)
    return max(tr, 8)


_PARAMS_1D = pltpu.CompilerParams(
    dimension_semantics=("parallel",), vmem_limit_bytes=_VMEM_LIMIT)
_PARAMS_2D = pltpu.CompilerParams(
    dimension_semantics=("parallel", "parallel"), vmem_limit_bytes=_VMEM_LIMIT)


# --------------------------------------------------- kernel 1: i_dense + swish
def _proj_kernel(x_ref, wi_ref, qw_ref, kw_ref,
                 u_ref, v_ref, q_ref, k_ref, *, inter):
    xp = jnp.dot(x_ref[...], wi_ref[...], preferred_element_type=jnp.float32)
    xa = xp * jax.nn.sigmoid(xp)                       # swish / SiLU
    u_ref[...] = xa[:, :inter].astype(u_ref.dtype)
    v_ref[...] = xa[:, inter:2 * inter].astype(v_ref.dtype)
    z = xa[:, 2 * inter:]
    q_ref[...] = (z * qw_ref[...].astype(jnp.float32)).astype(q_ref.dtype)
    k_ref[...] = (z * kw_ref[...].astype(jnp.float32)).astype(k_ref.dtype)


def _gau_proj(x2d, wi, qw, kw, inter, key_size):
    m, hidden = x2d.shape
    proj = 2 * inter + key_size
    dtype = x2d.dtype
    bpe = jnp.dtype(dtype).itemsize
    per_row = bpe * (hidden + 2 * inter + 2 * key_size) + 8 * proj  # + f32 temps
    fixed = wi.size * jnp.dtype(wi.dtype).itemsize + 2 * key_size * bpe
    tm = _pick_tile_rows(m, per_row, fixed)
    grid = (pl.cdiv(m, tm),)

    kernel = functools.partial(_proj_kernel, inter=inter)
    return pl.pallas_call(
        kernel,
        out_shape=(
            jax.ShapeDtypeStruct((m, inter), dtype),
            jax.ShapeDtypeStruct((m, inter), dtype),
            jax.ShapeDtypeStruct((m, key_size), dtype),
            jax.ShapeDtypeStruct((m, key_size), dtype),
        ),
        grid_spec=pltpu.PrefetchScalarGridSpec(
            num_scalar_prefetch=0,
            grid=grid,
            in_specs=[
                pl.BlockSpec((tm, hidden), lambda i: (i, 0)),
                pl.BlockSpec((hidden, proj), lambda i: (0, 0)),
                pl.BlockSpec((1, key_size), lambda i: (0, 0)),
                pl.BlockSpec((1, key_size), lambda i: (0, 0)),
            ],
            out_specs=[
                pl.BlockSpec((tm, inter), lambda i: (i, 0)),
                pl.BlockSpec((tm, inter), lambda i: (i, 0)),
                pl.BlockSpec((tm, key_size), lambda i: (i, 0)),
                pl.BlockSpec((tm, key_size), lambda i: (i, 0)),
            ],
        ),
        compiler_params=_PARAMS_1D,
    )(x2d, wi, qw.reshape(1, key_size), kw.reshape(1, key_size))


# --------------------------------------- kernel 2: attention (softmax_plus) + gate
def _attn_kernel(q_ref, k_ref, v_ref, u_ref, o_ref, *, logit_scale):
    q = q_ref[...].astype(jnp.float32)                        # (tq, dk)
    k = k_ref[...].astype(jnp.float32)                        # (S , dk)
    a = lax.dot_general(q, k, (((1,), (1,)), ((), ())),
                        preferred_element_type=jnp.float32)   # (tq, S)
    a = a * logit_scale
    a = a - jnp.max(a, axis=-1, keepdims=True)
    p = jnp.exp(a)
    p = p / jnp.sum(p, axis=-1, keepdims=True)
    av = jnp.dot(p.astype(v_ref.dtype), v_ref[...],
                 preferred_element_type=jnp.float32)          # (tq, dv)
    o_ref[...] = (u_ref[...].astype(jnp.float32) * av).astype(o_ref.dtype)


def _gau_attention(q, k, v, u, logit_scale):
    # TODO(synk): full-sequence K/V per batch (fine for moderate S); long-sequence
    # variants would need a flash-style online softmax over KV tiles.
    b, s, dk = q.shape
    dv = v.shape[-1]
    dtype = v.dtype
    bpe = jnp.dtype(dtype).itemsize
    per_row = bpe * (dk + 2 * dv) + 8 * s            # q/u/out rows + f32 score rows
    fixed = s * (dk + dv) * bpe                      # resident K and V blocks
    tq = _pick_tile_rows(s, per_row, fixed)
    grid = (b, pl.cdiv(s, tq))

    kernel = functools.partial(_attn_kernel, logit_scale=logit_scale)
    return pl.pallas_call(
        kernel,
        out_shape=jax.ShapeDtypeStruct((b, s, dv), dtype),
        grid_spec=pltpu.PrefetchScalarGridSpec(
            num_scalar_prefetch=0,
            grid=grid,
            in_specs=[
                pl.BlockSpec((None, tq, dk), lambda bi, i: (bi, i, 0)),
                pl.BlockSpec((None, s, dk), lambda bi, i: (bi, 0, 0)),
                pl.BlockSpec((None, s, dv), lambda bi, i: (bi, 0, 0)),
                pl.BlockSpec((None, tq, dv), lambda bi, i: (bi, i, 0)),
            ],
            out_specs=pl.BlockSpec((None, tq, dv), lambda bi, i: (bi, i, 0)),
        ),
        compiler_params=_PARAMS_2D,
    )(q, k, v, u)


# -------------------------------- kernel 3: o_dense + residual + RMS-style Norm
def _out_norm_kernel(uav_ref, wo_ref, h_ref, o_ref, *, eps):
    o = jnp.dot(uav_ref[...], wo_ref[...], preferred_element_type=jnp.float32)
    y = h_ref[...].astype(jnp.float32) + o
    var = jnp.mean(y * y, axis=-1, keepdims=True)
    o_ref[...] = (y * lax.rsqrt(var + eps)).astype(o_ref.dtype)


def _gau_out_norm(uav2d, wo, h2d, eps):
    m, dv = uav2d.shape
    hidden = wo.shape[1]
    dtype = h2d.dtype
    bpe = jnp.dtype(dtype).itemsize
    per_row = bpe * (dv + 2 * hidden) + 4 * hidden
    fixed = wo.size * jnp.dtype(wo.dtype).itemsize
    tm = _pick_tile_rows(m, per_row, fixed)
    grid = (pl.cdiv(m, tm),)

    kernel = functools.partial(_out_norm_kernel, eps=eps)
    return pl.pallas_call(
        kernel,
        out_shape=jax.ShapeDtypeStruct((m, hidden), dtype),
        grid_spec=pltpu.PrefetchScalarGridSpec(
            num_scalar_prefetch=0,
            grid=grid,
            in_specs=[
                pl.BlockSpec((tm, dv), lambda i: (i, 0)),
                pl.BlockSpec((dv, hidden), lambda i: (0, 0)),
                pl.BlockSpec((tm, hidden), lambda i: (i, 0)),
            ],
            out_specs=pl.BlockSpec((tm, hidden), lambda i: (i, 0)),
        ),
        compiler_params=_PARAMS_1D,
    )(uav2d, wo, h2d)


# ----------------------------------------------------------------- full layer
def gau_layer(hidden_states, wi, wo, qw, kw, *,
              intermediate_size, attention_key_size,
              eps=1e-12, attention_scale=True):
    """GAULayer forward (inference). hidden_states: (B, S, H).
    wi: (H, 2*E + K), wo: (E, H), qw/kw: (K,) ScaleOffset scale vectors."""
    # TODO(synk): attention_mask / sinusoidal_pos (rotary) paths not implemented
    #             (both are None in the module's default forward exercised here).
    # TODO(synk): attention_dropout / hidden_dropout are inference-mode identities.
    b, s, hidden = hidden_states.shape
    x2d = hidden_states.reshape(b * s, hidden)

    u, v, q, k = _gau_proj(x2d, wi, qw, kw, intermediate_size, attention_key_size)

    scale = (1.0 / math.sqrt(attention_key_size)) if attention_scale else 1.0
    # normalization='softmax_plus' with no mask: softmax(a * log(n) / log(512)), n = S
    logit_scale = scale * math.log(s) / math.log(512.0)

    uav = _gau_attention(
        q.reshape(b, s, attention_key_size),
        k.reshape(b, s, attention_key_size),
        v.reshape(b, s, intermediate_size),
        u.reshape(b, s, intermediate_size),
        logit_scale,
    )

    out2d = _gau_out_norm(uav.reshape(b * s, intermediate_size), wo, x2d, eps)
    return out2d.reshape(b, s, hidden)


if __name__ == "__main__":
    batch, seq = 2, 128
    hidden_size, intermediate_size, attention_key_size = 256, 512, 128
    eps = 1e-12

    key = jax.random.PRNGKey(0)
    k0, k1, k2, k3, k4 = jax.random.split(key, 5)
    h = jax.random.normal(k0, (batch, seq, hidden_size), dtype=jnp.float32)
    wi = jax.random.normal(
        k1, (hidden_size, 2 * intermediate_size + attention_key_size),
        dtype=jnp.float32) * (1.0 / math.sqrt(hidden_size))
    wo = jax.random.normal(
        k2, (intermediate_size, hidden_size),
        dtype=jnp.float32) * (1.0 / math.sqrt(intermediate_size))
    qw = 1.0 + 0.1 * jax.random.normal(k3, (attention_key_size,), dtype=jnp.float32)
    kw = 1.0 + 0.1 * jax.random.normal(k4, (attention_key_size,), dtype=jnp.float32)

    y = gau_layer(h, wi, wo, qw, kw,
                  intermediate_size=intermediate_size,
                  attention_key_size=attention_key_size, eps=eps)
    y = jax.block_until_ready(y)

    # Plain-JAX reference mirroring the PyTorch GAULayer forward (eval mode).
    def ref(hs):
        x = hs @ wi
        xa = x * jax.nn.sigmoid(x)
        u = xa[..., :intermediate_size]
        v = xa[..., intermediate_size:2 * intermediate_size]
        z = xa[..., 2 * intermediate_size:]
        qq = z * qw
        kk = z * kw
        a = jnp.einsum('bmd,bnd->bmn', qq, kk) / math.sqrt(attention_key_size)
        a = a * (math.log(seq) / math.log(512.0))
        A = jax.nn.softmax(a, axis=-1)
        o = (u * jnp.einsum('bmn,bnd->bmd', A, v)) @ wo
        yy = hs + o
        var = jnp.mean(jnp.square(yy), axis=-1, keepdims=True)
        return yy / jnp.sqrt(var + eps)

    y_ref = ref(h)
    assert y.shape == h.shape
    max_err = float(jnp.max(jnp.abs(y - y_ref)))
    assert jnp.allclose(y, y_ref, atol=2e-3, rtol=2e-3), f"max abs err {max_err}"

    print("KERNEL_OK")
</pallas_src>

<mosaic_0001>
module attributes {stable_mosaic.version = 11 : i64} {
  func.func @_proj_kernel(%arg0: i32, %arg1: memref<128x256xf32, #tpu.memory_space<vmem>>, %arg2: memref<256x1152xf32, #tpu.memory_space<vmem>>, %arg3: memref<1x128xf32, #tpu.memory_space<vmem>>, %arg4: memref<1x128xf32, #tpu.memory_space<vmem>>, %arg5: memref<128x512xf32, #tpu.memory_space<vmem>>, %arg6: memref<128x512xf32, #tpu.memory_space<vmem>>, %arg7: memref<128x128xf32, #tpu.memory_space<vmem>>, %arg8: memref<128x128xf32, #tpu.memory_space<vmem>>) attributes {dimension_semantics = [#tpu.dimension_semantics<parallel>], iteration_bounds = array<i64: 2>, scalar_prefetch = 0 : i64, scratch_operands = 0 : i64, tpu.core_type = #tpu.core_type<tc>, window_params = [{transform_indices = @transform_0, window_bounds = array<i64: 128, 256>}, {pipeline_mode = #tpu.pipeline_mode<synchronous>, transform_indices = @transform_1, window_bounds = array<i64: 256, 1152>}, {pipeline_mode = #tpu.pipeline_mode<synchronous>, transform_indices = @transform_2, window_bounds = array<i64: 1, 128>}, {pipeline_mode = #tpu.pipeline_mode<synchronous>, transform_indices = @transform_3, window_bounds = array<i64: 1, 128>}, {transform_indices = @transform_4, window_bounds = array<i64: 128, 512>}, {transform_indices = @transform_5, window_bounds = array<i64: 128, 512>}, {transform_indices = @transform_6, window_bounds = array<i64: 128, 128>}, {transform_indices = @transform_7, window_bounds = array<i64: 128, 128>}]} {
    %c0 = arith.constant 0 : index
    %c0_0 = arith.constant 0 : index
    %0 = vector.load %arg1[%c0, %c0_0] : memref<128x256xf32, #tpu.memory_space<vmem>>, vector<128x256xf32>
    %c0_1 = arith.constant 0 : index
    %c0_2 = arith.constant 0 : index
    %1 = vector.load %arg2[%c0_1, %c0_2] : memref<256x1152xf32, #tpu.memory_space<vmem>>, vector<256x1152xf32>
    %cst = arith.constant dense<0.000000e+00> : vector<128x1152xf32>
    %2 = tpu.matmul %0, %1, %cst {dimension_numbers = #tpu.dot_dimension_numbers<[1], [0], [0], [1], [0, 0, 1, 1], [], []>} : vector<128x256xf32>, vector<256x1152xf32>, vector<128x1152xf32> -> vector<128x1152xf32>
    %3 = arith.negf %2 : vector<128x1152xf32>
    %4 = math.exp %3 : vector<128x1152xf32>
    %cst_3 = arith.constant 1.000000e+00 : f32
    %5 = vector.broadcast %cst_3 : f32 to vector<128x1152xf32>
    %6 = arith.addf %5, %4 : vector<128x1152xf32>
    %7 = arith.divf %5, %6 : vector<128x1152xf32>
    %8 = arith.mulf %2, %7 : vector<128x1152xf32>
    %9 = vector.extract_strided_slice %8 {offsets = [0, 0], sizes = [128, 512], strides = [1, 1]} : vector<128x1152xf32> to vector<128x512xf32>
    %c0_4 = arith.constant 0 : index
    %c0_5 = arith.constant 0 : index
    %10 = vector.load %arg5[%c0_4, %c0_5] : memref<128x512xf32, #tpu.memory_space<vmem>>, vector<128x512xf32>
    tpu.vector_store %arg5[%c0_4, %c0_5], %9 {strides = array<i32>} : memref<128x512xf32, #tpu.memory_space<vmem>>, vector<128x512xf32>,
    %11 = vector.extract_strided_slice %8 {offsets = [0, 512], sizes = [128, 512], strides = [1, 1]} : vector<128x1152xf32> to vector<128x512xf32>
    %c0_6 = arith.constant 0 : index
    %c0_7 = arith.constant 0 : index
    %12 = vector.load %arg6[%c0_6, %c0_7] : memref<128x512xf32, #tpu.memory_space<vmem>>, vector<128x512xf32>
    tpu.vector_store %arg6[%c0_6, %c0_7], %11 {strides = array<i32>} : memref<128x512xf32, #tpu.memory_space<vmem>>, vector<128x512xf32>,
    %13 = vector.extract_strided_slice %8 {offsets = [0, 1024], sizes = [128, 128], strides = [1, 1]} : vector<128x1152xf32> to vector<128x128xf32>
    %c0_8 = arith.constant 0 : index
    %c0_9 = arith.constant 0 : index
    %14 = vector.load %arg3[%c0_8, %c0_9] : memref<1x128xf32, #tpu.memory_space<vmem>>, vector<1x128xf32>
    %15 = vector.broadcast %14 : vector<1x128xf32> to vector<128x128xf32>
    %16 = arith.mulf %13, %15 : vector<128x128xf32>
    %c0_10 = arith.constant 0 : index
    %c0_11 = arith.constant 0 : index
    %17 = vector.load %arg7[%c0_10, %c0_11] : memref<128x128xf32, #tpu.memory_space<vmem>>, vector<128x128xf32>
    tpu.vector_store %arg7[%c0_10, %c0_11], %16 {strides = array<i32>} : memref<128x128xf32, #tpu.memory_space<vmem>>, vector<128x128xf32>,
    %c0_12 = arith.constant 0 : index
    %c0_13 = arith.constant 0 : index
    %18 = vector.load %arg4[%c0_12, %c0_13] : memref<1x128xf32, #tpu.memory_space<vmem>>, vector<1x128xf32>
    %19 = vector.broadcast %18 : vector<1x128xf32> to vector<128x128xf32>
    %20 = arith.mulf %13, %19 : vector<128x128xf32>
    %c0_14 = arith.constant 0 : index
    %c0_15 = arith.constant 0 : index
    %21 = vector.load %arg8[%c0_14, %c0_15] : memref<128x128xf32, #tpu.memory_space<vmem>>, vector<128x128xf32>
    tpu.vector_store %arg8[%c0_14, %c0_15], %20 {strides = array<i32>} : memref<128x128xf32, #tpu.memory_space<vmem>>, vector<128x128xf32>,
    return
  }
  func.func @transform_0(%arg0: i32) -> (i32, i32) {
    %c0_i32 = arith.constant 0 : i32
    %c0_i32_0 = arith.constant 0 : i32
    return %arg0, %c0_i32 : i32, i32
  }
  func.func @transform_1(%arg0: i32) -> (i32, i32) {
    %c0_i32 = arith.constant 0 : i32
    %c0_i32_0 = arith.constant 0 : i32
    %c0_i32_1 = arith.constant 0 : i32
    return %c0_i32, %c0_i32_0 : i32, i32
  }
  func.func @transform_2(%arg0: i32) -> (i32, i32) {
    %c0_i32 = arith.constant 0 : i32
    %c0_i32_0 = arith.constant 0 : i32
    %c0_i32_1 = arith.constant 0 : i32
    return %c0_i32, %c0_i32_0 : i32, i32
  }
  func.func @transform_3(%arg0: i32) -> (i32, i32) {
    %c0_i32 = arith.constant 0 : i32
    %c0_i32_0 = arith.constant 0 : i32
    %c0_i32_1 = arith.constant 0 : i32
    return %c0_i32, %c0_i32_0 : i32, i32
  }
  func.func @transform_4(%arg0: i32) -> (i32, i32) {
    %c0_i32 = arith.constant 0 : i32
    %c0_i32_0 = arith.constant 0 : i32
    return %arg0, %c0_i32 : i32, i32
  }
  func.func @transform_5(%arg0: i32) -> (i32, i32) {
    %c0_i32 = arith.constant 0 : i32
    %c0_i32_0 = arith.constant 0 : i32
    return %arg0, %c0_i32 : i32, i32
  }
  func.func @transform_6(%arg0: i32) -> (i32, i32) {
    %c0_i32 = arith.constant 0 : i32
    %c0_i32_0 = arith.constant 0 : i32
    return %arg0, %c0_i32 : i32, i32
  }
  func.func @transform_7(%arg0: i32) -> (i32, i32) {
    %c0_i32 = arith.constant 0 : i32
    %c0_i32_0 = arith.constant 0 : i32
    return %arg0, %c0_i32 : i32, i32
  }
}

</mosaic_0001>

<bundles_post_ra>
// kernel: tpu_custom_call.1
= control target key start
LH: loop header
LB: loop body
LE: loop exit
PB: predicated region body
PF: predicated region fallthrough
CT: control target
= control target key end

     0   :  { %s11688_s0 = inlined_call_operand.hbm [shape: f32[256,256], index: 0, kind: input, shape index: {}]   ;;  %s11689_s1 = inlined_call_operand.hbm [shape: f32[256,1152], index: 1, kind: input, shape index: {}]   ;;  %s11690_s2 = inlined_call_operand.hbm [shape: f32[1,128], index: 2, kind: input, shape index: {}]   ;;  %s11691_s3 = inlined_call_operand.hbm [shape: f32[1,128], index: 3, kind: input, shape index: {}]   ;;  %s11692_s4 = inlined_call_operand.hbm [shape: f32[256,512], index: 4, kind: output, shape index: {0}]   ;;  %s11693_s5 = inlined_call_operand.hbm [shape: f32[256,512], index: 5, kind: output, shape index: {1}]   ;;  %s11694_s6 = inlined_call_operand.hbm [shape: f32[256,128], index: 6, kind: output, shape index: {2}]   ;;  %s11695_s7 = inlined_call_operand.hbm [shape: f32[256,128], index: 7, kind: output, shape index: {3}]  }
   0x1   :  { %11700 = sst [smem:[#allocation22_spill]] %s11688_s0 }
   0x2   :  { %11701 = sst [smem:[#allocation23_spill]] %s11689_s1 }
   0x3   :  { %13 = vsyncpa [#allocation3], 0 }
   0x4   :  { %15 = vsyncpa [#allocation3 + $0x1], 0 }
   0x5   :  { %16 = vsyncpa [#allocation6], 0 }
   0x6   :  { %17 = vsyncpa [#allocation9], 0 }
   0x7   :  { %18 = vsyncpa [#allocation4], 0 }
   0x8   :  { %20 = vsyncpa [#allocation4 + $0x1], 0 }
   0x9   :  { %21 = vsyncpa [#allocation12], 0 }
   0xa   :  { %23 = vsyncpa [#allocation12 + $0x1], 0 }
   0xb   :  { %24 = vsyncpa [#allocation15], 0 }
   0xc   :  { %26 = vsyncpa [#allocation15 + $0x1], 0  ;;  %s6565_s24 = smov 0   ;;  %s6567_s25 = smov 0  }
   0xd   :  { %s6569_s26 = smov 0   ;;  %s6571_s27 = smov 0  }
   0xe LB: > { %s6586_s28 = sadd.s32 4294967295, %s6512_s27   ;;  %s11696_s29 = sadd.s32 4294967294, %s6512_s27   ;;  %s6512_s27 = sphi %s6571_s27, %s12050_s27   ;;  %s6508_s26 = sphi %s6569_s26, %s12049_s26   ;;  %s6504_s25 = sphi %s6567_s25, %s12048_s25   ;;  %s6500_s24 = sphi %s6565_s24, %s12047_s24  }
   0xf   : > { %p52_p0 = scmp.ne.s32.totalorder %s6504_s25, %s6500_s24  ;;  %p53_p1 = scmp.eq.s32.totalorder %s6586_s28, 0 }
  0x10   : > { %p139_p2 = scmp.eq.s32.totalorder %s6586_s28, 1  ;;  %p145_p3 = scmp.eq.s32.totalorder %s11696_s29, 1 }
  0x11   : > { %p6597_p4 = por %p53_p1, %p52_p0  ;;  %p5232_p5 = scmp.ge.s32.totalorder %s6512_s27, 1 }
  0x12   : > { %p6602_p6 = por %p145_p3, %p52_p0  ;;  %p230_p7 = scmp.lt.s32.totalorder %s6512_s27, 3 }
  0x13   : > { %s11704_s1 = sld [smem:[#allocation23_spill]]  ;;  %s6514_s13 = smov [#allocation5]  }
  0x14   : > { %p6610_p8 = pnand %p5232_p5, %p230_p7  ;;  %s243_s14 = sshll.u32 %s6514_s13, 4  ;;  %s244_s14 = int_to_ptr.vmem [resolvable:$true] %s243_s14 }
  0x15   : > { %s256_s18 = sshll.u32 %s11690_s2, 4  ;;  %s6515_s19 = smov 1152   ;;  %s257_s18 = int_to_ptr.hbm [resolvable:$true] %s256_s18 }
  0x16   : > { %p5472_p9 = pneg %p6610_p8  ;;  %s6516_s20 = smov 72  }
  0x17   : > { %s6517_s21 = smov [#allocation7]   ;;  %s268_s10 = sshll.u32 %s11691_s3, 4  ;;  %s269_s10 = int_to_ptr.hbm [resolvable:$true] %s268_s10 }
  0x18   : > { %p6618_p10 = pnand %p5472_p9, %p53_p1  ;;  %s258_s22 = sshll.u32 %s6517_s21, 4  ;;  %s259_s22 = int_to_ptr.vmem [resolvable:$true] %s258_s22 }
  0x19   : > { %s241_s11 = sshll.u32 %s11704_s1, 4  ;;  %s6518_s13 = smov [#allocation8]   ;;  %s242_s11 = int_to_ptr.hbm [resolvable:$true] %s241_s11 }
  0x1a   : > { %5475 = dma.hbm_to_vmem [thread:$0]  (!%p6618_p10), %s242_s11, 36864, %s244_s14, [#allocation6], %s6515_s19, %s6515_s19, %s6516_s20  }
  0x1b   : > { %5478 = dma.hbm_to_vmem [thread:$0]  (!%p6618_p10), %s257_s18, 16, %s259_s22, [#allocation6]  }
  0x1c   : > { %s270_s16 = sshll.u32 %s6518_s13, 4  ;;  %s6634_s11 = sadd.s32 1, %s6512_s27   ;;  %s271_s16 = int_to_ptr.vmem [resolvable:$true] %s270_s16 }
  0x1d   : > { %5481 = dma.hbm_to_vmem [thread:$0]  (!%p6618_p10), %s269_s10, 16, %s271_s16, [#allocation9]  }
  0x1e   : > { %s36_s14 = ssub.s32 %s6512_s27, %s6634_s11  ;;  %s39_s17 = sadd.s32 1, %s6508_s26 }
  0x1f   : > { %p37_p12 = scmp.eq.s32.totalorder %s36_s14, 0  ;;  %p46_p13 = scmp.ne.s32.totalorder %s6508_s26, %s6504_s25 }
  0x20   : > { %p47_p0 = scmp.eq.s32.totalorder %s6512_s27, 0  ;;  %p5502_p3 = scmp.lt.s32.totalorder %s6512_s27, 2 }
  0x21   : > { %s6646_s19 = scalar_select %p37_p12, %s6508_s26, %s39_s17  }
  0x22   : > { %p48_p5 = por %p47_p0, %p46_p13  ;;  %p6650_p7 = por %p139_p2, %p46_p13 }
  0x23   : > { %s281_s20 = sand.u32 1, %s6508_s26   ;;  %s5411_s21 = sshll.u32 %s6512_s27, 8 }
  0x24   : > { %s5237_s15 = sshll.u32 %s281_s20, 8  ;;  %s11708_s0 = sld [smem:[#allocation22_spill]] }
  0x25   : > { %s285_s13 = scalar_lea.vmem [#allocation2], %s5237_s15  ;;  %p6661_p9 = pnand %p5502_p3, %p48_p5 }
  0x26   : > { %s294_s16 = sshll.u32 %s285_s13, 4  ;;  %s282_s17 = scalar_lea.sflag [#allocation3], %s281_s20  ;;  %s295_s16 = int_to_ptr.vmem [resolvable:$true] %s294_s16 }
  0x27   : > { %p6320_p10 = pneg %p6661_p9 }
  0x2a   : > { %s291_s9 = scalar_lea.hbm %s11708_s0, %s5411_s21  ;;  %s6323_s22 = scalar_lea.hbm %s11708_s0, 512 }
  0x2b   : > { %s292_s10 = sshll.u32 %s291_s9, 4  ;;  %s293_s10 = int_to_ptr.hbm [resolvable:$true] %s292_s10 }
  0x2c   : > { %s6316_s29 = sshra.s32 %s293_s10, 4  ;;  %s6317_s29 = int_to_ptr.hbm [resolvable:$true] %s6316_s29 }
  0x2d   : > { %s6318_s1 = scalar_lea.hbm %s6317_s29, 256  ;;  %p6324_p0 = scmp.lt.s32.totalorder %s6317_s29, %s11708_s0 }
  0x2e   : > { %p6319_p2 = scmp.ne.s32.totalorder %s6317_s29, %s6318_s1  ;;  %p6325_p3 = scmp.lt.s32.totalorder %s6323_s22, %s6318_s1 }
  0x30   : > { %p6321_p12 = pnand %p6320_p10, %p6319_p2  ;;  %p6326_p5 = por %p6325_p3, %p6324_p0 }
  0x32   : > { %p6322_p13 = pneg %p6321_p12 }
  0x34   : > { %p6327_p11 = pnand %p6326_p5, %p6322_p13 }
  0x36   : > { %6330 = shalt.err (!%p6327_p11)
}
  0x37   : > { %s6519_s20 = smov 256   ;;  %s6520_s13 = smov 16  }
  0x38   : > { %5485 = dma.hbm_to_vmem [thread:$0]  (!%p6661_p9), %s293_s10, 4096, %s295_s16, %s282_s17, %s6519_s20, %s6519_s20, %s6520_s13  }
  0x39   : > { %306 = sbr.rel (%p6610_p8) target bundleno = 946 (0x3b2), region = 36  ;;  %s6678_s21 = sand.u32 (!%p6610_p8), 1, %s6504_s25  }
  0x3a   : > { %s5242_s15 = sshll.u32 (!%p6610_p8), %s6678_s21, 8  ;;  %s309_s29 = scalar_lea.sflag (!%p6610_p8), [#allocation3], %s6678_s21 }
  0x3b   : > { %s6682_s1 = scalar_lea.vmem (!%p6610_p8), [#allocation2], %s5242_s15 }
  0x3e   : > { %6475 = dma.done.wait (%p6597_p4), %s309_s29, 4096  }
  0x3f   : > { %6477 = vsyncadd (%p6597_p4), %s309_s29, 4294963200 }
  0x40   : > { %6479 = dma.done.wait (%p53_p1), [#allocation6], 36880  }
  0x41   : > { %6481 = vsyncadd (%p53_p1), [#allocation6], 4294930416 }
  0x42   : > { %6483 = dma.done.wait (%p53_p1), [#allocation9], 16  }
  0x43   : > { %6485 = vsyncadd (%p53_p1), [#allocation9], 4294967280  ;;  %v546_v0 = vld [vmem:[#allocation5 + $0x438] sm:$0xff]  ;;  %v537_v2 = vld [vmem:[#allocation5 + $0x3f0] sm:$0xff]  ;;  %s5246_s30 = sshll.u32 %s6678_s21, 9  ;;  %s5248_s16 = sshll.u32 %s6678_s21, 7 }
  0x44   : > { %v690_v1 = vld [vmem:[#allocation5 + $0x8b8] sm:$0xff]  ;;  %699 = vmatpush.msra.mxu0 %v546_v0  ;;  %5418 = vmatpush.msra.mxu2 %v546_v0  ;;  %v681_v3 = vld [vmem:[#allocation5 + $0x870] sm:$0xff]  ;;  %v528_v4 = vld [vmem:[#allocation5 + $0x3a8] sm:$0xff]  ;;  %s6948_s12 = scalar_lea.vmem [#allocation10], %s5246_s30  ;;  %s8663_s10 = scalar_lea.vmem [#allocation11], %s5246_s30 }
  0x45   : > { %764 = vmatpush.msra.mxu1 %v690_v1  ;;  %5434 = vmatpush.msra.mxu3 %v690_v1  ;;  %v672_v5 = vld [vmem:[#allocation5 + $0x828] sm:$0xff]  ;;  %v519_v6 = vld [vmem:[#allocation5 + $0x360] sm:$0xff]  ;;  %v510_v8 = vld [vmem:[#allocation5 + $0x318] sm:$0xff]  ;;  %s10901_s14 = scalar_lea.vmem [#allocation13], %s5248_s16  ;;  %s10913_s17 = scalar_lea.vmem [#allocation14], %s5248_s16 }
  0x46   : > { %700 = vmatpush.msra.mxu0 %v537_v2  ;;  %5419 = vmatpush.msra.mxu2 %v537_v2  ;;  %v663_v7 = vld [vmem:[#allocation5 + $0x7e0] sm:$0xff]  ;;  %v654_v9 = vld [vmem:[#allocation5 + $0x798] sm:$0xff]  ;;  %v501_v10 = vld [vmem:[#allocation5 + $0x2d0] sm:$0xff]  ;;  %s11697_s22 = sshll.u32 %s6586_s28, 9  ;;  %s4978_s13 = sshll.u32 %s6948_s12, 4  ;;  %s4979_s13 = int_to_ptr.vmem [resolvable:$true] %s4978_s13 }
  0x47   : > { %765 = vmatpush.msra.mxu1 %v681_v3  ;;  %5435 = vmatpush.msra.mxu3 %v681_v3  ;;  %v645_v11 = vld [vmem:[#allocation5 + $0x750] sm:$0xff]  ;;  %v492_v12 = vld [vmem:[#allocation5 + $0x288] sm:$0xff]  ;;  %v483_v14 = vld [vmem:[#allocation5 + $0x240] sm:$0xff]  ;;  %s4977_s20 = scalar_lea.hbm %s11692_s4, %s11697_s22  ;;  %s4950_s29 = scalar_lea.sflag [#allocation4], %s6678_s21 }
  0x48   : > { %701 = vmatpush.msra.mxu0 %v528_v4  ;;  %5420 = vmatpush.msra.mxu2 %v528_v4  ;;  %v636_v13 = vld [vmem:[#allocation5 + $0x708] sm:$0xff]  ;;  %v627_v15 = vld [vmem:[#allocation5 + $0x6c0] sm:$0xff]  ;;  %v474_v16 = vld [vmem:[#allocation5 + $0x1f8] sm:$0xff]  ;;  %s4980_s15 = sshll.u32 %s4977_s20, 4  ;;  %s6366_s23 = scalar_lea.hbm %s11692_s4, 1024  ;;  %s4981_s15 = int_to_ptr.hbm [resolvable:$true] %s4980_s15 }
  0x49   : > { %766 = vmatpush.msra.mxu1 %v672_v5  ;;  %5436 = vmatpush.msra.mxu3 %v672_v5  ;;  %v618_v17 = vld [vmem:[#allocation5 + $0x678] sm:$0xff]  ;;  %v465_v18 = vld [vmem:[#allocation5 + $0x1b0] sm:$0xff]  ;;  %v456_v20 = vld [vmem:[#allocation5 + $0x168] sm:$0xff] }
  0x4a   : > { %702 = vmatpush.msra.mxu0 %v519_v6  ;;  %5421 = vmatpush.msra.mxu2 %v519_v6  ;;  %v609_v19 = vld [vmem:[#allocation5 + $0x630] sm:$0xff]  ;;  %v600_v21 = vld [vmem:[#allocation5 + $0x5e8] sm:$0xff]  ;;  %v447_v22 = vld [vmem:[#allocation5 + $0x120] sm:$0xff] }
  0x4b   : > { %767 = vmatpush.msra.mxu1 %v663_v7  ;;  %5437 = vmatpush.msra.mxu3 %v663_v7  ;;  %v591_v23 = vld [vmem:[#allocation5 + $0x5a0] sm:$0xff]  ;;  %v438_v24 = vld [vmem:[#allocation5 + $0xd8] sm:$0xff]  ;;  %v429_v26 = vld [vmem:[#allocation5 + $0x90] sm:$0xff] }
  0x4c   : > { %703 = vmatpush.msra.mxu0 %v510_v8  ;;  %5422 = vmatpush.msra.mxu2 %v510_v8  ;;  %v582_v25 = vld [vmem:[#allocation5 + $0x558] sm:$0xff]  ;;  %v573_v27 = vld [vmem:[#allocation5 + $0x510] sm:$0xff]  ;;  %v420_v28 = vld [vmem:[#allocation5 + $0x48] sm:$0xff] }
  0x4d   : > { %768 = vmatpush.msra.mxu1 %v654_v9  ;;  %5438 = vmatpush.msra.mxu3 %v654_v9  ;;  %v564_v29 = vld [vmem:[#allocation5 + $0x4c8] sm:$0xff]  ;;  %v411_v30 = vld [vmem:[#allocation5] sm:$0xff]  ;;  %v538_v40 = vld [vmem:[#allocation5 + $0x3f8] sm:$0xff] }
  0x4e   : > { %704 = vmatpush.msra.mxu0 %v501_v10  ;;  %5423 = vmatpush.msra.mxu2 %v501_v10  ;;  %v555_v31 = vld [vmem:[#allocation5 + $0x480] sm:$0xff]  ;;  %v6703_v34 = vld [vmem:[%s6682_s1 + $0x8] sm:$0xff]  ;;  %v682_v41 = vld [vmem:[#allocation5 + $0x878] sm:$0xff] }
  0x4f   : > { %769 = vmatpush.msra.mxu1 %v645_v11  ;;  %5439 = vmatpush.msra.mxu3 %v645_v11  ;;  %v6697_v32 = vld [vmem:[%s6682_s1] sm:$0xff]  ;;  %v6706_v35 = vld [vmem:[%s6682_s1 + $0x88] sm:$0xff]  ;;  %v529_v44 = vld [vmem:[#allocation5 + $0x3b0] sm:$0xff] }
  0x50   : > { %705 = vmatpush.msra.mxu0 %v492_v12  ;;  %5424 = vmatpush.msra.mxu2 %v492_v12  ;;  %v6700_v33 = vld [vmem:[%s6682_s1 + $0x80] sm:$0xff]  ;;  %v548_v38 = vld [vmem:[#allocation5 + $0x448] sm:$0xff]  ;;  %v673_v45 = vld [vmem:[#allocation5 + $0x830] sm:$0xff] }
  0x51   : > { %770 = vmatpush.msra.mxu1 %v636_v13  ;;  %5440 = vmatpush.msra.mxu3 %v636_v13  ;;  %v547_v36 = vld [vmem:[#allocation5 + $0x440] sm:$0xff]  ;;  %v692_v39 = vld [vmem:[#allocation5 + $0x8c8] sm:$0xff]  ;;  %v530_v46 = vld [vmem:[#allocation5 + $0x3b8] sm:$0xff] }
  0x52   : > { %706 = vmatpush.msra.mxu0 %v483_v14  ;;  %5425 = vmatpush.msra.mxu2 %v483_v14  ;;  %v691_v37 = vld [vmem:[#allocation5 + $0x8c0] sm:$0xff]  ;;  %v674_v47 = vld [vmem:[#allocation5 + $0x838] sm:$0xff]  ;;  %v6713_v48 = vld [vmem:[%s6682_s1 + $0x10] sm:$0xff] }
  0x53   : > { %771 = vmatpush.msra.mxu1 %v627_v15  ;;  %5441 = vmatpush.msra.mxu3 %v627_v15  ;;  %v539_v42 = vld [vmem:[#allocation5 + $0x400] sm:$0xff]  ;;  %v6716_v49 = vld [vmem:[%s6682_s1 + $0x90] sm:$0xff]  ;;  %v6719_v50 = vld [vmem:[%s6682_s1 + $0x18] sm:$0xff] }
  0x54   : > { %707 = vmatpush.msra.mxu0 %v474_v16  ;;  %5426 = vmatpush.msra.mxu2 %v474_v16  ;;  %v683_v43 = vld [vmem:[#allocation5 + $0x880] sm:$0xff]  ;;  %v6722_v51 = vld [vmem:[%s6682_s1 + $0x98] sm:$0xff]  ;;  %v520_v52 = vld [vmem:[#allocation5 + $0x368] sm:$0xff] }
  0x55   : > { %772 = vmatpush.msra.mxu1 %v618_v17  ;;  %5442 = vmatpush.msra.mxu3 %v618_v17  ;;  %v664_v53 = vld [vmem:[#allocation5 + $0x7e8] sm:$0xff]  ;;  %v521_v54 = vld [vmem:[#allocation5 + $0x370] sm:$0xff]  ;;  %v511_v56 = vld [vmem:[#allocation5 + $0x320] sm:$0xff] }
  0x56   : > { %708 = vmatpush.msra.mxu0 %v465_v18  ;;  %5427 = vmatpush.msra.mxu2 %v465_v18  ;;  %v665_v55 = vld [vmem:[#allocation5 + $0x7f0] sm:$0xff]  ;;  %v655_v57 = vld [vmem:[#allocation5 + $0x7a0] sm:$0xff]  ;;  %v512_v58 = vld [vmem:[#allocation5 + $0x328] sm:$0xff] }
  0x57   : > { %773 = vmatpush.msra.mxu1 %v609_v19  ;;  %5443 = vmatpush.msra.mxu3 %v609_v19  ;;  %v656_v59 = vld [vmem:[#allocation5 + $0x7a8] sm:$0xff]  ;;  %v502_v60 = vld [vmem:[#allocation5 + $0x2d8] sm:$0xff]  ;;  %v503_v62 = vld [vmem:[#allocation5 + $0x2e0] sm:$0xff] }
  0x58   : > { %709 = vmatpush.msra.mxu0 %v456_v20  ;;  %5428 = vmatpush.msra.mxu2 %v456_v20  ;;  %v646_v61 = vld [vmem:[#allocation5 + $0x758] sm:$0xff]  ;;  %v647_v63 = vld [vmem:[#allocation5 + $0x760] sm:$0xff]  ;;  %v6735_v2 = vld [vmem:[%s6682_s1 + $0x28] sm:$0xff] }
  0x59   : > { %774 = vmatpush.msra.mxu1 %v600_v21  ;;  %5444 = vmatpush.msra.mxu3 %v600_v21  ;;  %v6729_v0 = vld [vmem:[%s6682_s1 + $0x20] sm:$0xff]  ;;  %v6738_v3 = vld [vmem:[%s6682_s1 + $0xa8] sm:$0xff]  ;;  %v493_v4 = vld [vmem:[#allocation5 + $0x290] sm:$0xff] }
  0x5a   : > { %710 = vmatpush.msra.mxu0 %v447_v22  ;;  %5429 = vmatpush.msra.mxu2 %v447_v22  ;;  %v6732_v1 = vld [vmem:[%s6682_s1 + $0xa0] sm:$0xff]  ;;  %v637_v5 = vld [vmem:[#allocation5 + $0x710] sm:$0xff]  ;;  %v494_v6 = vld [vmem:[#allocation5 + $0x298] sm:$0xff] }
  0x5b   : > { %775 = vmatpush.msra.mxu1 %v591_v23  ;;  %5445 = vmatpush.msra.mxu3 %v591_v23  ;;  %v638_v7 = vld [vmem:[#allocation5 + $0x718] sm:$0xff]  ;;  %v484_v8 = vld [vmem:[#allocation5 + $0x248] sm:$0xff]  ;;  %v485_v10 = vld [vmem:[#allocation5 + $0x250] sm:$0xff] }
  0x5c   : > { %711 = vmatpush.msra.mxu0 %v438_v24  ;;  %5430 = vmatpush.msra.mxu2 %v438_v24  ;;  %v628_v9 = vld [vmem:[#allocation5 + $0x6c8] sm:$0xff]  ;;  %v629_v11 = vld [vmem:[#allocation5 + $0x6d0] sm:$0xff]  ;;  %v475_v12 = vld [vmem:[#allocation5 + $0x200] sm:$0xff] }
  0x5d   : > { %776 = vmatpush.msra.mxu1 %v582_v25  ;;  %5446 = vmatpush.msra.mxu3 %v582_v25  ;;  %v619_v13 = vld [vmem:[#allocation5 + $0x680] sm:$0xff]  ;;  %v476_v14 = vld [vmem:[#allocation5 + $0x208] sm:$0xff]  ;;  %v6745_v16 = vld [vmem:[%s6682_s1 + $0x30] sm:$0xff] }
  0x5e   : > { %712 = vmatpush.msra.mxu0 %v429_v26  ;;  %5431 = vmatpush.msra.mxu2 %v429_v26  ;;  %v620_v15 = vld [vmem:[#allocation5 + $0x688] sm:$0xff]  ;;  %v6748_v17 = vld [vmem:[%s6682_s1 + $0xb0] sm:$0xff]  ;;  %v6751_v18 = vld [vmem:[%s6682_s1 + $0x38] sm:$0xff] }
  0x5f   : > { %777 = vmatpush.msra.mxu1 %v573_v27  ;;  %5447 = vmatpush.msra.mxu3 %v573_v27  ;;  %v6754_v19 = vld [vmem:[%s6682_s1 + $0xb8] sm:$0xff]  ;;  %v467_v22 = vld [vmem:[#allocation5 + $0x1c0] sm:$0xff]  ;;  %v457_v24 = vld [vmem:[#allocation5 + $0x170] sm:$0xff] }
  0x60   : > { %713 = vmatpush.msra.mxu0 %v420_v28  ;;  %5432 = vmatpush.msra.mxu2 %v420_v28  ;;  %v466_v20 = vld [vmem:[#allocation5 + $0x1b8] sm:$0xff]  ;;  %v611_v23 = vld [vmem:[#allocation5 + $0x640] sm:$0xff]  ;;  %v601_v25 = vld [vmem:[#allocation5 + $0x5f0] sm:$0xff] }
  0x61   : > { %778 = vmatpush.msra.mxu1 %v564_v29  ;;  %5448 = vmatpush.msra.mxu3 %v564_v29  ;;  %v610_v21 = vld [vmem:[#allocation5 + $0x638] sm:$0xff]  ;;  %v448_v28 = vld [vmem:[#allocation5 + $0x128] sm:$0xff] }
  0x62   : > { %714 = vmatpush.msra.mxu0 %v411_v30  ;;  %5433 = vmatpush.msra.mxu2 %v411_v30  ;;  %v458_v26 = vld [vmem:[#allocation5 + $0x178] sm:$0xff]  ;;  %v592_v29 = vld [vmem:[#allocation5 + $0x5a8] sm:$0xff]  ;;  %v449_v30 = vld [vmem:[#allocation5 + $0x130] sm:$0xff] }
  0x63   : > { %779 = vmatpush.msra.mxu1 %v555_v31  ;;  %5449 = vmatpush.msra.mxu3 %v555_v31  ;;  %v602_v27 = vld [vmem:[#allocation5 + $0x5f8] sm:$0xff]  ;;  %v593_v31 = vld [vmem:[#allocation5 + $0x5b0] sm:$0xff] }
  0x64   : > { %715 = vmatmul.f32.vlgmr.msra.gmra.mxu0 %v6697_v32  ;;  %739 = vmatmul.f32.vlgmr.msra.gmra.mxu2 %v6700_v33 }
  0x65   : > { %780 = vmatmul.f32.vlgmr.msra.gmra.mxu1 %v6703_v34  ;;  %804 = vmatmul.f32.vlgmr.msra.gmra.mxu3 %v6706_v35 }
  0x66   : > { %829 = vmatpush.msrb.mxu2 %v547_v36  ;;  %894 = vmatpush.msrb.mxu3 %v691_v37  ;;  %v6761_v36 = vld [vmem:[%s6682_s1 + $0x40] sm:$0xff] }
  0x67   : > { %959 = vmatpush.msrb.mxu0 %v548_v38  ;;  %1024 = vmatpush.msrb.mxu1 %v692_v39  ;;  %v6764_v37 = vld [vmem:[%s6682_s1 + $0xc0] sm:$0xff]  ;;  %v6767_v38 = vld [vmem:[%s6682_s1 + $0x48] sm:$0xff] }
  0x68   : > { %830 = vmatpush.msrb.mxu2 %v538_v40  ;;  %895 = vmatpush.msrb.mxu3 %v682_v41  ;;  %v6770_v39 = vld [vmem:[%s6682_s1 + $0xc8] sm:$0xff]  ;;  %v439_v40 = vld [vmem:[#allocation5 + $0xe0] sm:$0xff] }
  0x69   : > { %960 = vmatpush.msrb.mxu0 %v539_v42  ;;  %1025 = vmatpush.msrb.mxu1 %v683_v43  ;;  %v583_v41 = vld [vmem:[#allocation5 + $0x560] sm:$0xff]  ;;  %v440_v42 = vld [vmem:[#allocation5 + $0xe8] sm:$0xff] }
  0x6a   : > { %831 = vmatpush.msrb.mxu2 %v529_v44  ;;  %896 = vmatpush.msrb.mxu3 %v673_v45  ;;  %v584_v43 = vld [vmem:[#allocation5 + $0x568] sm:$0xff]  ;;  %v430_v44 = vld [vmem:[#allocation5 + $0x98] sm:$0xff] }
  0x6b   : > { %961 = vmatpush.msrb.mxu0 %v530_v46  ;;  %1026 = vmatpush.msrb.mxu1 %v674_v47  ;;  %v574_v45 = vld [vmem:[#allocation5 + $0x518] sm:$0xff]  ;;  %v431_v46 = vld [vmem:[#allocation5 + $0xa0] sm:$0xff] }
  0x6c   : > { %718 = vmatmul.f32.gmra.mxu0 %v6713_v48  ;;  %742 = vmatmul.f32.gmra.mxu2 %v6716_v49  ;;  %v575_v47 = vld [vmem:[#allocation5 + $0x520] sm:$0xff] }
  0x6d   : > { %783 = vmatmul.f32.gmra.mxu1 %v6719_v50  ;;  %807 = vmatmul.f32.gmra.mxu3 %v6722_v51 }
  0x6e   : > { %832 = vmatpush.msrb.mxu2 %v520_v52  ;;  %897 = vmatpush.msrb.mxu3 %v664_v53  ;;  %v421_v52 = vld [vmem:[#allocation5 + $0x50] sm:$0xff] }
  0x6f   : > { %962 = vmatpush.msrb.mxu0 %v521_v54  ;;  %1027 = vmatpush.msrb.mxu1 %v665_v55  ;;  %v565_v53 = vld [vmem:[#allocation5 + $0x4d0] sm:$0xff]  ;;  %v422_v54 = vld [vmem:[#allocation5 + $0x58] sm:$0xff] }
  0x70   : > { %833 = vmatpush.msrb.mxu2 %v511_v56  ;;  %898 = vmatpush.msrb.mxu3 %v655_v57  ;;  %v566_v55 = vld [vmem:[#allocation5 + $0x4d8] sm:$0xff]  ;;  %v6777_v56 = vld [vmem:[%s6682_s1 + $0x50] sm:$0xff] }
  0x71   : > { %963 = vmatpush.msrb.mxu0 %v512_v58  ;;  %1028 = vmatpush.msrb.mxu1 %v656_v59  ;;  %v6780_v57 = vld [vmem:[%s6682_s1 + $0xd0] sm:$0xff]  ;;  %v6783_v58 = vld [vmem:[%s6682_s1 + $0x58] sm:$0xff] }
  0x72   : > { %834 = vmatpush.msrb.mxu2 %v502_v60  ;;  %899 = vmatpush.msrb.mxu3 %v646_v61  ;;  %v6786_v59 = vld [vmem:[%s6682_s1 + $0xd8] sm:$0xff]  ;;  %v412_v60 = vld [vmem:[#allocation5 + $0x8] sm:$0xff] }
  0x73   : > { %964 = vmatpush.msrb.mxu0 %v503_v62  ;;  %1029 = vmatpush.msrb.mxu1 %v647_v63  ;;  %v556_v61 = vld [vmem:[#allocation5 + $0x488] sm:$0xff]  ;;  %v413_v62 = vld [vmem:[#allocation5 + $0x10] sm:$0xff] }
  0x74   : > { %721 = vmatmul.f32.gmra.mxu0 %v6729_v0  ;;  %745 = vmatmul.f32.gmra.mxu2 %v6732_v1  ;;  %v557_v63 = vld [vmem:[#allocation5 + $0x490] sm:$0xff] }
  0x75   : > { %786 = vmatmul.f32.gmra.mxu1 %v6735_v2  ;;  %810 = vmatmul.f32.gmra.mxu3 %v6738_v3 }
  0x76   : > { %835 = vmatpush.msrb.mxu2 %v493_v4  ;;  %900 = vmatpush.msrb.mxu3 %v637_v5  ;;  %v549_v4 = vld [vmem:[#allocation5 + $0x450] sm:$0xff] }
  0x77   : > { %965 = vmatpush.msrb.mxu0 %v494_v6  ;;  %1030 = vmatpush.msrb.mxu1 %v638_v7  ;;  %v693_v5 = vld [vmem:[#allocation5 + $0x8d0] sm:$0xff]  ;;  %v550_v6 = vld [vmem:[#allocation5 + $0x458] sm:$0xff] }
  0x78   : > { %836 = vmatpush.msrb.mxu2 %v484_v8  ;;  %901 = vmatpush.msrb.mxu3 %v628_v9  ;;  %v694_v7 = vld [vmem:[#allocation5 + $0x8d8] sm:$0xff]  ;;  %v540_v8 = vld [vmem:[#allocation5 + $0x408] sm:$0xff] }
  0x79   : > { %966 = vmatpush.msrb.mxu0 %v485_v10  ;;  %1031 = vmatpush.msrb.mxu1 %v629_v11  ;;  %v684_v9 = vld [vmem:[#allocation5 + $0x888] sm:$0xff]  ;;  %v541_v10 = vld [vmem:[#allocation5 + $0x410] sm:$0xff] }
  0x7a   : > { %837 = vmatpush.msrb.mxu2 %v475_v12  ;;  %902 = vmatpush.msrb.mxu3 %v619_v13  ;;  %v685_v11 = vld [vmem:[#allocation5 + $0x890] sm:$0xff]  ;;  %v6793_v12 = vld [vmem:[%s6682_s1 + $0x60] sm:$0xff] }
  0x7b   : > { %967 = vmatpush.msrb.mxu0 %v476_v14  ;;  %1032 = vmatpush.msrb.mxu1 %v620_v15  ;;  %v6796_v13 = vld [vmem:[%s6682_s1 + $0xe0] sm:$0xff]  ;;  %v6799_v14 = vld [vmem:[%s6682_s1 + $0x68] sm:$0xff] }
  0x7c   : > { %724 = vmatmul.f32.gmra.mxu0 %v6745_v16  ;;  %748 = vmatmul.f32.gmra.mxu2 %v6748_v17  ;;  %v6802_v15 = vld [vmem:[%s6682_s1 + $0xe8] sm:$0xff] }
  0x7d   : > { %789 = vmatmul.f32.gmra.mxu1 %v6751_v18  ;;  %813 = vmatmul.f32.gmra.mxu3 %v6754_v19 }
  0x7e   : > { %838 = vmatpush.msrb.mxu2 %v466_v20  ;;  %903 = vmatpush.msrb.mxu3 %v610_v21  ;;  %v531_v20 = vld [vmem:[#allocation5 + $0x3c0] sm:$0xff] }
  0x7f   : > { %968 = vmatpush.msrb.mxu0 %v467_v22  ;;  %1033 = vmatpush.msrb.mxu1 %v611_v23  ;;  %v675_v21 = vld [vmem:[#allocation5 + $0x840] sm:$0xff]  ;;  %v532_v22 = vld [vmem:[#allocation5 + $0x3c8] sm:$0xff] }
  0x80   : > { %839 = vmatpush.msrb.mxu2 %v457_v24  ;;  %904 = vmatpush.msrb.mxu3 %v601_v25  ;;  %v676_v23 = vld [vmem:[#allocation5 + $0x848] sm:$0xff]  ;;  %v6809_v24 = vld [vmem:[%s6682_s1 + $0x70] sm:$0xff] }
  0x81   : > { %969 = vmatpush.msrb.mxu0 %v458_v26  ;;  %1034 = vmatpush.msrb.mxu1 %v602_v27  ;;  %v6812_v25 = vld [vmem:[%s6682_s1 + $0xf0] sm:$0xff]  ;;  %v6815_v26 = vld [vmem:[%s6682_s1 + $0x78] sm:$0xff] }
  0x82   : > { %840 = vmatpush.msrb.mxu2 %v448_v28  ;;  %905 = vmatpush.msrb.mxu3 %v592_v29  ;;  %v6818_v27 = vld [vmem:[%s6682_s1 + $0xf8] sm:$0xff] }
  0x83   : > { %970 = vmatpush.msrb.mxu0 %v449_v30  ;;  %1035 = vmatpush.msrb.mxu1 %v593_v31  ;;  %v522_v28 = vld [vmem:[#allocation5 + $0x378] sm:$0xff]  ;;  %v523_v30 = vld [vmem:[#allocation5 + $0x380] sm:$0xff] }
  0x84   : > { %727 = vmatmul.f32.gmra.mxu0 %v6761_v36  ;;  %751 = vmatmul.f32.gmra.mxu2 %v6764_v37  ;;  %v666_v29 = vld [vmem:[#allocation5 + $0x7f8] sm:$0xff]  ;;  %v667_v31 = vld [vmem:[#allocation5 + $0x800] sm:$0xff] }
  0x85   : > { %792 = vmatmul.f32.gmra.mxu1 %v6767_v38  ;;  %816 = vmatmul.f32.gmra.mxu3 %v6770_v39 }
  0x86   : > { %841 = vmatpush.msrb.mxu2 %v439_v40  ;;  %906 = vmatpush.msrb.mxu3 %v583_v41  ;;  %v513_v40 = vld [vmem:[#allocation5 + $0x330] sm:$0xff] }
  0x87   : > { %971 = vmatpush.msrb.mxu0 %v440_v42  ;;  %1036 = vmatpush.msrb.mxu1 %v584_v43  ;;  %v657_v41 = vld [vmem:[#allocation5 + $0x7b0] sm:$0xff]  ;;  %v514_v42 = vld [vmem:[#allocation5 + $0x338] sm:$0xff] }
  0x88   : > { %842 = vmatpush.msrb.mxu2 %v430_v44  ;;  %907 = vmatpush.msrb.mxu3 %v574_v45  ;;  %v658_v43 = vld [vmem:[#allocation5 + $0x7b8] sm:$0xff]  ;;  %v648_v44 = vld [vmem:[#allocation5 + $0x768] sm:$0xff]  ;;  %v505_v45 = vld [vmem:[#allocation5 + $0x2f0] sm:$0xff] }
  0x89   : > { %972 = vmatpush.msrb.mxu0 %v431_v46  ;;  %1037 = vmatpush.msrb.mxu1 %v575_v47  ;;  %v639_v46 = vld [vmem:[#allocation5 + $0x720] sm:$0xff]  ;;  %v496_v47 = vld [vmem:[#allocation5 + $0x2a8] sm:$0xff] }
  0x8a   : > { %843 = vmatpush.msrb.mxu2 %v421_v52  ;;  %908 = vmatpush.msrb.mxu3 %v565_v53  ;;  %v630_v52 = vld [vmem:[#allocation5 + $0x6d8] sm:$0xff]  ;;  %v477_v53 = vld [vmem:[#allocation5 + $0x210] sm:$0xff] }
  0x8b   : > { %973 = vmatpush.msrb.mxu0 %v422_v54  ;;  %1038 = vmatpush.msrb.mxu1 %v566_v55  ;;  %v621_v54 = vld [vmem:[#allocation5 + $0x690] sm:$0xff] }
  0x8c   : > { %730 = vmatmul.f32.gmra.mxu0 %v6777_v56  ;;  %754 = vmatmul.f32.gmra.mxu2 %v6780_v57 }
  0x8d   : > { %795 = vmatmul.f32.gmra.mxu1 %v6783_v58  ;;  %819 = vmatmul.f32.gmra.mxu3 %v6786_v59 }
  0x8e   : > { %844 = vmatpush.msrb.mxu2 %v412_v60  ;;  %909 = vmatpush.msrb.mxu3 %v556_v61 }
  0x8f   : > { %974 = vmatpush.msrb.mxu0 %v413_v62  ;;  %1039 = vmatpush.msrb.mxu1 %v557_v63 }
  0x90   : > { %1089 = vmatpush.msra.mxu2 %v549_v4  ;;  %1154 = vmatpush.msra.mxu3 %v693_v5  ;;  %v478_v5 = vld [vmem:[#allocation5 + $0x218] sm:$0xff] }
  0x91   : > { %1219 = vmatpush.msra.mxu0 %v550_v6  ;;  %1284 = vmatpush.msra.mxu1 %v694_v7  ;;  %v622_v6 = vld [vmem:[#allocation5 + $0x698] sm:$0xff] }
  0x92   : > { %1090 = vmatpush.msra.mxu2 %v540_v8  ;;  %1155 = vmatpush.msra.mxu3 %v684_v9  ;;  %v612_v8 = vld [vmem:[#allocation5 + $0x648] sm:$0xff] }
  0x93   : > { %1220 = vmatpush.msra.mxu0 %v541_v10  ;;  %1285 = vmatpush.msra.mxu1 %v685_v11 }
  0x94   : > { %733 = vmatmul.f32.gmra.mxu0 %v6793_v12  ;;  %757 = vmatmul.f32.gmra.mxu2 %v6796_v13 }
  0x95   : > { %798 = vmatmul.f32.gmra.mxu1 %v6799_v14  ;;  %822 = vmatmul.f32.gmra.mxu3 %v6802_v15 }
  0x96   : > { %1091 = vmatpush.msra.mxu2 %v531_v20  ;;  %1156 = vmatpush.msra.mxu3 %v675_v21 }
  0x97   : > { %1221 = vmatpush.msra.mxu0 %v532_v22  ;;  %1286 = vmatpush.msra.mxu1 %v676_v23 }
  0x98   : > { %1092 = vmatpush.msra.mxu2 %v522_v28  ;;  %1157 = vmatpush.msra.mxu3 %v666_v29  ;;  %v459_v29 = vld [vmem:[#allocation5 + $0x180] sm:$0xff] }
  0x99   : > { %1222 = vmatpush.msra.mxu0 %v523_v30  ;;  %1287 = vmatpush.msra.mxu1 %v667_v31  ;;  %v603_v30 = vld [vmem:[#allocation5 + $0x600] sm:$0xff] }
  0x9a   : > { %1093 = vmatpush.msra.mxu2 %v513_v40  ;;  %1158 = vmatpush.msra.mxu3 %v657_v41 }
  0x9b   : > { %1223 = vmatpush.msra.mxu0 %v514_v42  ;;  %1288 = vmatpush.msra.mxu1 %v658_v43 }
  0x9c   : > { %736 = vmatmul.f32.gmra.mxu0 %v6809_v24  ;;  %760 = vmatmul.f32.gmra.mxu2 %v6812_v25 }
  0x9d   : > { %801 = vmatmul.f32.gmra.mxu1 %v6815_v26  ;;  %825 = vmatmul.f32.gmra.mxu3 %v6818_v27 }
  0x9e   : > { %1159 = vmatpush.msra.mxu3 %v648_v44  ;;  %1224 = vmatpush.msra.mxu0 %v505_v45 }
  0xa0   : > { %1160 = vmatpush.msra.mxu3 %v639_v46  ;;  %1225 = vmatpush.msra.mxu0 %v496_v47 }
  0xa2   : > { %1161 = vmatpush.msra.mxu3 %v630_v52 }
  0xa4   : > { %845 = vmatmul.f32.vlgmr.msrb.gmra.mxu2 %v6697_v32  ;;  %975 = vmatmul.f32.vlgmr.msrb.gmra.mxu0 %v6697_v32  ;;  %v504_v32 = vld [vmem:[#allocation5 + $0x2e8] sm:$0xff] }
  0xa5   : > { %910 = vmatmul.f32.vlgmr.msrb.gmra.mxu3 %v6703_v34  ;;  %1040 = vmatmul.f32.vlgmr.msrb.gmra.mxu1 %v6703_v34  ;;  %v649_v34 = vld [vmem:[#allocation5 + $0x770] sm:$0xff] }
  0xa6   : > { %1094 = vmatpush.msra.mxu2 %v504_v32  ;;  %1289 = vmatpush.msra.mxu1 %v649_v34 }
  0xa7   : > { %1162 = vmatpush.msra.mxu3 %v621_v54  ;;  %v460_v54 = vld [vmem:[#allocation5 + $0x188] sm:$0xff] }
  0xa9   : > { %1163 = vmatpush.msra.mxu3 %v612_v8 }
  0xab   : > { %1164 = vmatpush.msra.mxu3 %v603_v30 }
  0xac   : > { %848 = vmatmul.f32.gmra.mxu2 %v6713_v48  ;;  %978 = vmatmul.f32.gmra.mxu0 %v6713_v48  ;;  %v495_v48 = vld [vmem:[#allocation5 + $0x2a0] sm:$0xff] }
  0xad   : > { %913 = vmatmul.f32.gmra.mxu3 %v6719_v50  ;;  %1043 = vmatmul.f32.gmra.mxu1 %v6719_v50  ;;  %v640_v50 = vld [vmem:[#allocation5 + $0x728] sm:$0xff] }
  0xae   : > { %1095 = vmatpush.msra.mxu2 %v495_v48  ;;  %1290 = vmatpush.msra.mxu1 %v640_v50 }
  0xb4   : > { %851 = vmatmul.f32.gmra.mxu2 %v6729_v0  ;;  %981 = vmatmul.f32.gmra.mxu0 %v6729_v0  ;;  %v486_v0 = vld [vmem:[#allocation5 + $0x258] sm:$0xff] }
  0xb5   : > { %916 = vmatmul.f32.gmra.mxu3 %v6735_v2  ;;  %1046 = vmatmul.f32.gmra.mxu1 %v6735_v2 }
  0xb6   : > { %1096 = vmatpush.msra.mxu2 %v486_v0 }
  0xb8   : > { %1097 = vmatpush.msra.mxu2 %v477_v53 }
  0xbc   : > { %854 = vmatmul.f32.gmra.mxu2 %v6745_v16  ;;  %984 = vmatmul.f32.gmra.mxu0 %v6745_v16 }
  0xbd   : > { %919 = vmatmul.f32.gmra.mxu3 %v6751_v18  ;;  %1049 = vmatmul.f32.gmra.mxu1 %v6751_v18 }
  0xc4   : > { %857 = vmatmul.f32.gmra.mxu2 %v6761_v36  ;;  %987 = vmatmul.f32.gmra.mxu0 %v6761_v36  ;;  %v487_v36 = vld [vmem:[#allocation5 + $0x260] sm:$0xff] }
  0xc5   : > { %922 = vmatmul.f32.gmra.mxu3 %v6767_v38  ;;  %1052 = vmatmul.f32.gmra.mxu1 %v6767_v38  ;;  %v631_v38 = vld [vmem:[#allocation5 + $0x6e0] sm:$0xff] }
  0xc6   : > { %1226 = vmatpush.msra.mxu0 %v487_v36  ;;  %1291 = vmatpush.msra.mxu1 %v631_v38 }
  0xc8   : > { %1227 = vmatpush.msra.mxu0 %v478_v5  ;;  %1292 = vmatpush.msra.mxu1 %v622_v6 }
  0xcc   : > { %860 = vmatmul.f32.gmra.mxu2 %v6777_v56  ;;  %990 = vmatmul.f32.gmra.mxu0 %v6777_v56 }
  0xcd   : > { %925 = vmatmul.f32.gmra.mxu3 %v6783_v58  ;;  %1055 = vmatmul.f32.gmra.mxu1 %v6783_v58 }
  0xd4   : > { %863 = vmatmul.f32.gmra.mxu2 %v6793_v12  ;;  %993 = vmatmul.f32.gmra.mxu0 %v6793_v12 }
  0xd5   : > { %928 = vmatmul.f32.gmra.mxu3 %v6799_v14  ;;  %1058 = vmatmul.f32.gmra.mxu1 %v6799_v14 }
  0xdc   : > { %866 = vmatmul.f32.gmra.mxu2 %v6809_v24  ;;  %996 = vmatmul.f32.gmra.mxu0 %v6809_v24 }
  0xdd   : > { %931 = vmatmul.f32.gmra.mxu3 %v6815_v26  ;;  %1061 = vmatmul.f32.gmra.mxu1 %v6815_v26  ;;  %v613_v26 = vld [vmem:[#allocation5 + $0x650] sm:$0xff] }
  0xde   : > { %1293 = vmatpush.msra.mxu1 %v613_v26 }
  0xe1   : > { %v716_v2 = vpop.f32.mrf.mxu0 }
  0xe2   : > { %v781_v16 = vpop.f32.mrf.mxu1 }
  0xe3   : > { %v6856_v18 = vadd.f32 %v781_v16, %v716_v2 }
  0xe4   : > { %869 = vmatmul.f32.gmra.mxu2 %v6700_v33  ;;  %999 = vmatmul.f32.gmra.mxu0 %v6700_v33 }
  0xe5   : > { %v5250_v55 = vmul.f32 -1.442695, %v6856_v18  ;;  %934 = vmatmul.f32.gmra.mxu3 %v6706_v35  ;;  %1064 = vmatmul.f32.gmra.mxu1 %v6706_v35  ;;  %v468_v35 = vld [vmem:[#allocation5 + $0x1c8] sm:$0xff] }
  0xe6   : > { %1098 = vmatpush.msra.mxu2 %v468_v35  ;;  %v594_v35 = vld [vmem:[#allocation5 + $0x5b8] sm:$0xff] }
  0xe7   : > { %5552 = vpow2.f32 %v5250_v55  ;;  %v740_v56 = vpop.f32.mrf.mxu2  ;;  %v604_v55 = vld [vmem:[#allocation5 + $0x608] sm:$0xff]  ;;  %1165 = vmatpush.msra.mxu3 %v594_v35 }
  0xe8   : > { %v805_v58 = vpop.f32.mrf.mxu3  ;;  %1099 = vmatpush.msra.mxu2 %v459_v29  ;;  %1294 = vmatpush.msra.mxu1 %v604_v55  ;;  %v585_v29 = vld [vmem:[#allocation5 + $0x570] sm:$0xff] }
  0xe9   : > { %v6863_v60 = vadd.f32 %v805_v58, %v740_v56  ;;  %v719_v61 = vpop.f32.mrf.mxu0  ;;  %1166 = vmatpush.msra.mxu3 %v585_v29  ;;  %v432_v56 = vld [vmem:[#allocation5 + $0xa8] sm:$0xff] }
  0xea   : > { %v784_v62 = vpop.f32.mrf.mxu1 }
  0xeb   : > { %v5322_v63 = vmul.f32 -1.442695, %v6863_v60  ;;  %v6866_v4 = vadd.f32 %v784_v62, %v719_v61 }
  0xec   : > { %872 = vmatmul.f32.gmra.mxu2 %v6716_v49  ;;  %1002 = vmatmul.f32.gmra.mxu0 %v6716_v49  ;;  %v469_v49 = vld [vmem:[#allocation5 + $0x1d0] sm:$0xff] }
  0xed   : > { %v5553_v7 = vpop.eup %5552  ;;  %5554 = vpow2.f32 %v5322_v63  ;;  %v5259_v33 = vmul.f32 -1.442695, %v6866_v4  ;;  %937 = vmatmul.f32.gmra.mxu3 %v6722_v51  ;;  %1067 = vmatmul.f32.gmra.mxu1 %v6722_v51 }
  0xee   : > { %v6869_v9 = vadd.f32 1.0, %v5553_v7  ;;  %1228 = vmatpush.msra.mxu0 %v469_v49 }
  0xef   : > { %5556 = vpow2.f32 %v5259_v33  ;;  %v743_v10 = vpop.f32.mrf.mxu2  ;;  %v450_v33 = vld [vmem:[#allocation5 + $0x138] sm:$0xff] }
  0xf0   : > { %5558 = vrcp.f32 %v6869_v9  ;;  %v808_v11 = vpop.f32.mrf.mxu3  ;;  %v2454_v44 = vand.u32 2147483647, %v6869_v9  ;;  %v2456_v45 = vand.u32 2147483648, %v6869_v9  ;;  %vm2450_vm1 = vweird.f32 %v6869_v9  ;;  %1229 = vmatpush.msra.mxu0 %v460_v54  ;;  %1100 = vmatpush.msra.mxu2 %v450_v33  ;;  %v577_v33 = vld [vmem:[#allocation5 + $0x530] sm:$0xff] }
  0xf1   : > { %v6876_v12 = vadd.f32 %v808_v11, %v743_v10  ;;  %v722_v14 = vpop.f32.mrf.mxu0 }
  0xf2   : > { %v787_v20 = vpop.f32.mrf.mxu1  ;;  %vm6906_vm2 = vcmp.eq.f32.partialorder %v2454_v44, 8.507059e+37  ;;  %v2457_v38 = vor.u32 1.1754944e-38, %v2456_v45 }
  0xf3   : > { %v5555_v21 = vpop.eup %5554  ;;  %v5331_v22 = vmul.f32 -1.442695, %v6876_v12  ;;  %v6879_v23 = vadd.f32 %v787_v20, %v722_v14 }
  0xf4   : > { %v6881_v24 = vadd.f32 1.0, %v5555_v21  ;;  %875 = vmatmul.f32.gmra.mxu2 %v6732_v1  ;;  %1005 = vmatmul.f32.gmra.mxu0 %v6732_v1 }
  0xf5   : > { %v5557_v51 = vpop.eup %5556  ;;  %5560 = vpow2.f32 %v5331_v22  ;;  %v5268_v28 = vmul.f32 -1.442695, %v6879_v23  ;;  %940 = vmatmul.f32.gmra.mxu3 %v6738_v3  ;;  %1070 = vmatmul.f32.gmra.mxu1 %v6738_v3  ;;  %v595_v22 = vld [vmem:[#allocation5 + $0x5c0] sm:$0xff] }
  0xf6   : > { %v5559_v31 = vpop.eup %5558  ;;  %5562 = vrcp.f32 %v6881_v24  ;;  %v6888_v41 = vadd.f32 1.0, %v5557_v51  ;;  %v3534_v58 = vand.u32 2147483647, %v6881_v24  ;;  %v3536_v61 = vand.u32 2147483648, %v6881_v24  ;;  %1295 = vmatpush.msra.mxu1 %v595_v22 }
  0xf7   : > { %v2446_v40 = vmul.f32 %v5559_v31, %v6869_v9  ;;  %5564 = vpow2.f32 %v5268_v28  ;;  %v746_v42 = vpop.f32.mrf.mxu2  ;;  %vm2451_vm0 = vweird.f32 %v5559_v31  ;;  %v451_v9 = vld [vmem:[#allocation5 + $0x140] sm:$0xff]  ;;  %v441_v28 = vld [vmem:[#allocation5 + $0xf0] sm:$0xff]  ;;  %vm3530_vm5 = vweird.f32 %v6881_v24 }
  0xf8   : > { %v811_v43 = vpop.f32.mrf.mxu3  ;;  %5566 = vrcp.f32 %v6888_v41  ;;  %vm6912_vm3 = vmor %vm2450_vm1, %vm2451_vm0  ;;  %v2589_v14 = vand.u32 2147483647, %v6888_v41  ;;  %v2591_v20 = vand.u32 2147483648, %v6888_v41  ;;  %vm6941_vm6 = vcmp.eq.f32.partialorder %v3534_v58, 8.507059e+37  ;;  %1230 = vmatpush.msra.mxu0 %v451_v9  ;;  %1101 = vmatpush.msra.mxu2 %v441_v28  ;;  %v576_v58 = vld [vmem:[#allocation5 + $0x528] sm:$0xff] }
  0xf9   : > { %v2447_v32 = vsub.f32 1.0, %v2446_v40  ;;  %v725_v34 = vpop.f32.mrf.mxu0  ;;  %v6895_v48 = vadd.f32 %v811_v43, %v746_v42  ;;  %v3537_v43 = vor.u32 1.1754944e-38, %v3536_v61  ;;  %vm2585_vm9 = vweird.f32 %v6888_v41  ;;  %v433_v61 = vld [vmem:[#allocation5 + $0xb0] sm:$0xff]  ;;  %1167 = vmatpush.msra.mxu3 %v576_v58 }
  0xfa   : > { %v790_v46 = vpop.f32.mrf.mxu1  ;;  %vm6964_vm10 = vcmp.eq.f32.partialorder %v2589_v14, 8.507059e+37  ;;  %1102 = vmatpush.msra.mxu2 %v432_v56 }
  0xfb   : > { %v5561_v47 = vpop.eup %5560  ;;  %v2448_v1 = vmul.f32 %v5559_v31, %v2447_v32  ;;  %v6897_v3 = vadd.f32 %v790_v46, %v725_v34  ;;  %v5340_v52 = vmul.f32 -1.442695, %v6895_v48  ;;  %v2592_v46 = vor.u32 1.1754944e-38, %v2591_v20 }
  0xfc   : > { %v6899_v50 = vpop.eup %5562  ;;  %v6902_v0 = vadd.f32 1.0, %v5561_v47  ;;  %878 = vmatmul.f32.gmra.mxu2 %v6748_v17  ;;  %1008 = vmatmul.f32.gmra.mxu0 %v6748_v17  ;;  %v558_v17 = vld [vmem:[#allocation5 + $0x498] sm:$0xff] }
  0xfd   : > { %v5565_v2 = vpop.eup %5564  ;;  %v2449_v16 = vadd.f32 %v5559_v31, %v2448_v1  ;;  %v3526_v53 = vmul.f32 %v6899_v50, %v6881_v24  ;;  %v5277_v62 = vmul.f32 -1.442695, %v6897_v3  ;;  %943 = vmatmul.f32.gmra.mxu3 %v6754_v19  ;;  %1073 = vmatmul.f32.gmra.mxu1 %v6754_v19  ;;  %vm3531_vm4 = vweird.f32 %v6899_v50  ;;  %v442_v1 = vld [vmem:[#allocation5 + $0xf8] sm:$0xff] }
  0xfe   : > { %5568 = vrcp.f32 %v6902_v0  ;;  %v6920_v63 = vpop.eup %5566  ;;  %v6924_v7 = vadd.f32 1.0, %v5565_v2  ;;  %vm3532_vm8 = vmor %vm3530_vm5, %vm3531_vm4  ;;  %vm3665_vm12 = vweird.f32 %v6902_v0  ;;  %1231 = vmatpush.msra.mxu0 %v442_v1  ;;  %v3669_v9 = vand.u32 2147483647, %v6902_v0 }
  0xff   : > { %v2453_v5 = vsel %vm6912_vm3, %v5559_v31, %v2449_v16  ;;  %v3527_v6 = vsub.f32 1.0, %v3526_v53  ;;  %5570 = vpow2.f32 %v5340_v52  ;;  %v749_v8 = vpop.f32.mrf.mxu2  ;;  %v2581_v11 = vmul.f32 %v6920_v63, %v6888_v41  ;;  %v586_v52 = vld [vmem:[#allocation5 + $0x578] sm:$0xff] }
 0x100   : > { %v2458_v10 = vsel %vm6906_vm2, %v2457_v38, %v2453_v5  ;;  %v814_v21 = vpop.f32.mrf.mxu3  ;;  %5572 = vrcp.f32 %v6924_v7  ;;  %vm2586_vm7 = vweird.f32 %v6920_v63  ;;  %1296 = vmatpush.msra.mxu1 %v586_v52  ;;  %v3671_v5 = vand.u32 2147483648, %v6902_v0  ;;  %1232 = vmatpush.msra.mxu0 %v433_v61 }
 0x101   : > { %v4605_v49 = vmul.f32 %v2458_v10, %v6856_v18  ;;  %v3528_v26 = vmul.f32 %v6899_v50, %v3527_v6  ;;  %v728_v51 = vpop.f32.mrf.mxu0  ;;  %v2582_v19 = vsub.f32 1.0, %v2581_v11  ;;  %5574 = vpow2.f32 %v5277_v62  ;;  %vm6977_vm11 = vmor %vm2585_vm9, %vm2586_vm7  ;;  %v423_v11 = vld [vmem:[#allocation5 + $0x60] sm:$0xff] }
 0x102   : > { %v793_v18 = vpop.f32.mrf.mxu1  ;;  %v6952_v31 = vadd.f32 %v814_v21, %v749_v8  ;;  %v2724_v20 = vand.u32 2147483647, %v6924_v7  ;;  %1297 = vmatpush.msra.mxu1 %v577_v33  ;;  %v2726_v28 = vand.u32 2147483648, %v6924_v7  ;;  %1103 = vmatpush.msra.mxu2 %v423_v11  ;;  %vm3670_vm0 = vcmp.eq.f32.partialorder %v3669_v9, 8.507059e+37 }
 0x103   : > { %4749 = vst [vmem:[%s6948_s12] sm:$0xff] %v4605_v49  ;;  %v3529_v30 = vadd.f32 %v6899_v50, %v3528_v26  ;;  %v6954_v40 = vadd.f32 %v793_v18, %v728_v51  ;;  %v2583_v32 = vmul.f32 %v6920_v63, %v2582_v19  ;;  %v424_v49 = vld [vmem:[#allocation5 + $0x68] sm:$0xff]  ;;  %v415_v19 = vld [vmem:[#allocation5 + $0x20] sm:$0xff]  ;;  %vm2720_vm1 = vweird.f32 %v6924_v7 }
 0x104   : > { %v6956_v42 = vpop.eup %5568  ;;  %v5349_v24 = vmul.f32 -1.442695, %v6952_v31  ;;  %881 = vmatmul.f32.gmra.mxu2 %v6764_v37  ;;  %1011 = vmatmul.f32.gmra.mxu0 %v6764_v37  ;;  %v567_v37 = vld [vmem:[#allocation5 + $0x4e0] sm:$0xff]  ;;  %v568_v26 = vld [vmem:[#allocation5 + $0x4e8] sm:$0xff]  ;;  %vm2725_vm3 = vcmp.eq.f32.partialorder %v2724_v20, 8.507059e+37  ;;  %v2727_v52 = vor.u32 1.1754944e-38, %v2726_v28 }
 0x105   : > { %v5571_v45 = vpop.eup %5570  ;;  %v3533_v34 = vsel %vm3532_vm8, %v6899_v50, %v3529_v30  ;;  %v3661_v47 = vmul.f32 %v6956_v42, %v6902_v0  ;;  %v2584_v41 = vadd.f32 %v6920_v63, %v2583_v32  ;;  %v5286_v54 = vmul.f32 -1.442695, %v6954_v40  ;;  %946 = vmatmul.f32.gmra.mxu3 %v6770_v39  ;;  %1076 = vmatmul.f32.gmra.mxu1 %v6770_v39  ;;  %v559_v32 = vld [vmem:[#allocation5 + $0x4a0] sm:$0xff] }
 0x106   : > { %v3538_v2 = vsel %vm6941_vm6, %v3537_v43, %v3533_v34  ;;  %v6982_v50 = vadd.f32 1.0, %v5571_v45  ;;  %v6984_v36 = vpop.eup %5572  ;;  %5576 = vpow2.f32 %v5349_v24  ;;  %vm3666_vm13 = vweird.f32 %v6956_v42  ;;  %1168 = vmatpush.msra.mxu3 %v567_v37  ;;  %1233 = vmatpush.msra.mxu0 %v424_v49 }
 0x107   : > { %v4677_v38 = vmul.f32 %v3538_v2, %v6863_v60  ;;  %v3662_v53 = vsub.f32 1.0, %v3661_v47  ;;  %v752_v55 = vpop.f32.mrf.mxu2  ;;  %v2588_v62 = vsel %vm6977_vm11, %v6920_v63, %v2584_v41  ;;  %v2716_v60 = vmul.f32 %v6984_v36, %v6924_v7  ;;  %v5575_v35 = vpop.eup %5574  ;;  %vm7018_vm14 = vmor %vm3665_vm12, %vm3666_vm13  ;;  %1298 = vmatpush.msra.mxu1 %v568_v26 }
 0x108   : > { %5578 = vrcp.f32 %v6982_v50  ;;  %v817_v6 = vpop.f32.mrf.mxu3  ;;  %v2593_v8 = vsel %vm6964_vm10, %v2592_v46, %v2588_v62  ;;  %v7007_v21 = vadd.f32 1.0, %v5575_v35  ;;  %v3672_v30 = vor.u32 1.1754944e-38, %v3671_v5  ;;  %1169 = vmatpush.msra.mxu3 %v558_v17  ;;  %1234 = vmatpush.msra.mxu0 %v415_v19 }
 0x109   : > { %4781 = vst [vmem:[%s6948_s12 + $0x100] sm:$0xff] %v4677_v38  ;;  %v3663_v63 = vmul.f32 %v6956_v42, %v3662_v53  ;;  %v731_v10 = vpop.f32.mrf.mxu0  ;;  %v4614_v39 = vmul.f32 %v2593_v8, %v6866_v4  ;;  %v2717_v14 = vsub.f32 1.0, %v2716_v60  ;;  %5580 = vpow2.f32 %v5286_v54  ;;  %v414_v4 = vld [vmem:[#allocation5 + $0x18] sm:$0xff]  ;;  %1299 = vmatpush.msra.mxu1 %v559_v32 }
 0x10a   : > { %v796_v22 = vpop.f32.mrf.mxu1  ;;  %v7011_v29 = vadd.f32 %v817_v6, %v752_v55  ;;  %vm2721_vm15 = vweird.f32 %v6984_v36  ;;  %5582 = vrcp.f32 %v7007_v21  ;;  %1104 = vmatpush.msra.mxu2 %v414_v4  ;;  %v3804_v16 = vand.u32 2147483647, %v6982_v50 }
 0x10b   : > { %v3664_v51 = vadd.f32 %v6956_v42, %v3663_v63  ;;  %4753 = vst [vmem:[%s6948_s12 + $0x20] sm:$0xff] %v4614_v39  ;;  %v2718_v43 = vmul.f32 %v6984_v36, %v2717_v14  ;;  %v7035_v1 = vadd.f32 %v796_v22, %v731_v10  ;;  %vm7040_vm2 = vmor %vm2720_vm1, %vm2721_vm15  ;;  %v3806_v38 = vand.u32 2147483648, %v6982_v50 }
 0x10c   : > { %v5577_v44 = vpop.eup %5576  ;;  %v5358_v0 = vmul.f32 -1.442695, %v7011_v29  ;;  %884 = vmatmul.f32.gmra.mxu2 %v6780_v57  ;;  %1014 = vmatmul.f32.gmra.mxu0 %v6780_v57  ;;  %v2859_v58 = vand.u32 2147483647, %v7007_v21  ;;  %vm3800_vm5 = vweird.f32 %v6982_v50  ;;  %vm7068_vm6 = vcmp.eq.f32.partialorder %v3804_v16, 8.507059e+37 }
 0x10d   : > { %v3668_v45 = vsel %vm7018_vm14, %v6956_v42, %v3664_v51  ;;  %v2719_v47 = vadd.f32 %v6984_v36, %v2718_v43  ;;  %v7033_v24 = vadd.f32 1.0, %v5577_v44  ;;  %949 = vmatmul.f32.gmra.mxu3 %v6786_v59  ;;  %1079 = vmatmul.f32.gmra.mxu1 %v6786_v59  ;;  %v5295_v57 = vmul.f32 -1.442695, %v7035_v1 }
 0x10e   : > { %v7030_v34 = vpop.eup %5578  ;;  %v3673_v46 = vsel %vm3670_vm0, %v3672_v30, %v3668_v45  ;;  %vm2855_vm7 = vweird.f32 %v7007_v21  ;;  %vm7075_vm9 = vcmp.eq.f32.partialorder %v2859_v58, 8.507059e+37 }
 0x10f   : > { %v4686_v42 = vmul.f32 %v3673_v46, %v6876_v12  ;;  %v3796_v2 = vmul.f32 %v7030_v34, %v6982_v50  ;;  %v755_v41 = vpop.f32.mrf.mxu2  ;;  %v2723_v12 = vsel %vm7040_vm2, %v6984_v36, %v2719_v47  ;;  %5584 = vrcp.f32 %v7033_v24  ;;  %v5581_v54 = vpop.eup %5580 }
 0x110   : > { %v820_v53 = vpop.f32.mrf.mxu3  ;;  %v2728_v55 = vsel %vm2725_vm3, %v2727_v52, %v2723_v12  ;;  %v2861_v36 = vand.u32 2147483648, %v7007_v21  ;;  %v5583_v62 = vpop.eup %5582  ;;  %v7060_v60 = vadd.f32 1.0, %v5581_v54  ;;  %5586 = vpow2.f32 %v5358_v0 }
 0x111   : > { %4785 = vst [vmem:[%s6948_s12 + $0x120] sm:$0xff] %v4686_v42  ;;  %v3797_v56 = vsub.f32 1.0, %v3796_v2  ;;  %v734_v61 = vpop.f32.mrf.mxu0  ;;  %v4623_v5 = vmul.f32 %v2728_v55, %v6879_v23  ;;  %vm3801_vm4 = vweird.f32 %v7030_v34  ;;  %v2851_v33 = vmul.f32 %v5583_v62, %v7007_v21 }
 0x112   : > { %v799_v59 = vpop.f32.mrf.mxu1  ;;  %v3807_v23 = vor.u32 1.1754944e-38, %v3806_v38  ;;  %5588 = vrcp.f32 %v7060_v60  ;;  %vm3802_vm8 = vmor %vm3800_vm5, %vm3801_vm4  ;;  %v2862_v50 = vor.u32 1.1754944e-38, %v2861_v36  ;;  %v7079_v11 = vadd.f32 %v820_v53, %v755_v41 }
 0x113   : > { %v3798_v6 = vmul.f32 %v7030_v34, %v3797_v56  ;;  %4757 = vst [vmem:[%s6948_s12 + $0x40] sm:$0xff] %v4623_v5  ;;  %v2852_v63 = vsub.f32 1.0, %v2851_v33  ;;  %5590 = vpow2.f32 %v5295_v57  ;;  %v7081_v37 = vadd.f32 %v799_v59, %v734_v61 }
 0x114   : > { %vm2856_vm10 = vweird.f32 %v5583_v62  ;;  %887 = vmatmul.f32.gmra.mxu2 %v6796_v13  ;;  %v3939_v51 = vand.u32 2147483647, %v7033_v24  ;;  %v3941_v28 = vand.u32 2147483648, %v7033_v24  ;;  %v5367_v4 = vmul.f32 -1.442695, %v7079_v11  ;;  %1017 = vmatmul.f32.gmra.mxu0 %v6796_v13 }
 0x115   : > { %v3799_v8 = vadd.f32 %v7030_v34, %v3798_v6  ;;  %v5585_v9 = vpop.eup %5584  ;;  %v2853_v14 = vmul.f32 %v5583_v62, %v2852_v63  ;;  %952 = vmatmul.f32.gmra.mxu3 %v6802_v15  ;;  %1082 = vmatmul.f32.gmra.mxu1 %v6802_v15  ;;  %vm2857_vm11 = vmor %vm2855_vm7, %vm2856_vm10  ;;  %vm3935_vm12 = vweird.f32 %v7033_v24  ;;  %v5304_v13 = vmul.f32 -1.442695, %v7081_v37 }
 0x116   : > { %v3931_v20 = vmul.f32 %v5585_v9, %v7033_v24  ;;  %v5587_v49 = vpop.eup %5586  ;;  %5592 = vpow2.f32 %v5367_v4  ;;  %vm3936_vm13 = vweird.f32 %v5585_v9  ;;  %vm7108_vm14 = vcmp.eq.f32.partialorder %v3939_v51, 8.507059e+37 }
 0x117   : > { %v3803_v39 = vsel %vm3802_vm8, %v7030_v34, %v3799_v8  ;;  %v758_v22 = vpop.f32.mrf.mxu2  ;;  %v2854_v18 = vadd.f32 %v5583_v62, %v2853_v14  ;;  %v7095_v43 = vadd.f32 1.0, %v5587_v49  ;;  %v3942_v42 = vor.u32 1.1754944e-38, %v3941_v28  ;;  %vm3937_vm15 = vmor %vm3935_vm12, %vm3936_vm13  ;;  %v6128_v28 = vld [vmem:[%s6682_s1] sm:$0xff] }
 0x118   : > { %v3808_v26 = vsel %vm7068_vm6, %v3807_v23, %v3803_v39  ;;  %v823_v17 = vpop.f32.mrf.mxu3  ;;  %v3932_v30 = vsub.f32 1.0, %v3931_v20  ;;  %v5589_v44 = vpop.eup %5588  ;;  %v2994_v41 = vand.u32 2147483647, %v7060_v60  ;;  %v2996_v12 = vand.u32 2147483648, %v7060_v60 }
 0x119   : > { %v4695_v19 = vmul.f32 %v3808_v26, %v6895_v48  ;;  %v737_v32 = vpop.f32.mrf.mxu0  ;;  %v7102_v45 = vadd.f32 %v823_v17, %v758_v22  ;;  %v5591_v0 = vpop.eup %5590  ;;  %v2858_v48 = vsel %vm2857_vm11, %v5583_v62, %v2854_v18  ;;  %v2986_v46 = vmul.f32 %v5589_v44, %v7060_v60 }
 0x11a   : > { %v802_v15 = vpop.f32.mrf.mxu1  ;;  %v3933_v34 = vmul.f32 %v5585_v9, %v3932_v30  ;;  %v2863_v21 = vsel %vm7075_vm9, %v2862_v50, %v2858_v48  ;;  %5594 = vrcp.f32 %v7095_v43  ;;  %v7118_v16 = vadd.f32 1.0, %v5591_v0 }
 0x11b   : > { %4789 = vst [vmem:[%s6948_s12 + $0x140] sm:$0xff] %v4695_v19  ;;  %v4632_v7 = vmul.f32 %v2863_v21, %v6897_v3  ;;  %v2987_v2 = vsub.f32 1.0, %v2986_v46  ;;  %5596 = vpow2.f32 %v5304_v13  ;;  %v5376_v38 = vmul.f32 -1.442695, %v7102_v45 }
 0x11c   : > { %v3934_v52 = vadd.f32 %v5585_v9, %v3933_v34  ;;  %vm2991_vm0 = vweird.f32 %v5589_v44  ;;  %v7122_v55 = vadd.f32 %v802_v15, %v737_v32  ;;  %890 = vmatmul.f32.gmra.mxu2 %v6812_v25  ;;  %v5593_v56 = vpop.eup %5592  ;;  %vm2990_vm1 = vweird.f32 %v7060_v60  ;;  %1020 = vmatmul.f32.gmra.mxu0 %v6812_v25  ;;  %v6129_v32 = vld [vmem:[%s6682_s1 + $0x8] sm:$0xff] }
 0x11d   : > { %4761 = vst [vmem:[%s6948_s12 + $0x60] sm:$0xff] %v4632_v7  ;;  %v2988_v54 = vmul.f32 %v5589_v44, %v2987_v2  ;;  %v4074_v58 = vand.u32 2147483647, %v7095_v43  ;;  %5598 = vrcp.f32 %v7118_v16  ;;  %955 = vmatmul.f32.gmra.mxu3 %v6818_v27  ;;  %v4076_v5 = vand.u32 2147483648, %v7095_v43  ;;  %1085 = vmatmul.f32.gmra.mxu1 %v6818_v27  ;;  %vm2992_vm2 = vmor %vm2990_vm1, %vm2991_vm0 }
 0x11e   : > { %v3938_v53 = vsel %vm3937_vm15, %v5585_v9, %v3934_v52  ;;  %v7134_v57 = vadd.f32 1.0, %v5593_v56  ;;  %v2997_v6 = vor.u32 1.1754944e-38, %v2996_v12  ;;  %5600 = vpow2.f32 %v5376_v38 }
 0x11f   : > { %v761_v3 = vpop.f32.mrf.mxu2  ;;  %v3943_v24 = vsel %vm7108_vm14, %v3942_v42, %v3938_v53  ;;  %v2989_v62 = vadd.f32 %v5589_v44, %v2988_v54  ;;  %v5313_v33 = vmul.f32 -1.442695, %v7122_v55  ;;  %vm2995_vm3 = vcmp.eq.f32.partialorder %v2994_v41, 8.507059e+37  ;;  %v551_v41 = vld [vmem:[#allocation5 + $0x460] sm:$0xff]  ;;  %v686_v53 = vld [vmem:[#allocation5 + $0x898] sm:$0xff] }
 0x120   : > { %v826_v36 = vpop.f32.mrf.mxu3  ;;  %v4704_v61 = vmul.f32 %v3943_v24, %v6952_v31  ;;  %v7137_v59 = vpop.eup %5594  ;;  %vm4070_vm4 = vweird.f32 %v7095_v43  ;;  %vm7147_vm5 = vcmp.eq.f32.partialorder %v4074_v58, 8.507059e+37  ;;  %v3129_v9 = vand.u32 2147483647, %v7118_v16  ;;  %1349 = vmatpush.msrb.mxu2 %v551_v41 }
 0x121   : > { %v976_v60 = vpop.f32.mrf.mxu0  ;;  %v7141_v25 = vadd.f32 %v826_v36, %v761_v3  ;;  %v2993_v31 = vsel %vm2992_vm2, %v5589_v44, %v2989_v62  ;;  %v4066_v23 = vmul.f32 %v7137_v59, %v7095_v43  ;;  %v5597_v27 = vpop.eup %5596  ;;  %5602 = vrcp.f32 %v7134_v57  ;;  %v695_v43 = vld [vmem:[#allocation5 + $0x8e0] sm:$0xff] }
 0x122   : > { %v1041_v35 = vpop.f32.mrf.mxu1  ;;  %4793 = vst [vmem:[%s6948_s12 + $0x160] sm:$0xff] %v4704_v61  ;;  %v2998_v8 = vsel %vm2995_vm3, %v2997_v6, %v2993_v31  ;;  %v4077_v39 = vor.u32 1.1754944e-38, %v4076_v5  ;;  %v7154_v14 = vadd.f32 1.0, %v5597_v27  ;;  %v3131_v22 = vand.u32 2147483648, %v7118_v16  ;;  %1414 = vmatpush.msrb.mxu3 %v695_v43 }
 0x123   : > { %v4641_v10 = vmul.f32 %v2998_v8, %v6954_v40  ;;  %v4067_v50 = vsub.f32 1.0, %v4066_v23  ;;  %v7156_v20 = vpop.eup %5598  ;;  %5604 = vpow2.f32 %v5313_v33  ;;  %v5385_v49 = vmul.f32 -1.442695, %v7141_v25  ;;  %v6131_v23 = vld [vmem:[%s6682_s1 + $0x18] sm:$0xff] }
 0x124   : > { %v7160_v26 = vadd.f32 %v1041_v35, %v976_v60  ;;  %vm4071_vm6 = vweird.f32 %v7137_v59  ;;  %v3121_v40 = vmul.f32 %v7156_v20, %v7118_v16  ;;  %vm3125_vm7 = vweird.f32 %v7118_v16  ;;  %1105 = vmatmul.f32.vlgmr.msra.gmra.mxu2 %v6128_v28  ;;  %v5601_v17 = vpop.eup %5600  ;;  %1235 = vmatmul.f32.vlgmr.msra.gmra.mxu0 %v6128_v28 }
 0x125   : > { %4765 = vst [vmem:[%s6948_s12 + $0x80] sm:$0xff] %v4641_v10  ;;  %v4068_v51 = vmul.f32 %v7137_v59, %v4067_v50  ;;  %vm7169_vm8 = vcmp.eq.f32.partialorder %v3129_v9, 8.507059e+37  ;;  %v4209_v18 = vand.u32 2147483647, %v7134_v57  ;;  %v4211_v30 = vand.u32 2147483648, %v7134_v57  ;;  %1170 = vmatmul.f32.vlgmr.msra.gmra.mxu3 %v6129_v32  ;;  %1300 = vmatmul.f32.vlgmr.msra.gmra.mxu1 %v6129_v32  ;;  %vm4072_vm9 = vmor %vm4070_vm4, %vm4071_vm6 }
 0x126   : > { %5606 = vrcp.f32 %v7154_v14  ;;  %v3122_v15 = vsub.f32 1.0, %v3121_v40  ;;  %v7178_v0 = vadd.f32 1.0, %v5601_v17  ;;  %v3132_v46 = vor.u32 1.1754944e-38, %v3131_v22  ;;  %1415 = vmatpush.msrb.mxu3 %v686_v53 }
 0x127   : > { %v846_v4 = vpop.f32.mrf.mxu2  ;;  %v4069_v13 = vadd.f32 %v7137_v59, %v4068_v51  ;;  %5608 = vpow2.f32 %v5385_v49  ;;  %v7180_v34 = vpop.eup %5602  ;;  %vm4205_vm10 = vweird.f32 %v7134_v57  ;;  %v5252_v21 = vmul.f32 -1.442695, %v7160_v26 }
 0x128   : > { %v911_v44 = vpop.f32.mrf.mxu3  ;;  %v3123_v52 = vmul.f32 %v7156_v20, %v3122_v15  ;;  %vm3126_vm11 = vweird.f32 %v7156_v20  ;;  %v4201_v2 = vmul.f32 %v7180_v34, %v7134_v57  ;;  %vm7197_vm12 = vcmp.eq.f32.partialorder %v4209_v18, 8.507059e+37 }
 0x129   : > { %v979_v48 = vpop.f32.mrf.mxu0  ;;  %v7188_v47 = vadd.f32 %v911_v44, %v846_v4  ;;  %v4073_v7 = vsel %vm4072_vm9, %v7137_v59, %v4069_v13  ;;  %v5605_v12 = vpop.eup %5604  ;;  %v3264_v54 = vand.u32 2147483647, %v7154_v14  ;;  %5610 = vrcp.f32 %v7178_v0  ;;  %vm3127_vm13 = vmor %vm3125_vm7, %vm3126_vm11  ;;  %v6130_v59 = vld [vmem:[%s6682_s1 + $0x10] sm:$0xff] }
 0x12a   : > { %v1044_v42 = vpop.f32.mrf.mxu1  ;;  %v4078_v38 = vsel %vm7147_vm5, %v4077_v39, %v4073_v7  ;;  %v3124_v56 = vadd.f32 %v7156_v20, %v3123_v52  ;;  %v4202_v24 = vsub.f32 1.0, %v4201_v2  ;;  %v4212_v58 = vor.u32 1.1754944e-38, %v4211_v30  ;;  %v696_v7 = vld [vmem:[#allocation5 + $0x8e8] sm:$0xff]  ;;  %v542_v52 = vld [vmem:[#allocation5 + $0x418] sm:$0xff]  ;;  %v6132_v2 = vld [vmem:[%s6682_s1 + $0x20] sm:$0xff] }
 0x12b   : > { %v4713_v3 = vmul.f32 %v4078_v38, %v7011_v29  ;;  %vm3260_vm14 = vweird.f32 %v7154_v14  ;;  %v7212_v61 = vadd.f32 1.0, %v5605_v12  ;;  %5612 = vpow2.f32 %v5252_v21  ;;  %1544 = vmatpush.msrb.mxu1 %v696_v7  ;;  %1350 = vmatpush.msrb.mxu2 %v542_v52 }
 0x12c   : > { %v7205_v36 = vpop.eup %5606  ;;  %v5251_v29 = vmul.f32 -1.442695, %v7188_v47  ;;  %v3128_v5 = vsel %vm3127_vm13, %v7156_v20, %v3124_v56  ;;  %v4203_v60 = vmul.f32 %v7180_v34, %v4202_v24  ;;  %vm4206_vm15 = vweird.f32 %v7180_v34  ;;  %1108 = vmatmul.f32.gmra.mxu2 %v6130_v59  ;;  %1238 = vmatmul.f32.gmra.mxu0 %v6130_v59 }
 0x12d   : > { %v5609_v62 = vpop.eup %5608  ;;  %4797 = vst [vmem:[%s6948_s12 + $0x180] sm:$0xff] %v4713_v3  ;;  %v3256_v16 = vmul.f32 %v7205_v36, %v7154_v14  ;;  %v3133_v33 = vsel %vm7169_vm8, %v3132_v46, %v3128_v5  ;;  %vm7226_vm0 = vcmp.eq.f32.partialorder %v3264_v54, 8.507059e+37  ;;  %v3266_v31 = vand.u32 2147483648, %v7154_v14  ;;  %1173 = vmatmul.f32.gmra.mxu3 %v6131_v23  ;;  %1303 = vmatmul.f32.gmra.mxu1 %v6131_v23  ;;  %vm4207_vm1 = vmor %vm4205_vm10, %vm4206_vm15 }
 0x12e   : > { %5614 = vrcp.f32 %v7212_v61  ;;  %v4650_v8 = vmul.f32 %v3133_v33, %v7035_v1  ;;  %v4204_v63 = vadd.f32 %v7180_v34, %v4203_v60  ;;  %v4344_v10 = vand.u32 2147483647, %v7178_v0 }
 0x12f   : > { %v7222_v6 = vpop.f32.mrf.mxu2  ;;  %v3257_v9 = vsub.f32 1.0, %v3256_v16  ;;  %v7240_v39 = vpop.eup %5610  ;;  %v4346_v20 = vand.u32 2147483648, %v7178_v0  ;;  %v7247_v22 = vadd.f32 1.0, %v5609_v62  ;;  %5616 = vpow2.f32 %v5251_v29  ;;  %v6133_v16 = vld [vmem:[%s6682_s1 + $0x28] sm:$0xff] }
 0x130   : > { %v7233_v27 = vpop.f32.mrf.mxu3  ;;  %v7249_v1 = vadd.f32 %v1044_v42, %v979_v48  ;;  %4769 = vst [vmem:[%s6948_s12 + $0xa0] sm:$0xff] %v4650_v8  ;;  %v4208_v51 = vsel %vm4207_vm1, %v7180_v34, %v4204_v63  ;;  %vm3261_vm2 = vweird.f32 %v7205_v36  ;;  %v4336_v57 = vmul.f32 %v7240_v39, %v7178_v0  ;;  %v552_v42 = vld [vmem:[#allocation5 + $0x468] sm:$0xff] }
 0x131   : > { %v7238_v50 = vpop.f32.mrf.mxu0  ;;  %v3258_v40 = vmul.f32 %v7205_v36, %v3257_v9  ;;  %v5613_v28 = vpop.eup %5612  ;;  %v4213_v4 = vsel %vm7197_vm12, %v4212_v58, %v4208_v51  ;;  %v3267_v17 = vor.u32 1.1754944e-38, %v3266_v31  ;;  %vm4340_vm3 = vweird.f32 %v7178_v0  ;;  %vm7273_vm5 = vmor %vm3260_vm14, %vm3261_vm2  ;;  %1479 = vmatpush.msrb.mxu0 %v552_v42  ;;  %v6135_v42 = vld [vmem:[%s6682_s1 + $0x38] sm:$0xff] }
 0x132   : > { %v7251_v49 = vpop.f32.mrf.mxu1  ;;  %5618 = vrcp.f32 %v7247_v22  ;;  %v4722_v19 = vmul.f32 %v4213_v4, %v7079_v11  ;;  %v4337_v30 = vsub.f32 1.0, %v4336_v57  ;;  %vm7265_vm4 = vcmp.eq.f32.partialorder %v4344_v10, 8.507059e+37 }
 0x133   : > { %v3259_v18 = vadd.f32 %v7205_v36, %v3258_v40  ;;  %v4347_v15 = vor.u32 1.1754944e-38, %v4346_v20  ;;  %v3399_v48 = vand.u32 2147483647, %v7212_v61  ;;  %v7278_v11 = vadd.f32 1.0, %v5613_v28  ;;  %v6134_v28 = vld [vmem:[%s6682_s1 + $0x30] sm:$0xff] }
 0x134   : > { %v7269_v44 = vpop.eup %5614  ;;  %v5261_v34 = vmul.f32 -1.442695, %v7249_v1  ;;  %4801 = vst [vmem:[%s6948_s12 + $0x1a0] sm:$0xff] %v4722_v19  ;;  %v4338_v21 = vmul.f32 %v7240_v39, %v4337_v30  ;;  %vm4341_vm6 = vweird.f32 %v7240_v39  ;;  %1111 = vmatmul.f32.gmra.mxu2 %v6132_v2  ;;  %vm3395_vm7 = vweird.f32 %v7212_v61  ;;  %1241 = vmatmul.f32.gmra.mxu0 %v6132_v2 }
 0x135   : > { %v3263_v46 = vsel %vm7273_vm5, %v7205_v36, %v3259_v18  ;;  %v3391_v14 = vmul.f32 %v7269_v44, %v7212_v61  ;;  %v5617_v43 = vpop.eup %5616  ;;  %v3401_v38 = vand.u32 2147483648, %v7212_v61  ;;  %5620 = vrcp.f32 %v7278_v11  ;;  %vm7308_vm8 = vmor %vm4340_vm3, %vm4341_vm6  ;;  %1176 = vmatmul.f32.gmra.mxu3 %v6133_v16  ;;  %1306 = vmatmul.f32.gmra.mxu1 %v6133_v16  ;;  %v524_v16 = vld [vmem:[#allocation5 + $0x388] sm:$0xff] }
 0x136   : > { %v3268_v12 = vsel %vm7226_vm0, %v3267_v17, %v3263_v46  ;;  %v4339_v56 = vadd.f32 %v7240_v39, %v4338_v21  ;;  %v4479_v58 = vand.u32 2147483647, %v7247_v22  ;;  %vm7312_vm9 = vcmp.eq.f32.partialorder %v3399_v48, 8.507059e+37  ;;  %v687_v46 = vld [vmem:[#allocation5 + $0x8a0] sm:$0xff]  ;;  %v533_v21 = vld [vmem:[#allocation5 + $0x3d0] sm:$0xff] }
 0x137   : > { %v7290_v41 = vpop.f32.mrf.mxu2  ;;  %v4659_v3 = vmul.f32 %v3268_v12, %v7081_v37  ;;  %v3392_v24 = vsub.f32 1.0, %v3391_v14  ;;  %v4481_v5 = vand.u32 2147483648, %v7247_v22  ;;  %v7317_v60 = vadd.f32 1.0, %v5617_v43  ;;  %1545 = vmatpush.msrb.mxu1 %v687_v46  ;;  %1351 = vmatpush.msrb.mxu2 %v533_v21 }
 0x138   : > { %v7297_v54 = vpop.f32.mrf.mxu3  ;;  %v7302_v29 = vpop.eup %5618  ;;  %5622 = vpow2.f32 %v5261_v34  ;;  %v4343_v0 = vsel %vm7308_vm8, %v7240_v39, %v4339_v56  ;;  %vm3396_vm10 = vweird.f32 %v7269_v44  ;;  %v3402_v23 = vor.u32 1.1754944e-38, %v3401_v38  ;;  %v543_v34 = vld [vmem:[#allocation5 + $0x420] sm:$0xff] }
 0x139   : > { %v985_v36 = vpop.f32.mrf.mxu0  ;;  %4773 = vst [vmem:[%s6948_s12 + $0xc0] sm:$0xff] %v4659_v3  ;;  %v3393_v33 = vmul.f32 %v7269_v44, %v3392_v24  ;;  %v4471_v35 = vmul.f32 %v7302_v29, %v7247_v22  ;;  %v4348_v31 = vsel %vm7265_vm4, %v4347_v15, %v4343_v0  ;;  %vm4475_vm11 = vweird.f32 %v7247_v22  ;;  %vm3397_vm13 = vmor %vm3395_vm7, %vm3396_vm10  ;;  %1480 = vmatpush.msrb.mxu0 %v543_v34  ;;  %v6136_v0 = vld [vmem:[%s6682_s1 + $0x40] sm:$0xff]  ;;  %v6138_v34 = vld [vmem:[%s6682_s1 + $0x50] sm:$0xff] }
 0x13a   : > { %v1050_v59 = vpop.f32.mrf.mxu1  ;;  %5624 = vrcp.f32 %v7317_v60  ;;  %v4731_v8 = vmul.f32 %v4348_v31, %v7102_v45  ;;  %vm7334_vm12 = vcmp.eq.f32.partialorder %v4479_v58, 8.507059e+37  ;;  %vm4476_vm14 = vweird.f32 %v7302_v29  ;;  %1352 = vmatpush.msrb.mxu2 %v524_v16 }
 0x13b   : > { %v3394_v63 = vadd.f32 %v7269_v44, %v3393_v33  ;;  %v4472_v9 = vsub.f32 1.0, %v4471_v35  ;;  %v7338_v39 = vpop.eup %5620  ;;  %v4482_v20 = vor.u32 1.1754944e-38, %v4481_v5  ;;  %v7345_v51 = vadd.f32 %v7233_v27, %v7222_v6  ;;  %vm7369_vm0 = vmor %vm4475_vm11, %vm4476_vm14  ;;  %v678_v5 = vld [vmem:[#allocation5 + $0x858] sm:$0xff] }
 0x13c   : > { %v7349_v45 = vadd.f32 %v7251_v49, %v7238_v50  ;;  %4805 = vst [vmem:[%s6948_s12 + $0x1c0] sm:$0xff] %v4731_v8  ;;  %v2476_v61 = vmul.f32 %v7338_v39, %v7278_v11  ;;  %vm2480_vm15 = vweird.f32 %v7278_v11  ;;  %1114 = vmatmul.f32.gmra.mxu2 %v6134_v28  ;;  %v2484_v27 = vand.u32 2147483647, %v7278_v11  ;;  %1244 = vmatmul.f32.gmra.mxu0 %v6134_v28 }
 0x13d   : > { %v3398_v40 = vsel %vm3397_vm13, %v7269_v44, %v3394_v63  ;;  %v4473_v57 = vmul.f32 %v7302_v29, %v4472_v9  ;;  %v2486_v50 = vand.u32 2147483648, %v7278_v11  ;;  %v5260_v49 = vmul.f32 -1.442695, %v7345_v51  ;;  %1179 = vmatmul.f32.gmra.mxu3 %v6135_v42  ;;  %1309 = vmatmul.f32.gmra.mxu1 %v6135_v42  ;;  %v534_v11 = vld [vmem:[#allocation5 + $0x3d8] sm:$0xff] }
 0x13e   : > { %v5623_v17 = vpop.eup %5622  ;;  %v3403_v6 = vsel %vm7312_vm9, %v3402_v23, %v3398_v40  ;;  %v2477_v44 = vsub.f32 1.0, %v2476_v61  ;;  %v7380_v22 = vadd.f32 %v7297_v54, %v7290_v41  ;;  %v7382_v14 = vadd.f32 %v1050_v59, %v985_v36  ;;  %v677_v41 = vld [vmem:[#allocation5 + $0x850] sm:$0xff]  ;;  %1481 = vmatpush.msrb.mxu0 %v534_v11  ;;  %1546 = vmatpush.msrb.mxu1 %v678_v5  ;;  %v668_v23 = vld [vmem:[#allocation5 + $0x808] sm:$0xff] }
 0x13f   : > { %v855_v4 = vpop.f32.mrf.mxu2  ;;  %v4668_v18 = vmul.f32 %v3403_v6, %v7122_v55  ;;  %v4474_v30 = vadd.f32 %v7302_v29, %v4473_v57  ;;  %v7373_v13 = vadd.f32 1.0, %v5623_v17  ;;  %5626 = vpow2.f32 %v5260_v49  ;;  %1416 = vmatpush.msrb.mxu3 %v677_v41  ;;  %v6137_v61 = vld [vmem:[%s6682_s1 + $0x48] sm:$0xff] }
 0x140   : > { %v920_v19 = vpop.f32.mrf.mxu3  ;;  %v7375_v48 = vpop.eup %5624  ;;  %v5270_v55 = vmul.f32 -1.442695, %v7349_v45  ;;  %v2478_v2 = vmul.f32 %v7338_v39, %v2477_v44  ;;  %vm2481_vm1 = vweird.f32 %v7338_v39  ;;  %vm7395_vm2 = vcmp.eq.f32.partialorder %v2484_v27, 8.507059e+37 }
 0x141   : > { %v988_v15 = vpop.f32.mrf.mxu0  ;;  %4777 = vst [vmem:[%s6948_s12 + $0xe0] sm:$0xff] %v4668_v18  ;;  %v4478_v52 = vsel %vm7369_vm0, %v7302_v29, %v4474_v30  ;;  %v2461_v43 = vmul.f32 %v7375_v48, %v7317_v60  ;;  %v2487_v53 = vor.u32 1.1754944e-38, %v2486_v50  ;;  %5628 = vrcp.f32 %v7373_v13  ;;  %vm7407_vm3 = vmor %vm2480_vm15, %vm2481_vm1  ;;  %1417 = vmatpush.msrb.mxu3 %v668_v23 }
 0x142   : > { %v1053_v7 = vpop.f32.mrf.mxu1  ;;  %v4483_v12 = vsel %vm7334_vm12, %v4482_v20, %v4478_v52  ;;  %v2479_v3 = vadd.f32 %v7338_v39, %v2478_v2  ;;  %v2469_v24 = vand.u32 2147483647, %v7317_v60  ;;  %v2471_v36 = vand.u32 2147483648, %v7317_v60  ;;  %v669_v52 = vld [vmem:[#allocation5 + $0x810] sm:$0xff]  ;;  %v515_v2 = vld [vmem:[#allocation5 + $0x340] sm:$0xff] }
 0x143   : > { %v4740_v54 = vmul.f32 %v4483_v12, %v7141_v25  ;;  %v2462_v56 = vsub.f32 1.0, %v2461_v43  ;;  %5630 = vpow2.f32 %v5270_v55  ;;  %v5269_v25 = vmul.f32 -1.442695, %v7380_v22  ;;  %1547 = vmatpush.msrb.mxu1 %v669_v52  ;;  %1353 = vmatpush.msrb.mxu2 %v515_v2 }
 0x144   : > { %v5279_v29 = vmul.f32 -1.442695, %v7382_v14  ;;  %v2483_v62 = vsel %vm7407_vm3, %v7338_v39, %v2479_v3  ;;  %vm2466_vm4 = vweird.f32 %v7375_v48  ;;  %v7420_v59 = vadd.f32 %v920_v19, %v855_v4  ;;  %1117 = vmatmul.f32.gmra.mxu2 %v6136_v0  ;;  %1247 = vmatmul.f32.gmra.mxu0 %v6136_v0 }
 0x145   : > { %4809 = vst [vmem:[%s6948_s12 + $0x1e0] sm:$0xff] %v4740_v54  ;;  %v2463_v37 = vmul.f32 %v7375_v48, %v2462_v56  ;;  %v5627_v35 = vpop.eup %5626  ;;  %v2488_v31 = vsel %vm7395_vm2, %v2487_v53, %v2483_v62  ;;  %vm2465_vm5 = vweird.f32 %v7317_v60  ;;  %5632 = vpow2.f32 %v5269_v25  ;;  %1182 = vmatmul.f32.gmra.mxu3 %v6137_v61  ;;  %1312 = vmatmul.f32.gmra.mxu1 %v6137_v61  ;;  %v659_v54 = vld [vmem:[#allocation5 + $0x7c0] sm:$0xff] }
 0x146   : > { %v7426_v8 = vadd.f32 %v1053_v7, %v988_v15  ;;  %v4607_v9 = vmul.f32 %v2488_v31, %v7160_v26  ;;  %v7430_v39 = vadd.f32 1.0, %v5627_v35  ;;  %5634 = vpow2.f32 %v5279_v29  ;;  %vm2467_vm6 = vmor %vm2465_vm5, %vm2466_vm4  ;;  %v525_v7 = vld [vmem:[#allocation5 + $0x390] sm:$0xff]  ;;  %1418 = vmatpush.msrb.mxu3 %v659_v54  ;;  %v660_v29 = vld [vmem:[#allocation5 + $0x7c8] sm:$0xff] }
 0x147   : > { %v858_v33 = vpop.f32.mrf.mxu2  ;;  %v2464_v10 = vadd.f32 %v7375_v48, %v2463_v37  ;;  %v7434_v40 = vpop.eup %5628  ;;  %v2472_v57 = vor.u32 1.1754944e-38, %v2471_v36  ;;  %v5278_v26 = vmul.f32 -1.442695, %v7420_v59  ;;  %vm2470_vm7 = vcmp.eq.f32.partialorder %v2469_v24, 8.507059e+37  ;;  %1482 = vmatpush.msrb.mxu0 %v525_v7  ;;  %v6139_v37 = vld [vmem:[%s6682_s1 + $0x58] sm:$0xff]  ;;  %1548 = vmatpush.msrb.mxu1 %v660_v29 }
 0x148   : > { %v923_v63 = vpop.f32.mrf.mxu3  ;;  %4751 = vst [vmem:[%s6948_s12 + $0x10] sm:$0xff] %v4607_v9  ;;  %v2611_v6 = vmul.f32 %v7434_v40, %v7373_v13  ;;  %5636 = vrcp.f32 %v7430_v39  ;;  %v5288_v50 = vmul.f32 -1.442695, %v7426_v8  ;;  %v2619_v18 = vand.u32 2147483647, %v7373_v13 }
 0x149   : > { %v7432_v20 = vpop.f32.mrf.mxu0  ;;  %v7442_v28 = vadd.f32 %v923_v63, %v858_v33  ;;  %v2468_v17 = vsel %vm2467_vm6, %v7375_v48, %v2464_v10  ;;  %v5631_v60 = vpop.eup %5630  ;;  %v2621_v44 = vand.u32 2147483648, %v7373_v13  ;;  %5638 = vpow2.f32 %v5278_v26 }
 0x14a   : > { %v7444_v4 = vpop.f32.mrf.mxu1  ;;  %v2473_v27 = vsel %vm2470_vm7, %v2472_v57, %v2468_v17  ;;  %v2612_v19 = vsub.f32 1.0, %v2611_v6  ;;  %v7454_v30 = vadd.f32 1.0, %v5631_v60  ;;  %vm2616_vm8 = vweird.f32 %v7434_v40  ;;  %v6140_v60 = vld [vmem:[%s6682_s1 + $0x60] sm:$0xff] }
 0x14b   : > { %v4606_v49 = vmul.f32 %v2473_v27, %v7188_v47  ;;  %v5633_v32 = vpop.eup %5632  ;;  %v5287_v15 = vmul.f32 -1.442695, %v7442_v28  ;;  %v2604_v47 = vand.u32 2147483647, %v7430_v39  ;;  %vm2615_vm9 = vweird.f32 %v7373_v13 }
 0x14c   : > { %v5635_v48 = vpop.eup %5634  ;;  %v2613_v55 = vmul.f32 %v7434_v40, %v2612_v19  ;;  %5640 = vrcp.f32 %v7454_v30  ;;  %1120 = vmatmul.f32.gmra.mxu2 %v6138_v34  ;;  %v7465_v21 = vadd.f32 1.0, %v5633_v32  ;;  %vm7472_vm10 = vcmp.eq.f32.partialorder %v2619_v18, 8.507059e+37  ;;  %vm7483_vm11 = vmor %vm2615_vm9, %vm2616_vm8  ;;  %1250 = vmatmul.f32.gmra.mxu0 %v6138_v34 }
 0x14d   : > { %4750 = vst [vmem:[%s6948_s12 + $0x8] sm:$0xff] %v4606_v49  ;;  %v7467_v42 = vadd.f32 1.0, %v5635_v48  ;;  %5642 = vpow2.f32 %v5288_v50  ;;  %v2606_v53 = vand.u32 2147483648, %v7430_v39  ;;  %v2622_v24 = vor.u32 1.1754944e-38, %v2621_v44  ;;  %1185 = vmatmul.f32.gmra.mxu3 %v6139_v37  ;;  %1315 = vmatmul.f32.gmra.mxu1 %v6139_v37 }
 0x14e   : > { %v7469_v41 = vpop.eup %5636  ;;  %v2614_v12 = vadd.f32 %v7434_v40, %v2613_v55  ;;  %5644 = vpow2.f32 %v5287_v15  ;;  %v2754_v36 = vand.u32 2147483647, %v7454_v30  ;;  %vm2600_vm12 = vweird.f32 %v7430_v39 }
 0x14f   : > { %v861_v46 = vpop.f32.mrf.mxu2  ;;  %v2596_v58 = vmul.f32 %v7469_v41, %v7430_v39  ;;  %5646 = vrcp.f32 %v7465_v21  ;;  %vm7497_vm13 = vcmp.eq.f32.partialorder %v2604_v47, 8.507059e+37  ;;  %v2756_v62 = vand.u32 2147483648, %v7454_v30  ;;  %v5639_v11 = vpop.eup %5638 }
 0x150   : > { %v926_v43 = vpop.f32.mrf.mxu3  ;;  %v2618_v13 = vsel %vm7483_vm11, %v7434_v40, %v2614_v12  ;;  %v2741_v0 = vand.u32 2147483648, %v7465_v21  ;;  %5648 = vrcp.f32 %v7467_v42  ;;  %v2607_v31 = vor.u32 1.1754944e-38, %v2606_v53 }
 0x151   : > { %v7477_v3 = vpop.f32.mrf.mxu0  ;;  %v2623_v5 = vsel %vm7472_vm10, %v2622_v24, %v2618_v13  ;;  %v2597_v16 = vsub.f32 1.0, %v2596_v58  ;;  %vm2750_vm14 = vweird.f32 %v7454_v30  ;;  %v2739_v23 = vand.u32 2147483647, %v7465_v21  ;;  %v516_v13 = vld [vmem:[#allocation5 + $0x348] sm:$0xff] }
 0x152   : > { %v7491_v25 = vpop.f32.mrf.mxu1  ;;  %v7507_v33 = vpop.eup %5640  ;;  %v4616_v35 = vmul.f32 %v2623_v5, %v7249_v1  ;;  %vm2601_vm15 = vweird.f32 %v7469_v41  ;;  %vm7516_vm0 = vcmp.eq.f32.partialorder %v2754_v36, 8.507059e+37  ;;  %v7522_v1 = vadd.f32 %v7444_v4, %v7432_v20  ;;  %1483 = vmatpush.msrb.mxu0 %v516_v13  ;;  %v506_v5 = vld [vmem:[#allocation5 + $0x2f8] sm:$0xff] }
 0x153   : > { %v5643_v63 = vpop.eup %5642  ;;  %v2598_v9 = vmul.f32 %v7469_v41, %v2597_v16  ;;  %v2746_v10 = vmul.f32 %v7507_v33, %v7454_v30  ;;  %v2757_v26 = vor.u32 1.1754944e-38, %v2756_v62  ;;  %v2889_v61 = vand.u32 2147483647, %v7467_v42  ;;  %vm2602_vm2 = vmor %vm2600_vm12, %vm2601_vm15  ;;  %v650_v16 = vld [vmem:[#allocation5 + $0x778] sm:$0xff]  ;;  %1354 = vmatpush.msrb.mxu2 %v506_v5 }
 0x154   : > { %v5645_v57 = vpop.eup %5644  ;;  %4755 = vst [vmem:[%s6948_s12 + $0x30] sm:$0xff] %v4616_v35  ;;  %v7526_v17 = vadd.f32 1.0, %v5639_v11  ;;  %v7528_v6 = vadd.f32 %v926_v43, %v861_v46  ;;  %1123 = vmatmul.f32.gmra.mxu2 %v6140_v60  ;;  %vm2735_vm1 = vweird.f32 %v7465_v21  ;;  %v7537_v20 = vor.u32 1.1754944e-38, %v2741_v0  ;;  %1253 = vmatmul.f32.gmra.mxu0 %v6140_v60  ;;  %v498_v5 = vld [vmem:[#allocation5 + $0x2b8] sm:$0xff] }
 0x155   : > { %v7533_v50 = vpop.eup %5646  ;;  %v2599_v49 = vadd.f32 %v7469_v41, %v2598_v9  ;;  %v2747_v19 = vsub.f32 1.0, %v2746_v10  ;;  %vm2751_vm3 = vweird.f32 %v7507_v33  ;;  %vm7548_vm4 = vcmp.eq.f32.partialorder %v2739_v23, 8.507059e+37  ;;  %1419 = vmatpush.msrb.mxu3 %v650_v16  ;;  %v6142_v10 = vld [vmem:[%s6682_s1 + $0x70] sm:$0xff]  ;;  %v642_v16 = vld [vmem:[#allocation5 + $0x738] sm:$0xff] }
 0x156   : > { %v2731_v18 = vmul.f32 %v7533_v50, %v7465_v21  ;;  %vm2885_vm5 = vweird.f32 %v7467_v42  ;;  %5650 = vrcp.f32 %v7526_v17  ;;  %v7554_v44 = vadd.f32 1.0, %v5643_v63  ;;  %v7558_v39 = vpop.eup %5648  ;;  %vm2752_vm8 = vmor %vm2750_vm14, %vm2751_vm3 }
 0x157   : > { %v7531_v27 = vpop.f32.mrf.mxu2  ;;  %v2603_v48 = vsel %vm2602_vm2, %v7469_v41, %v2599_v49  ;;  %v2748_v55 = vmul.f32 %v7507_v33, %v2747_v19  ;;  %v2891_v47 = vand.u32 2147483648, %v7467_v42  ;;  %v7563_v34 = vadd.f32 1.0, %v5645_v57  ;;  %v6141_v41 = vld [vmem:[%s6682_s1 + $0x68] sm:$0xff]  ;;  %v6143_v19 = vld [vmem:[%s6682_s1 + $0x78] sm:$0xff] }
 0x158   : > { %v7539_v4 = vpop.f32.mrf.mxu3  ;;  %v2608_v7 = vsel %vm7497_vm13, %v2607_v31, %v2603_v48  ;;  %v2732_v52 = vsub.f32 1.0, %v2731_v18  ;;  %v2881_v2 = vmul.f32 %v7558_v39, %v7467_v42  ;;  %vm7571_vm6 = vcmp.eq.f32.partialorder %v2889_v61, 8.507059e+37  ;;  %1188 = vmatmul.f32.gmra.mxu3 %v6141_v41  ;;  %1318 = vmatmul.f32.gmra.mxu1 %v6141_v41 }
 0x159   : > { %v7556_v15 = vpop.f32.mrf.mxu0  ;;  %v4615_v12 = vmul.f32 %v2608_v7, %v7345_v51  ;;  %v2749_v38 = vadd.f32 %v7507_v33, %v2748_v55  ;;  %vm2736_vm7 = vweird.f32 %v7533_v50  ;;  %v2874_v53 = vand.u32 2147483647, %v7526_v17 }
 0x15a   : > { %v7565_v46 = vpop.f32.mrf.mxu1  ;;  %v2733_v54 = vmul.f32 %v7533_v50, %v2732_v52  ;;  %v2882_v56 = vsub.f32 1.0, %v2881_v2  ;;  %v2876_v24 = vand.u32 2147483648, %v7526_v17  ;;  %5652 = vrcp.f32 %v7554_v44  ;;  %vm2737_vm10 = vmor %vm2735_vm1, %vm2736_vm7 }
 0x15b   : > { %4754 = vst [vmem:[%s6948_s12 + $0x28] sm:$0xff] %v4615_v12  ;;  %v2753_v51 = vsel %vm2752_vm8, %v7507_v33, %v2749_v38  ;;  %v2892_v58 = vor.u32 1.1754944e-38, %v2891_v47  ;;  %5654 = vrcp.f32 %v7563_v34  ;;  %v5297_v36 = vmul.f32 -1.442695, %v7522_v1  ;;  %v507_v12 = vld [vmem:[#allocation5 + $0x300] sm:$0xff] }
 0x15c   : > { %v7591_v30 = vpop.eup %5650  ;;  %v2758_v62 = vsel %vm7516_vm0, %v2757_v26, %v2753_v51  ;;  %v2734_v37 = vadd.f32 %v7533_v50, %v2733_v54  ;;  %v2883_v11 = vmul.f32 %v7558_v39, %v2882_v56  ;;  %vm2886_vm9 = vweird.f32 %v7558_v39  ;;  %1126 = vmatmul.f32.gmra.mxu2 %v6142_v10  ;;  %1256 = vmatmul.f32.gmra.mxu0 %v6142_v10  ;;  %v651_v38 = vld [vmem:[#allocation5 + $0x780] sm:$0xff]  ;;  %v497_v54 = vld [vmem:[#allocation5 + $0x2b0] sm:$0xff] }
 0x15d   : > { %v4625_v33 = vmul.f32 %v2758_v62, %v7349_v45  ;;  %v2866_v35 = vmul.f32 %v7591_v30, %v7526_v17  ;;  %vm2870_vm11 = vweird.f32 %v7526_v17  ;;  %vm7608_vm12 = vcmp.eq.f32.partialorder %v2874_v53, 8.507059e+37  ;;  %vm7624_vm13 = vmor %vm2885_vm5, %vm2886_vm9  ;;  %1484 = vmatpush.msrb.mxu0 %v507_v12  ;;  %1549 = vmatpush.msrb.mxu1 %v651_v38  ;;  %v641_v56 = vld [vmem:[#allocation5 + $0x730] sm:$0xff] }
 0x15e   : > { %v2738_v63 = vsel %vm2737_vm10, %v7533_v50, %v2734_v37  ;;  %v2884_v45 = vadd.f32 %v7558_v39, %v2883_v11  ;;  %v2877_v9 = vor.u32 1.1754944e-38, %v2876_v24  ;;  %v3024_v21 = vand.u32 2147483647, %v7554_v44  ;;  %1355 = vmatpush.msrb.mxu2 %v497_v54  ;;  %1420 = vmatpush.msrb.mxu3 %v641_v56 }
 0x15f   : > { %v7598_v0 = vpop.f32.mrf.mxu2  ;;  %4759 = vst [vmem:[%s6948_s12 + $0x50] sm:$0xff] %v4625_v33  ;;  %v2743_v40 = vsel %vm7548_vm4, %v7537_v20, %v2738_v63  ;;  %v2867_v26 = vsub.f32 1.0, %v2866_v35  ;;  %vm3020_vm14 = vweird.f32 %v7554_v44  ;;  %v3026_v61 = vand.u32 2147483648, %v7554_v44  ;;  %1485 = vmatpush.msrb.mxu0 %v498_v5  ;;  %1550 = vmatpush.msrb.mxu1 %v642_v16  ;;  %v623_v16 = vld [vmem:[#allocation5 + $0x6a0] sm:$0xff] }
 0x160   : > { %v932_v23 = vpop.f32.mrf.mxu3  ;;  %5656 = vpow2.f32 %v5297_v36  ;;  %v7630_v60 = vpop.eup %5652  ;;  %v4624_v50 = vmul.f32 %v2743_v40, %v7380_v22  ;;  %v2888_v49 = vsel %vm7624_vm13, %v7558_v39, %v2884_v45  ;;  %vm2871_vm15 = vweird.f32 %v7591_v30  ;;  %1191 = vmatmul.f32.gmra.mxu3 %v6143_v19  ;;  %1321 = vmatmul.f32.gmra.mxu1 %v6143_v19 }
 0x161   : > { %vm3005_vm0 = vweird.f32 %v7563_v34  ;;  %v5296_v42 = vmul.f32 -1.442695, %v7528_v6  ;;  %v7640_v20 = vpop.f32.mrf.mxu0  ;;  %v7644_v32 = vpop.eup %5654  ;;  %v2893_v22 = vsel %vm7571_vm6, %v2892_v58, %v2888_v49  ;;  %v2868_v39 = vmul.f32 %v7591_v30, %v2867_v26  ;;  %vm7668_vm2 = vmor %vm2870_vm11, %vm2871_vm15 }
 0x162   : > { %v7642_v18 = vpop.f32.mrf.mxu1  ;;  %v3016_v48 = vmul.f32 %v7630_v60, %v7554_v44  ;;  %v3009_v55 = vand.u32 2147483647, %v7563_v34  ;;  %4758 = vst [vmem:[%s6948_s12 + $0x48] sm:$0xff] %v4624_v50  ;;  %v4634_v47 = vmul.f32 %v2893_v22, %v7382_v14  ;;  %vm3021_vm1 = vweird.f32 %v7630_v60 }
 0x163   : > { %v3001_v7 = vmul.f32 %v7644_v32, %v7563_v34  ;;  %v3011_v52 = vand.u32 2147483648, %v7563_v34  ;;  %v2869_v2 = vadd.f32 %v7591_v30, %v2868_v39  ;;  %5658 = vpow2.f32 %v5296_v42  ;;  %vm7707_vm4 = vmor %vm3020_vm14, %vm3021_vm1 }
 0x164   : > { %v3017_v43 = vsub.f32 1.0, %v3016_v48  ;;  %v7661_v41 = vadd.f32 %v7491_v25, %v7477_v3  ;;  %4763 = vst [vmem:[%s6948_s12 + $0x70] sm:$0xff] %v4634_v47  ;;  %vm3006_vm3 = vweird.f32 %v7644_v32  ;;  %v7675_v3 = vadd.f32 %v7539_v4, %v7531_v27  ;;  %v6146_v48 = vld [vmem:[%s6682_s1 + $0x90] sm:$0xff] }
 0x165   : > { %v3002_v53 = vsub.f32 1.0, %v3001_v7  ;;  %v7679_v25 = vadd.f32 %v7565_v46, %v7556_v15  ;;  %v2873_v24 = vsel %vm7668_vm2, %v7591_v30, %v2869_v2  ;;  %v7687_v36 = vadd.f32 %v932_v23, %v7598_v0  ;;  %v6144_v30 = vld [vmem:[%s6682_s1 + $0x80] sm:$0xff]  ;;  %v488_v0 = vld [vmem:[#allocation5 + $0x268] sm:$0xff]  ;;  %vm7729_vm6 = vmor %vm3005_vm0, %vm3006_vm3 }
 0x166   : > { %v5657_v17 = vpop.eup %5656  ;;  %v3018_v51 = vmul.f32 %v7630_v60, %v3017_v43  ;;  %v5306_v58 = vmul.f32 -1.442695, %v7661_v41  ;;  %v2878_v15 = vsel %vm7608_vm12, %v2877_v9, %v2873_v24  ;;  %v5305_v29 = vmul.f32 -1.442695, %v7675_v3  ;;  %1129 = vmatmul.f32.gmra.mxu2 %v6144_v30  ;;  %v632_v23 = vld [vmem:[#allocation5 + $0x6e8] sm:$0xff]  ;;  %1259 = vmatmul.f32.gmra.mxu0 %v6144_v30  ;;  %v489_v30 = vld [vmem:[#allocation5 + $0x270] sm:$0xff] }
 0x167   : > { %v7689_v27 = vpop.f32.mrf.mxu2  ;;  %v3003_v46 = vmul.f32 %v7644_v32, %v3002_v53  ;;  %v7696_v13 = vadd.f32 1.0, %v5657_v17  ;;  %v4633_v62 = vmul.f32 %v2878_v15, %v7420_v59  ;;  %v5315_v11 = vmul.f32 -1.442695, %v7679_v25  ;;  %1356 = vmatpush.msrb.mxu2 %v488_v0  ;;  %1421 = vmatpush.msrb.mxu3 %v632_v23  ;;  %v6147_v15 = vld [vmem:[%s6682_s1 + $0x98] sm:$0xff] }
 0x168   : > { %v7691_v4 = vpop.f32.mrf.mxu3  ;;  %v3019_v37 = vadd.f32 %v7630_v60, %v3018_v51  ;;  %5660 = vpow2.f32 %v5306_v58  ;;  %vm7713_vm5 = vcmp.eq.f32.partialorder %v3024_v21, 8.507059e+37  ;;  %v3027_v35 = vor.u32 1.1754944e-38, %v3026_v61  ;;  %1486 = vmatpush.msrb.mxu0 %v489_v30 }
 0x169   : > { %v3004_v31 = vadd.f32 %v7644_v32, %v3003_v46  ;;  %5662 = vrcp.f32 %v7696_v13  ;;  %v5659_v63 = vpop.eup %5658  ;;  %4762 = vst [vmem:[%s6948_s12 + $0x68] sm:$0xff] %v4633_v62  ;;  %v3012_v9 = vor.u32 1.1754944e-38, %v3011_v52  ;;  %v5314_v21 = vmul.f32 -1.442695, %v7687_v36  ;;  %v1003_v10 = vpop.f32.mrf.mxu0  ;;  %v633_v62 = vld [vmem:[#allocation5 + $0x6f0] sm:$0xff]  ;;  %1422 = vmatpush.msrb.mxu3 %v623_v16  ;;  %v470_v16 = vld [vmem:[#allocation5 + $0x1d8] sm:$0xff] }
 0x16a   : > { %v3023_v45 = vsel %vm7707_vm4, %v7630_v60, %v3019_v37  ;;  %5664 = vpow2.f32 %v5305_v29  ;;  %v1068_v40 = vpop.f32.mrf.mxu1  ;;  %vm3010_vm7 = vcmp.eq.f32.partialorder %v3009_v55, 8.507059e+37  ;;  %v7741_v61 = vadd.f32 1.0, %v5659_v63  ;;  %v6145_v60 = vld [vmem:[%s6682_s1 + $0x88] sm:$0xff]  ;;  %v479_v37 = vld [vmem:[#allocation5 + $0x220] sm:$0xff]  ;;  %1551 = vmatpush.msrb.mxu1 %v633_v62 }
 0x16b   : > { %v3028_v57 = vsel %vm7713_vm5, %v3027_v35, %v3023_v45  ;;  %v3008_v26 = vsel %vm7729_vm6, %v7644_v32, %v3004_v31  ;;  %1194 = vmatmul.f32.gmra.mxu3 %v6145_v60  ;;  %v3159_v42 = vand.u32 2147483647, %v7696_v13  ;;  %5666 = vpow2.f32 %v5315_v11  ;;  %1324 = vmatmul.f32.gmra.mxu1 %v6145_v60 }
 0x16c   : > { %v4643_v50 = vmul.f32 %v3028_v57, %v7426_v8  ;;  %v3013_v49 = vsel %vm3010_vm7, %v3012_v9, %v3008_v26  ;;  %v3161_v32 = vand.u32 2147483648, %v7696_v13  ;;  %5668 = vrcp.f32 %v7741_v61  ;;  %1357 = vmatpush.msrb.mxu2 %v479_v37  ;;  %v6148_v9 = vld [vmem:[%s6682_s1 + $0xa0] sm:$0xff] }
 0x16d   : > { %v4642_v19 = vmul.f32 %v3013_v49, %v7442_v28  ;;  %5670 = vpow2.f32 %v5314_v21  ;;  %v7752_v22 = vadd.f32 %v7642_v18, %v7640_v20  ;;  %vm3155_vm8 = vweird.f32 %v7696_v13  ;;  %v471_v20 = vld [vmem:[#allocation5 + $0x1e0] sm:$0xff] }
 0x16e   : > { %v5661_v34 = vpop.eup %5660  ;;  %4767 = vst [vmem:[%s6948_s12 + $0x90] sm:$0xff] %v4643_v50  ;;  %1132 = vmatmul.f32.gmra.mxu2 %v6146_v48  ;;  %vm7767_vm9 = vcmp.eq.f32.partialorder %v3159_v42, 8.507059e+37  ;;  %v3162_v52 = vor.u32 1.1754944e-38, %v3161_v32  ;;  %v3144_v2 = vand.u32 2147483647, %v7741_v61  ;;  %v3146_v43 = vand.u32 2147483648, %v7741_v61  ;;  %1262 = vmatmul.f32.gmra.mxu0 %v6146_v48 }
 0x16f   : > { %v7754_v39 = vpop.eup %5662  ;;  %4766 = vst [vmem:[%s6948_s12 + $0x88] sm:$0xff] %v4642_v19  ;;  %v7757_v8 = vadd.f32 1.0, %v5661_v34  ;;  %v7760_v55 = vpop.f32.mrf.mxu2  ;;  %v5324_v18 = vmul.f32 -1.442695, %v7752_v22  ;;  %vm3140_vm10 = vweird.f32 %v7741_v61  ;;  %v7781_v54 = vadd.f32 %v7691_v4, %v7689_v27  ;;  %1358 = vmatpush.msrb.mxu2 %v470_v16 }
 0x170   : > { %v7762_v28 = vpop.f32.mrf.mxu3  ;;  %v5665_v47 = vpop.eup %5664  ;;  %v3151_v7 = vmul.f32 %v7754_v39, %v7696_v13  ;;  %vm3156_vm11 = vweird.f32 %v7754_v39  ;;  %v7792_v58 = vadd.f32 %v1068_v40, %v1003_v10  ;;  %vm7800_vm12 = vcmp.eq.f32.partialorder %v3144_v2, 8.507059e+37 }
 0x171   : > { %5672 = vrcp.f32 %v7757_v8  ;;  %v5667_v12 = vpop.eup %5666  ;;  %v3296_v14 = vand.u32 2147483648, %v7757_v8  ;;  %v7777_v53 = vadd.f32 1.0, %v5665_v47  ;;  %v7783_v56 = vpop.f32.mrf.mxu0  ;;  %v3294_v29 = vand.u32 2147483647, %v7757_v8  ;;  %vm7816_vm14 = vmor %vm3155_vm8, %vm3156_vm11 }
 0x172   : > { %v3152_v38 = vsub.f32 1.0, %v3151_v7  ;;  %v7785_v17 = vpop.f32.mrf.mxu1  ;;  %v7787_v24 = vpop.eup %5668  ;;  %v7790_v51 = vadd.f32 1.0, %v5667_v12  ;;  %5674 = vpow2.f32 %v5324_v18  ;;  %v3147_v5 = vor.u32 1.1754944e-38, %v3146_v43  ;;  %v6149_v18 = vld [vmem:[%s6682_s1 + $0xa8] sm:$0xff] }
 0x173   : > { %1197 = vmatmul.f32.gmra.mxu3 %v6147_v15  ;;  %v5671_v46 = vpop.eup %5670  ;;  %v3136_v4 = vmul.f32 %v7787_v24, %v7741_v61  ;;  %5676 = vrcp.f32 %v7777_v53  ;;  %1327 = vmatmul.f32.gmra.mxu1 %v6147_v15  ;;  %vm3290_vm13 = vweird.f32 %v7757_v8  ;;  %v7807_v59 = vor.u32 1.1754944e-38, %v3296_v14 }
 0x174   : > { %v3153_v27 = vmul.f32 %v7754_v39, %v3152_v38  ;;  %5678 = vrcp.f32 %v7790_v51  ;;  %v5323_v35 = vmul.f32 -1.442695, %v7781_v54  ;;  %vm3141_vm15 = vweird.f32 %v7787_v24 }
 0x175   : > { %v3137_v33 = vsub.f32 1.0, %v3136_v4  ;;  %v3279_v63 = vand.u32 2147483647, %v7777_v53  ;;  %v7822_v45 = vadd.f32 1.0, %v5671_v46  ;;  %v7825_v44 = vmul.f32 -1.442695, %v7792_v58  ;;  %vm7859_vm2 = vmor %vm3140_vm10, %vm3141_vm15 }
 0x176   : > { %v3154_v0 = vadd.f32 %v7754_v39, %v3153_v27  ;;  %1135 = vmatmul.f32.gmra.mxu2 %v6148_v9  ;;  %vm7838_vm0 = vcmp.eq.f32.partialorder %v3294_v29, 8.507059e+37  ;;  %v3281_v60 = vand.u32 2147483648, %v7777_v53  ;;  %v3429_v42 = vand.u32 2147483647, %v7790_v51  ;;  %1265 = vmatmul.f32.gmra.mxu0 %v6148_v9 }
 0x177   : > { %v7810_v31 = vpop.eup %5672  ;;  %v7828_v21 = vpop.f32.mrf.mxu2  ;;  %v3138_v40 = vmul.f32 %v7787_v24, %v3137_v33  ;;  %v3431_v19 = vand.u32 2147483648, %v7790_v51  ;;  %5680 = vrcp.f32 %v7822_v45  ;;  %vm3275_vm1 = vweird.f32 %v7777_v53 }
 0x178   : > { %v7830_v10 = vpop.f32.mrf.mxu3  ;;  %v3158_v13 = vsel %vm7816_vm14, %v7754_v39, %v3154_v0  ;;  %v3286_v57 = vmul.f32 %v7810_v31, %v7757_v8  ;;  %v5675_v50 = vpop.eup %5674  ;;  %vm3291_vm3 = vweird.f32 %v7810_v31  ;;  %vm7866_vm4 = vcmp.eq.f32.partialorder %v3279_v63, 8.507059e+37  ;;  %v6150_v0 = vld [vmem:[%s6682_s1 + $0xb0] sm:$0xff]  ;;  %v614_v63 = vld [vmem:[#allocation5 + $0x658] sm:$0xff] }
 0x179   : > { %v3163_v49 = vsel %vm7767_vm9, %v3162_v52, %v3158_v13  ;;  %v7848_v32 = vpop.eup %5676  ;;  %v3139_v39 = vadd.f32 %v7787_v24, %v3138_v40  ;;  %vm3425_vm5 = vweird.f32 %v7790_v51  ;;  %v7872_v52 = vpop.f32.mrf.mxu0  ;;  %v3282_v12 = vor.u32 1.1754944e-38, %v3281_v60  ;;  %vm7895_vm7 = vmor %vm3290_vm13, %vm3291_vm3  ;;  %1423 = vmatpush.msrb.mxu3 %v614_v63  ;;  %v462_v63 = vld [vmem:[#allocation5 + $0x198] sm:$0xff] }
 0x17a   : > { %v4652_v34 = vmul.f32 %v3163_v49, %v7522_v1  ;;  %v3287_v48 = vsub.f32 1.0, %v3286_v57  ;;  %v7853_v47 = vpop.eup %5678  ;;  %v3271_v1 = vmul.f32 %v7848_v32, %v7777_v53  ;;  %v7874_v61 = vpop.f32.mrf.mxu1  ;;  %vm7885_vm6 = vcmp.eq.f32.partialorder %v3429_v42, 8.507059e+37 }
 0x17b   : > { %1200 = vmatmul.f32.gmra.mxu3 %v6149_v18  ;;  %v3143_v2 = vsel %vm7859_vm2, %v7787_v24, %v3139_v39  ;;  %v3421_v38 = vmul.f32 %v7853_v47, %v7790_v51  ;;  %1330 = vmatmul.f32.gmra.mxu1 %v6149_v18  ;;  %v3432_v27 = vor.u32 1.1754944e-38, %v3431_v19  ;;  %v7899_v62 = vadd.f32 1.0, %v5675_v50  ;;  %v615_v18 = vld [vmem:[#allocation5 + $0x660] sm:$0xff] }
 0x17c   : > { %4771 = vst [vmem:[%s6948_s12 + $0xb0] sm:$0xff] %v4652_v34  ;;  %v3288_v43 = vmul.f32 %v7810_v31, %v3287_v48  ;;  %v3148_v14 = vsel %vm7800_vm12, %v3147_v5, %v3143_v2  ;;  %v3272_v15 = vsub.f32 1.0, %v3271_v1  ;;  %vm3276_vm8 = vweird.f32 %v7848_v32  ;;  %v624_v5 = vld [vmem:[#allocation5 + $0x6a8] sm:$0xff]  ;;  %v461_v2 = vld [vmem:[#allocation5 + $0x190] sm:$0xff] }
 0x17d   : > { %v4651_v24 = vmul.f32 %v3148_v14, %v7528_v6  ;;  %v3422_v30 = vsub.f32 1.0, %v3421_v38  ;;  %v7901_v37 = vpop.eup %5680  ;;  %5682 = vpow2.f32 %v5323_v35  ;;  %v480_v6 = vld [vmem:[#allocation5 + $0x228] sm:$0xff]  ;;  %v7907_v8 = vadd.f32 %v7762_v28, %v7760_v55  ;;  %1552 = vmatpush.msrb.mxu1 %v624_v5  ;;  %vm7933_vm10 = vmor %vm3275_vm1, %vm3276_vm8  ;;  %1359 = vmatpush.msrb.mxu2 %v461_v2 }
 0x17e   : > { %v3289_v4 = vadd.f32 %v7810_v31, %v3288_v43  ;;  %v3273_v11 = vmul.f32 %v7848_v32, %v3272_v15  ;;  %1138 = vmatmul.f32.gmra.mxu2 %v6150_v0  ;;  %vm3426_vm9 = vweird.f32 %v7853_v47  ;;  %v3406_v35 = vmul.f32 %v7901_v37, %v7822_v45  ;;  %1487 = vmatpush.msrb.mxu0 %v480_v6 }
 0x17f   : > { %4770 = vst [vmem:[%s6948_s12 + $0xa8] sm:$0xff] %v4651_v24  ;;  %v3423_v23 = vmul.f32 %v7853_v47, %v3422_v30  ;;  %v7918_v9 = vpop.f32.mrf.mxu2  ;;  %5684 = vrcp.f32 %v7899_v62  ;;  %v7940_v60 = vadd.f32 %v7785_v17, %v7783_v56  ;;  %vm7949_vm11 = vmor %vm3425_vm5, %vm3426_vm9  ;;  %v3416_v50 = vand.u32 2147483648, %v7822_v45  ;;  %v6151_v56 = vld [vmem:[%s6682_s1 + $0xb8] sm:$0xff]  ;;  %1268 = vmatmul.f32.gmra.mxu0 %v6150_v0  ;;  %1553 = vmatpush.msrb.mxu1 %v615_v18  ;;  %v6153_v0 = vld [vmem:[%s6682_s1 + $0xc8] sm:$0xff] }
 0x180   : > { %v3293_v33 = vsel %vm7895_vm7, %v7810_v31, %v3289_v4  ;;  %v7920_v55 = vpop.f32.mrf.mxu3  ;;  %v3274_v13 = vadd.f32 %v7848_v32, %v3273_v11  ;;  %v3414_v31 = vand.u32 2147483647, %v7822_v45  ;;  %v3407_v26 = vsub.f32 1.0, %v3406_v35  ;;  %1488 = vmatpush.msrb.mxu0 %v471_v20  ;;  %v6152_v4 = vld [vmem:[%s6682_s1 + $0xc0] sm:$0xff]  ;;  %v6154_v20 = vld [vmem:[%s6682_s1 + $0xd0] sm:$0xff] }
 0x181   : > { %v3298_v28 = vsel %vm7838_vm0, %v7807_v59, %v3293_v33  ;;  %v3424_v59 = vadd.f32 %v7853_v47, %v3423_v23  ;;  %5686 = vpow2.f32 %v7825_v44  ;;  %v5332_v49 = vmul.f32 -1.442695, %v7907_v8  ;;  %v7957_v17 = vpop.f32.mrf.mxu0 }
 0x182   : > { %v4661_v40 = vmul.f32 %v3298_v28, %v7661_v41  ;;  %v3278_v41 = vsel %vm7933_vm10, %v7848_v32, %v3274_v13  ;;  %v7959_v42 = vpop.f32.mrf.mxu1  ;;  %v3408_v32 = vmul.f32 %v7901_v37, %v3407_v26  ;;  %vm3411_vm12 = vweird.f32 %v7901_v37  ;;  %1489 = vmatpush.msrb.mxu0 %v462_v63 }
 0x183   : > { %1203 = vmatmul.f32.gmra.mxu3 %v6151_v56  ;;  %v3283_v51 = vsel %vm7866_vm4, %v3282_v12, %v3278_v41  ;;  %v3428_v19 = vsel %vm7949_vm11, %v7853_v47, %v3424_v59  ;;  %1333 = vmatmul.f32.gmra.mxu1 %v6151_v56  ;;  %v5683_v44 = vpop.eup %5682  ;;  %vm3410_vm13 = vweird.f32 %v7822_v45  ;;  %5688 = vpow2.f32 %v5332_v49  ;;  %v605_v45 = vld [vmem:[#allocation5 + $0x610] sm:$0xff] }
 0x184   : > { %4775 = vst [vmem:[%s6948_s12 + $0xd0] sm:$0xff] %v4661_v40  ;;  %v4660_v34 = vmul.f32 %v3283_v51, %v7675_v3  ;;  %v3433_v39 = vsel %vm7885_vm6, %v3432_v27, %v3428_v19  ;;  %v3409_v47 = vadd.f32 %v7901_v37, %v3408_v32  ;;  %v7975_v7 = vadd.f32 1.0, %v5683_v44  ;;  %vm7983_vm14 = vmor %vm3410_vm13, %vm3411_vm12  ;;  %1424 = vmatpush.msrb.mxu3 %v605_v45  ;;  %v597_v49 = vld [vmem:[#allocation5 + $0x5d0] sm:$0xff] }
 0x185   : > { %v4670_v48 = vmul.f32 %v3433_v39, %v7679_v25  ;;  %v5342_v1 = vmul.f32 -1.442695, %v7940_v60  ;;  %v7978_v43 = vpop.eup %5684  ;;  %v3417_v25 = vor.u32 1.1754944e-38, %v3416_v50  ;;  %v7989_v12 = vadd.f32 %v7830_v10, %v7828_v21  ;;  %v453_v50 = vld [vmem:[#allocation5 + $0x150] sm:$0xff] }
 0x186   : > { %4774 = vst [vmem:[%s6948_s12 + $0xc8] sm:$0xff] %v4660_v34  ;;  %v7993_v38 = vadd.f32 %v7874_v61, %v7872_v52  ;;  %v3413_v14 = vsel %vm7983_vm14, %v7901_v37, %v3409_v47  ;;  %vm3415_vm15 = vcmp.eq.f32.partialorder %v3414_v31, 8.507059e+37  ;;  %v3556_v15 = vmul.f32 %v7978_v43, %v7899_v62  ;;  %1141 = vmatmul.f32.gmra.mxu2 %v6152_v4  ;;  %v596_v31 = vld [vmem:[#allocation5 + $0x5c8] sm:$0xff]  ;;  %v443_v47 = vld [vmem:[#allocation5 + $0x100] sm:$0xff] }
 0x187   : > { %4779 = vst [vmem:[%s6948_s12 + $0xf0] sm:$0xff] %v4670_v48  ;;  %5690 = vrcp.f32 %v7975_v7  ;;  %v8002_v21 = vpop.f32.mrf.mxu2  ;;  %v5687_v52 = vpop.eup %5686  ;;  %v3418_v61 = vsel %vm3415_vm15, %v3417_v25, %v3413_v14  ;;  %v3564_v46 = vand.u32 2147483647, %v7899_v62  ;;  %v3566_v27 = vand.u32 2147483648, %v7899_v62  ;;  %1271 = vmatmul.f32.gmra.mxu0 %v6152_v4  ;;  %1425 = vmatpush.msrb.mxu3 %v596_v31  ;;  %v416_v31 = vld [vmem:[#allocation5 + $0x28] sm:$0xff] }
 0x188   : > { %v8004_v10 = vpop.f32.mrf.mxu3  ;;  %v8010_v24 = vadd.f32 %v7920_v55, %v7918_v9  ;;  %v4669_v29 = vmul.f32 %v3418_v61, %v7687_v36  ;;  %v3557_v30 = vsub.f32 1.0, %v3556_v15  ;;  %v8014_v37 = vadd.f32 1.0, %v5687_v52  ;;  %v606_v9 = vld [vmem:[#allocation5 + $0x618] sm:$0xff]  ;;  %v452_v55 = vld [vmem:[#allocation5 + $0x148] sm:$0xff]  ;;  %1490 = vmatpush.msrb.mxu0 %v453_v50  ;;  %v6156_v50 = vld [vmem:[%s6682_s1 + $0xe0] sm:$0xff] }
 0x189   : > { %5692 = vpow2.f32 %v5342_v1  ;;  %v5689_v11 = vpop.eup %5688  ;;  %v3549_v6 = vand.u32 2147483647, %v7975_v7  ;;  %v5341_v5 = vmul.f32 -1.442695, %v7989_v12  ;;  %v5351_v16 = vmul.f32 -1.442695, %v7993_v38  ;;  %v8020_v33 = vpop.f32.mrf.mxu0  ;;  %1554 = vmatpush.msrb.mxu1 %v606_v9  ;;  %1360 = vmatpush.msrb.mxu2 %v452_v55 }
 0x18a   : > { %v8022_v23 = vpop.f32.mrf.mxu1  ;;  %4778 = vst [vmem:[%s6948_s12 + $0xe8] sm:$0xff] %v4669_v29  ;;  %v3558_v36 = vmul.f32 %v7978_v43, %v3557_v30  ;;  %vm3561_vm0 = vweird.f32 %v7978_v43  ;;  %v3551_v35 = vand.u32 2147483648, %v7975_v7  ;;  %5694 = vrcp.f32 %v8014_v37  ;;  %v587_v1 = vld [vmem:[#allocation5 + $0x580] sm:$0xff]  ;;  %v6155_v15 = vld [vmem:[%s6682_s1 + $0xd8] sm:$0xff] }
 0x18b   : > { %1206 = vmatmul.f32.gmra.mxu3 %v6153_v0  ;;  %1336 = vmatmul.f32.gmra.mxu1 %v6153_v0  ;;  %vm3560_vm1 = vweird.f32 %v7899_v62  ;;  %vm8030_vm2 = vcmp.eq.f32.partialorder %v3564_v46, 8.507059e+37  ;;  %v8034_v13 = vadd.f32 1.0, %v5689_v11  ;;  %5696 = vpow2.f32 %v5341_v5 }
 0x18c   : > { %v3559_v57 = vadd.f32 %v7978_v43, %v3558_v36  ;;  %5698 = vpow2.f32 %v5351_v16  ;;  %v5350_v59 = vmul.f32 -1.442695, %v8010_v24  ;;  %v8042_v62 = vadd.f32 %v7959_v42, %v7957_v17  ;;  %vm8046_vm3 = vmor %vm3560_vm1, %vm3561_vm0  ;;  %1555 = vmatpush.msrb.mxu1 %v597_v49  ;;  %1361 = vmatpush.msrb.mxu2 %v443_v47  ;;  %v588_v42 = vld [vmem:[#allocation5 + $0x588] sm:$0xff]  ;;  %v417_v49 = vld [vmem:[#allocation5 + $0x30] sm:$0xff] }
 0x18d   : > { %v8036_v40 = vpop.eup %5690  ;;  %v3567_v41 = vor.u32 1.1754944e-38, %v3566_v27  ;;  %vm3545_vm4 = vweird.f32 %v7975_v7  ;;  %5700 = vrcp.f32 %v8034_v13  ;;  %vm8057_vm5 = vcmp.eq.f32.partialorder %v3549_v6, 8.507059e+37  ;;  %1426 = vmatpush.msrb.mxu3 %v587_v1 }
 0x18e   : > { %v3541_v53 = vmul.f32 %v8036_v40, %v7975_v7  ;;  %v3563_v17 = vsel %vm8046_vm3, %v7978_v43, %v3559_v57  ;;  %v3552_v51 = vor.u32 1.1754944e-38, %v3551_v35  ;;  %v3699_v19 = vand.u32 2147483647, %v8014_v37  ;;  %1144 = vmatmul.f32.gmra.mxu2 %v6154_v20  ;;  %1556 = vmatpush.msrb.mxu1 %v588_v42  ;;  %v6158_v42 = vld [vmem:[%s6682_s1 + $0xf0] sm:$0xff] }
 0x18f   : > { %v5693_v56 = vpop.eup %5692  ;;  %v8062_v32 = vpop.f32.mrf.mxu2  ;;  %v3568_v34 = vsel %vm8030_vm2, %v3567_v41, %v3563_v17  ;;  %vm3695_vm6 = vweird.f32 %v8014_v37  ;;  %v3701_v43 = vand.u32 2147483648, %v8014_v37  ;;  %5702 = vpow2.f32 %v5350_v59  ;;  %1274 = vmatmul.f32.gmra.mxu0 %v6154_v20  ;;  %v444_v17 = vld [vmem:[#allocation5 + $0x108] sm:$0xff] }
 0x190   : > { %v8064_v44 = vpop.f32.mrf.mxu3  ;;  %v3542_v39 = vsub.f32 1.0, %v3541_v53  ;;  %v8069_v48 = vadd.f32 1.0, %v5693_v56  ;;  %v8072_v18 = vpop.eup %5694  ;;  %v4679_v2 = vmul.f32 %v3568_v34, %v7752_v22  ;;  %v5360_v3 = vmul.f32 -1.442695, %v8042_v62  ;;  %1491 = vmatpush.msrb.mxu0 %v444_v17 }
 0x191   : > { %v5697_v25 = vpop.eup %5696  ;;  %vm3546_vm7 = vweird.f32 %v8036_v40  ;;  %v3691_v14 = vmul.f32 %v8072_v18, %v8014_v37  ;;  %v8083_v22 = vpop.f32.mrf.mxu0  ;;  %vm8088_vm8 = vcmp.eq.f32.partialorder %v3699_v19, 8.507059e+37  ;;  %v3684_v27 = vand.u32 2147483647, %v8034_v13 }
 0x192   : > { %v3543_v45 = vmul.f32 %v8036_v40, %v3542_v39  ;;  %5704 = vrcp.f32 %v8069_v48  ;;  %v8085_v52 = vpop.f32.mrf.mxu1  ;;  %v5699_v61 = vpop.eup %5698  ;;  %4783 = vst [vmem:[%s6948_s12 + $0x110] sm:$0xff] %v4679_v2  ;;  %v3686_v4 = vand.u32 2147483648, %v8034_v13  ;;  %v8094_v29 = vadd.f32 1.0, %v5697_v25  ;;  %vm3547_vm9 = vmor %vm3545_vm4, %vm3546_vm7  ;;  %v435_v25 = vld [vmem:[#allocation5 + $0xc0] sm:$0xff] }
 0x193   : > { %1209 = vmatmul.f32.gmra.mxu3 %v6155_v15  ;;  %1339 = vmatmul.f32.gmra.mxu1 %v6155_v15  ;;  %v8096_v30 = vpop.eup %5700  ;;  %v3692_v6 = vsub.f32 1.0, %v3691_v14  ;;  %v8099_v5 = vadd.f32 1.0, %v5699_v61  ;;  %5706 = vpow2.f32 %v5360_v3  ;;  %vm3696_vm10 = vweird.f32 %v8072_v18  ;;  %v578_v3 = vld [vmem:[#allocation5 + $0x538] sm:$0xff] }
 0x194   : > { %v3544_v11 = vadd.f32 %v8036_v40, %v3543_v45  ;;  %v3702_v16 = vor.u32 1.1754944e-38, %v3701_v43  ;;  %v3676_v0 = vmul.f32 %v8096_v30, %v8034_v13  ;;  %v3834_v36 = vand.u32 2147483647, %v8069_v48  ;;  %vm8134_vm13 = vmor %vm3695_vm6, %vm3696_vm10  ;;  %v434_v43 = vld [vmem:[#allocation5 + $0xb8] sm:$0xff]  ;;  %v6157_v45 = vld [vmem:[%s6682_s1 + $0xe8] sm:$0xff]  ;;  %1427 = vmatpush.msrb.mxu3 %v578_v3  ;;  %1492 = vmatpush.msrb.mxu0 %v435_v25 }
 0x195   : > { %v3693_v63 = vmul.f32 %v8072_v18, %v3692_v6  ;;  %v3836_v9 = vand.u32 2147483648, %v8069_v48  ;;  %5708 = vrcp.f32 %v8094_v29  ;;  %v5703_v55 = vpop.eup %5702  ;;  %vm3680_vm11 = vweird.f32 %v8034_v13  ;;  %1362 = vmatpush.msrb.mxu2 %v434_v43  ;;  %v579_v6 = vld [vmem:[#allocation5 + $0x540] sm:$0xff] }
 0x196   : > { %v3548_v35 = vsel %vm3547_vm9, %v8036_v40, %v3544_v11  ;;  %v3677_v28 = vsub.f32 1.0, %v3676_v0  ;;  %vm8116_vm12 = vcmp.eq.f32.partialorder %v3684_v27, 8.507059e+37  ;;  %v3687_v53 = vor.u32 1.1754944e-38, %v3686_v4  ;;  %1147 = vmatmul.f32.gmra.mxu2 %v6156_v50  ;;  %1557 = vmatpush.msrb.mxu1 %v579_v6  ;;  %v425_v0 = vld [vmem:[#allocation5 + $0x70] sm:$0xff] }
 0x197   : > { %v3553_v7 = vsel %vm8057_vm5, %v3552_v51, %v3548_v35  ;;  %v8120_v57 = vpop.f32.mrf.mxu2  ;;  %v3694_v41 = vadd.f32 %v8072_v18, %v3693_v63  ;;  %5710 = vrcp.f32 %v8099_v5  ;;  %vm3681_vm14 = vweird.f32 %v8096_v30  ;;  %1277 = vmatmul.f32.gmra.mxu0 %v6156_v50  ;;  %v426_v35 = vld [vmem:[#allocation5 + $0x78] sm:$0xff]  ;;  %1363 = vmatpush.msrb.mxu2 %v425_v0 }
 0x198   : > { %v8122_v40 = vpop.f32.mrf.mxu3  ;;  %v8124_v59 = vpop.eup %5704  ;;  %v4678_v26 = vmul.f32 %v3553_v7, %v7781_v54  ;;  %v3678_v56 = vmul.f32 %v8096_v30, %v3677_v28  ;;  %vm3830_vm15 = vweird.f32 %v8069_v48  ;;  %vm8147_vm0 = vcmp.eq.f32.partialorder %v3834_v36, 8.507059e+37  ;;  %vm8172_vm2 = vmor %vm3680_vm11, %vm3681_vm14  ;;  %v569_v36 = vld [vmem:[#allocation5 + $0x4f0] sm:$0xff]  ;;  %1493 = vmatpush.msrb.mxu0 %v426_v35 }
 0x199   : > { %v3826_v54 = vmul.f32 %v8124_v59, %v8069_v48  ;;  %v5707_v51 = vpop.eup %5706  ;;  %v3698_v37 = vsel %vm8134_vm13, %v8072_v18, %v3694_v41  ;;  %v8151_v34 = vor.u32 1.1754944e-38, %v3836_v9  ;;  %v3819_v39 = vand.u32 2147483647, %v8094_v29  ;;  %v8154_v47 = vpop.f32.mrf.mxu0  ;;  %1428 = vmatpush.msrb.mxu3 %v569_v36  ;;  %v561_v48 = vld [vmem:[#allocation5 + $0x4b0] sm:$0xff]  ;;  %1364 = vmatpush.msrb.mxu2 %v416_v31 }
 0x19a   : > { %4782 = vst [vmem:[%s6948_s12 + $0x108] sm:$0xff] %v4678_v26  ;;  %v3703_v1 = vsel %vm8088_vm8, %v3702_v16, %v3698_v37  ;;  %v3679_v20 = vadd.f32 %v8096_v30, %v3678_v56  ;;  %vm3815_vm1 = vweird.f32 %v8094_v29  ;;  %v8160_v18 = vadd.f32 1.0, %v5703_v55  ;;  %v8163_v14 = vpop.f32.mrf.mxu1  ;;  %v570_v55 = vld [vmem:[#allocation5 + $0x4f8] sm:$0xff]  ;;  %1494 = vmatpush.msrb.mxu0 %v417_v49 }
 0x19b   : > { %v3827_v2 = vsub.f32 1.0, %v3826_v54  ;;  %1212 = vmatmul.f32.gmra.mxu3 %v6157_v45  ;;  %v8165_v15 = vpop.eup %5708  ;;  %v4688_v61 = vmul.f32 %v3703_v1, %v7792_v58  ;;  %v3821_v27 = vand.u32 2147483648, %v8094_v29  ;;  %v3969_v4 = vand.u32 2147483647, %v8099_v5  ;;  %1342 = vmatmul.f32.gmra.mxu1 %v6157_v45 }
 0x19c   : > { %v8178_v11 = vadd.f32 1.0, %v5707_v51  ;;  %v3683_v58 = vsel %vm8172_vm2, %v8096_v30, %v3679_v20  ;;  %vm3831_vm3 = vweird.f32 %v8124_v59  ;;  %v3811_v16 = vmul.f32 %v8165_v15, %v8094_v29  ;;  %1558 = vmatpush.msrb.mxu1 %v570_v55 }
 0x19d   : > { %v3828_v13 = vmul.f32 %v8124_v59, %v3827_v2  ;;  %v8187_v63 = vpop.eup %5710  ;;  %4787 = vst [vmem:[%s6948_s12 + $0x130] sm:$0xff] %v4688_v61  ;;  %v3688_v9 = vsel %vm8116_vm12, %v3687_v53, %v3683_v58  ;;  %vm3965_vm4 = vweird.f32 %v8099_v5  ;;  %v3971_v30 = vand.u32 2147483648, %v8099_v5  ;;  %v560_v53 = vld [vmem:[#allocation5 + $0x4a8] sm:$0xff]  ;;  %vm8205_vm5 = vmor %vm3830_vm15, %vm3831_vm3 }
 0x19e   : > { %5712 = vrcp.f32 %v8160_v18  ;;  %v4687_v7 = vmul.f32 %v3688_v9, %v7907_v8  ;;  %v3812_v26 = vsub.f32 1.0, %v3811_v16  ;;  %v3961_v41 = vmul.f32 %v8187_v63, %v8099_v5  ;;  %1150 = vmatmul.f32.gmra.mxu2 %v6158_v42  ;;  %1429 = vmatpush.msrb.mxu3 %v560_v53 }
 0x19f   : > { %v3829_v28 = vadd.f32 %v8124_v59, %v3828_v13  ;;  %v8199_v50 = vpop.f32.mrf.mxu2  ;;  %vm8209_vm6 = vcmp.eq.f32.partialorder %v3819_v39, 8.507059e+37  ;;  %v3822_v54 = vor.u32 1.1754944e-38, %v3821_v27  ;;  %vm8213_vm7 = vcmp.eq.f32.partialorder %v3969_v4, 8.507059e+37  ;;  %1559 = vmatpush.msrb.mxu1 %v561_v48  ;;  %1280 = vmatmul.f32.gmra.mxu0 %v6158_v42 }
 0x1a0   : > { %5714 = vrcp.f32 %v8178_v11  ;;  %v8219_v51 = vpop.f32.mrf.mxu3  ;;  %4786 = vst [vmem:[%s6948_s12 + $0x128] sm:$0xff] %v4687_v7  ;;  %v3813_v39 = vmul.f32 %v8165_v15, %v3812_v26  ;;  %vm3816_vm8 = vweird.f32 %v8165_v15  ;;  %v3962_v1 = vsub.f32 1.0, %v3961_v41 }
 0x1a1   : > { %v3833_v37 = vsel %vm8205_vm5, %v8124_v59, %v3829_v28  ;;  %vm3966_vm9 = vweird.f32 %v8187_v63  ;;  %v3972_v2 = vor.u32 1.1754944e-38, %v3971_v30  ;;  %v3954_v43 = vand.u32 2147483647, %v8160_v18  ;;  %v8232_v3 = vpop.f32.mrf.mxu0  ;;  %vm3817_vm11 = vmor %vm3815_vm1, %vm3816_vm8  ;;  %v6160_v30 = vld [vmem:[%s6682_s1] sm:$0xff] }
 0x1a2   : > { %v3838_v20 = vsel %vm8147_vm0, %v8151_v34, %v3833_v37  ;;  %v3814_v25 = vadd.f32 %v8165_v15, %v3813_v39  ;;  %v3963_v45 = vmul.f32 %v8187_v63, %v3962_v1  ;;  %vm3950_vm10 = vweird.f32 %v8160_v18  ;;  %v6159_v34 = vld [vmem:[%s6682_s1 + $0xf8] sm:$0xff]  ;;  %v8243_v61 = vpop.f32.mrf.mxu1  ;;  %vm3967_vm12 = vmor %vm3965_vm4, %vm3966_vm9 }
 0x1a3   : > { %v4697_v59 = vmul.f32 %v3838_v20, %v7940_v60  ;;  %v8240_v19 = vadd.f32 %v8004_v10, %v8002_v21  ;;  %1215 = vmatmul.f32.gmra.mxu3 %v6159_v34  ;;  %v3956_v60 = vand.u32 2147483648, %v8160_v18  ;;  %v4104_v27 = vand.u32 2147483647, %v8178_v11  ;;  %1345 = vmatmul.f32.gmra.mxu1 %v6159_v34  ;;  %v6162_v20 = vld [vmem:[%s6682_s1 + $0x10] sm:$0xff] }
 0x1a4   : > { %v5713_v46 = vpop.eup %5712  ;;  %v8253_v4 = vadd.f32 %v8022_v23, %v8020_v33  ;;  %v8257_v21 = vadd.f32 %v8064_v44, %v8062_v32  ;;  %v3818_v10 = vsel %vm3817_vm11, %v8165_v15, %v3814_v25  ;;  %v3964_v6 = vadd.f32 %v8187_v63, %v3963_v45 }
 0x1a5   : > { %4791 = vst [vmem:[%s6948_s12 + $0x150] sm:$0xff] %v4697_v59  ;;  %v3946_v29 = vmul.f32 %v5713_v46, %v8160_v18  ;;  %v4106_v58 = vand.u32 2147483648, %v8178_v11  ;;  %v3823_v33 = vsel %vm8209_vm6, %v3822_v54, %v3818_v10  ;;  %v5359_v23 = vmul.f32 -1.442695, %v8240_v19 }
 0x1a6   : > { %v8264_v13 = vpop.eup %5714  ;;  %v5369_v32 = vmul.f32 -1.442695, %v8253_v4  ;;  %v5368_v44 = vmul.f32 -1.442695, %v8257_v21  ;;  %v4696_v15 = vmul.f32 %v3823_v33, %v7989_v12  ;;  %v3968_v16 = vsel %vm3967_vm12, %v8187_v63, %v3964_v6  ;;  %1365 = vmatmul.f32.vlgmr.msrb.gmra.mxu2 %v6160_v30 }
 0x1a7   : > { %v3947_v0 = vsub.f32 1.0, %v3946_v29  ;;  %v4096_v36 = vmul.f32 %v8264_v13, %v8178_v11  ;;  %v1106_v35 = vpop.f32.mrf.mxu2  ;;  %v3973_v5 = vsel %vm8213_vm7, %v3972_v2, %v3968_v16  ;;  %vm3951_vm13 = vweird.f32 %v5713_v46  ;;  %1495 = vmatmul.f32.vlgmr.msrb.gmra.mxu0 %v6160_v30 }
 0x1a8   : > { %5716 = vpow2.f32 %v5359_v23  ;;  %v8283_v9 = vadd.f32 %v8085_v52, %v8083_v22  ;;  %v1171_v12 = vpop.f32.mrf.mxu3  ;;  %4790 = vst [vmem:[%s6948_s12 + $0x148] sm:$0xff] %v4696_v15  ;;  %v4706_v63 = vmul.f32 %v3973_v5, %v7993_v38  ;;  %v8291_v26 = vadd.f32 %v8122_v40, %v8120_v57  ;;  %vm3952_vm15 = vmor %vm3950_vm10, %vm3951_vm13 }
 0x1a9   : > { %v3948_v55 = vmul.f32 %v5713_v46, %v3947_v0  ;;  %v4097_v7 = vsub.f32 1.0, %v4096_v36  ;;  %5718 = vpow2.f32 %v5369_v32  ;;  %v8295_v22 = vadd.f32 %v8163_v14, %v8154_v47  ;;  %v1239_v52 = vpop.f32.mrf.mxu0  ;;  %v6161_v14 = vld [vmem:[%s6682_s1 + $0x8] sm:$0xff] }
 0x1aa   : > { %5720 = vpow2.f32 %v5368_v44  ;;  %v5378_v28 = vmul.f32 -1.442695, %v8283_v9  ;;  %4795 = vst [vmem:[%s6948_s12 + $0x170] sm:$0xff] %v4706_v63  ;;  %v3957_v31 = vor.u32 1.1754944e-38, %v3956_v60  ;;  %vm4101_vm14 = vweird.f32 %v8264_v13  ;;  %v1304_v53 = vpop.f32.mrf.mxu1  ;;  %v6164_v63 = vld [vmem:[%s6682_s1 + $0x20] sm:$0xff] }
 0x1ab   : > { %v3949_v41 = vadd.f32 %v5713_v46, %v3948_v55  ;;  %v4098_v38 = vmul.f32 %v8264_v13, %v4097_v7  ;;  %v5377_v57 = vmul.f32 -1.442695, %v8291_v26  ;;  %v5387_v40 = vmul.f32 -1.442695, %v8295_v22  ;;  %1430 = vmatmul.f32.vlgmr.msrb.gmra.mxu3 %v6161_v14  ;;  %1560 = vmatmul.f32.vlgmr.msrb.gmra.mxu1 %v6161_v14 }
 0x1ac   : > { %5722 = vpow2.f32 %v5378_v28  ;;  %v8307_v47 = vadd.f32 %v8219_v51, %v8199_v50  ;;  %vm3955_vm0 = vcmp.eq.f32.partialorder %v3954_v43, 8.507059e+37  ;;  %vm4100_vm1 = vweird.f32 %v8178_v11 }
 0x1ad   : > { %v3953_v49 = vsel %vm3952_vm15, %v5713_v46, %v3949_v41  ;;  %v4099_v8 = vadd.f32 %v8264_v13, %v4098_v38  ;;  %vm4102_vm2 = vmor %vm4100_vm1, %vm4101_vm14  ;;  %vm4105_vm3 = vcmp.eq.f32.partialorder %v4104_v27, 8.507059e+37  ;;  %v4107_v50 = vor.u32 1.1754944e-38, %v4106_v58 }
 0x1ae   : > { %v5717_v56 = vpop.eup %5716  ;;  %v3958_v54 = vsel %vm3955_vm0, %v3957_v31, %v3953_v49  ;;  %5724 = vpow2.f32 %v5377_v57  ;;  %v5386_v1 = vmul.f32 -1.442695, %v8307_v47  ;;  %1368 = vmatmul.f32.gmra.mxu2 %v6162_v20  ;;  %v8329_v43 = vadd.f32 %v8243_v61, %v8232_v3  ;;  %v6163_v3 = vld [vmem:[%s6682_s1 + $0x18] sm:$0xff]  ;;  %v697_v57 = vld [vmem:[#allocation5 + $0x8f0] sm:$0xff] }
 0x1af   : > { %v5719_v17 = vpop.eup %5718  ;;  %v4705_v42 = vmul.f32 %v3958_v54, %v8010_v24  ;;  %v4103_v18 = vsel %vm4102_vm2, %v8264_v13, %v4099_v8  ;;  %v8318_v51 = vadd.f32 1.0, %v5717_v56  ;;  %5726 = vpow2.f32 %v5387_v40  ;;  %v1109_v11 = vpop.f32.mrf.mxu2  ;;  %1498 = vmatmul.f32.gmra.mxu0 %v6162_v20  ;;  %1674 = vmatpush.msra.mxu3 %v697_v57 }
 0x1b0   : > { %v5721_v48 = vpop.eup %5720  ;;  %v4108_v37 = vsel %vm4105_vm3, %v4107_v50, %v4103_v18  ;;  %v8320_v39 = vadd.f32 1.0, %v5719_v17  ;;  %v1174_v2 = vpop.f32.mrf.mxu3  ;;  %v8332_v25 = vadd.f32 %v1171_v12, %v1106_v35  ;;  %v8334_v45 = vadd.f32 %v1304_v53, %v1239_v52  ;;  %v553_v53 = vld [vmem:[#allocation5 + $0x470] sm:$0xff]  ;;  %v6165_v18 = vld [vmem:[%s6682_s1 + $0x28] sm:$0xff] }
 0x1b1   : > { %4794 = vst [vmem:[%s6948_s12 + $0x168] sm:$0xff] %v4705_v42  ;;  %v4715_v24 = vmul.f32 %v4108_v37, %v8042_v62  ;;  %5728 = vrcp.f32 %v8318_v51  ;;  %v8337_v34 = vadd.f32 1.0, %v5721_v48  ;;  %v4089_v62 = vand.u32 2147483647, %v8318_v51  ;;  %v8344_v61 = vpop.f32.mrf.mxu0  ;;  %1609 = vmatpush.msra.mxu2 %v553_v53 }
 0x1b2   : > { %v5723_v59 = vpop.eup %5722  ;;  %5730 = vrcp.f32 %v8320_v39  ;;  %v4091_v27 = vand.u32 2147483648, %v8318_v51  ;;  %v4239_v6 = vand.u32 2147483647, %v8320_v39  ;;  %v5254_v29 = vmul.f32 -1.442695, %v8329_v43  ;;  %v8349_v58 = vpop.f32.mrf.mxu1 }
 0x1b3   : > { %4799 = vst [vmem:[%s6948_s12 + $0x190] sm:$0xff] %v4715_v24  ;;  %v8339_v46 = vadd.f32 1.0, %v5723_v59  ;;  %5732 = vpow2.f32 %v5386_v1  ;;  %1433 = vmatmul.f32.gmra.mxu3 %v6163_v3  ;;  %v4241_v13 = vand.u32 2147483648, %v8320_v39  ;;  %v8354_v33 = vmul.f32 -1.442695, %v8332_v25  ;;  %1563 = vmatmul.f32.gmra.mxu1 %v6163_v3 }
 0x1b4   : > { %v5725_v60 = vpop.eup %5724  ;;  %5734 = vrcp.f32 %v8337_v34  ;;  %v8357_v23 = vmul.f32 -1.442695, %v8334_v45  ;;  %vm4085_vm4 = vweird.f32 %v8318_v51  ;;  %vm4235_vm5 = vweird.f32 %v8320_v39 }
 0x1b5   : > { %v5727_v10 = vpop.eup %5726  ;;  %5736 = vrcp.f32 %v8339_v46  ;;  %v8363_v44 = vadd.f32 1.0, %v5725_v60  ;;  %vm8373_vm6 = vcmp.eq.f32.partialorder %v4089_v62, 8.507059e+37  ;;  %v8377_v5 = vor.u32 1.1754944e-38, %v4091_v27  ;;  %v554_v27 = vld [vmem:[#allocation5 + $0x478] sm:$0xff] }
 0x1b6   : > { %v8365_v15 = vadd.f32 1.0, %v5727_v10  ;;  %v4224_v30 = vand.u32 2147483647, %v8337_v34  ;;  %v4226_v12 = vand.u32 2147483648, %v8337_v34  ;;  %1371 = vmatmul.f32.gmra.mxu2 %v6164_v63  ;;  %vm8384_vm7 = vcmp.eq.f32.partialorder %v4239_v6, 8.507059e+37  ;;  %1739 = vmatpush.msra.mxu0 %v554_v27 }
 0x1b7   : > { %v8359_v32 = vpop.eup %5728  ;;  %v8367_v16 = vpop.f32.mrf.mxu2  ;;  %v4374_v28 = vand.u32 2147483647, %v8339_v46  ;;  %v4376_v52 = vand.u32 2147483648, %v8339_v46  ;;  %5738 = vrcp.f32 %v8363_v44  ;;  %v4242_v38 = vor.u32 1.1754944e-38, %v4241_v13  ;;  %1501 = vmatmul.f32.gmra.mxu0 %v6164_v63 }
 0x1b8   : > { %v8369_v0 = vpop.eup %5730  ;;  %v4081_v36 = vmul.f32 %v8359_v32, %v8318_v51  ;;  %5740 = vpow2.f32 %v5254_v29  ;;  %v8391_v40 = vadd.f32 %v1174_v2, %v1109_v11  ;;  %v8393_v14 = vpop.f32.mrf.mxu3  ;;  %vm4220_vm8 = vweird.f32 %v8337_v34 }
 0x1b9   : > { %v4231_v55 = vmul.f32 %v8369_v0, %v8320_v39  ;;  %v5733_v41 = vpop.eup %5732  ;;  %vm4370_vm9 = vweird.f32 %v8339_v46  ;;  %5742 = vrcp.f32 %v8365_v15  ;;  %vm4086_vm10 = vweird.f32 %v8359_v32  ;;  %v8411_v11 = vpop.f32.mrf.mxu0 }
 0x1ba   : > { %v4082_v31 = vsub.f32 1.0, %v4081_v36  ;;  %v8395_v49 = vpop.eup %5734  ;;  %vm8406_vm11 = vcmp.eq.f32.partialorder %v4224_v30, 8.507059e+37  ;;  %v4227_v42 = vor.u32 1.1754944e-38, %v4226_v12  ;;  %vm4236_vm12 = vweird.f32 %v8369_v0  ;;  %vm8431_vm15 = vmor %vm4085_vm4, %vm4086_vm10  ;;  %v8438_v29 = vpop.f32.mrf.mxu1 }
 0x1bb   : > { %v4232_v8 = vsub.f32 1.0, %v4231_v55  ;;  %v8400_v56 = vpop.eup %5736  ;;  %v4216_v50 = vmul.f32 %v8395_v49, %v8337_v34  ;;  %1436 = vmatmul.f32.gmra.mxu3 %v6165_v18  ;;  %vm8417_vm13 = vcmp.eq.f32.partialorder %v4374_v28, 8.507059e+37  ;;  %v4377_v20 = vor.u32 1.1754944e-38, %v4376_v52  ;;  %1566 = vmatmul.f32.gmra.mxu1 %v6165_v18  ;;  %vm4237_vm1 = vmor %vm4235_vm5, %vm4236_vm12  ;;  %v6166_v55 = vld [vmem:[%s6682_s1 + $0x30] sm:$0xff] }
 0x1bc   : > { %v4083_v54 = vmul.f32 %v8359_v32, %v4082_v31  ;;  %v4366_v37 = vmul.f32 %v8400_v56, %v8339_v46  ;;  %vm4355_vm14 = vweird.f32 %v8363_v44  ;;  %v4359_v59 = vand.u32 2147483647, %v8363_v44 }
 0x1bd   : > { %v4233_v48 = vmul.f32 %v8369_v0, %v4232_v8  ;;  %v4217_v24 = vsub.f32 1.0, %v4216_v50  ;;  %v4361_v60 = vand.u32 2147483648, %v8363_v44  ;;  %v8425_v62 = vpop.eup %5738  ;;  %vm4221_vm0 = vweird.f32 %v8395_v49 }
 0x1be   : > { %v4084_v2 = vadd.f32 %v8359_v32, %v4083_v54  ;;  %v4367_v10 = vsub.f32 1.0, %v4366_v37  ;;  %v4509_v6 = vand.u32 2147483647, %v8365_v15  ;;  %v5741_v36 = vpop.eup %5740  ;;  %v4351_v12 = vmul.f32 %v8425_v62, %v8363_v44  ;;  %1374 = vmatmul.f32.gmra.mxu2 %v6166_v55  ;;  %vm8474_vm3 = vmor %vm4220_vm8, %vm4221_vm0 }
 0x1bf   : > { %v4234_v3 = vadd.f32 %v8369_v0, %v4233_v48  ;;  %v8440_v13 = vpop.f32.mrf.mxu2  ;;  %v4218_v30 = vmul.f32 %v8395_v49, %v4217_v24  ;;  %v8452_v63 = vadd.f32 1.0, %v5733_v41  ;;  %v8455_v28 = vpop.eup %5742  ;;  %vm4371_vm2 = vweird.f32 %v8400_v56  ;;  %1504 = vmatmul.f32.gmra.mxu0 %v6166_v55 }
 0x1c0   : > { %v4088_v51 = vsel %vm8431_vm15, %v8359_v32, %v4084_v2  ;;  %v4368_v39 = vmul.f32 %v8400_v56, %v4367_v10  ;;  %v4352_v57 = vsub.f32 1.0, %v4351_v12  ;;  %v8467_v8 = vpop.f32.mrf.mxu3  ;;  %v8481_v7 = vadd.f32 1.0, %v5741_v36  ;;  %vm4372_vm4 = vmor %vm4370_vm9, %vm4371_vm2  ;;  %v544_v10 = vld [vmem:[#allocation5 + $0x428] sm:$0xff] }
 0x1c1   : > { %v4093_v32 = vsel %vm8373_vm6, %v8377_v5, %v4088_v51  ;;  %v4238_v52 = vsel %vm4237_vm1, %v8369_v0, %v4234_v3  ;;  %v4219_v53 = vadd.f32 %v8395_v49, %v4218_v30  ;;  %v4501_v5 = vmul.f32 %v8455_v28, %v8365_v15  ;;  %v8493_v54 = vpop.f32.mrf.mxu0  ;;  %v698_v3 = vld [vmem:[#allocation5 + $0x8f8] sm:$0xff]  ;;  %1610 = vmatpush.msra.mxu2 %v544_v10  ;;  %v6168_v30 = vld [vmem:[%s6682_s1 + $0x40] sm:$0xff] }
 0x1c2   : > { %v4714_v31 = vmul.f32 %v4093_v32, %v8240_v19  ;;  %v4243_v41 = vsel %vm8384_vm7, %v4242_v38, %v4238_v52  ;;  %v4369_v19 = vadd.f32 %v8400_v56, %v4368_v39  ;;  %v4353_v34 = vmul.f32 %v8425_v62, %v4352_v57  ;;  %v6167_v38 = vld [vmem:[%s6682_s1 + $0x38] sm:$0xff]  ;;  %1804 = vmatpush.msra.mxu1 %v698_v3  ;;  %v689_v57 = vld [vmem:[#allocation5 + $0x8b0] sm:$0xff] }
 0x1c3   : > { %v4724_v35 = vmul.f32 %v4243_v41, %v8253_v4  ;;  %v4223_v4 = vsel %vm8474_vm3, %v8395_v49, %v4219_v53  ;;  %vm4356_vm5 = vweird.f32 %v8425_v62  ;;  %5744 = vrcp.f32 %v8452_v63  ;;  %1439 = vmatmul.f32.gmra.mxu3 %v6167_v38  ;;  %1569 = vmatmul.f32.gmra.mxu1 %v6167_v38 }
 0x1c4   : > { %4798 = vst [vmem:[%s6948_s12 + $0x188] sm:$0xff] %v4714_v31  ;;  %v4228_v50 = vsel %vm8406_vm11, %v4227_v42, %v4223_v4  ;;  %v4373_v49 = vsel %vm4372_vm4, %v8400_v56, %v4369_v19  ;;  %v4502_v18 = vsub.f32 1.0, %v4501_v5  ;;  %v4511_v46 = vand.u32 2147483648, %v8365_v15  ;;  %vm8509_vm6 = vmor %vm4355_vm14, %vm4356_vm5  ;;  %v688_v42 = vld [vmem:[#allocation5 + $0x8a8] sm:$0xff]  ;;  %1805 = vmatpush.msra.mxu1 %v689_v57  ;;  %v679_v4 = vld [vmem:[#allocation5 + $0x860] sm:$0xff] }
 0x1c5   : > { %4803 = vst [vmem:[%s6948_s12 + $0x1b0] sm:$0xff] %v4724_v35  ;;  %v4723_v48 = vmul.f32 %v4228_v50, %v8257_v21  ;;  %v4378_v37 = vsel %vm8417_vm13, %v4377_v20, %v4373_v49  ;;  %v4354_v2 = vadd.f32 %v8425_v62, %v4353_v34  ;;  %v4362_v24 = vor.u32 1.1754944e-38, %v4361_v60  ;;  %1675 = vmatpush.msra.mxu3 %v688_v42  ;;  %v535_v35 = vld [vmem:[#allocation5 + $0x3e0] sm:$0xff]  ;;  %v526_v42 = vld [vmem:[#allocation5 + $0x398] sm:$0xff] }
 0x1c6   : > { %v4733_v17 = vmul.f32 %v4378_v37, %v8283_v9  ;;  %v4503_v56 = vmul.f32 %v8455_v28, %v4502_v18  ;;  %vm4506_vm7 = vweird.f32 %v8455_v28  ;;  %5746 = vrcp.f32 %v8481_v7  ;;  %v8516_v9 = vpop.f32.mrf.mxu1  ;;  %1377 = vmatmul.f32.gmra.mxu2 %v6168_v30 }
 0x1c7   : > { %v8518_v1 = vpop.f32.mrf.mxu2  ;;  %4802 = vst [vmem:[%s6948_s12 + $0x1a8] sm:$0xff] %v4723_v48  ;;  %v4358_v20 = vsel %vm8509_vm6, %v8425_v62, %v4354_v2  ;;  %vm4360_vm8 = vcmp.eq.f32.partialorder %v4359_v59, 8.507059e+37  ;;  %vm4505_vm9 = vweird.f32 %v8365_v15  ;;  %v4512_v51 = vor.u32 1.1754944e-38, %v4511_v46  ;;  %1507 = vmatmul.f32.gmra.mxu0 %v6168_v30  ;;  %1611 = vmatpush.msra.mxu2 %v535_v35  ;;  %v6170_v48 = vld [vmem:[%s6682_s1 + $0x50] sm:$0xff] }
 0x1c8   : > { %4807 = vst [vmem:[%s6948_s12 + $0x1d0] sm:$0xff] %v4733_v17  ;;  %v4363_v60 = vsel %vm4360_vm8, %v4362_v24, %v4358_v20  ;;  %v4504_v36 = vadd.f32 %v8455_v28, %v4503_v56  ;;  %5748 = vpow2.f32 %v8354_v33  ;;  %vm4507_vm10 = vmor %vm4505_vm9, %vm4506_vm7  ;;  %v4496_v59 = vand.u32 2147483648, %v8452_v63  ;;  %v8539_v55 = vpop.f32.mrf.mxu3  ;;  %1676 = vmatpush.msra.mxu3 %v679_v4  ;;  %v536_v56 = vld [vmem:[#allocation5 + $0x3e8] sm:$0xff] }
 0x1c9   : > { %v8531_v12 = vpop.eup %5744  ;;  %v4732_v44 = vmul.f32 %v4363_v60, %v8291_v26  ;;  %5750 = vpow2.f32 %v8357_v23  ;;  %v5262_v62 = vmul.f32 -1.442695, %v8391_v40  ;;  %vm4510_vm11 = vcmp.eq.f32.partialorder %v4509_v6, 8.507059e+37  ;;  %v8562_v53 = vpop.f32.mrf.mxu0  ;;  %1612 = vmatpush.msra.mxu2 %v526_v42 }
 0x1ca   : > { %v4508_v33 = vsel %vm4507_vm10, %v8455_v28, %v4504_v36  ;;  %v4486_v32 = vmul.f32 %v8531_v12, %v8452_v63  ;;  %vm4490_vm12 = vweird.f32 %v8452_v63  ;;  %v8550_v23 = vadd.f32 %v8349_v58, %v8344_v61  ;;  %v6169_v28 = vld [vmem:[%s6682_s1 + $0x48] sm:$0xff]  ;;  %v670_v36 = vld [vmem:[#allocation5 + $0x818] sm:$0xff] }
 0x1cb   : > { %4806 = vst [vmem:[%s6948_s12 + $0x1c8] sm:$0xff] %v4732_v44  ;;  %v4513_v26 = vsel %vm4510_vm11, %v4512_v51, %v4508_v33  ;;  %5752 = vpow2.f32 %v5262_v62  ;;  %v8554_v52 = vadd.f32 %v8393_v14, %v8367_v16  ;;  %1442 = vmatmul.f32.gmra.mxu3 %v6169_v28  ;;  %v4494_v31 = vand.u32 2147483647, %v8452_v63  ;;  %v545_v14 = vld [vmem:[#allocation5 + $0x430] sm:$0xff]  ;;  %1572 = vmatmul.f32.gmra.mxu1 %v6169_v28 }
 0x1cc   : > { %v8557_v15 = vpop.eup %5746  ;;  %v4742_v6 = vmul.f32 %v4513_v26, %v8295_v22  ;;  %v4487_v39 = vsub.f32 1.0, %v4486_v32  ;;  %v2514_v41 = vand.u32 2147483647, %v8481_v7  ;;  %v4497_v61 = vor.u32 1.1754944e-38, %v4496_v59  ;;  %1740 = vmatpush.msra.mxu0 %v545_v14  ;;  %1677 = vmatpush.msra.mxu3 %v670_v36 }
 0x1cd   : > { %v2506_v58 = vmul.f32 %v8557_v15, %v8481_v7  ;;  %v5272_v16 = vmul.f32 -1.442695, %v8550_v23  ;;  %v8569_v22 = vadd.f32 %v8438_v29, %v8411_v11  ;;  %vm4491_vm13 = vweird.f32 %v8531_v12 }
 0x1ce   : > { %v5749_v0 = vpop.eup %5748  ;;  %4811 = vst [vmem:[%s6948_s12 + $0x1f0] sm:$0xff] %v4742_v6  ;;  %v4488_v19 = vmul.f32 %v8531_v12, %v4487_v39  ;;  %v2516_v5 = vand.u32 2147483648, %v8481_v7  ;;  %v5271_v34 = vmul.f32 -1.442695, %v8554_v52  ;;  %v8576_v38 = vpop.f32.mrf.mxu1  ;;  %v8582_v49 = vadd.f32 %v8467_v8, %v8440_v13  ;;  %1380 = vmatmul.f32.gmra.mxu2 %v6170_v48  ;;  %vm4492_vm15 = vmor %vm4490_vm12, %vm4491_vm13  ;;  %1741 = vmatpush.msra.mxu0 %v536_v56  ;;  %v671_v56 = vld [vmem:[#allocation5 + $0x820] sm:$0xff] }
 0x1cf   : > { %v5751_v50 = vpop.eup %5750  ;;  %v2507_v11 = vsub.f32 1.0, %v2506_v58  ;;  %v8578_v29 = vadd.f32 1.0, %v5749_v0  ;;  %5754 = vpow2.f32 %v5272_v16  ;;  %vm2511_vm14 = vweird.f32 %v8557_v15  ;;  %v8589_v37 = vpop.f32.mrf.mxu2  ;;  %1510 = vmatmul.f32.gmra.mxu0 %v6170_v48  ;;  %v6172_v58 = vld [vmem:[%s6682_s1 + $0x60] sm:$0xff]  ;;  %v6173_v48 = vld [vmem:[%s6682_s1 + $0x68] sm:$0xff] }
 0x1d0   : > { %v4489_v18 = vadd.f32 %v8531_v12, %v4488_v19  ;;  %v8586_v46 = vadd.f32 1.0, %v5751_v50  ;;  %5756 = vpow2.f32 %v5271_v34  ;;  %v5281_v8 = vmul.f32 -1.442695, %v8569_v22  ;;  %v8605_v63 = vpop.f32.mrf.mxu3 }
 0x1d1   : > { %v5753_v2 = vpop.eup %5752  ;;  %v2508_v13 = vmul.f32 %v8557_v15, %v2507_v11  ;;  %5758 = vrcp.f32 %v8578_v29  ;;  %v8600_v24 = vadd.f32 %v8516_v9, %v8493_v54  ;;  %vm4495_vm0 = vcmp.eq.f32.partialorder %v4494_v31, 8.507059e+37  ;;  %v680_v54 = vld [vmem:[#allocation5 + $0x868] sm:$0xff]  ;;  %v6171_v9 = vld [vmem:[%s6682_s1 + $0x58] sm:$0xff] }
 0x1d2   : > { %v4493_v27 = vsel %vm4492_vm15, %v8531_v12, %v4489_v18  ;;  %vm2510_vm1 = vweird.f32 %v8481_v7  ;;  %5760 = vrcp.f32 %v8586_v46  ;;  %vm8608_vm2 = vcmp.eq.f32.partialorder %v2514_v41, 8.507059e+37  ;;  %1806 = vmatpush.msra.mxu1 %v680_v54  ;;  %v8627_v12 = vpop.f32.mrf.mxu0  ;;  %v517_v54 = vld [vmem:[#allocation5 + $0x350] sm:$0xff] }
 0x1d3   : > { %v4498_v3 = vsel %vm4495_vm0, %v4497_v61, %v4493_v27  ;;  %v2509_v10 = vadd.f32 %v8557_v15, %v2508_v13  ;;  %v2517_v21 = vor.u32 1.1754944e-38, %v2516_v5  ;;  %1445 = vmatmul.f32.gmra.mxu3 %v6171_v9  ;;  %vm8616_vm3 = vmor %vm2510_vm1, %vm2511_vm14  ;;  %v8620_v60 = vadd.f32 1.0, %v5753_v2  ;;  %1575 = vmatmul.f32.gmra.mxu1 %v6171_v9  ;;  %v6175_v5 = vld [vmem:[%s6682_s1 + $0x78] sm:$0xff] }
 0x1d4   : > { %v4741_v20 = vmul.f32 %v4498_v3, %v8307_v47  ;;  %v5280_v51 = vmul.f32 -1.442695, %v8582_v49  ;;  %v8625_v30 = vadd.f32 %v8539_v55, %v8518_v1  ;;  %v2499_v59 = vand.u32 2147483647, %v8578_v29  ;;  %1807 = vmatpush.msra.mxu1 %v671_v56  ;;  %1613 = vmatpush.msra.mxu2 %v517_v54 }
 0x1d5   : > { %v5755_v47 = vpop.eup %5754  ;;  %v2513_v44 = vsel %vm8616_vm3, %v8557_v15, %v2509_v10  ;;  %5762 = vpow2.f32 %v5281_v8  ;;  %v8634_v62 = vmul.f32 -1.442695, %v8600_v24  ;;  %v2501_v55 = vand.u32 2147483648, %v8578_v29 }
 0x1d6   : > { %v5757_v33 = vpop.eup %5756  ;;  %4810 = vst [vmem:[%s6948_s12 + $0x1e8] sm:$0xff] %v4741_v20  ;;  %v2518_v1 = vsel %vm8608_vm2, %v2517_v21, %v2513_v44  ;;  %v2649_v32 = vand.u32 2147483647, %v8586_v46  ;;  %5764 = vrcp.f32 %v8620_v60  ;;  %v8642_v26 = vpop.f32.mrf.mxu1  ;;  %vm2495_vm4 = vweird.f32 %v8578_v29  ;;  %1383 = vmatmul.f32.gmra.mxu2 %v6172_v58  ;;  %v527_v21 = vld [vmem:[#allocation5 + $0x3a0] sm:$0xff] }
 0x1d7   : > { %v8644_v28 = vpop.eup %5758  ;;  %v4609_v15 = vmul.f32 %v2518_v1, %v8329_v43  ;;  %v2651_v6 = vand.u32 2147483648, %v8586_v46  ;;  %v8649_v39 = vadd.f32 1.0, %v5755_v47  ;;  %vm2645_vm5 = vweird.f32 %v8586_v46  ;;  %v8659_v16 = vpop.f32.mrf.mxu2  ;;  %1742 = vmatpush.msra.mxu0 %v527_v21  ;;  %v499_v21 = vld [vmem:[#allocation5 + $0x2c0] sm:$0xff] }
 0x1d8   : > { %v8651_v31 = vpop.eup %5760  ;;  %v2491_v41 = vmul.f32 %v8644_v28, %v8578_v29  ;;  %v8656_v61 = vadd.f32 1.0, %v5757_v33  ;;  %5766 = vpow2.f32 %v5280_v51  ;;  %vm8666_vm6 = vcmp.eq.f32.partialorder %v2499_v59, 8.507059e+37  ;;  %v661_v51 = vld [vmem:[#allocation5 + $0x7d0] sm:$0xff]  ;;  %1513 = vmatmul.f32.gmra.mxu0 %v6172_v58 }
 0x1d9   : > { %4813 = vst [vmem:[%s8663_s10] sm:$0xff] %v4609_v15  ;;  %v2641_v14 = vmul.f32 %v8651_v31, %v8586_v46  ;;  %v2634_v57 = vand.u32 2147483647, %v8620_v60  ;;  %v2636_v35 = vand.u32 2147483648, %v8620_v60  ;;  %v2502_v19 = vor.u32 1.1754944e-38, %v2501_v55  ;;  %1678 = vmatpush.msra.mxu3 %v661_v51 }
 0x1da   : > { %v2492_v0 = vsub.f32 1.0, %v2491_v41  ;;  %vm8674_vm7 = vcmp.eq.f32.partialorder %v2649_v32, 8.507059e+37  ;;  %5768 = vrcp.f32 %v8649_v39  ;;  %v2652_v11 = vor.u32 1.1754944e-38, %v2651_v6  ;;  %v8692_v8 = vpop.f32.mrf.mxu0 }
 0x1db   : > { %v8679_v4 = vpop.f32.mrf.mxu3  ;;  %v5763_v34 = vpop.eup %5762  ;;  %v2642_v50 = vsub.f32 1.0, %v2641_v14  ;;  %5770 = vrcp.f32 %v8656_v61  ;;  %v8683_v18 = vmul.f32 -1.442695, %v8625_v30  ;;  %1448 = vmatmul.f32.gmra.mxu3 %v6173_v48  ;;  %vm2496_vm8 = vweird.f32 %v8644_v28  ;;  %1578 = vmatmul.f32.gmra.mxu1 %v6173_v48  ;;  %v6174_v14 = vld [vmem:[%s6682_s1 + $0x70] sm:$0xff] }
 0x1dc   : > { %v8686_v2 = vpop.eup %5764  ;;  %v2493_v13 = vmul.f32 %v8644_v28, %v2492_v0  ;;  %vm2646_vm9 = vweird.f32 %v8651_v31  ;;  %vm2630_vm10 = vweird.f32 %v8620_v60  ;;  %vm8697_vm11 = vcmp.eq.f32.partialorder %v2634_v57, 8.507059e+37  ;;  %vm8714_vm12 = vmor %vm2495_vm4, %vm2496_vm8 }
 0x1dd   : > { %v2643_v27 = vmul.f32 %v8651_v31, %v2642_v50  ;;  %v2626_v3 = vmul.f32 %v8686_v2, %v8620_v60  ;;  %v8701_v17 = vor.u32 1.1754944e-38, %v2636_v35  ;;  %v2784_v20 = vand.u32 2147483647, %v8649_v39  ;;  %vm8731_vm14 = vmor %vm2645_vm5, %vm2646_vm9 }
 0x1de   : > { %v5767_v42 = vpop.eup %5766  ;;  %v2494_v9 = vadd.f32 %v8644_v28, %v2493_v13  ;;  %v2786_v7 = vand.u32 2147483648, %v8649_v39  ;;  %v8706_v36 = vadd.f32 1.0, %v5763_v34  ;;  %v8708_v47 = vpop.f32.mrf.mxu1  ;;  %vm2780_vm13 = vweird.f32 %v8649_v39  ;;  %1386 = vmatmul.f32.gmra.mxu2 %v6174_v14 }
 0x1df   : > { %v2644_v59 = vadd.f32 %v8651_v31, %v2643_v27  ;;  %v2627_v33 = vsub.f32 1.0, %v2626_v3  ;;  %v2769_v1 = vand.u32 2147483647, %v8656_v61  ;;  %5772 = vpow2.f32 %v8634_v62 }
 0x1e0   : > { %v8722_v55 = vpop.eup %5768  ;;  %v2498_v29 = vsel %vm8714_vm12, %v8644_v28, %v2494_v9  ;;  %vm2631_vm15 = vweird.f32 %v8686_v2  ;;  %vm2765_vm0 = vweird.f32 %v8656_v61  ;;  %5774 = vrcp.f32 %v8706_v36  ;;  %1516 = vmatmul.f32.gmra.mxu0 %v6174_v14  ;;  %v6177_v14 = vld [vmem:[%s6682_s1 + $0x88] sm:$0xff] }
 0x1e1   : > { %v8738_v62 = vadd.f32 1.0, %v5767_v42  ;;  %v8740_v15 = vpop.eup %5770  ;;  %v2503_v28 = vsel %vm8666_vm6, %v2502_v19, %v2498_v29  ;;  %v2648_v46 = vsel %vm8731_vm14, %v8651_v31, %v2644_v59  ;;  %v2628_v6 = vmul.f32 %v8686_v2, %v2627_v33  ;;  %v8757_v31 = vpop.f32.mrf.mxu2  ;;  %vm2632_vm2 = vmor %vm2630_vm10, %vm2631_vm15  ;;  %v6176_v29 = vld [vmem:[%s6682_s1 + $0x80] sm:$0xff] }
 0x1e2   : > { %v2776_v41 = vmul.f32 %v8722_v55, %v8649_v39  ;;  %v4608_v58 = vmul.f32 %v2503_v28, %v8332_v25  ;;  %v2653_v57 = vsel %vm8674_vm7, %v2652_v11, %v2648_v46  ;;  %v2761_v43 = vmul.f32 %v8740_v15, %v8656_v61  ;;  %v518_v46 = vld [vmem:[#allocation5 + $0x358] sm:$0xff] }
 0x1e3   : > { %v2771_v35 = vand.u32 2147483648, %v8656_v61  ;;  %v8759_v0 = vpop.f32.mrf.mxu3  ;;  %v4618_v19 = vmul.f32 %v2653_v57, %v8334_v45  ;;  %v2629_v34 = vadd.f32 %v8686_v2, %v2628_v6  ;;  %vm8763_vm1 = vcmp.eq.f32.partialorder %v2784_v20, 8.507059e+37  ;;  %1451 = vmatmul.f32.gmra.mxu3 %v6175_v5  ;;  %v8790_v42 = vpop.f32.mrf.mxu0  ;;  %1581 = vmatmul.f32.gmra.mxu1 %v6175_v5  ;;  %v662_v6 = vld [vmem:[#allocation5 + $0x7d8] sm:$0xff]  ;;  %v652_v57 = vld [vmem:[#allocation5 + $0x788] sm:$0xff] }
 0x1e4   : > { %v2777_v50 = vsub.f32 1.0, %v2776_v41  ;;  %4752 = vst [vmem:[%s6948_s12 + $0x18] sm:$0xff] %v4608_v58  ;;  %v2787_v11 = vor.u32 1.1754944e-38, %v2786_v7  ;;  %v2762_v48 = vsub.f32 1.0, %v2761_v43  ;;  %v2919_v13 = vand.u32 2147483647, %v8706_v36  ;;  %1743 = vmatpush.msra.mxu0 %v518_v46  ;;  %1808 = vmatpush.msra.mxu1 %v662_v6 }
 0x1e5   : > { %5776 = vrcp.f32 %v8738_v62  ;;  %v5773_v45 = vpop.eup %5772  ;;  %4817 = vst [vmem:[%s8663_s10 + $0x20] sm:$0xff] %v4618_v19  ;;  %v2633_v27 = vsel %vm2632_vm2, %v8686_v2, %v2629_v34  ;;  %vm2781_vm3 = vweird.f32 %v8722_v55  ;;  %vm8779_vm4 = vcmp.eq.f32.partialorder %v2769_v1, 8.507059e+37  ;;  %v508_v41 = vld [vmem:[#allocation5 + $0x308] sm:$0xff]  ;;  %1679 = vmatpush.msra.mxu3 %v652_v57 }
 0x1e6   : > { %v2778_v3 = vmul.f32 %v8722_v55, %v2777_v50  ;;  %v8783_v60 = vpop.eup %5774  ;;  %v2638_v56 = vsel %vm8697_vm11, %v8701_v17, %v2633_v27  ;;  %v2763_v54 = vmul.f32 %v8740_v15, %v2762_v48  ;;  %vm2766_vm5 = vweird.f32 %v8740_v15  ;;  %vm8801_vm7 = vmor %vm2780_vm13, %vm2781_vm3  ;;  %1389 = vmatmul.f32.gmra.mxu2 %v6176_v29 }
 0x1e7   : > { %v2772_v2 = vor.u32 1.1754944e-38, %v2771_v35  ;;  %v4617_v9 = vmul.f32 %v2638_v56, %v8391_v40  ;;  %v2911_v7 = vmul.f32 %v8783_v60, %v8706_v36  ;;  %vm2915_vm6 = vweird.f32 %v8706_v36  ;;  %vm2767_vm9 = vmor %vm2765_vm0, %vm2766_vm5  ;;  %1614 = vmatpush.msra.mxu2 %v508_v41  ;;  %v6178_v40 = vld [vmem:[%s6682_s1 + $0x90] sm:$0xff]  ;;  %v644_v41 = vld [vmem:[#allocation5 + $0x748] sm:$0xff] }
 0x1e8   : > { %v2779_v20 = vadd.f32 %v8722_v55, %v2778_v3  ;;  %v8797_v10 = vpop.f32.mrf.mxu1  ;;  %v2764_v51 = vadd.f32 %v8740_v15, %v2763_v54  ;;  %vm8806_vm8 = vcmp.eq.f32.partialorder %v2919_v13, 8.507059e+37  ;;  %v2921_v44 = vand.u32 2147483648, %v8706_v36  ;;  %v653_v3 = vld [vmem:[#allocation5 + $0x790] sm:$0xff]  ;;  %1519 = vmatmul.f32.gmra.mxu0 %v6176_v29 }
 0x1e9   : > { %v8811_v59 = vadd.f32 1.0, %v5773_v45  ;;  %4756 = vst [vmem:[%s6948_s12 + $0x38] sm:$0xff] %v4617_v9  ;;  %v2912_v33 = vsub.f32 1.0, %v2911_v7  ;;  %5778 = vpow2.f32 %v8683_v18  ;;  %v8824_v1 = vadd.f32 %v8576_v38, %v8562_v53  ;;  %v8844_v43 = vpop.f32.mrf.mxu2  ;;  %1809 = vmatpush.msra.mxu1 %v653_v3  ;;  %1615 = vmatpush.msra.mxu2 %v499_v21 }
 0x1ea   : > { %v2783_v39 = vsel %vm8801_vm7, %v8722_v55, %v2779_v20  ;;  %v2768_v28 = vsel %vm2767_vm9, %v8740_v15, %v2764_v51  ;;  %vm2916_vm10 = vweird.f32 %v8783_v60  ;;  %v2922_v58 = vor.u32 1.1754944e-38, %v2921_v44  ;;  %v6179_v44 = vld [vmem:[%s6682_s1 + $0x98] sm:$0xff] }
 0x1eb   : > { %v8827_v32 = vpop.eup %5776  ;;  %v2788_v55 = vsel %vm8763_vm1, %v2787_v11, %v2783_v39  ;;  %5780 = vrcp.f32 %v8811_v59  ;;  %v2773_v18 = vsel %vm8779_vm4, %v2772_v2, %v2768_v28  ;;  %v2913_v53 = vmul.f32 %v8783_v60, %v2912_v33  ;;  %1454 = vmatmul.f32.gmra.mxu3 %v6177_v14  ;;  %vm2917_vm12 = vmor %vm2915_vm6, %vm2916_vm10  ;;  %1584 = vmatmul.f32.gmra.mxu1 %v6177_v14  ;;  %v490_v14 = vld [vmem:[#allocation5 + $0x278] sm:$0xff] }
 0x1ec   : > { %v4627_v61 = vmul.f32 %v2788_v55, %v8550_v23  ;;  %v2896_v38 = vmul.f32 %v8827_v32, %v8738_v62  ;;  %v4626_v15 = vmul.f32 %v2773_v18, %v8554_v52  ;;  %vm2900_vm11 = vweird.f32 %v8738_v62  ;;  %1810 = vmatpush.msra.mxu1 %v644_v41  ;;  %1616 = vmatpush.msra.mxu2 %v490_v14 }
 0x1ed   : > { %v2904_v23 = vand.u32 2147483647, %v8738_v62  ;;  %v2914_v19 = vadd.f32 %v8783_v60, %v2913_v53  ;;  %v5299_v50 = vmul.f32 -1.442695, %v8824_v1  ;;  %v8853_v52 = vadd.f32 %v8605_v63, %v8589_v37  ;;  %v8870_v37 = vpop.f32.mrf.mxu0 }
 0x1ee   : > { %v8846_v35 = vpop.f32.mrf.mxu3  ;;  %4821 = vst [vmem:[%s8663_s10 + $0x40] sm:$0xff] %v4627_v61  ;;  %v2897_v34 = vsub.f32 1.0, %v2896_v38  ;;  %vm2901_vm13 = vweird.f32 %v8827_v32  ;;  %v2906_v25 = vand.u32 2147483648, %v8738_v62  ;;  %v8864_v5 = vadd.f32 %v8642_v26, %v8627_v12  ;;  %1392 = vmatmul.f32.gmra.mxu2 %v6178_v40 }
 0x1ef   : > { %4760 = vst [vmem:[%s6948_s12 + $0x58] sm:$0xff] %v4626_v15  ;;  %v8868_v11 = vadd.f32 %v8679_v4, %v8659_v16  ;;  %v5779_v63 = vpop.eup %5778  ;;  %v2918_v48 = vsel %vm2917_vm12, %v8783_v60, %v2914_v19  ;;  %5782 = vpow2.f32 %v5299_v50  ;;  %v5298_v13 = vmul.f32 -1.442695, %v8853_v52  ;;  %v509_v4 = vld [vmem:[#allocation5 + $0x310] sm:$0xff]  ;;  %vm8900_vm15 = vmor %vm2900_vm11, %vm2901_vm13 }
 0x1f0   : > { %v2898_v36 = vmul.f32 %v8827_v32, %v2897_v34  ;;  %v8875_v45 = vpop.f32.mrf.mxu1  ;;  %v2923_v12 = vsel %vm8806_vm8, %v2922_v58, %v2918_v48  ;;  %v8881_v26 = vadd.f32 1.0, %v5779_v63  ;;  %v5308_v16 = vmul.f32 -1.442695, %v8864_v5  ;;  %1744 = vmatpush.msra.mxu0 %v509_v4 }
 0x1f1   : > { %v8877_v27 = vpop.eup %5780  ;;  %v8886_v60 = vadd.f32 %v8708_v47, %v8692_v8  ;;  %v4636_v56 = vmul.f32 %v2923_v12, %v8569_v22  ;;  %vm8890_vm14 = vcmp.eq.f32.partialorder %v2904_v23, 8.507059e+37  ;;  %v643_v8 = vld [vmem:[#allocation5 + $0x740] sm:$0xff]  ;;  %v2907_v47 = vor.u32 1.1754944e-38, %v2906_v25  ;;  %v1133_v38 = vpop.f32.mrf.mxu2  ;;  %1522 = vmatmul.f32.gmra.mxu0 %v6178_v40 }
 0x1f2   : > { %v2899_v54 = vadd.f32 %v8827_v32, %v2898_v36  ;;  %v3046_v9 = vmul.f32 %v8877_v27, %v8811_v59  ;;  %v3054_v20 = vand.u32 2147483647, %v8811_v59  ;;  %v3056_v7 = vand.u32 2147483648, %v8811_v59  ;;  %1680 = vmatpush.msra.mxu3 %v643_v8 }
 0x1f3   : > { %5784 = vrcp.f32 %v8881_v26  ;;  %4825 = vst [vmem:[%s8663_s10 + $0x60] sm:$0xff] %v4636_v56  ;;  %v5307_v62 = vmul.f32 -1.442695, %v8868_v11  ;;  %1457 = vmatmul.f32.gmra.mxu3 %v6179_v44  ;;  %vm3051_vm0 = vweird.f32 %v8877_v27  ;;  %v3039_v33 = vand.u32 2147483647, %v8881_v26  ;;  %1587 = vmatmul.f32.gmra.mxu1 %v6179_v44  ;;  %v6180_v56 = vld [vmem:[%s6682_s1 + $0xa0] sm:$0xff] }
 0x1f4   : > { %v2903_v17 = vsel %vm8900_vm15, %v8827_v32, %v2899_v54  ;;  %v3047_v51 = vsub.f32 1.0, %v3046_v9  ;;  %5786 = vpow2.f32 %v5298_v13  ;;  %v5317_v28 = vmul.f32 -1.442695, %v8886_v60  ;;  %v6181_v54 = vld [vmem:[%s6682_s1 + $0xa8] sm:$0xff] }
 0x1f5   : > { %v2908_v39 = vsel %vm8890_vm14, %v2907_v47, %v2903_v17  ;;  %5788 = vpow2.f32 %v5308_v16  ;;  %v5783_v29 = vpop.eup %5782  ;;  %v3041_v61 = vand.u32 2147483648, %v8881_v26  ;;  %v8926_v53 = vadd.f32 %v8759_v0, %v8757_v31  ;;  %v8945_v23 = vpop.f32.mrf.mxu0 }
 0x1f6   : > { %v4635_v32 = vmul.f32 %v2908_v39, %v8582_v49  ;;  %v3048_v55 = vmul.f32 %v8877_v27, %v3047_v51  ;;  %5790 = vpow2.f32 %v5307_v62  ;;  %v8922_v18 = vadd.f32 1.0, %v5783_v29  ;;  %v1198_v46 = vpop.f32.mrf.mxu3  ;;  %v500_v49 = vld [vmem:[#allocation5 + $0x2c8] sm:$0xff]  ;;  %1395 = vmatmul.f32.gmra.mxu2 %v6180_v56 }
 0x1f7   : > { %vm3050_vm1 = vweird.f32 %v8811_v59  ;;  %5792 = vpow2.f32 %v5317_v28  ;;  %vm8939_vm3 = vcmp.eq.f32.partialorder %v3054_v20, 8.507059e+37  ;;  %v3057_v0 = vor.u32 1.1754944e-38, %v3056_v7  ;;  %1745 = vmatpush.msra.mxu0 %v500_v49  ;;  %v634_v59 = vld [vmem:[#allocation5 + $0x6f8] sm:$0xff] }
 0x1f8   : > { %4764 = vst [vmem:[%s6948_s12 + $0x78] sm:$0xff] %v4635_v32  ;;  %v3049_v6 = vadd.f32 %v8877_v27, %v3048_v55  ;;  %vm8935_vm2 = vmor %vm3050_vm1, %vm3051_vm0  ;;  %vm3035_vm4 = vweird.f32 %v8881_v26  ;;  %5794 = vrcp.f32 %v8922_v18  ;;  %v8947_v57 = vpop.f32.mrf.mxu1  ;;  %vm8954_vm5 = vcmp.eq.f32.partialorder %v3039_v33, 8.507059e+37  ;;  %1681 = vmatpush.msra.mxu3 %v634_v59  ;;  %v6183_v59 = vld [vmem:[%s6682_s1 + $0xb8] sm:$0xff] }
 0x1f9   : > { %v8931_v15 = vpop.eup %5784  ;;  %v5316_v63 = vmul.f32 -1.442695, %v8926_v53  ;;  %v3042_v13 = vor.u32 1.1754944e-38, %v3041_v61  ;;  %v3191_v2 = vand.u32 2147483648, %v8922_v18  ;;  %v8973_v9 = vadd.f32 %v8797_v10, %v8790_v42  ;;  %v9008_v40 = vpop.f32.mrf.mxu2  ;;  %1525 = vmatmul.f32.gmra.mxu0 %v6180_v56 }
 0x1fa   : > { %v5787_v19 = vpop.eup %5786  ;;  %v3053_v34 = vsel %vm8935_vm2, %v8877_v27, %v3049_v6  ;;  %v3031_v50 = vmul.f32 %v8931_v15, %v8881_v26  ;;  %v3189_v27 = vand.u32 2147483647, %v8922_v18  ;;  %v8977_v8 = vadd.f32 %v8846_v35, %v8844_v43 }
 0x1fb   : > { %v5789_v48 = vpop.eup %5788  ;;  %v3058_v36 = vsel %vm8939_vm3, %v3057_v0, %v3053_v34  ;;  %v8962_v12 = vadd.f32 1.0, %v5787_v19  ;;  %5796 = vpow2.f32 %v5316_v63  ;;  %1460 = vmatmul.f32.gmra.mxu3 %v6181_v54  ;;  %vm3036_vm6 = vweird.f32 %v8931_v15  ;;  %1590 = vmatmul.f32.gmra.mxu1 %v6181_v54  ;;  %v6182_v0 = vld [vmem:[%s6682_s1 + $0xb0] sm:$0xff] }
 0x1fc   : > { %v5791_v16 = vpop.eup %5790  ;;  %v4645_v4 = vmul.f32 %v3058_v36, %v8600_v24  ;;  %v3032_v3 = vsub.f32 1.0, %v3031_v50  ;;  %v8965_v21 = vadd.f32 1.0, %v5789_v48  ;;  %vm3185_vm7 = vweird.f32 %v8922_v18  ;;  %vm3037_vm9 = vmor %vm3035_vm4, %vm3036_vm6 }
 0x1fd   : > { %5798 = vrcp.f32 %v8962_v12  ;;  %v5793_v24 = vpop.eup %5792  ;;  %v3176_v47 = vand.u32 2147483648, %v8962_v12  ;;  %v8987_v42 = vadd.f32 1.0, %v5791_v16  ;;  %v8991_v10 = vadd.f32 %v8875_v45, %v8870_v37  ;;  %v635_v16 = vld [vmem:[#allocation5 + $0x700] sm:$0xff] }
 0x1fe   : > { %4829 = vst [vmem:[%s8663_s10 + $0x80] sm:$0xff] %v4645_v4  ;;  %v3033_v22 = vmul.f32 %v8931_v15, %v3032_v3  ;;  %5800 = vrcp.f32 %v8965_v21  ;;  %v8984_v20 = vpop.eup %5794  ;;  %v8993_v43 = vadd.f32 %v1198_v46, %v1133_v38  ;;  %vm8998_vm8 = vcmp.eq.f32.partialorder %v3189_v27, 8.507059e+37  ;;  %v9010_v44 = vpop.f32.mrf.mxu3  ;;  %1398 = vmatmul.f32.gmra.mxu2 %v6182_v0  ;;  %v481_v4 = vld [vmem:[#allocation5 + $0x230] sm:$0xff]  ;;  %1811 = vmatpush.msra.mxu1 %v635_v16 }
 0x1ff   : > { %v3181_v7 = vmul.f32 %v8984_v20, %v8922_v18  ;;  %v3174_v51 = vand.u32 2147483647, %v8962_v12  ;;  %v3192_v62 = vor.u32 1.1754944e-38, %v3191_v2  ;;  %v3324_v37 = vand.u32 2147483647, %v8965_v21  ;;  %v9027_v46 = vpop.f32.mrf.mxu0  ;;  %v491_v18 = vld [vmem:[#allocation5 + $0x280] sm:$0xff]  ;;  %1617 = vmatpush.msra.mxu2 %v481_v4 }
 0x200   : > { %v3034_v35 = vadd.f32 %v8931_v15, %v3033_v22  ;;  %v3326_v45 = vand.u32 2147483648, %v8965_v21  ;;  %5802 = vrcp.f32 %v8987_v42  ;;  %vm3170_vm10 = vweird.f32 %v8962_v12  ;;  %v9029_v6 = vpop.f32.mrf.mxu1  ;;  %1746 = vmatpush.msra.mxu0 %v491_v18  ;;  %v625_v22 = vld [vmem:[#allocation5 + $0x6b0] sm:$0xff] }
 0x201   : > { %v5797_v39 = vpop.eup %5796  ;;  %v3182_v29 = vsub.f32 1.0, %v3181_v7  ;;  %v9014_v32 = vor.u32 1.1754944e-38, %v3176_v47  ;;  %v9016_v26 = vadd.f32 1.0, %v5793_v24  ;;  %vm3186_vm11 = vweird.f32 %v8984_v20  ;;  %1682 = vmatpush.msra.mxu3 %v625_v22  ;;  %1528 = vmatmul.f32.gmra.mxu0 %v6182_v0 }
 0x202   : > { %v3038_v33 = vsel %vm3037_vm9, %v8931_v15, %v3034_v35  ;;  %vm3320_vm12 = vweird.f32 %v8965_v21  ;;  %v3309_v61 = vand.u32 2147483647, %v8987_v42  ;;  %v9025_v38 = vadd.f32 1.0, %v5797_v39  ;;  %vm9059_vm15 = vmor %vm3185_vm7, %vm3186_vm11 }
 0x203   : > { %v9018_v55 = vpop.eup %5798  ;;  %v3043_v28 = vsel %vm8954_vm5, %v3042_v13, %v3038_v33  ;;  %v3183_v14 = vmul.f32 %v8984_v20, %v3182_v29  ;;  %vm9037_vm13 = vcmp.eq.f32.partialorder %v3174_v51, 8.507059e+37  ;;  %v3311_v31 = vand.u32 2147483648, %v8987_v42  ;;  %1463 = vmatmul.f32.gmra.mxu3 %v6183_v59  ;;  %1593 = vmatmul.f32.gmra.mxu1 %v6183_v59  ;;  %v9105_v33 = vpop.f32.mrf.mxu2 }
 0x204   : > { %v9031_v49 = vpop.eup %5800  ;;  %v4644_v41 = vmul.f32 %v3043_v28, %v8625_v30  ;;  %v3166_v15 = vmul.f32 %v9018_v55, %v8962_v12  ;;  %vm9046_vm14 = vcmp.eq.f32.partialorder %v3324_v37, 8.507059e+37  ;;  %v9050_v34 = vor.u32 1.1754944e-38, %v3326_v45  ;;  %v616_v30 = vld [vmem:[#allocation5 + $0x668] sm:$0xff]  ;;  %v6187_v28 = vld [vmem:[%s6682_s1 + $0xd8] sm:$0xff] }
 0x205   : > { %v3316_v19 = vmul.f32 %v9031_v49, %v8965_v21  ;;  %5804 = vrcp.f32 %v9016_v26  ;;  %v3184_v50 = vadd.f32 %v8984_v20, %v3183_v14  ;;  %vm3171_vm0 = vweird.f32 %v9018_v55  ;;  %1683 = vmatpush.msra.mxu3 %v616_v30 }
 0x206   : > { %4768 = vst [vmem:[%s6948_s12 + $0x98] sm:$0xff] %v4644_v41  ;;  %v3167_v63 = vsub.f32 1.0, %v3166_v15  ;;  %vm3305_vm1 = vweird.f32 %v8987_v42  ;;  %v5326_v48 = vmul.f32 -1.442695, %v8973_v9  ;;  %v9066_v36 = vpop.eup %5802  ;;  %vm3321_vm2 = vweird.f32 %v9031_v49  ;;  %vm9097_vm6 = vmor %vm3170_vm10, %vm3171_vm0  ;;  %v9107_v29 = vpop.f32.mrf.mxu3  ;;  %v6184_v15 = vld [vmem:[%s6682_s1 + $0xc0] sm:$0xff] }
 0x207   : > { %v3317_v13 = vsub.f32 1.0, %v3316_v19  ;;  %v3461_v27 = vand.u32 2147483648, %v9016_v26  ;;  %5806 = vrcp.f32 %v9025_v38  ;;  %v3188_v3 = vsel %vm9059_vm15, %v8984_v20, %v3184_v50  ;;  %vm9117_vm7 = vmor %vm3320_vm12, %vm3321_vm2  ;;  %1401 = vmatmul.f32.gmra.mxu2 %v6184_v15  ;;  %v9136_v59 = vpop.f32.mrf.mxu0  ;;  %v6185_v50 = vld [vmem:[%s6682_s1 + $0xc8] sm:$0xff] }
 0x208   : > { %v3168_v56 = vmul.f32 %v9018_v55, %v3167_v63  ;;  %v3301_v54 = vmul.f32 %v9066_v36, %v8987_v42  ;;  %vm9077_vm3 = vcmp.eq.f32.partialorder %v3309_v61, 8.507059e+37  ;;  %v9081_v24 = vor.u32 1.1754944e-38, %v3311_v31  ;;  %v9138_v19 = vpop.f32.mrf.mxu1  ;;  %v482_v63 = vld [vmem:[#allocation5 + $0x238] sm:$0xff] }
 0x209   : > { %v3193_v47 = vsel %vm8998_vm8, %v3192_v62, %v3188_v3  ;;  %v3318_v35 = vmul.f32 %v9031_v49, %v3317_v13  ;;  %vm3455_vm4 = vweird.f32 %v9016_v26  ;;  %v3459_v20 = vand.u32 2147483647, %v9016_v26  ;;  %v472_v13 = vld [vmem:[#allocation5 + $0x1e8] sm:$0xff]  ;;  %1747 = vmatpush.msra.mxu0 %v482_v63 }
 0x20a   : > { %v4654_v7 = vmul.f32 %v3193_v47, %v8824_v1  ;;  %v3169_v51 = vadd.f32 %v9018_v55, %v3168_v56  ;;  %v3302_v37 = vsub.f32 1.0, %v3301_v54  ;;  %vm3306_vm5 = vweird.f32 %v9066_v36  ;;  %1618 = vmatpush.msra.mxu2 %v472_v13  ;;  %1531 = vmatmul.f32.gmra.mxu0 %v6184_v15  ;;  %v598_v13 = vld [vmem:[#allocation5 + $0x5d8] sm:$0xff] }
 0x20b   : > { %v9091_v45 = vpop.eup %5804  ;;  %v3319_v62 = vadd.f32 %v9031_v49, %v3318_v35  ;;  %v9102_v39 = vor.u32 1.1754944e-38, %v3461_v27  ;;  %5808 = vpow2.f32 %v5326_v48  ;;  %v5325_v1 = vmul.f32 -1.442695, %v8977_v8  ;;  %1466 = vmatmul.f32.gmra.mxu3 %v6185_v50  ;;  %v626_v48 = vld [vmem:[#allocation5 + $0x6b8] sm:$0xff]  ;;  %vm9151_vm9 = vmor %vm3305_vm1, %vm3306_vm5  ;;  %1596 = vmatmul.f32.gmra.mxu1 %v6185_v50 }
 0x20c   : > { %4833 = vst [vmem:[%s8663_s10 + $0xa0] sm:$0xff] %v4654_v7  ;;  %v3173_v12 = vsel %vm9097_vm6, %v9018_v55, %v3169_v51  ;;  %v3303_v61 = vmul.f32 %v9066_v36, %v3302_v37  ;;  %v3451_v41 = vmul.f32 %v9091_v45, %v9016_v26  ;;  %v3444_v14 = vand.u32 2147483647, %v9025_v38  ;;  %1812 = vmatpush.msra.mxu1 %v626_v48  ;;  %v607_v51 = vld [vmem:[#allocation5 + $0x620] sm:$0xff] }
 0x20d   : > { %v9126_v31 = vpop.eup %5806  ;;  %v3178_v55 = vsel %vm9037_vm13, %v9014_v32, %v3173_v12  ;;  %v3323_v21 = vsel %vm9117_vm7, %v9031_v49, %v3319_v62  ;;  %vm3456_vm8 = vweird.f32 %v9091_v45  ;;  %v3446_v0 = vand.u32 2147483648, %v9025_v38  ;;  %1684 = vmatpush.msra.mxu3 %v607_v51  ;;  %v6186_v12 = vld [vmem:[%s6682_s1 + $0xd0] sm:$0xff] }
 0x20e   : > { %v4653_v25 = vmul.f32 %v3178_v55, %v8853_v52  ;;  %v3328_v32 = vsel %vm9046_vm14, %v9050_v34, %v3323_v21  ;;  %v3304_v58 = vadd.f32 %v9066_v36, %v3303_v61  ;;  %v3452_v49 = vsub.f32 1.0, %v3451_v41  ;;  %vm9183_vm11 = vmor %vm3455_vm4, %vm3456_vm8  ;;  %v9207_v26 = vpop.f32.mrf.mxu3 }
 0x20f   : > { %v4663_v27 = vmul.f32 %v3328_v32, %v8864_v5  ;;  %v3436_v52 = vmul.f32 %v9126_v31, %v9025_v38  ;;  %vm3441_vm10 = vweird.f32 %v9126_v31  ;;  %5810 = vpow2.f32 %v5325_v1  ;;  %1404 = vmatmul.f32.gmra.mxu2 %v6186_v12  ;;  %v9229_v41 = vpop.f32.mrf.mxu0  ;;  %v608_v32 = vld [vmem:[#allocation5 + $0x628] sm:$0xff]  ;;  %1685 = vmatpush.msra.mxu3 %v598_v13 }
 0x210   : > { %4772 = vst [vmem:[%s6948_s12 + $0xb8] sm:$0xff] %v4653_v25  ;;  %v3308_v5 = vsel %vm9151_vm9, %v9066_v36, %v3304_v58  ;;  %v3453_v42 = vmul.f32 %v9091_v45, %v3452_v49  ;;  %v5335_v34 = vmul.f32 -1.442695, %v8991_v10  ;;  %v5334_v16 = vmul.f32 -1.442695, %v8993_v43  ;;  %v9231_v15 = vpop.f32.mrf.mxu1  ;;  %v464_v25 = vld [vmem:[#allocation5 + $0x1a8] sm:$0xff] }
 0x211   : > { %v5809_v4 = vpop.eup %5808  ;;  %4837 = vst [vmem:[%s8663_s10 + $0xc0] sm:$0xff] %v4663_v27  ;;  %v3313_v3 = vsel %vm9077_vm3, %v9081_v24, %v3308_v5  ;;  %v3437_v56 = vsub.f32 1.0, %v3436_v52  ;;  %v9171_v54 = vadd.f32 %v8947_v57, %v8945_v23  ;;  %v9175_v36 = vadd.f32 %v9010_v44, %v9008_v40  ;;  %v473_v40 = vld [vmem:[#allocation5 + $0x1f0] sm:$0xff]  ;;  %v463_v44 = vld [vmem:[#allocation5 + $0x1a0] sm:$0xff]  ;;  %v454_v58 = vld [vmem:[#allocation5 + $0x158] sm:$0xff] }
 0x212   : > { %v4662_v22 = vmul.f32 %v3313_v3, %v8868_v11  ;;  %v3454_v47 = vadd.f32 %v9091_v45, %v3453_v42  ;;  %v9187_v24 = vadd.f32 1.0, %v5809_v4  ;;  %5812 = vpow2.f32 %v5335_v34  ;;  %v617_v11 = vld [vmem:[#allocation5 + $0x670] sm:$0xff]  ;;  %1748 = vmatpush.msra.mxu0 %v473_v40  ;;  %1619 = vmatpush.msra.mxu2 %v463_v44 }
 0x213   : > { %v3438_v23 = vmul.f32 %v9126_v31, %v3437_v56  ;;  %5814 = vpow2.f32 %v5334_v16  ;;  %v5344_v57 = vmul.f32 -1.442695, %v9171_v54  ;;  %v9193_v35 = vadd.f32 %v9029_v6, %v9027_v46  ;;  %1813 = vmatpush.msra.mxu1 %v617_v11  ;;  %1469 = vmatmul.f32.gmra.mxu3 %v6187_v28 }
 0x214   : > { %4776 = vst [vmem:[%s6948_s12 + $0xd8] sm:$0xff] %v4662_v22  ;;  %v3458_v7 = vsel %vm9183_vm11, %v9091_v45, %v3454_v47  ;;  %vm3460_vm12 = vcmp.eq.f32.partialorder %v3459_v20, 8.507059e+37  ;;  %5816 = vrcp.f32 %v9187_v24  ;;  %vm3440_vm13 = vweird.f32 %v9025_v38  ;;  %v9205_v45 = vpop.f32.mrf.mxu2  ;;  %1749 = vmatpush.msra.mxu0 %v464_v25  ;;  %1620 = vmatpush.msra.mxu2 %v454_v58  ;;  %v6188_v22 = vld [vmem:[%s6682_s1 + $0xe0] sm:$0xff]  ;;  %v6189_v47 = vld [vmem:[%s6682_s1 + $0xe8] sm:$0xff] }
 0x215   : > { %v5811_v37 = vpop.eup %5810  ;;  %v3463_v46 = vsel %vm3460_vm12, %v9102_v39, %v3458_v7  ;;  %v3439_v6 = vadd.f32 %v9126_v31, %v3438_v23  ;;  %5818 = vpow2.f32 %v5344_v57  ;;  %vm9212_vm14 = vmor %vm3440_vm13, %vm3441_vm10  ;;  %v3447_v62 = vor.u32 1.1754944e-38, %v3446_v0  ;;  %1814 = vmatpush.msra.mxu1 %v608_v32  ;;  %1534 = vmatmul.f32.gmra.mxu0 %v6186_v12 }
 0x216   : > { %v4672_v20 = vmul.f32 %v3463_v46, %v8886_v60  ;;  %v9218_v39 = vadd.f32 1.0, %v5811_v37  ;;  %v5343_v1 = vmul.f32 -1.442695, %v9175_v36  ;;  %vm3445_vm15 = vcmp.eq.f32.partialorder %v3444_v14, 8.507059e+37  ;;  %1599 = vmatmul.f32.gmra.mxu1 %v6187_v28  ;;  %v9264_v34 = vpop.f32.mrf.mxu3 }
 0x217   : > { %v3443_v60 = vsel %vm9212_vm14, %v9126_v31, %v3439_v6  ;;  %v5353_v61 = vmul.f32 -1.442695, %v9193_v35  ;;  %v3594_v0 = vand.u32 2147483647, %v9187_v24  ;;  %v3596_v50 = vand.u32 2147483648, %v9187_v24  ;;  %1407 = vmatmul.f32.gmra.mxu2 %v6188_v22  ;;  %v9280_v44 = vpop.f32.mrf.mxu0 }
 0x218   : > { %v5813_v55 = vpop.eup %5812  ;;  %4841 = vst [vmem:[%s8663_s10 + $0xe0] sm:$0xff] %v4672_v20  ;;  %v3448_v21 = vsel %vm3445_vm15, %v3447_v62, %v3443_v60  ;;  %5820 = vrcp.f32 %v9218_v39  ;;  %v9242_v49 = vadd.f32 %v9107_v29, %v9105_v33  ;;  %vm3590_vm0 = vweird.f32 %v9187_v24  ;;  %v9282_v7 = vpop.f32.mrf.mxu1 }
 0x219   : > { %v5815_v31 = vpop.eup %5814  ;;  %v4671_v38 = vmul.f32 %v3448_v21, %v8926_v53  ;;  %v9238_v14 = vadd.f32 1.0, %v5813_v55  ;;  %5822 = vpow2.f32 %v5343_v1  ;;  %vm9253_vm1 = vcmp.eq.f32.partialorder %v3594_v0, 8.507059e+37 }
 0x21a   : > { %v9244_v63 = vpop.eup %5816  ;;  %v9246_v48 = vadd.f32 1.0, %v5815_v31  ;;  %5824 = vpow2.f32 %v5353_v61  ;;  %v3579_v29 = vand.u32 2147483647, %v9218_v39  ;;  %v3581_v18 = vand.u32 2147483648, %v9218_v39 }
 0x21b   : > { %v5819_v27 = vpop.eup %5818  ;;  %4780 = vst [vmem:[%s6948_s12 + $0xf8] sm:$0xff] %v4671_v38  ;;  %v3586_v53 = vmul.f32 %v9244_v63, %v9187_v24  ;;  %5826 = vrcp.f32 %v9238_v14  ;;  %v3597_v30 = vor.u32 1.1754944e-38, %v3596_v50  ;;  %vm3575_vm2 = vweird.f32 %v9218_v39  ;;  %1472 = vmatmul.f32.gmra.mxu3 %v6189_v47 }
 0x21c   : > { %5828 = vrcp.f32 %v9246_v48  ;;  %v5352_v5 = vmul.f32 -1.442695, %v9242_v49  ;;  %v9262_v42 = vpop.f32.mrf.mxu2  ;;  %vm3591_vm3 = vweird.f32 %v9244_v63  ;;  %v3729_v4 = vand.u32 2147483647, %v9238_v14 }
 0x21d   : > { %v3587_v52 = vsub.f32 1.0, %v3586_v53  ;;  %v3731_v3 = vand.u32 2147483648, %v9238_v14  ;;  %v9271_v56 = vadd.f32 1.0, %v5819_v27  ;;  %v3714_v40 = vand.u32 2147483647, %v9246_v48  ;;  %vm3592_vm7 = vmor %vm3590_vm0, %vm3591_vm3  ;;  %1537 = vmatmul.f32.gmra.mxu0 %v6188_v22 }
 0x21e   : > { %v9266_v16 = vpop.eup %5820  ;;  %v3716_v11 = vand.u32 2147483648, %v9246_v48  ;;  %vm9284_vm4 = vcmp.eq.f32.partialorder %v3579_v29, 8.507059e+37  ;;  %v3582_v46 = vor.u32 1.1754944e-38, %v3581_v18  ;;  %vm3725_vm5 = vweird.f32 %v9238_v14  ;;  %1602 = vmatmul.f32.gmra.mxu1 %v6189_v47  ;;  %v9330_v53 = vpop.f32.mrf.mxu3  ;;  %v9347_v18 = vld [vmem:[%s6682_s1 + $0xf0] sm:$0xff]  ;;  %v436_v29 = vld [vmem:[#allocation5 + $0xc8] sm:$0xff] }
 0x21f   : > { %v5823_v2 = vpop.eup %5822  ;;  %v3588_v23 = vmul.f32 %v9244_v63, %v3587_v52  ;;  %v3571_v57 = vmul.f32 %v9266_v16, %v9218_v39  ;;  %5830 = vrcp.f32 %v9271_v56  ;;  %vm3710_vm6 = vweird.f32 %v9246_v48  ;;  %1410 = vmatmul.f32.gmra.mxu2 %v9347_v18  ;;  %v9351_v52 = vld [vmem:[%s6682_s1 + $0xf8] sm:$0xff]  ;;  %v9362_v22 = vpop.f32.mrf.mxu0 }
 0x220   : > { %v5825_v51 = vpop.eup %5824  ;;  %v9294_v62 = vadd.f32 1.0, %v5823_v2  ;;  %5832 = vpow2.f32 %v5352_v5  ;;  %vm3576_vm8 = vweird.f32 %v9266_v16  ;;  %vm9305_vm9 = vcmp.eq.f32.partialorder %v3729_v4, 8.507059e+37  ;;  %v9364_v47 = vpop.f32.mrf.mxu1 }
 0x221   : > { %v9290_v6 = vpop.eup %5826  ;;  %v3589_v20 = vadd.f32 %v9244_v63, %v3588_v23  ;;  %v3572_v17 = vsub.f32 1.0, %v3571_v57  ;;  %v3732_v60 = vor.u32 1.1754944e-38, %v3731_v3  ;;  %v9309_v61 = vadd.f32 1.0, %v5825_v51  ;;  %vm9338_vm11 = vmor %vm3575_vm2, %vm3576_vm8  ;;  %v455_v57 = vld [vmem:[#allocation5 + $0x160] sm:$0xff]  ;;  %v572_v51 = vld [vmem:[#allocation5 + $0x508] sm:$0xff] }
 0x222   : > { %v9296_v1 = vpop.eup %5828  ;;  %v3721_v12 = vmul.f32 %v9290_v6, %v9238_v14  ;;  %vm9315_vm10 = vcmp.eq.f32.partialorder %v3714_v40, 8.507059e+37  ;;  %v9319_v50 = vor.u32 1.1754944e-38, %v3716_v11  ;;  %v3864_v25 = vand.u32 2147483647, %v9271_v56  ;;  %v599_v40 = vld [vmem:[#allocation5 + $0x5e0] sm:$0xff]  ;;  %1750 = vmatpush.msra.mxu0 %v455_v57 }
 0x223   : > { %v3593_v55 = vsel %vm3592_vm7, %v9244_v63, %v3589_v20  ;;  %v3573_v21 = vmul.f32 %v9266_v16, %v3572_v17  ;;  %v3706_v24 = vmul.f32 %v9296_v1, %v9246_v48  ;;  %5834 = vrcp.f32 %v9294_v62  ;;  %1475 = vmatmul.f32.gmra.mxu3 %v9351_v52  ;;  %1815 = vmatpush.msra.mxu1 %v599_v40 }
 0x224   : > { %v3598_v31 = vsel %vm9253_vm1, %v3597_v30, %v3593_v55  ;;  %v3722_v38 = vsub.f32 1.0, %v3721_v12  ;;  %v3866_v13 = vand.u32 2147483648, %v9271_v56  ;;  %v9328_v27 = vpop.f32.mrf.mxu2  ;;  %vm3726_vm12 = vweird.f32 %v9290_v6 }
 0x225   : > { %v4681_v32 = vmul.f32 %v3598_v31, %v8973_v9  ;;  %v3574_v58 = vadd.f32 %v9266_v16, %v3573_v21  ;;  %v3707_v63 = vsub.f32 1.0, %v3706_v24  ;;  %v9332_v33 = vpop.eup %5830  ;;  %vm3711_vm13 = vweird.f32 %v9296_v1  ;;  %vm9376_vm15 = vmor %vm3725_vm5, %vm3726_vm12  ;;  %v445_v21 = vld [vmem:[#allocation5 + $0x110] sm:$0xff]  ;;  %1540 = vmatmul.f32.gmra.mxu0 %v9347_v18 }
 0x226   : > { %v3723_v9 = vmul.f32 %v9290_v6, %v3722_v38  ;;  %5836 = vrcp.f32 %v9309_v61  ;;  %v5833_v39 = vpop.eup %5832  ;;  %v3856_v4 = vmul.f32 %v9332_v33, %v9271_v56  ;;  %v3849_v3 = vand.u32 2147483647, %v9294_v62  ;;  %vm9394_vm1 = vmor %vm3710_vm6, %vm3711_vm13  ;;  %v589_v24 = vld [vmem:[#allocation5 + $0x590] sm:$0xff]  ;;  %1621 = vmatpush.msra.mxu2 %v445_v21  ;;  %1605 = vmatmul.f32.gmra.mxu1 %v9351_v52 }
 0x227   : > { %4845 = vst [vmem:[%s8663_s10 + $0x100] sm:$0xff] %v4681_v32  ;;  %v3578_v30 = vsel %vm9338_vm11, %v9266_v16, %v3574_v58  ;;  %v3708_v5 = vmul.f32 %v9296_v1, %v3707_v63  ;;  %vm3860_vm14 = vweird.f32 %v9271_v56  ;;  %v3851_v16 = vand.u32 2147483648, %v9294_v62  ;;  %v446_v32 = vld [vmem:[#allocation5 + $0x118] sm:$0xff]  ;;  %1686 = vmatpush.msra.mxu3 %v589_v24 }
 0x228   : > { %v3583_v2 = vsel %vm9284_vm4, %v3582_v46, %v3578_v30  ;;  %v3724_v23 = vadd.f32 %v9290_v6, %v3723_v9  ;;  %v3857_v46 = vsub.f32 1.0, %v3856_v4  ;;  %vm9381_vm0 = vcmp.eq.f32.partialorder %v3864_v25, 8.507059e+37  ;;  %v590_v58 = vld [vmem:[#allocation5 + $0x598] sm:$0xff]  ;;  %v580_v9 = vld [vmem:[#allocation5 + $0x548] sm:$0xff]  ;;  %1751 = vmatpush.msra.mxu0 %v446_v32  ;;  %v581_v4 = vld [vmem:[#allocation5 + $0x550] sm:$0xff]  ;;  %1622 = vmatpush.msra.mxu2 %v436_v29 }
 0x229   : > { %v4680_v11 = vmul.f32 %v3583_v2, %v8977_v8  ;;  %v3709_v37 = vadd.f32 %v9296_v1, %v3708_v5  ;;  %v9385_v17 = vpop.eup %5834  ;;  %vm3861_vm2 = vweird.f32 %v9332_v33  ;;  %v3867_v12 = vor.u32 1.1754944e-38, %v3866_v13  ;;  %1816 = vmatpush.msra.mxu1 %v590_v58  ;;  %1687 = vmatpush.msra.mxu3 %v580_v9  ;;  %v427_v2 = vld [vmem:[#allocation5 + $0x80] sm:$0xff] }
 0x22a   : > { %v3728_v8 = vsel %vm9376_vm15, %v9290_v6, %v3724_v23  ;;  %v9399_v55 = vadd.f32 1.0, %v5833_v39  ;;  %v3858_v48 = vmul.f32 %v9332_v33, %v3857_v46  ;;  %v3841_v38 = vmul.f32 %v9385_v17, %v9294_v62  ;;  %v437_v39 = vld [vmem:[#allocation5 + $0xd0] sm:$0xff]  ;;  %vm9429_vm4 = vmor %vm3860_vm14, %vm3861_vm2  ;;  %v571_v23 = vld [vmem:[#allocation5 + $0x500] sm:$0xff]  ;;  %v9451_v46 = vpop.f32.mrf.mxu1  ;;  %1623 = vmatpush.msra.mxu2 %v427_v2 }
 0x22b   : > { %4784 = vst [vmem:[%s6948_s12 + $0x118] sm:$0xff] %v4680_v11  ;;  %v3733_v31 = vsel %vm9305_vm9, %v3732_v60, %v3728_v8  ;;  %v3713_v6 = vsel %vm9394_vm1, %v9296_v1, %v3709_v37  ;;  %vm9410_vm3 = vcmp.eq.f32.partialorder %v3849_v3, 8.507059e+37  ;;  %v9420_v1 = vor.u32 1.1754944e-38, %v3851_v16  ;;  %v428_v16 = vld [vmem:[#allocation5 + $0x88] sm:$0xff]  ;;  %1752 = vmatpush.msra.mxu0 %v437_v39  ;;  %1817 = vmatpush.msra.mxu1 %v581_v4  ;;  %v9449_v37 = vpop.f32.mrf.mxu0 }
 0x22c   : > { %v9414_v63 = vpop.eup %5836  ;;  %v4690_v28 = vmul.f32 %v3733_v31, %v8991_v10  ;;  %v3718_v60 = vsel %vm9315_vm10, %v9319_v50, %v3713_v6  ;;  %v4001_v13 = vand.u32 2147483648, %v9309_v61  ;;  %v3859_v5 = vadd.f32 %v9332_v33, %v3858_v48  ;;  %v9435_v3 = vpop.f32.mrf.mxu2  ;;  %1688 = vmatpush.msra.mxu3 %v571_v23  ;;  %v418_v31 = vld [vmem:[#allocation5 + $0x38] sm:$0xff] }
 0x22d   : > { %v4689_v30 = vmul.f32 %v3718_v60, %v8993_v43  ;;  %v3842_v0 = vsub.f32 1.0, %v3841_v38  ;;  %v3991_v50 = vmul.f32 %v9414_v63, %v9309_v61  ;;  %v9437_v43 = vpop.f32.mrf.mxu3  ;;  %vm3845_vm5 = vweird.f32 %v9294_v62  ;;  %1753 = vmatpush.msra.mxu0 %v428_v16  ;;  %1818 = vmatpush.msra.mxu1 %v572_v51  ;;  %v562_v6 = vld [vmem:[#allocation5 + $0x4b8] sm:$0xff]  ;;  %v563_v62 = vld [vmem:[#allocation5 + $0x4c0] sm:$0xff] }
 0x22e   : > { %4849 = vst [vmem:[%s8663_s10 + $0x120] sm:$0xff] %v4690_v28  ;;  %v3999_v56 = vand.u32 2147483647, %v9309_v61  ;;  %5838 = vrcp.f32 %v9399_v55  ;;  %v3863_v57 = vsel %vm9429_vm4, %v9332_v33, %v3859_v5  ;;  %vm3846_vm6 = vweird.f32 %v9385_v17  ;;  %1624 = vmatpush.msra.mxu2 %v418_v31  ;;  %1689 = vmatpush.msra.mxu3 %v562_v6 }
 0x22f   : > { %4788 = vst [vmem:[%s6948_s12 + $0x138] sm:$0xff] %v4689_v30  ;;  %v3843_v40 = vmul.f32 %v9385_v17, %v3842_v0  ;;  %v3992_v11 = vsub.f32 1.0, %v3991_v50  ;;  %v3868_v8 = vsel %vm9381_vm0, %v3867_v12, %v3863_v57  ;;  %vm3996_vm7 = vweird.f32 %v9414_v63  ;;  %vm9471_vm8 = vmor %vm3845_vm5, %vm3846_vm6  ;;  %1819 = vmatpush.msra.mxu1 %v563_v62 }
 0x230   : > { %v9458_v33 = vadd.f32 %v9138_v19, %v9136_v59  ;;  %v9462_v14 = vadd.f32 %v9207_v26, %v9205_v45  ;;  %v4699_v21 = vmul.f32 %v3868_v8, %v9171_v54  ;;  %v4002_v12 = vor.u32 1.1754944e-38, %v4001_v13  ;;  %v419_v26 = vld [vmem:[#allocation5 + $0x40] sm:$0xff] }
 0x231   : > { %v3844_v24 = vadd.f32 %v9385_v17, %v3843_v40  ;;  %v3993_v20 = vmul.f32 %v9414_v63, %v3992_v11  ;;  %vm3995_vm9 = vweird.f32 %v9309_v61  ;;  %v9480_v45 = vadd.f32 %v9231_v15, %v9229_v41  ;;  %1754 = vmatpush.msra.mxu0 %v419_v26  ;;  %v6194_v40 = vld [vmem:[%s6682_s1 + $0x10] sm:$0xff]  ;;  %v6195_v11 = vld [vmem:[%s6682_s1 + $0x18] sm:$0xff] }
 0x232   : > { %v5362_v19 = vmul.f32 -1.442695, %v9458_v33  ;;  %v5361_v54 = vmul.f32 -1.442695, %v9462_v14  ;;  %4853 = vst [vmem:[%s8663_s10 + $0x140] sm:$0xff] %v4699_v21  ;;  %v9491_v32 = vadd.f32 %v9264_v34, %v9262_v42  ;;  %v9495_v41 = vadd.f32 %v9282_v7, %v9280_v44  ;;  %vm3997_vm10 = vmor %vm3995_vm9, %vm3996_vm7  ;;  %v1564_v39 = vpop.f32.mrf.mxu1 }
 0x233   : > { %v3848_v48 = vsel %vm9471_vm8, %v9385_v17, %v3844_v24  ;;  %v3994_v38 = vadd.f32 %v9414_v63, %v3993_v20  ;;  %v5371_v52 = vmul.f32 -1.442695, %v9480_v45  ;;  %v9507_v42 = vadd.f32 %v9330_v53, %v9328_v27  ;;  %v6192_v27 = vld [vmem:[%s6682_s1] sm:$0xff]  ;;  %v6193_v53 = vld [vmem:[%s6682_s1 + $0x8] sm:$0xff]  ;;  %v1499_v9 = vpop.f32.mrf.mxu0 }
 0x234   : > { %v5839_v15 = vpop.eup %5838  ;;  %v3853_v18 = vsel %vm9410_vm3, %v9420_v1, %v3848_v48  ;;  %5840 = vpow2.f32 %v5362_v19  ;;  %vm4000_vm11 = vcmp.eq.f32.partialorder %v3999_v56, 8.507059e+37  ;;  %v3984_v17 = vand.u32 2147483647, %v9399_v55  ;;  %1625 = vmatmul.f32.vlgmr.msra.gmra.mxu2 %v6192_v27  ;;  %1690 = vmatmul.f32.vlgmr.msra.gmra.mxu3 %v6193_v53 }
 0x235   : > { %v4698_v34 = vmul.f32 %v3853_v18, %v9175_v36  ;;  %v3998_v44 = vsel %vm3997_vm10, %v9414_v63, %v3994_v38  ;;  %v3976_v7 = vmul.f32 %v5839_v15, %v9399_v55  ;;  %5842 = vpow2.f32 %v5361_v54  ;;  %v1366_v36 = vpop.f32.mrf.mxu2  ;;  %v1431_v58 = vpop.f32.mrf.mxu3  ;;  %1755 = vmatmul.f32.vlgmr.msra.gmra.mxu0 %v6192_v27  ;;  %1820 = vmatmul.f32.vlgmr.msra.gmra.mxu1 %v6193_v53 }
 0x236   : > { %v4003_v61 = vsel %vm4000_vm11, %v4002_v12, %v3998_v44  ;;  %v5370_v25 = vmul.f32 -1.442695, %v9491_v32  ;;  %5844 = vpow2.f32 %v5371_v52  ;;  %v5380_v60 = vmul.f32 -1.442695, %v9495_v41 }
 0x237   : > { %4792 = vst [vmem:[%s6948_s12 + $0x158] sm:$0xff] %v4698_v34  ;;  %v4708_v63 = vmul.f32 %v4003_v61, %v9193_v35  ;;  %v3977_v28 = vsub.f32 1.0, %v3976_v7  ;;  %v3986_v1 = vand.u32 2147483648, %v9399_v55  ;;  %v5379_v13 = vmul.f32 -1.442695, %v9507_v42 }
 0x238   : > { %5846 = vpow2.f32 %v5370_v25  ;;  %v9523_v29 = vadd.f32 %v9364_v47, %v9362_v22  ;;  %vm3981_vm12 = vweird.f32 %v5839_v15  ;;  %vm3980_vm13 = vweird.f32 %v9399_v55 }
 0x239   : > { %4857 = vst [vmem:[%s8663_s10 + $0x160] sm:$0xff] %v4708_v63  ;;  %v3978_v30 = vmul.f32 %v5839_v15, %v3977_v28  ;;  %5848 = vpow2.f32 %v5380_v60  ;;  %v9532_v22 = vadd.f32 %v9437_v43, %v9435_v3  ;;  %vm3982_vm14 = vmor %vm3980_vm13, %vm3981_vm12  ;;  %vm3985_vm15 = vcmp.eq.f32.partialorder %v3984_v17, 8.507059e+37  ;;  %v6197_v63 = vld [vmem:[%s6682_s1 + $0x28] sm:$0xff] }
 0x23a   : > { %v5841_v5 = vpop.eup %5840  ;;  %v5389_v35 = vmul.f32 -1.442695, %v9523_v29  ;;  %v3987_v50 = vor.u32 1.1754944e-38, %v3986_v1  ;;  %5850 = vpow2.f32 %v5379_v13  ;;  %v9536_v55 = vadd.f32 %v9451_v46, %v9449_v37  ;;  %v9561_v12 = vpop.f32.mrf.mxu1 }
 0x23b   : > { %v3979_v10 = vadd.f32 %v5839_v15, %v3978_v30  ;;  %v9528_v0 = vadd.f32 1.0, %v5841_v5  ;;  %v5843_v47 = vpop.eup %5842  ;;  %v9539_v2 = vadd.f32 %v1431_v58, %v1366_v36  ;;  %v9541_v23 = vadd.f32 %v1564_v39, %v1499_v9  ;;  %v9559_v20 = vpop.f32.mrf.mxu0  ;;  %v6196_v58 = vld [vmem:[%s6682_s1 + $0x20] sm:$0xff] }
 0x23c   : > { %v5845_v4 = vpop.eup %5844  ;;  %v9543_v16 = vadd.f32 1.0, %v5843_v47  ;;  %1628 = vmatmul.f32.gmra.mxu2 %v6194_v40  ;;  %1693 = vmatmul.f32.gmra.mxu3 %v6195_v11  ;;  %v5388_v21 = vmul.f32 -1.442695, %v9532_v22 }
 0x23d   : > { %v3983_v56 = vsel %vm3982_vm14, %v5839_v15, %v3979_v10  ;;  %5852 = vrcp.f32 %v9528_v0  ;;  %v9545_v57 = vadd.f32 1.0, %v5845_v4  ;;  %v9549_v51 = vpop.f32.mrf.mxu2  ;;  %v9551_v37 = vpop.f32.mrf.mxu3  ;;  %v4134_v24 = vand.u32 2147483647, %v9528_v0  ;;  %1758 = vmatmul.f32.gmra.mxu0 %v6194_v40  ;;  %1823 = vmatmul.f32.gmra.mxu1 %v6195_v11 }
 0x23e   : > { %v5847_v3 = vpop.eup %5846  ;;  %v3988_v43 = vsel %vm3985_vm15, %v3987_v50, %v3983_v56  ;;  %5854 = vpow2.f32 %v5389_v35  ;;  %v4136_v6 = vand.u32 2147483648, %v9528_v0  ;;  %v4121_v19 = vand.u32 2147483648, %v9543_v16 }
 0x23f   : > { %v4707_v46 = vmul.f32 %v3988_v43, %v9242_v49  ;;  %v9554_v8 = vadd.f32 1.0, %v5847_v3  ;;  %5856 = vrcp.f32 %v9543_v16  ;;  %v5849_v31 = vpop.eup %5848  ;;  %v9567_v49 = vmul.f32 -1.442695, %v9536_v55 }
 0x240   : > { %5858 = vrcp.f32 %v9545_v57  ;;  %v5851_v59 = vpop.eup %5850  ;;  %v9572_v54 = vmul.f32 -1.442695, %v9539_v2  ;;  %v9575_v26 = vmul.f32 -1.442695, %v9541_v23  ;;  %vm4130_vm0 = vweird.f32 %v9528_v0 }
 0x241   : > { %4796 = vst [vmem:[%s6948_s12 + $0x178] sm:$0xff] %v4707_v46  ;;  %5860 = vrcp.f32 %v9554_v8  ;;  %v4119_v48 = vand.u32 2147483647, %v9543_v16  ;;  %v4269_v38 = vand.u32 2147483647, %v9545_v57  ;;  %vm9584_vm1 = vcmp.eq.f32.partialorder %v4134_v24, 8.507059e+37 }
 0x242   : > { %5862 = vpow2.f32 %v5388_v21  ;;  %v4271_v34 = vand.u32 2147483648, %v9545_v57  ;;  %v4256_v44 = vand.u32 2147483648, %v9554_v8  ;;  %v9590_v7 = vadd.f32 1.0, %v5849_v31  ;;  %v9643_v21 = vpop.f32.mrf.mxu1 }
 0x243   : > { %v9577_v62 = vpop.eup %5852  ;;  %v4137_v61 = vor.u32 1.1754944e-38, %v4136_v6  ;;  %vm4115_vm2 = vweird.f32 %v9543_v16  ;;  %v4254_v17 = vand.u32 2147483647, %v9554_v8  ;;  %v9594_v25 = vadd.f32 1.0, %v5851_v59  ;;  %v9641_v46 = vpop.f32.mrf.mxu0 }
 0x244   : > { %v5855_v15 = vpop.eup %5854  ;;  %v4126_v18 = vmul.f32 %v9577_v62, %v9528_v0  ;;  %vm4131_vm3 = vweird.f32 %v9577_v62  ;;  %v9599_v36 = vor.u32 1.1754944e-38, %v4121_v19  ;;  %vm4265_vm4 = vweird.f32 %v9545_v57  ;;  %1631 = vmatmul.f32.gmra.mxu2 %v6196_v58  ;;  %1696 = vmatmul.f32.gmra.mxu3 %v6197_v63 }
 0x245   : > { %v9596_v27 = vpop.eup %5856  ;;  %5864 = vrcp.f32 %v9590_v7  ;;  %v9605_v28 = vpop.f32.mrf.mxu2  ;;  %vm9613_vm5 = vcmp.eq.f32.partialorder %v4119_v48, 8.507059e+37  ;;  %vm4250_vm6 = vweird.f32 %v9554_v8  ;;  %v4406_v39 = vand.u32 2147483648, %v9590_v7  ;;  %1761 = vmatmul.f32.gmra.mxu0 %v6196_v58  ;;  %1826 = vmatmul.f32.gmra.mxu1 %v6197_v63  ;;  %vm4132_vm12 = vmor %vm4130_vm0, %vm4131_vm3 }
 0x246   : > { %v4127_v53 = vsub.f32 1.0, %v4126_v18  ;;  %v9607_v60 = vpop.f32.mrf.mxu3  ;;  %v9609_v1 = vpop.eup %5858  ;;  %v4111_v13 = vmul.f32 %v9596_v27, %v9543_v16  ;;  %5866 = vrcp.f32 %v9594_v25  ;;  %v9620_v30 = vadd.f32 1.0, %v5855_v15 }
 0x247   : > { %v9622_v5 = vpop.eup %5860  ;;  %v4261_v10 = vmul.f32 %v9609_v1, %v9545_v57  ;;  %vm9627_vm7 = vcmp.eq.f32.partialorder %v4269_v38, 8.507059e+37  ;;  %v4272_v50 = vor.u32 1.1754944e-38, %v4271_v34  ;;  %v4257_v4 = vor.u32 1.1754944e-38, %v4256_v44 }
 0x248   : > { %v4128_v35 = vmul.f32 %v9577_v62, %v4127_v53  ;;  %v9631_v56 = vpop.eup %5862  ;;  %v4112_v3 = vsub.f32 1.0, %v4111_v13  ;;  %vm4116_vm8 = vweird.f32 %v9596_v27  ;;  %v4246_v43 = vmul.f32 %v9622_v5, %v9554_v8 }
 0x249   : > { %vm9636_vm9 = vcmp.eq.f32.partialorder %v4254_v17, 8.507059e+37  ;;  %v4404_v11 = vand.u32 2147483647, %v9590_v7  ;;  %v4262_v31 = vsub.f32 1.0, %v4261_v10  ;;  %vm4266_vm10 = vweird.f32 %v9609_v1  ;;  %vm9680_vm0 = vmor %vm4115_vm2, %vm4116_vm8 }
 0x24a   : > { %v4129_v24 = vadd.f32 %v9577_v62, %v4128_v35  ;;  %vm4251_vm11 = vweird.f32 %v9622_v5  ;;  %v4113_v6 = vmul.f32 %v9596_v27, %v4112_v3  ;;  %v4247_v59 = vsub.f32 1.0, %v4246_v43  ;;  %v6199_v35 = vld [vmem:[%s6682_s1 + $0x38] sm:$0xff] }
 0x24b   : > { %vm4400_vm13 = vweird.f32 %v9590_v7  ;;  %v9654_v19 = vor.u32 1.1754944e-38, %v4406_v39  ;;  %5868 = vrcp.f32 %v9620_v30  ;;  %v9657_v48 = vpop.eup %5864  ;;  %v4263_v15 = vmul.f32 %v9609_v1, %v4262_v31  ;;  %v6198_v39 = vld [vmem:[%s6682_s1 + $0x30] sm:$0xff]  ;;  %vm4252_vm3 = vmor %vm4250_vm6, %vm4251_vm11 }
 0x24c   : > { %v4133_v38 = vsel %vm4132_vm12, %v9577_v62, %v4129_v24  ;;  %vm4385_vm14 = vweird.f32 %v9594_v25  ;;  %v4389_v0 = vand.u32 2147483647, %v9594_v25  ;;  %v9663_v18 = vpop.eup %5866  ;;  %v4114_v44 = vadd.f32 %v9596_v27, %v4113_v6  ;;  %1634 = vmatmul.f32.gmra.mxu2 %v6198_v39  ;;  %1699 = vmatmul.f32.gmra.mxu3 %v6199_v35 }
 0x24d   : > { %v4138_v34 = vsel %vm9584_vm1, %v4137_v61, %v4133_v38  ;;  %v4248_v17 = vmul.f32 %v9622_v5, %v4247_v59  ;;  %v4396_v53 = vmul.f32 %v9657_v48, %v9590_v7  ;;  %vm9671_vm15 = vcmp.eq.f32.partialorder %v4404_v11, 8.507059e+37  ;;  %vm4267_vm1 = vmor %vm4265_vm4, %vm4266_vm10  ;;  %v9699_v3 = vpop.f32.mrf.mxu2  ;;  %1764 = vmatmul.f32.gmra.mxu0 %v6198_v39  ;;  %1829 = vmatmul.f32.gmra.mxu1 %v6199_v35 }
 0x24e   : > { %v4717_v58 = vmul.f32 %v4138_v34, %v9458_v33  ;;  %v4264_v61 = vadd.f32 %v9609_v1, %v4263_v15  ;;  %v4381_v63 = vmul.f32 %v9663_v18, %v9594_v25  ;;  %v4391_v13 = vand.u32 2147483648, %v9594_v25  ;;  %v9701_v43 = vpop.f32.mrf.mxu3  ;;  %v6201_v25 = vld [vmem:[%s6682_s1 + $0x48] sm:$0xff] }
 0x24f   : > { %v4118_v33 = vsel %vm9680_vm0, %v9596_v27, %v4114_v44  ;;  %v4249_v16 = vadd.f32 %v9622_v5, %v4248_v17  ;;  %v4397_v10 = vsub.f32 1.0, %v4396_v53  ;;  %vm4401_vm2 = vweird.f32 %v9657_v48  ;;  %v6200_v53 = vld [vmem:[%s6682_s1 + $0x40] sm:$0xff] }
 0x250   : > { %4861 = vst [vmem:[%s8663_s10 + $0x180] sm:$0xff] %v4717_v58  ;;  %v4123_v27 = vsel %vm9613_vm5, %v9599_v36, %v4118_v33  ;;  %v4268_v11 = vsel %vm4267_vm1, %v9609_v1, %v4264_v61  ;;  %v4382_v57 = vsub.f32 1.0, %v4381_v63  ;;  %vm4386_vm4 = vweird.f32 %v9663_v18  ;;  %vm4402_vm6 = vmor %vm4400_vm13, %vm4401_vm2 }
 0x251   : > { %v5869_v24 = vpop.eup %5868  ;;  %v4716_v31 = vmul.f32 %v4123_v27, %v9462_v14  ;;  %v4273_v6 = vsel %vm9627_vm7, %v4272_v50, %v4268_v11  ;;  %v4253_v9 = vsel %vm4252_vm3, %v9622_v5, %v4249_v16  ;;  %v4398_v36 = vmul.f32 %v9657_v48, %v4397_v10  ;;  %vm4387_vm7 = vmor %vm4385_vm14, %vm4386_vm4  ;;  %v6202_v10 = vld [vmem:[%s6682_s1 + $0x50] sm:$0xff]  ;;  %v6203_v27 = vld [vmem:[%s6682_s1 + $0x58] sm:$0xff] }
 0x252   : > { %v4726_v1 = vmul.f32 %v4273_v6, %v9480_v45  ;;  %v4258_v8 = vsel %vm9636_vm9, %v4257_v4, %v4253_v9  ;;  %v4383_v59 = vmul.f32 %v9663_v18, %v4382_v57  ;;  %v4531_v38 = vmul.f32 %v5869_v24, %v9620_v30  ;;  %v9730_v45 = vpop.f32.mrf.mxu0  ;;  %v9732_v4 = vpop.f32.mrf.mxu1 }
 0x253   : > { %4800 = vst [vmem:[%s6948_s12 + $0x198] sm:$0xff] %v4716_v31  ;;  %v4725_v14 = vmul.f32 %v4258_v8, %v9491_v32  ;;  %v4399_v47 = vadd.f32 %v9657_v48, %v4398_v36  ;;  %vm9726_vm5 = vcmp.eq.f32.partialorder %v4389_v0, 8.507059e+37  ;;  %v4392_v50 = vor.u32 1.1754944e-38, %v4391_v13 }
 0x254   : > { %4865 = vst [vmem:[%s8663_s10 + $0x1a0] sm:$0xff] %v4726_v1  ;;  %v4384_v32 = vadd.f32 %v9663_v18, %v4383_v59  ;;  %v4532_v40 = vsub.f32 1.0, %v4531_v38  ;;  %v4541_v15 = vand.u32 2147483648, %v9620_v30  ;;  %v9742_v0 = vadd.f32 1.0, %v9631_v56  ;;  %1637 = vmatmul.f32.gmra.mxu2 %v6200_v53  ;;  %1702 = vmatmul.f32.gmra.mxu3 %v6201_v25 }
 0x255   : > { %4804 = vst [vmem:[%s6948_s12 + $0x1b8] sm:$0xff] %v4725_v14  ;;  %v4403_v34 = vsel %vm4402_vm6, %v9657_v48, %v4399_v47  ;;  %vm4536_vm8 = vweird.f32 %v5869_v24  ;;  %5870 = vpow2.f32 %v9567_v49  ;;  %v9753_v7 = vadd.f32 %v9551_v37, %v9549_v51  ;;  %1767 = vmatmul.f32.gmra.mxu0 %v6200_v53  ;;  %1832 = vmatmul.f32.gmra.mxu1 %v6201_v25 }
 0x256   : > { %v4408_v56 = vsel %vm9671_vm15, %v9654_v19, %v4403_v34  ;;  %v4388_v44 = vsel %vm4387_vm7, %v9663_v18, %v4384_v32  ;;  %v4533_v48 = vmul.f32 %v5869_v24, %v4532_v40  ;;  %v4539_v17 = vand.u32 2147483647, %v9620_v30  ;;  %v1443_v52 = vpop.f32.mrf.mxu3  ;;  %v6207_v34 = vld [vmem:[%s6682_s1 + $0x78] sm:$0xff] }
 0x257   : > { %v4735_v49 = vmul.f32 %v4408_v56, %v9495_v41  ;;  %v4393_v51 = vsel %vm9726_vm5, %v4392_v50, %v4388_v44  ;;  %5872 = vrcp.f32 %v9742_v0  ;;  %vm4535_vm9 = vweird.f32 %v9620_v30 }
 0x258   : > { %v4734_v37 = vmul.f32 %v4393_v51, %v9507_v42  ;;  %v4534_v19 = vadd.f32 %v5869_v24, %v4533_v48  ;;  %v4542_v18 = vor.u32 1.1754944e-38, %v4541_v15  ;;  %vm4537_vm10 = vmor %vm4535_vm9, %vm4536_vm8  ;;  %5874 = vpow2.f32 %v9572_v54  ;;  %v1378_v42 = vpop.f32.mrf.mxu2 }
 0x259   : > { %4869 = vst [vmem:[%s8663_s10 + $0x1c0] sm:$0xff] %v4735_v49  ;;  %v5264_v62 = vmul.f32 -1.442695, %v9753_v7  ;;  %v9774_v41 = vadd.f32 %v9561_v12, %v9559_v20  ;;  %v9778_v58 = vadd.f32 %v9607_v60, %v9605_v28  ;;  %vm4540_vm11 = vcmp.eq.f32.partialorder %v4539_v17, 8.507059e+37 }
 0x25a   : > { %4808 = vst [vmem:[%s6948_s12 + $0x1d8] sm:$0xff] %v4734_v37  ;;  %v4538_v30 = vsel %vm4537_vm10, %v5869_v24, %v4534_v19  ;;  %v4524_v61 = vand.u32 2147483647, %v9742_v0  ;;  %5876 = vpow2.f32 %v9575_v26  ;;  %v1511_v28 = vpop.f32.mrf.mxu0  ;;  %v1576_v60 = vpop.f32.mrf.mxu1  ;;  %v9790_v26 = vadd.f32 %v9643_v21, %v9641_v46  ;;  %v6204_v37 = vld [vmem:[%s6682_s1 + $0x60] sm:$0xff]  ;;  %v6205_v19 = vld [vmem:[%s6682_s1 + $0x68] sm:$0xff] }
 0x25b   : > { %v5871_v54 = vpop.eup %5870  ;;  %v4543_v63 = vsel %vm4540_vm11, %v4542_v18, %v4538_v30  ;;  %5878 = vpow2.f32 %v5264_v62  ;;  %v5274_v20 = vmul.f32 -1.442695, %v9774_v41  ;;  %v5273_v12 = vmul.f32 -1.442695, %v9778_v58 }
 0x25c   : > { %v4744_v13 = vmul.f32 %v4543_v63, %v9523_v29  ;;  %v9786_v39 = vadd.f32 1.0, %v5871_v54  ;;  %v4526_v33 = vand.u32 2147483648, %v9742_v0  ;;  %1640 = vmatmul.f32.gmra.mxu2 %v6202_v10  ;;  %1705 = vmatmul.f32.gmra.mxu3 %v6203_v27  ;;  %vm4520_vm12 = vweird.f32 %v9742_v0 }
 0x25d   : > { %v5873_v35 = vpop.eup %5872  ;;  %5880 = vpow2.f32 %v5274_v20  ;;  %vm9799_vm13 = vcmp.eq.f32.partialorder %v4524_v61, 8.507059e+37  ;;  %v5283_v46 = vmul.f32 -1.442695, %v9790_v26  ;;  %v9808_v31 = vadd.f32 %v9701_v43, %v9699_v3  ;;  %1770 = vmatmul.f32.gmra.mxu0 %v6202_v10  ;;  %1835 = vmatmul.f32.gmra.mxu1 %v6203_v27 }
 0x25e   : > { %4873 = vst [vmem:[%s8663_s10 + $0x1e0] sm:$0xff] %v4744_v13  ;;  %v4516_v16 = vmul.f32 %v5873_v35, %v9742_v0  ;;  %5882 = vrcp.f32 %v9786_v39  ;;  %v5875_v29 = vpop.eup %5874  ;;  %v9812_v6 = vadd.f32 %v9732_v4, %v9730_v45  ;;  %v4527_v36 = vor.u32 1.1754944e-38, %v4526_v33  ;;  %v9827_v5 = vpop.f32.mrf.mxu3 }
 0x25f   : > { %5884 = vpow2.f32 %v5273_v12  ;;  %v9804_v24 = vadd.f32 1.0, %v5875_v29  ;;  %v2544_v1 = vand.u32 2147483647, %v9786_v39  ;;  %vm4521_vm14 = vweird.f32 %v5873_v35 }
 0x260   : > { %v5877_v21 = vpop.eup %5876  ;;  %v4517_v57 = vsub.f32 1.0, %v4516_v16  ;;  %5886 = vpow2.f32 %v5283_v46  ;;  %v9818_v38 = vadd.f32 %v1443_v52, %v1378_v42  ;;  %vm2540_vm15 = vweird.f32 %v9786_v39  ;;  %v9825_v47 = vpop.f32.mrf.mxu2  ;;  %vm9842_vm0 = vmor %vm4520_vm12, %vm4521_vm14 }
 0x261   : > { %v5879_v9 = vpop.eup %5878  ;;  %v9815_v8 = vadd.f32 1.0, %v5877_v21  ;;  %5888 = vrcp.f32 %v9804_v24  ;;  %v2546_v43 = vand.u32 2147483648, %v9786_v39  ;;  %v9823_v14 = vadd.f32 %v1576_v60, %v1511_v28 }
 0x262   : > { %v4518_v59 = vmul.f32 %v5873_v35, %v4517_v57  ;;  %v9831_v4 = vadd.f32 1.0, %v5879_v9  ;;  %v9834_v32 = vmul.f32 -1.442695, %v9808_v31  ;;  %v9837_v40 = vmul.f32 -1.442695, %v9812_v6  ;;  %v9854_v53 = vpop.f32.mrf.mxu0  ;;  %v9856_v25 = vpop.f32.mrf.mxu1 }
 0x263   : > { %v5881_v3 = vpop.eup %5880  ;;  %5890 = vrcp.f32 %v9815_v8  ;;  %vm9848_vm1 = vcmp.eq.f32.partialorder %v2544_v1, 8.507059e+37  ;;  %v2529_v48 = vand.u32 2147483647, %v9804_v24  ;;  %v2531_v17 = vand.u32 2147483648, %v9804_v24 }
 0x264   : > { %v9829_v50 = vpop.eup %5882  ;;  %v4519_v45 = vadd.f32 %v5873_v35, %v4518_v59  ;;  %v2679_v49 = vand.u32 2147483647, %v9815_v8  ;;  %v2681_v51 = vand.u32 2147483648, %v9815_v8  ;;  %5892 = vrcp.f32 %v9831_v4  ;;  %1643 = vmatmul.f32.gmra.mxu2 %v6204_v37  ;;  %1708 = vmatmul.f32.gmra.mxu3 %v6205_v19 }
 0x265   : > { %v5885_v15 = vpop.eup %5884  ;;  %v2536_v56 = vmul.f32 %v9829_v50, %v9786_v39  ;;  %v2547_v52 = vor.u32 1.1754944e-38, %v2546_v43  ;;  %vm2525_vm2 = vweird.f32 %v9804_v24  ;;  %vm2541_vm3 = vweird.f32 %v9829_v50  ;;  %1773 = vmatmul.f32.gmra.mxu0 %v6204_v37  ;;  %1838 = vmatmul.f32.gmra.mxu1 %v6205_v19 }
 0x266   : > { %v4523_v0 = vsel %vm9842_vm0, %v5873_v35, %v4519_v45  ;;  %v5887_v18 = vpop.eup %5886  ;;  %vm2675_vm4 = vweird.f32 %v9815_v8  ;;  %v9873_v54 = vadd.f32 1.0, %v5881_v3  ;;  %v9875_v63 = vadd.f32 1.0, %v5885_v15  ;;  %vm2542_vm8 = vmor %vm2540_vm15, %vm2541_vm3  ;;  %v9919_v59 = vpop.f32.mrf.mxu3  ;;  %v6206_v15 = vld [vmem:[%s6682_s1 + $0x70] sm:$0xff] }
 0x267   : > { %v4528_v62 = vsel %vm9799_vm13, %v4527_v36, %v4523_v0  ;;  %v2537_v42 = vsub.f32 1.0, %v2536_v56  ;;  %v9868_v30 = vpop.eup %5888  ;;  %vm9882_vm5 = vcmp.eq.f32.partialorder %v2529_v48, 8.507059e+37  ;;  %v2664_v13 = vand.u32 2147483647, %v9831_v4 }
 0x268   : > { %v4743_v61 = vmul.f32 %v4528_v62, %v9532_v22  ;;  %v2521_v28 = vmul.f32 %v9868_v30, %v9804_v24  ;;  %v2532_v22 = vor.u32 1.1754944e-38, %v2531_v17  ;;  %vm9890_vm6 = vcmp.eq.f32.partialorder %v2679_v49, 8.507059e+37  ;;  %v9917_v1 = vpop.f32.mrf.mxu2 }
 0x269   : > { %v9877_v20 = vpop.eup %5890  ;;  %v2538_v12 = vmul.f32 %v9829_v50, %v2537_v42  ;;  %v2682_v16 = vor.u32 1.1754944e-38, %v2681_v51  ;;  %5894 = vrcp.f32 %v9873_v54  ;;  %vm2660_vm7 = vweird.f32 %v9831_v4 }
 0x26a   : > { %4812 = vst [vmem:[%s6948_s12 + $0x1f8] sm:$0xff] %v4743_v61  ;;  %v2671_v35 = vmul.f32 %v9877_v20, %v9815_v8  ;;  %v2522_v27 = vsub.f32 1.0, %v2521_v28  ;;  %v2666_v29 = vand.u32 2147483648, %v9831_v4  ;;  %v9898_v11 = vpop.eup %5892  ;;  %vm2526_vm9 = vweird.f32 %v9868_v30  ;;  %v9930_v49 = vpop.f32.mrf.mxu0 }
 0x26b   : > { %v2539_v10 = vadd.f32 %v9829_v50, %v2538_v12  ;;  %5896 = vrcp.f32 %v9875_v63  ;;  %v9906_v21 = vadd.f32 1.0, %v5887_v18  ;;  %vm2676_vm10 = vweird.f32 %v9877_v20  ;;  %v9932_v44 = vpop.f32.mrf.mxu1  ;;  %vm2527_vm12 = vmor %vm2525_vm2, %vm2526_vm9 }
 0x26c   : > { %v2672_v46 = vsub.f32 1.0, %v2671_v35  ;;  %v2523_v9 = vmul.f32 %v9868_v30, %v2522_v27  ;;  %v2656_v36 = vmul.f32 %v9898_v11, %v9831_v4  ;;  %vm9913_vm11 = vcmp.eq.f32.partialorder %v2664_v13, 8.507059e+37  ;;  %1646 = vmatmul.f32.gmra.mxu2 %v6206_v15  ;;  %1711 = vmatmul.f32.gmra.mxu3 %v6207_v34  ;;  %vm2677_vm15 = vmor %vm2675_vm4, %vm2676_vm10  ;;  %v6209_v27 = vld [vmem:[%s6682_s1 + $0x88] sm:$0xff] }
 0x26d   : > { %v2543_v57 = vsel %vm2542_vm8, %v9829_v50, %v2539_v10  ;;  %v2814_v50 = vand.u32 2147483647, %v9873_v54  ;;  %v2816_v45 = vand.u32 2147483648, %v9873_v54  ;;  %v2667_v0 = vor.u32 1.1754944e-38, %v2666_v29  ;;  %1776 = vmatmul.f32.gmra.mxu0 %v6206_v15  ;;  %1841 = vmatmul.f32.gmra.mxu1 %v6207_v34  ;;  %v6208_v10 = vld [vmem:[%s6682_s1 + $0x80] sm:$0xff] }
 0x26e   : > { %v2548_v3 = vsel %vm9848_vm1, %v2547_v52, %v2543_v57  ;;  %v2673_v43 = vmul.f32 %v9877_v20, %v2672_v46  ;;  %v2524_v48 = vadd.f32 %v9868_v30, %v2523_v9  ;;  %v2657_v17 = vsub.f32 1.0, %v2656_v36  ;;  %v9998_v9 = vpop.f32.mrf.mxu3 }
 0x26f   : > { %v4611_v56 = vmul.f32 %v2548_v3, %v9536_v55  ;;  %v9934_v51 = vpop.eup %5894  ;;  %vm2661_vm13 = vweird.f32 %v9898_v11  ;;  %vm2810_vm14 = vweird.f32 %v9873_v54  ;;  %5898 = vrcp.f32 %v9906_v21 }
 0x270   : > { %v2674_v37 = vadd.f32 %v9877_v20, %v2673_v43  ;;  %v2528_v55 = vsel %vm2527_vm12, %v9868_v30, %v2524_v48  ;;  %v2658_v19 = vmul.f32 %v9898_v11, %v2657_v17  ;;  %v2806_v24 = vmul.f32 %v9934_v51, %v9873_v54  ;;  %vm2662_vm2 = vmor %vm2660_vm7, %vm2661_vm13  ;;  %v9996_v57 = vpop.f32.mrf.mxu2 }
 0x271   : > { %4815 = vst [vmem:[%s8663_s10 + $0x10] sm:$0xff] %v4611_v56  ;;  %v2801_v18 = vand.u32 2147483648, %v9875_v63  ;;  %v9954_v62 = vpop.eup %5896  ;;  %v2533_v42 = vsel %vm9882_vm5, %v2532_v22, %v2528_v55  ;;  %vm9959_vm0 = vcmp.eq.f32.partialorder %v2814_v50, 8.507059e+37  ;;  %v2817_v8 = vor.u32 1.1754944e-38, %v2816_v45 }
 0x272   : > { %v2678_v52 = vsel %vm2677_vm15, %v9877_v20, %v2674_v37  ;;  %vm2795_vm1 = vweird.f32 %v9875_v63  ;;  %v4610_v61 = vmul.f32 %v2533_v42, %v9539_v2  ;;  %v2659_v28 = vadd.f32 %v9898_v11, %v2658_v19  ;;  %v10018_v45 = vpop.f32.mrf.mxu0 }
 0x273   : > { %v2683_v12 = vsel %vm9890_vm6, %v2682_v16, %v2678_v52  ;;  %v2807_v60 = vsub.f32 1.0, %v2806_v24  ;;  %vm2811_vm3 = vweird.f32 %v9934_v51  ;;  %v2791_v2 = vmul.f32 %v9954_v62, %v9875_v63  ;;  %v10020_v15 = vpop.f32.mrf.mxu1  ;;  %v6210_v24 = vld [vmem:[%s6682_s1 + $0x90] sm:$0xff] }
 0x274   : > { %v4620_v20 = vmul.f32 %v2683_v12, %v9541_v23  ;;  %v2799_v22 = vand.u32 2147483647, %v9875_v63  ;;  %4814 = vst [vmem:[%s8663_s10 + $0x8] sm:$0xff] %v4610_v61  ;;  %v2663_v13 = vsel %vm2662_vm2, %v9898_v11, %v2659_v28  ;;  %v2802_v23 = vor.u32 1.1754944e-38, %v2801_v18  ;;  %1649 = vmatmul.f32.gmra.mxu2 %v6208_v10  ;;  %1714 = vmatmul.f32.gmra.mxu3 %v6209_v27  ;;  %vm2812_vm6 = vmor %vm2810_vm14, %vm2811_vm3  ;;  %v6211_v18 = vld [vmem:[%s6682_s1 + $0x98] sm:$0xff] }
 0x275   : > { %v2808_v35 = vmul.f32 %v9934_v51, %v2807_v60  ;;  %vm2945_vm4 = vweird.f32 %v9906_v21  ;;  %5900 = vpow2.f32 %v9834_v32  ;;  %v9982_v4 = vpop.eup %5898  ;;  %v2668_v33 = vsel %vm9913_vm11, %v2667_v0, %v2663_v13  ;;  %1779 = vmatmul.f32.gmra.mxu0 %v6208_v10  ;;  %1844 = vmatmul.f32.gmra.mxu1 %v6209_v27 }
 0x276   : > { %4819 = vst [vmem:[%s8663_s10 + $0x30] sm:$0xff] %v4620_v20  ;;  %v2792_v16 = vsub.f32 1.0, %v2791_v2  ;;  %vm2796_vm5 = vweird.f32 %v9954_v62  ;;  %5902 = vpow2.f32 %v9837_v40  ;;  %v4619_v29 = vmul.f32 %v2668_v33, %v9753_v7 }
 0x277   : > { %v2809_v32 = vadd.f32 %v9934_v51, %v2808_v35  ;;  %v2941_v11 = vmul.f32 %v9982_v4, %v9906_v21  ;;  %v2949_v46 = vand.u32 2147483647, %v9906_v21  ;;  %v2951_v7 = vand.u32 2147483648, %v9906_v21  ;;  %vm2797_vm8 = vmor %vm2795_vm1, %vm2796_vm5 }
 0x278   : > { %v2793_v40 = vmul.f32 %v9954_v62, %v2792_v16  ;;  %v5291_v36 = vmul.f32 -1.442695, %v9818_v38  ;;  %v5301_v39 = vmul.f32 -1.442695, %v9823_v14  ;;  %4818 = vst [vmem:[%s8663_s10 + $0x28] sm:$0xff] %v4619_v29  ;;  %v10012_v50 = vadd.f32 %v9827_v5, %v9825_v47  ;;  %v10051_v42 = vpop.f32.mrf.mxu2 }
 0x279   : > { %v2813_v3 = vsel %vm2812_vm6, %v9934_v51, %v2809_v32  ;;  %v2942_v43 = vsub.f32 1.0, %v2941_v11  ;;  %v10016_v54 = vadd.f32 %v9856_v25, %v9854_v53  ;;  %vm2946_vm7 = vweird.f32 %v9982_v4 }
 0x27a   : > { %v2818_v34 = vsel %vm9959_vm0, %v2817_v8, %v2813_v3  ;;  %v2794_v56 = vadd.f32 %v9954_v62, %v2793_v40  ;;  %5904 = vpow2.f32 %v5291_v36  ;;  %v5300_v25 = vmul.f32 -1.442695, %v10012_v50  ;;  %vm2947_vm10 = vmor %vm2945_vm4, %vm2946_vm7  ;;  %v10065_v20 = vpop.f32.mrf.mxu0  ;;  %v6213_v40 = vld [vmem:[%s6682_s1 + $0xa8] sm:$0xff] }
 0x27b   : > { %v5901_v47 = vpop.eup %5900  ;;  %v4629_v5 = vmul.f32 %v2818_v34, %v9774_v41  ;;  %v2943_v53 = vmul.f32 %v9982_v4, %v2942_v43  ;;  %5906 = vpow2.f32 %v5301_v39  ;;  %vm2800_vm9 = vcmp.eq.f32.partialorder %v2799_v22, 8.507059e+37  ;;  %v10067_v2 = vpop.f32.mrf.mxu1 }
 0x27c   : > { %v5903_v48 = vpop.eup %5902  ;;  %v2798_v17 = vsel %vm2797_vm8, %v9954_v62, %v2794_v56  ;;  %v10034_v0 = vadd.f32 1.0, %v5901_v47  ;;  %v5310_v41 = vmul.f32 -1.442695, %v10016_v54  ;;  %5908 = vpow2.f32 %v5300_v25  ;;  %1652 = vmatmul.f32.gmra.mxu2 %v6210_v24  ;;  %1717 = vmatmul.f32.gmra.mxu3 %v6211_v18 }
 0x27d   : > { %4823 = vst [vmem:[%s8663_s10 + $0x50] sm:$0xff] %v4629_v5  ;;  %v2803_v51 = vsel %vm2800_vm9, %v2802_v23, %v2798_v17  ;;  %v2944_v63 = vadd.f32 %v9982_v4, %v2943_v53  ;;  %v10039_v37 = vadd.f32 1.0, %v5903_v48  ;;  %v2952_v19 = vor.u32 1.1754944e-38, %v2951_v7  ;;  %1782 = vmatmul.f32.gmra.mxu0 %v6210_v24  ;;  %1847 = vmatmul.f32.gmra.mxu1 %v6211_v18 }
 0x27e   : > { %v4628_v55 = vmul.f32 %v2803_v51, %v9778_v58  ;;  %5910 = vrcp.f32 %v10034_v0  ;;  %vm2950_vm11 = vcmp.eq.f32.partialorder %v2949_v46, 8.507059e+37  ;;  %v10053_v58 = vpop.f32.mrf.mxu3  ;;  %v2934_v30 = vand.u32 2147483647, %v10034_v0  ;;  %v6212_v46 = vld [vmem:[%s6682_s1 + $0xa0] sm:$0xff] }
 0x27f   : > { %v2948_v62 = vsel %vm2947_vm10, %v9982_v4, %v2944_v63  ;;  %5912 = vrcp.f32 %v10039_v37  ;;  %v10059_v8 = vadd.f32 %v9919_v59, %v9917_v1  ;;  %v2936_v28 = vand.u32 2147483648, %v10034_v0 }
 0x280   : > { %v5905_v52 = vpop.eup %5904  ;;  %4822 = vst [vmem:[%s8663_s10 + $0x48] sm:$0xff] %v4628_v55  ;;  %v2953_v21 = vsel %vm2950_vm11, %v2952_v19, %v2948_v62  ;;  %5914 = vpow2.f32 %v5310_v41  ;;  %v3084_v22 = vand.u32 2147483647, %v10039_v37  ;;  %v3086_v1 = vand.u32 2147483648, %v10039_v37  ;;  %v10103_v34 = vpop.f32.mrf.mxu2 }
 0x281   : > { %v5907_v61 = vpop.eup %5906  ;;  %v4638_v12 = vmul.f32 %v2953_v21, %v9790_v26  ;;  %v10063_v60 = vadd.f32 1.0, %v5905_v52  ;;  %vm2930_vm12 = vweird.f32 %v10034_v0  ;;  %vm3080_vm13 = vweird.f32 %v10039_v37  ;;  %v6217_v52 = vld [vmem:[%s6682_s1 + $0xc8] sm:$0xff] }
 0x282   : > { %v10070_v13 = vadd.f32 1.0, %v5907_v61  ;;  %v5909_v35 = vpop.eup %5908  ;;  %v5309_v59 = vmul.f32 -1.442695, %v10059_v8  ;;  %vm10085_vm14 = vcmp.eq.f32.partialorder %v2934_v30, 8.507059e+37  ;;  %v2937_v16 = vor.u32 1.1754944e-38, %v2936_v28  ;;  %v10128_v19 = vpop.f32.mrf.mxu0 }
 0x283   : > { %4827 = vst [vmem:[%s8663_s10 + $0x70] sm:$0xff] %v4638_v12  ;;  %5916 = vrcp.f32 %v10063_v60  ;;  %v3071_v10 = vand.u32 2147483648, %v10063_v60  ;;  %vm10092_vm15 = vcmp.eq.f32.partialorder %v3084_v22, 8.507059e+37  ;;  %v3069_v32 = vand.u32 2147483647, %v10063_v60  ;;  %v10130_v24 = vpop.f32.mrf.mxu1 }
 0x284   : > { %v10075_v26 = vpop.eup %5910  ;;  %5918 = vrcp.f32 %v10070_v13  ;;  %v3221_v11 = vand.u32 2147483648, %v10070_v13  ;;  %1655 = vmatmul.f32.gmra.mxu2 %v6212_v46  ;;  %1720 = vmatmul.f32.gmra.mxu3 %v6213_v40  ;;  %v3087_v39 = vor.u32 1.1754944e-38, %v3086_v1  ;;  %v3219_v3 = vand.u32 2147483647, %v10070_v13  ;;  %v6215_v1 = vld [vmem:[%s6682_s1 + $0xb8] sm:$0xff] }
 0x285   : > { %v10081_v23 = vpop.eup %5912  ;;  %v2926_v4 = vmul.f32 %v10075_v26, %v10034_v0  ;;  %v10101_v43 = vadd.f32 1.0, %v5909_v35  ;;  %vm3065_vm0 = vweird.f32 %v10063_v60  ;;  %5920 = vpow2.f32 %v5309_v59  ;;  %1785 = vmatmul.f32.gmra.mxu0 %v6212_v46  ;;  %1850 = vmatmul.f32.gmra.mxu1 %v6213_v40  ;;  %v6214_v35 = vld [vmem:[%s6682_s1 + $0xb0] sm:$0xff] }
 0x286   : > { %v3076_v27 = vmul.f32 %v10081_v23, %v10039_v37  ;;  %v5915_v7 = vpop.eup %5914  ;;  %v10105_v56 = vpop.f32.mrf.mxu3  ;;  %vm2931_vm1 = vweird.f32 %v10075_v26  ;;  %v10114_v48 = vor.u32 1.1754944e-38, %v3071_v10  ;;  %vm3215_vm2 = vweird.f32 %v10070_v13 }
 0x287   : > { %v2927_v36 = vsub.f32 1.0, %v2926_v4  ;;  %v10108_v5 = vadd.f32 1.0, %v5915_v7  ;;  %5922 = vrcp.f32 %v10101_v43  ;;  %vm3081_vm3 = vweird.f32 %v10081_v23  ;;  %vm2932_vm6 = vmor %vm2930_vm12, %vm2931_vm1 }
 0x288   : > { %v3077_v47 = vsub.f32 1.0, %v3076_v27  ;;  %vm10124_vm4 = vcmp.eq.f32.partialorder %v3069_v32, 8.507059e+37  ;;  %v3222_v55 = vor.u32 1.1754944e-38, %v3221_v11  ;;  %vm10135_vm5 = vcmp.eq.f32.partialorder %v3219_v3, 8.507059e+37  ;;  %vm10162_vm7 = vmor %vm3080_vm13, %vm3081_vm3  ;;  %v10190_v10 = vpop.f32.mrf.mxu2 }
 0x289   : > { %v10110_v53 = vpop.eup %5916  ;;  %v2928_v25 = vmul.f32 %v10075_v26, %v2927_v36  ;;  %v10141_v21 = vadd.f32 %v9932_v44, %v9930_v49  ;;  %v10145_v30 = vadd.f32 %v9998_v9, %v9996_v57  ;;  %5924 = vrcp.f32 %v10108_v5 }
 0x28a   : > { %v10118_v17 = vpop.eup %5918  ;;  %v3078_v41 = vmul.f32 %v10081_v23, %v3077_v47  ;;  %v3061_v51 = vmul.f32 %v10110_v53, %v10063_v60  ;;  %v10155_v49 = vadd.f32 %v10020_v15, %v10018_v45  ;;  %v3204_v0 = vand.u32 2147483647, %v10101_v43 }
 0x28b   : > { %v2929_v18 = vadd.f32 %v10075_v26, %v2928_v25  ;;  %v3211_v62 = vmul.f32 %v10118_v17, %v10070_v13  ;;  %v10169_v28 = vadd.f32 %v10053_v58, %v10051_v42  ;;  %v5921_v22 = vpop.eup %5920  ;;  %vm3066_vm8 = vweird.f32 %v10110_v53  ;;  %v10227_v25 = vpop.f32.mrf.mxu0 }
 0x28c   : > { %v3079_v61 = vadd.f32 %v10081_v23, %v3078_v41  ;;  %v3062_v12 = vsub.f32 1.0, %v3061_v51  ;;  %vm3200_vm9 = vweird.f32 %v10101_v43  ;;  %1658 = vmatmul.f32.gmra.mxu2 %v6214_v35  ;;  %1723 = vmatmul.f32.gmra.mxu3 %v6215_v1  ;;  %vm3216_vm10 = vweird.f32 %v10118_v17  ;;  %vm3067_vm11 = vmor %vm3065_vm0, %vm3066_vm8 }
 0x28d   : > { %v2933_v44 = vsel %vm2932_vm6, %v10075_v26, %v2929_v18  ;;  %v3212_v9 = vsub.f32 1.0, %v3211_v62  ;;  %v5923_v42 = vpop.eup %5922  ;;  %vm10200_vm13 = vcmp.eq.f32.partialorder %v3204_v0, 8.507059e+37  ;;  %v10204_v29 = vadd.f32 1.0, %v5921_v22  ;;  %1788 = vmatmul.f32.gmra.mxu0 %v6214_v35  ;;  %1853 = vmatmul.f32.gmra.mxu1 %v6215_v1  ;;  %v6216_v62 = vld [vmem:[%s6682_s1 + $0xc0] sm:$0xff] }
 0x28e   : > { %v2938_v45 = vsel %vm10085_vm14, %v2937_v16, %v2933_v44  ;;  %v3083_v15 = vsel %vm10162_vm7, %v10081_v23, %v3079_v61  ;;  %v3063_v37 = vmul.f32 %v10110_v53, %v3062_v12  ;;  %v3196_v33 = vmul.f32 %v5923_v42, %v10101_v43  ;;  %v10192_v27 = vpop.f32.mrf.mxu3  ;;  %vm3217_vm14 = vmor %vm3215_vm2, %vm3216_vm10 }
 0x28f   : > { %v4637_v58 = vmul.f32 %v2938_v45, %v9808_v31  ;;  %v3088_v26 = vsel %vm10092_vm15, %v3087_v39, %v3083_v15  ;;  %v3213_v59 = vmul.f32 %v10118_v17, %v3212_v9  ;;  %v3206_v16 = vand.u32 2147483648, %v10101_v43  ;;  %v10206_v32 = vpop.eup %5924 }
 0x290   : > { %v4647_v23 = vmul.f32 %v3088_v26, %v9812_v6  ;;  %v3064_v4 = vadd.f32 %v10110_v53, %v3063_v37  ;;  %vm3201_vm12 = vweird.f32 %v5923_v42  ;;  %v3197_v60 = vsub.f32 1.0, %v3196_v33  ;;  %v6219_v6 = vld [vmem:[%s6682_s1 + $0xd8] sm:$0xff] }
 0x291   : > { %4826 = vst [vmem:[%s8663_s10 + $0x68] sm:$0xff] %v4637_v58  ;;  %v3214_v31 = vadd.f32 %v10118_v17, %v3213_v59  ;;  %v5319_v46 = vmul.f32 -1.442695, %v10141_v21  ;;  %v5318_v40 = vmul.f32 -1.442695, %v10145_v30  ;;  %v3346_v39 = vmul.f32 %v10206_v32, %v10108_v5  ;;  %vm3202_vm15 = vmor %vm3200_vm9, %vm3201_vm12 }
 0x292   : > { %4831 = vst [vmem:[%s8663_s10 + $0x90] sm:$0xff] %v4647_v23  ;;  %v3068_v11 = vsel %vm3067_vm11, %v10110_v53, %v3064_v4  ;;  %v5328_v3 = vmul.f32 -1.442695, %v10155_v49  ;;  %v3198_v53 = vmul.f32 %v5923_v42, %v3197_v60  ;;  %5926 = vrcp.f32 %v10204_v29 }
 0x293   : > { %v3073_v7 = vsel %vm10124_vm4, %v10114_v48, %v3068_v11  ;;  %v3218_v36 = vsel %vm3217_vm14, %v10118_v17, %v3214_v31  ;;  %v10229_v48 = vpop.f32.mrf.mxu1  ;;  %v3207_v41 = vor.u32 1.1754944e-38, %v3206_v16  ;;  %v3347_v51 = vsub.f32 1.0, %v3346_v39  ;;  %v1532_v1 = vpop.f32.mrf.mxu0  ;;  %v6218_v31 = vld [vmem:[%s6682_s1 + $0xd0] sm:$0xff] }
 0x294   : > { %v4646_v13 = vmul.f32 %v3073_v7, %v9818_v38  ;;  %v3223_v47 = vsel %vm10135_vm5, %v3222_v55, %v3218_v36  ;;  %v3354_v63 = vand.u32 2147483647, %v10108_v5  ;;  %v3199_v38 = vadd.f32 %v5923_v42, %v3198_v53  ;;  %1661 = vmatmul.f32.gmra.mxu2 %v6216_v62  ;;  %1726 = vmatmul.f32.gmra.mxu3 %v6217_v52 }
 0x295   : > { %v4656_v17 = vmul.f32 %v3223_v47, %v9823_v14  ;;  %v3356_v18 = vand.u32 2147483648, %v10108_v5  ;;  %5928 = vpow2.f32 %v5319_v46  ;;  %v5327_v55 = vmul.f32 -1.442695, %v10169_v28  ;;  %1791 = vmatmul.f32.gmra.mxu0 %v6216_v62  ;;  %1856 = vmatmul.f32.gmra.mxu1 %v6217_v52 }
 0x296   : > { %4830 = vst [vmem:[%s8663_s10 + $0x88] sm:$0xff] %v4646_v13  ;;  %v3348_v14 = vmul.f32 %v10206_v32, %v3347_v51  ;;  %vm3351_vm0 = vweird.f32 %v10206_v32  ;;  %5930 = vpow2.f32 %v5318_v40  ;;  %v10246_v61 = vadd.f32 %v10067_v2, %v10065_v20  ;;  %v1464_v22 = vpop.f32.mrf.mxu3 }
 0x297   : > { %4835 = vst [vmem:[%s8663_s10 + $0xb0] sm:$0xff] %v4656_v17  ;;  %v3203_v12 = vsel %vm3202_vm15, %v5923_v42, %v3199_v38  ;;  %vm3350_vm1 = vweird.f32 %v10108_v5  ;;  %5932 = vpow2.f32 %v5328_v3  ;;  %v10251_v44 = vadd.f32 %v10105_v56, %v10103_v34  ;;  %v1399_v56 = vpop.f32.mrf.mxu2 }
 0x298   : > { %v3208_v43 = vsel %vm10200_vm13, %v3207_v41, %v3203_v12  ;;  %v3349_v57 = vadd.f32 %v10206_v32, %v3348_v14  ;;  %5934 = vpow2.f32 %v5327_v55  ;;  %v5337_v9 = vmul.f32 -1.442695, %v10246_v61  ;;  %v10257_v0 = vpop.eup %5926  ;;  %vm3352_vm2 = vmor %vm3350_vm1, %vm3351_vm0 }
 0x299   : > { %v4655_v20 = vmul.f32 %v3208_v43, %v10012_v50  ;;  %v3357_v2 = vor.u32 1.1754944e-38, %v3356_v18  ;;  %v5336_v5 = vmul.f32 -1.442695, %v10251_v44  ;;  %v10263_v34 = vadd.f32 %v10130_v24, %v10128_v19 }
 0x29a   : > { %v3353_v45 = vsel %vm3352_vm2, %v10206_v32, %v3349_v57  ;;  %vm3355_vm3 = vcmp.eq.f32.partialorder %v3354_v63, 8.507059e+37  ;;  %v3331_v15 = vmul.f32 %v10257_v0, %v10204_v29  ;;  %5936 = vpow2.f32 %v5337_v9 }
 0x29b   : > { %v5929_v50 = vpop.eup %5928  ;;  %4834 = vst [vmem:[%s8663_s10 + $0xa8] sm:$0xff] %v4655_v20  ;;  %v3358_v37 = vsel %vm3355_vm3, %v3357_v2, %v3353_v45  ;;  %v3339_v35 = vand.u32 2147483647, %v10204_v29  ;;  %v3341_v19 = vand.u32 2147483648, %v10204_v29  ;;  %v10273_v24 = vadd.f32 %v10192_v27, %v10190_v10  ;;  %v1597_v42 = vpop.f32.mrf.mxu1  ;;  %v6221_v20 = vld [vmem:[%s6682_s1 + $0xe8] sm:$0xff] }
 0x29c   : > { %v5931_v58 = vpop.eup %5930  ;;  %v4665_v26 = vmul.f32 %v3358_v37, %v10016_v54  ;;  %v3332_v59 = vsub.f32 1.0, %v3331_v15  ;;  %v10276_v23 = vadd.f32 1.0, %v5929_v50  ;;  %v5346_v4 = vmul.f32 -1.442695, %v10263_v34  ;;  %1664 = vmatmul.f32.gmra.mxu2 %v6218_v31  ;;  %1729 = vmatmul.f32.gmra.mxu3 %v6219_v6  ;;  %v10324_v38 = vpop.f32.mrf.mxu0 }
 0x29d   : > { %v5933_v33 = vpop.eup %5932  ;;  %v10279_v16 = vadd.f32 1.0, %v5931_v58  ;;  %5938 = vpow2.f32 %v5336_v5  ;;  %vm3335_vm4 = vweird.f32 %v10204_v29  ;;  %vm3336_vm5 = vweird.f32 %v10257_v0  ;;  %1794 = vmatmul.f32.gmra.mxu0 %v6218_v31  ;;  %1859 = vmatmul.f32.gmra.mxu1 %v6219_v6 }
 0x29e   : > { %v5935_v10 = vpop.eup %5934  ;;  %4839 = vst [vmem:[%s8663_s10 + $0xd0] sm:$0xff] %v4665_v26  ;;  %v3333_v27 = vmul.f32 %v10257_v0, %v3332_v59  ;;  %5940 = vrcp.f32 %v10276_v23  ;;  %vm10288_vm6 = vcmp.eq.f32.partialorder %v3339_v35, 8.507059e+37  ;;  %v3342_v32 = vor.u32 1.1754944e-38, %v3341_v19  ;;  %vm3337_vm7 = vmor %vm3335_vm4, %vm3336_vm5  ;;  %v10311_v47 = vpop.f32.mrf.mxu3 }
 0x29f   : > { %5942 = vrcp.f32 %v10279_v16  ;;  %v10294_v11 = vmul.f32 -1.442695, %v10273_v24  ;;  %v10297_v40 = vadd.f32 1.0, %v5933_v33  ;;  %v10301_v29 = vadd.f32 %v10229_v48, %v10227_v25  ;;  %v10309_v13 = vpop.f32.mrf.mxu2 }
 0x2a0   : > { %v5937_v60 = vpop.eup %5936  ;;  %v3334_v46 = vadd.f32 %v10257_v0, %v3333_v27  ;;  %5944 = vpow2.f32 %v5346_v4  ;;  %v3489_v7 = vand.u32 2147483647, %v10276_v23  ;;  %v3491_v36 = vand.u32 2147483648, %v10276_v23 }
 0x2a1   : > { %v10305_v39 = vadd.f32 1.0, %v5935_v10  ;;  %v10307_v3 = vadd.f32 %v1464_v22, %v1399_v56  ;;  %v3474_v17 = vand.u32 2147483647, %v10279_v16  ;;  %v3476_v25 = vand.u32 2147483648, %v10279_v16 }
 0x2a2   : > { %v3338_v53 = vsel %vm3337_vm7, %v10257_v0, %v3334_v46  ;;  %5946 = vrcp.f32 %v10297_v40  ;;  %v10320_v51 = vadd.f32 1.0, %v5937_v60  ;;  %v10322_v63 = vadd.f32 %v1597_v42, %v1532_v1  ;;  %v6220_v0 = vld [vmem:[%s6682_s1 + $0xe0] sm:$0xff] }
 0x2a3   : > { %v5939_v48 = vpop.eup %5938  ;;  %v3343_v41 = vsel %vm10288_vm6, %v3342_v32, %v3338_v53  ;;  %5948 = vrcp.f32 %v10305_v39  ;;  %v10326_v18 = vpop.f32.mrf.mxu1  ;;  %vm3485_vm8 = vweird.f32 %v10276_v23  ;;  %vm3470_vm9 = vweird.f32 %v10279_v16 }
 0x2a4   : > { %v10328_v55 = vpop.eup %5940  ;;  %v4664_v62 = vmul.f32 %v3343_v41, %v10059_v8  ;;  %v3626_v52 = vand.u32 2147483648, %v10297_v40  ;;  %vm10338_vm10 = vcmp.eq.f32.partialorder %v3489_v7, 8.507059e+37  ;;  %v3492_v57 = vor.u32 1.1754944e-38, %v3491_v36  ;;  %1667 = vmatmul.f32.gmra.mxu2 %v6220_v0  ;;  %1732 = vmatmul.f32.gmra.mxu3 %v6221_v20 }
 0x2a5   : > { %v10334_v14 = vpop.eup %5942  ;;  %v3481_v12 = vmul.f32 %v10328_v55, %v10276_v23  ;;  %v3624_v9 = vand.u32 2147483647, %v10297_v40  ;;  %v3611_v8 = vand.u32 2147483648, %v10305_v39  ;;  %vm10349_vm11 = vcmp.eq.f32.partialorder %v3474_v17, 8.507059e+37  ;;  %1797 = vmatmul.f32.gmra.mxu0 %v6220_v0  ;;  %1862 = vmatmul.f32.gmra.mxu1 %v6221_v20 }
 0x2a6   : > { %v5945_v2 = vpop.eup %5944  ;;  %4838 = vst [vmem:[%s8663_s10 + $0xc8] sm:$0xff] %v4664_v62  ;;  %v3466_v5 = vmul.f32 %v10334_v14, %v10279_v16  ;;  %v3477_v22 = vor.u32 1.1754944e-38, %v3476_v25  ;;  %v3609_v45 = vand.u32 2147483647, %v10305_v39  ;;  %vm3486_vm12 = vweird.f32 %v10328_v55  ;;  %v10380_v31 = vpop.f32.mrf.mxu3 }
 0x2a7   : > { %v3482_v15 = vsub.f32 1.0, %v3481_v12  ;;  %vm3620_vm13 = vweird.f32 %v10297_v40  ;;  %5950 = vrcp.f32 %v10320_v51  ;;  %vm3471_vm14 = vweird.f32 %v10334_v14  ;;  %v10378_v33 = vpop.f32.mrf.mxu2  ;;  %vm10398_vm3 = vmor %vm3485_vm8, %vm3486_vm12 }
 0x2a8   : > { %v10357_v50 = vpop.eup %5946  ;;  %v3467_v37 = vsub.f32 1.0, %v3466_v5  ;;  %v10360_v35 = vor.u32 1.1754944e-38, %v3626_v52  ;;  %vm3605_vm15 = vweird.f32 %v10305_v39  ;;  %v10363_v19 = vadd.f32 1.0, %v5939_v48  ;;  %vm10415_vm6 = vmor %vm3470_vm9, %vm3471_vm14  ;;  %v10422_v52 = vpop.f32.mrf.mxu0 }
 0x2a9   : > { %v10365_v1 = vpop.eup %5948  ;;  %v3483_v42 = vmul.f32 %v10328_v55, %v3482_v15  ;;  %v3616_v58 = vmul.f32 %v10357_v50, %v10297_v40  ;;  %vm10370_vm0 = vcmp.eq.f32.partialorder %v3624_v9, 8.507059e+37  ;;  %v10374_v59 = vor.u32 1.1754944e-38, %v3611_v8  ;;  %v6222_v9 = vld [vmem:[%s6682_s1 + $0xf0] sm:$0xff] }
 0x2aa   : > { %v10376_v4 = vadd.f32 1.0, %v5945_v2  ;;  %v3468_v6 = vmul.f32 %v10334_v14, %v3467_v37  ;;  %v3601_v10 = vmul.f32 %v10365_v1, %v10305_v39  ;;  %vm10385_vm1 = vcmp.eq.f32.partialorder %v3609_v45, 8.507059e+37 }
 0x2ab   : > { %v3759_v54 = vand.u32 2147483647, %v10320_v51  ;;  %v3761_v32 = vand.u32 2147483648, %v10320_v51  ;;  %v3484_v60 = vadd.f32 %v10328_v55, %v3483_v42  ;;  %v3617_v46 = vsub.f32 1.0, %v3616_v58  ;;  %v10424_v12 = vpop.f32.mrf.mxu1 }
 0x2ac   : > { %vm3621_vm2 = vweird.f32 %v10357_v50  ;;  %5952 = vrcp.f32 %v10363_v19  ;;  %v3469_v36 = vadd.f32 %v10334_v14, %v3468_v6  ;;  %v3602_v53 = vsub.f32 1.0, %v3601_v10  ;;  %1670 = vmatmul.f32.gmra.mxu2 %v6222_v9 }
 0x2ad   : > { %vm3606_vm4 = vweird.f32 %v10365_v1  ;;  %vm3755_vm5 = vweird.f32 %v10320_v51  ;;  %v3744_v17 = vand.u32 2147483647, %v10363_v19  ;;  %v10406_v25 = vpop.eup %5950  ;;  %v3488_v23 = vsel %vm10398_vm3, %v10328_v55, %v3484_v60  ;;  %v6223_v55 = vld [vmem:[%s6682_s1 + $0xf8] sm:$0xff]  ;;  %vm3622_vm8 = vmor %vm3620_vm13, %vm3621_vm2  ;;  %1800 = vmatmul.f32.gmra.mxu0 %v6222_v9  ;;  %s6360_s1 = sshra.s32 %s4981_s15, 4  ;;  %s6361_s1 = int_to_ptr.hbm [resolvable:$true] %s6360_s1 }
 0x2ae   : > { %v3618_v41 = vmul.f32 %v10357_v50, %v3617_v46  ;;  %v3746_v62 = vand.u32 2147483648, %v10363_v19  ;;  %5954 = vrcp.f32 %v10376_v4  ;;  %1735 = vmatmul.f32.gmra.mxu3 %v6223_v55  ;;  %v3493_v16 = vsel %vm10338_vm10, %v3492_v57, %v3488_v23  ;;  %vm10456_vm9 = vmor %vm3605_vm15, %vm3606_vm4  ;;  %v10478_v10 = vpop.f32.mrf.mxu3  ;;  %1865 = vmatmul.f32.gmra.mxu1 %v6223_v55  ;;  %s6362_s30 = scalar_lea.hbm %s6361_s1, 512  ;;  %p6367_p11 = scmp.lt.s32.totalorder %s6361_s1, %s11692_s4 }
 0x2af   : > { %v3473_v8 = vsel %vm10415_vm6, %v10334_v14, %v3469_v36  ;;  %v3603_v0 = vmul.f32 %v10365_v1, %v3602_v53  ;;  %v3751_v20 = vmul.f32 %v10406_v25, %v10320_v51  ;;  %v4674_v2 = vmul.f32 %v3493_v16, %v10141_v21  ;;  %v10476_v6 = vpop.f32.mrf.mxu2  ;;  %p6363_p1 = scmp.ne.s32.totalorder %s6361_s1, %s6362_s30  ;;  %p6368_p9 = scmp.lt.s32.totalorder %s6366_s23, %s6362_s30 }
 0x2b0   : > { %v3478_v5 = vsel %vm10349_vm11, %v3477_v22, %v3473_v8  ;;  %v3619_v45 = vadd.f32 %v10357_v50, %v3618_v41  ;;  %vm10440_vm7 = vcmp.eq.f32.partialorder %v3759_v54, 8.507059e+37  ;;  %v3762_v15 = vor.u32 1.1754944e-38, %v3761_v32 }
 0x2b1   : > { %v4673_v57 = vmul.f32 %v3478_v5, %v10145_v30  ;;  %v3604_v14 = vadd.f32 %v10365_v1, %v3603_v0  ;;  %v3752_v21 = vsub.f32 1.0, %v3751_v20  ;;  %4843 = vst [vmem:[%s8663_s10 + $0xf0] sm:$0xff] %v4674_v2  ;;  %vm3756_vm10 = vweird.f32 %v10406_v25  ;;  %p6364_p4 = pnand %p6363_p1, %p6650_p7  ;;  %p6369_p2 = por %p6368_p9, %p6367_p11 }
 0x2b2   : > { %v5953_v56 = vpop.eup %5952  ;;  %v3623_v22 = vsel %vm3622_vm8, %v10357_v50, %v3619_v45  ;;  %vm3740_vm11 = vweird.f32 %v10363_v19  ;;  %v3747_v30 = vor.u32 1.1754944e-38, %v3746_v62  ;;  %vm10471_vm12 = vcmp.eq.f32.partialorder %v3744_v17, 8.507059e+37  ;;  %vm3757_vm14 = vmor %vm3755_vm5, %vm3756_vm10 }
 0x2b3   : > { %4842 = vst [vmem:[%s8663_s10 + $0xe8] sm:$0xff] %v4673_v57  ;;  %v3628_v40 = vsel %vm10370_vm0, %v10360_v35, %v3623_v22  ;;  %v3608_v50 = vsel %vm10456_vm9, %v10365_v1, %v3604_v14  ;;  %v3753_v39 = vmul.f32 %v10406_v25, %v3752_v21  ;;  %v3736_v42 = vmul.f32 %v5953_v56, %v10363_v19  ;;  %v1606_v48 = vpop.f32.mrf.mxu1  ;;  %p6365_p8 = pneg %p6364_p4 }
 0x2b4   : > { %vm3890_vm13 = vweird.f32 %v10376_v4  ;;  %v5955_v35 = vpop.eup %5954  ;;  %v4683_v26 = vmul.f32 %v3628_v40, %v10155_v49  ;;  %v3613_v1 = vsel %vm10385_vm1, %v10374_v59, %v3608_v50  ;;  %v3894_v54 = vand.u32 2147483647, %v10376_v4 }
 0x2b5   : > { %v3896_v32 = vand.u32 2147483648, %v10376_v4  ;;  %v4682_v60 = vmul.f32 %v3613_v1, %v10169_v28  ;;  %v3754_v46 = vadd.f32 %v10406_v25, %v3753_v39  ;;  %v3737_v7 = vsub.f32 1.0, %v3736_v42  ;;  %p6370_p10 = pnand %p6369_p2, %p6365_p8 }
 0x2b6   : > { %v3886_v36 = vmul.f32 %v5955_v35, %v10376_v4  ;;  %4847 = vst [vmem:[%s8663_s10 + $0x110] sm:$0xff] %v4683_v26  ;;  %vm3741_vm15 = vweird.f32 %v5953_v56  ;;  %vm3891_vm0 = vweird.f32 %v5955_v35  ;;  %5956 = vpow2.f32 %v10294_v11  ;;  %v1541_v11 = vpop.f32.mrf.mxu0  ;;  %v10536_v5 = vpop.f32.mrf.mxu3 }
 0x2b7   : > { %v5355_v49 = vmul.f32 -1.442695, %v10301_v29  ;;  %4846 = vst [vmem:[%s8663_s10 + $0x108] sm:$0xff] %v4682_v60  ;;  %v3758_v28 = vsel %vm3757_vm14, %v10406_v25, %v3754_v46  ;;  %v3738_v59 = vmul.f32 %v5953_v56, %v3737_v7  ;;  %v5354_v53 = vmul.f32 -1.442695, %v10307_v3  ;;  %vm3742_vm1 = vmor %vm3740_vm11, %vm3741_vm15  ;;  %v10534_v2 = vpop.f32.mrf.mxu2 }
 0x2b8   : > { %v3887_v27 = vsub.f32 1.0, %v3886_v36  ;;  %v3763_v17 = vsel %vm10440_vm7, %v3762_v15, %v3758_v28  ;;  %v5364_v51 = vmul.f32 -1.442695, %v10322_v63  ;;  %v10504_v23 = vadd.f32 %v10311_v47, %v10309_v13  ;;  %vm3892_vm3 = vmor %vm3890_vm13, %vm3891_vm0 }
 0x2b9   : > { %5958 = vpow2.f32 %v5355_v49  ;;  %v4692_v41 = vmul.f32 %v3763_v17, %v10246_v61  ;;  %v3739_v25 = vadd.f32 %v5953_v56, %v3738_v59  ;;  %v10513_v55 = vadd.f32 %v10326_v18, %v10324_v38 }
 0x2ba   : > { %v3888_v62 = vmul.f32 %v5955_v35, %v3887_v27  ;;  %5960 = vpow2.f32 %v5354_v53  ;;  %v5363_v9 = vmul.f32 -1.442695, %v10504_v23  ;;  %v10517_v13 = vadd.f32 %v10380_v31, %v10378_v33 }
 0x2bb   : > { %5962 = vpow2.f32 %v5364_v51  ;;  %4851 = vst [vmem:[%s8663_s10 + $0x130] sm:$0xff] %v4692_v41  ;;  %v3743_v61 = vsel %vm3742_vm1, %v5953_v56, %v3739_v25  ;;  %vm3895_vm2 = vcmp.eq.f32.partialorder %v3894_v54, 8.507059e+37  ;;  %v3897_v16 = vor.u32 1.1754944e-38, %v3896_v32  ;;  %v10559_v37 = vpop.f32.mrf.mxu1 }
 0x2bc   : > { %v3889_v47 = vadd.f32 %v5955_v35, %v3888_v62  ;;  %v5957_v8 = vpop.eup %5956  ;;  %v3748_v19 = vsel %vm10471_vm12, %v3747_v30, %v3743_v61  ;;  %v5373_v38 = vmul.f32 -1.442695, %v10513_v55  ;;  %v5372_v18 = vmul.f32 -1.442695, %v10517_v13 }
 0x2bd   : > { %v10529_v33 = vadd.f32 %v10424_v12, %v10422_v52  ;;  %v4691_v31 = vmul.f32 %v3748_v19, %v10251_v44  ;;  %v10532_v20 = vadd.f32 1.0, %v5957_v8  ;;  %5964 = vpow2.f32 %v5363_v9 }
 0x2be   : > { %v3893_v0 = vsel %vm3892_vm3, %v5955_v35, %v3889_v47  ;;  %5966 = vpow2.f32 %v5373_v38  ;;  %v10547_v14 = vadd.f32 %v10478_v10, %v10476_v6  ;;  %v10553_v56 = vadd.f32 %v1606_v48, %v1541_v11  ;;  %v10557_v22 = vpop.f32.mrf.mxu0  ;;  %v10589_v59 = vpop.f32.mrf.mxu3 }
 0x2bf   : > { %v5959_v4 = vpop.eup %5958  ;;  %v3898_v45 = vsel %vm3895_vm2, %v3897_v16, %v3893_v0  ;;  %4850 = vst [vmem:[%s8663_s10 + $0x128] sm:$0xff] %v4691_v31  ;;  %5968 = vrcp.f32 %v10532_v20  ;;  %v5382_v15 = vmul.f32 -1.442695, %v10529_v33  ;;  %v3881_v40 = vand.u32 2147483648, %v10532_v20  ;;  %v10587_v28 = vpop.f32.mrf.mxu2 }
 0x2c0   : > { %v5961_v43 = vpop.eup %5960  ;;  %v4701_v57 = vmul.f32 %v3898_v45, %v10263_v34  ;;  %v10541_v44 = vadd.f32 1.0, %v5959_v4  ;;  %5970 = vpow2.f32 %v5372_v18  ;;  %v3879_v34 = vand.u32 2147483647, %v10532_v20 }
 0x2c1   : > { %v5963_v52 = vpop.eup %5962  ;;  %v10543_v12 = vadd.f32 1.0, %v5961_v43  ;;  %vm3875_vm4 = vweird.f32 %v10532_v20  ;;  %v10567_v42 = vmul.f32 -1.442695, %v10547_v14  ;;  %v10572_v35 = vmul.f32 -1.442695, %v10553_v56 }
 0x2c2   : > { %4855 = vst [vmem:[%s8663_s10 + $0x150] sm:$0xff] %v4701_v57  ;;  %v10550_v21 = vadd.f32 1.0, %v5963_v52  ;;  %5972 = vrcp.f32 %v10541_v44  ;;  %v4031_v39 = vand.u32 2147483648, %v10541_v44  ;;  %v4029_v6 = vand.u32 2147483647, %v10541_v44 }
 0x2c3   : > { %v5965_v30 = vpop.eup %5964  ;;  %5974 = vrcp.f32 %v10543_v12  ;;  %v4014_v10 = vand.u32 2147483647, %v10543_v12  ;;  %vm10575_vm5 = vcmp.eq.f32.partialorder %v3879_v34, 8.507059e+37  ;;  %v4016_v32 = vand.u32 2147483648, %v10543_v12  ;;  %v10626_v57 = vpop.f32.mrf.mxu1 }
 0x2c4   : > { %v5967_v50 = vpop.eup %5966  ;;  %5976 = vrcp.f32 %v10550_v21  ;;  %v4166_v60 = vand.u32 2147483648, %v10550_v21  ;;  %v10581_v46 = vadd.f32 1.0, %v5965_v30  ;;  %v3882_v7 = vor.u32 1.1754944e-38, %v3881_v40 }
 0x2c5   : > { %v5969_v58 = vpop.eup %5968  ;;  %5978 = vpow2.f32 %v5382_v15  ;;  %vm4025_vm6 = vweird.f32 %v10541_v44  ;;  %v4164_v36 = vand.u32 2147483647, %v10550_v21  ;;  %v10585_v49 = vadd.f32 1.0, %v5967_v50 }
 0x2c6   : > { %v5971_v26 = vpop.eup %5970  ;;  %v3871_v1 = vmul.f32 %v5969_v58, %v10532_v20  ;;  %vm3876_vm7 = vweird.f32 %v5969_v58  ;;  %v4032_v17 = vor.u32 1.1754944e-38, %v4031_v39  ;;  %vm4010_vm8 = vweird.f32 %v10543_v12  ;;  %v10624_v43 = vpop.f32.mrf.mxu0 }
 0x2c7   : > { %5980 = vrcp.f32 %v10581_v46  ;;  %vm10599_vm9 = vcmp.eq.f32.partialorder %v4029_v6, 8.507059e+37  ;;  %vm4160_vm10 = vweird.f32 %v10550_v21  ;;  %v4151_v41 = vand.u32 2147483648, %v10581_v46  ;;  %vm3877_vm0 = vmor %vm3875_vm4, %vm3876_vm7 }
 0x2c8   : > { %v10591_v27 = vpop.eup %5972  ;;  %v3872_v53 = vsub.f32 1.0, %v3871_v1  ;;  %5982 = vrcp.f32 %v10585_v49  ;;  %v10606_v25 = vadd.f32 1.0, %v5971_v26  ;;  %vm10610_vm11 = vcmp.eq.f32.partialorder %v4014_v10, 8.507059e+37 }
 0x2c9   : > { %v10595_v51 = vpop.eup %5974  ;;  %v4021_v11 = vmul.f32 %v10591_v27, %v10541_v44  ;;  %v4017_v16 = vor.u32 1.1754944e-38, %v4016_v32  ;;  %v4167_v8 = vor.u32 1.1754944e-38, %v4166_v60  ;;  %vm4026_vm12 = vweird.f32 %v10591_v27  ;;  %v10660_v44 = vpop.f32.mrf.mxu3 }
 0x2ca   : > { %v5977_v62 = vpop.eup %5976  ;;  %v3873_v9 = vmul.f32 %v5969_v58, %v3872_v53  ;;  %v4006_v61 = vmul.f32 %v10595_v51, %v10543_v12  ;;  %vm10618_vm13 = vcmp.eq.f32.partialorder %v4164_v36, 8.507059e+37  ;;  %v4149_v0 = vand.u32 2147483647, %v10581_v46  ;;  %vm4027_vm4 = vmor %vm4025_vm6, %vm4026_vm12 }
 0x2cb   : > { %v10614_v19 = vpop.eup %5978  ;;  %v4022_v38 = vsub.f32 1.0, %v4021_v11  ;;  %v4156_v18 = vmul.f32 %v5977_v62, %v10550_v21  ;;  %vm4011_vm14 = vweird.f32 %v10595_v51  ;;  %vm4161_vm15 = vweird.f32 %v5977_v62  ;;  %v10658_v11 = vpop.f32.mrf.mxu2 }
 0x2cc   : > { %v3874_v4 = vadd.f32 %v5969_v58, %v3873_v9  ;;  %v4007_v45 = vsub.f32 1.0, %v4006_v61  ;;  %vm4145_vm1 = vweird.f32 %v10581_v46  ;;  %v4152_v34 = vor.u32 1.1754944e-38, %v4151_v41  ;;  %vm4162_vm6 = vmor %vm4160_vm10, %vm4161_vm15 }
 0x2cd   : > { %v4023_v52 = vmul.f32 %v10591_v27, %v4022_v38  ;;  %v4157_v15 = vsub.f32 1.0, %v4156_v18  ;;  %5984 = vrcp.f32 %v10606_v25  ;;  %v5981_v30 = vpop.eup %5980  ;;  %vm4295_vm2 = vweird.f32 %v10585_v49 }
 0x2ce   : > { %v3878_v40 = vsel %vm3877_vm0, %v5969_v58, %v3874_v4  ;;  %v4008_v50 = vmul.f32 %v10595_v51, %v4007_v45  ;;  %v4299_v39 = vand.u32 2147483647, %v10585_v49  ;;  %v5983_v6 = vpop.eup %5982  ;;  %v4141_v1 = vmul.f32 %v5981_v30, %v10581_v46  ;;  %v1762_v31 = vpop.f32.mrf.mxu0 }
 0x2cf   : > { %v3883_v20 = vsel %vm10575_vm5, %v3882_v7, %v3878_v40  ;;  %v4024_v10 = vadd.f32 %v10591_v27, %v4023_v52  ;;  %v4158_v26 = vmul.f32 %v5977_v62, %v4157_v15  ;;  %vm10641_vm3 = vcmp.eq.f32.partialorder %v4149_v0, 8.507059e+37  ;;  %vm4012_vm5 = vmor %vm4010_vm8, %vm4011_vm14 }
 0x2d0   : > { %v4700_v58 = vmul.f32 %v3883_v20, %v10273_v24  ;;  %v4009_v54 = vadd.f32 %v10595_v51, %v4008_v50  ;;  %v4291_v60 = vmul.f32 %v5983_v6, %v10585_v49  ;;  %v4301_v7 = vand.u32 2147483648, %v10585_v49 }
 0x2d1   : > { %v4028_v36 = vsel %vm4027_vm4, %v10591_v27, %v4024_v10  ;;  %v4159_v53 = vadd.f32 %v5977_v62, %v4158_v26  ;;  %v4142_v24 = vsub.f32 1.0, %v4141_v1  ;;  %vm4146_vm7 = vweird.f32 %v5981_v30 }
 0x2d2   : > { %4854 = vst [vmem:[%s8663_s10 + $0x148] sm:$0xff] %v4700_v58  ;;  %v4033_v41 = vsel %vm10599_vm9, %v4032_v17, %v4028_v36  ;;  %v4013_v9 = vsel %vm4012_vm5, %v10595_v51, %v4009_v54  ;;  %v4292_v12 = vsub.f32 1.0, %v4291_v60  ;;  %vm4296_vm8 = vweird.f32 %v5983_v6  ;;  %vm4147_vm10 = vmor %vm4145_vm1, %vm4146_vm7 }
 0x2d3   : > { %v5985_v27 = vpop.eup %5984  ;;  %v4710_v61 = vmul.f32 %v4033_v41, %v10301_v29  ;;  %v4018_v38 = vsel %vm10610_vm11, %v4017_v16, %v4013_v9  ;;  %v4163_v18 = vsel %vm4162_vm6, %v5977_v62, %v4159_v53  ;;  %v4143_v0 = vmul.f32 %v5981_v30, %v4142_v24  ;;  %vm4297_vm11 = vmor %vm4295_vm2, %vm4296_vm8 }
 0x2d4   : > { %v4709_v48 = vmul.f32 %v4018_v38, %v10307_v3  ;;  %v4168_v17 = vsel %vm10618_vm13, %v4167_v8, %v4163_v18  ;;  %v4293_v51 = vmul.f32 %v5983_v6, %v4292_v12  ;;  %v4276_v21 = vmul.f32 %v5985_v27, %v10606_v25 }
 0x2d5   : > { %4859 = vst [vmem:[%s8663_s10 + $0x170] sm:$0xff] %v4710_v61  ;;  %v4719_v4 = vmul.f32 %v4168_v17, %v10322_v63  ;;  %v4144_v45 = vadd.f32 %v5981_v30, %v4143_v0  ;;  %vm10678_vm9 = vcmp.eq.f32.partialorder %v4299_v39, 8.507059e+37  ;;  %v4302_v47 = vor.u32 1.1754944e-38, %v4301_v7  ;;  %v1827_v63 = vpop.f32.mrf.mxu1 }
 0x2d6   : > { %4858 = vst [vmem:[%s8663_s10 + $0x168] sm:$0xff] %v4709_v48  ;;  %v4294_v3 = vadd.f32 %v5983_v6, %v4293_v51  ;;  %v4277_v62 = vsub.f32 1.0, %v4276_v21  ;;  %v4286_v16 = vand.u32 2147483648, %v10606_v25  ;;  %v10688_v8 = vadd.f32 1.0, %v10614_v19 }
 0x2d7   : > { %4863 = vst [vmem:[%s8663_s10 + $0x190] sm:$0xff] %v4719_v4  ;;  %v4148_v52 = vsel %vm4147_vm10, %v5981_v30, %v4144_v45  ;;  %vm4281_vm12 = vweird.f32 %v5985_v27  ;;  %5986 = vpow2.f32 %v10567_v42  ;;  %v10697_v46 = vadd.f32 %v10536_v5, %v10534_v2 }
 0x2d8   : > { %v4153_v19 = vsel %vm10641_vm3, %v4152_v34, %v4148_v52  ;;  %v4298_v15 = vsel %vm4297_vm11, %v5983_v6, %v4294_v3  ;;  %v4278_v40 = vmul.f32 %v5985_v27, %v4277_v62  ;;  %v4284_v50 = vand.u32 2147483647, %v10606_v25  ;;  %v1697_v6 = vpop.f32.mrf.mxu3 }
 0x2d9   : > { %v4718_v30 = vmul.f32 %v4153_v19, %v10504_v23  ;;  %v4303_v49 = vsel %vm10678_vm9, %v4302_v47, %v4298_v15  ;;  %5988 = vrcp.f32 %v10688_v8  ;;  %vm4280_vm13 = vweird.f32 %v10606_v25 }
 0x2da   : > { %v4728_v42 = vmul.f32 %v4303_v49, %v10513_v55  ;;  %v4279_v39 = vadd.f32 %v5985_v27, %v4278_v40  ;;  %v4287_v2 = vor.u32 1.1754944e-38, %v4286_v16  ;;  %vm4282_vm14 = vmor %vm4280_vm13, %vm4281_vm12  ;;  %5990 = vpow2.f32 %v10572_v35  ;;  %v1632_v55 = vpop.f32.mrf.mxu2 }
 0x2db   : > { %4862 = vst [vmem:[%s8663_s10 + $0x188] sm:$0xff] %v4718_v30  ;;  %v5390_v5 = vmul.f32 -1.442695, %v10697_v46  ;;  %v10714_v23 = vadd.f32 %v10559_v37, %v10557_v22  ;;  %v10718_v34 = vadd.f32 %v10589_v59, %v10587_v28  ;;  %vm4285_vm15 = vcmp.eq.f32.partialorder %v4284_v50, 8.507059e+37 }
 0x2dc   : > { %4867 = vst [vmem:[%s8663_s10 + $0x1b0] sm:$0xff] %v4728_v42  ;;  %v4283_v25 = vsel %vm4282_vm14, %v5985_v27, %v4279_v39  ;;  %v10724_v26 = vadd.f32 %v10626_v57, %v10624_v43  ;;  %v4434_v37 = vand.u32 2147483647, %v10688_v8  ;;  %v10732_v59 = vadd.f32 %v10660_v44, %v10658_v11 }
 0x2dd   : > { %v5987_v20 = vpop.eup %5986  ;;  %v4288_v10 = vsel %vm4285_vm15, %v4287_v2, %v4283_v25  ;;  %5992 = vpow2.f32 %v5390_v5  ;;  %v5258_v35 = vmul.f32 -1.442695, %v10714_v23  ;;  %v5257_v32 = vmul.f32 -1.442695, %v10718_v34  ;;  %v1830_v57 = vpop.f32.mrf.mxu1 }
 0x2de   : > { %v4727_v22 = vmul.f32 %v4288_v10, %v10517_v13  ;;  %v10728_v28 = vadd.f32 1.0, %v5987_v20  ;;  %v10738_v43 = vadd.f32 %v1827_v63, %v1762_v31  ;;  %v1765_v13 = vpop.f32.mrf.mxu0  ;;  %vm4430_vm0 = vweird.f32 %v10688_v8 }
 0x2df   : > { %v5989_v1 = vpop.eup %5988  ;;  %5994 = vpow2.f32 %v5258_v35  ;;  %v4436_v60 = vand.u32 2147483648, %v10688_v8  ;;  %v5267_v7 = vmul.f32 -1.442695, %v10724_v26  ;;  %vm10743_vm1 = vcmp.eq.f32.partialorder %v4434_v37, 8.507059e+37 }
 0x2e0   : > { %4866 = vst [vmem:[%s8663_s10 + $0x1a8] sm:$0xff] %v4727_v22  ;;  %v4426_v58 = vmul.f32 %v5989_v1, %v10688_v8  ;;  %5996 = vrcp.f32 %v10728_v28  ;;  %v5991_v54 = vpop.eup %5990  ;;  %v5266_v11 = vmul.f32 -1.442695, %v10732_v59  ;;  %vm4431_vm2 = vweird.f32 %v5989_v1  ;;  %v10762_v51 = vpop.f32.mrf.mxu3 }
 0x2e1   : > { %v10747_v24 = vadd.f32 1.0, %v5991_v54  ;;  %v4419_v41 = vand.u32 2147483647, %v10728_v28  ;;  %5998 = vpow2.f32 %v5257_v32  ;;  %v10751_v9 = vadd.f32 %v1697_v6, %v1632_v55  ;;  %vm4432_vm4 = vmor %vm4430_vm0, %vm4431_vm2 }
 0x2e2   : > { %v4427_v36 = vsub.f32 1.0, %v4426_v58  ;;  %v4421_v27 = vand.u32 2147483648, %v10728_v28  ;;  %v5276_v61 = vmul.f32 -1.442695, %v10738_v43  ;;  %v4437_v18 = vor.u32 1.1754944e-38, %v4436_v60  ;;  %v10760_v17 = vpop.f32.mrf.mxu2 }
 0x2e3   : > { %v5993_v44 = vpop.eup %5992  ;;  %6000 = vrcp.f32 %v10747_v24  ;;  %v10758_v48 = vadd.f32 %v1830_v57, %v1765_v13  ;;  %vm4415_vm3 = vweird.f32 %v10728_v28  ;;  %vm10771_vm5 = vcmp.eq.f32.partialorder %v4419_v41, 8.507059e+37 }
 0x2e4   : > { %v4428_v12 = vmul.f32 %v5989_v1, %v4427_v36  ;;  %v10756_v0 = vadd.f32 1.0, %v5993_v44  ;;  %6002 = vpow2.f32 %v5267_v7  ;;  %v4569_v3 = vand.u32 2147483647, %v10747_v24 }
 0x2e5   : > { %v5995_v38 = vpop.eup %5994  ;;  %6004 = vpow2.f32 %v5266_v11  ;;  %v4422_v16 = vor.u32 1.1754944e-38, %v4421_v27  ;;  %v5275_v31 = vmul.f32 -1.442695, %v10751_v9  ;;  %vm4565_vm7 = vweird.f32 %v10747_v24  ;;  %v10791_v39 = vpop.f32.mrf.mxu1 }
 0x2e6   : > { %v5997_v21 = vpop.eup %5996  ;;  %v4429_v4 = vadd.f32 %v5989_v1, %v4428_v12  ;;  %v10765_v45 = vadd.f32 1.0, %v5995_v38  ;;  %6006 = vrcp.f32 %v10756_v0  ;;  %v4571_v19 = vand.u32 2147483648, %v10747_v24  ;;  %v10789_v42 = vpop.f32.mrf.mxu0 }
 0x2e7   : > { %v4411_v29 = vmul.f32 %v5997_v21, %v10728_v28  ;;  %6008 = vpow2.f32 %v5276_v61  ;;  %v5999_v63 = vpop.eup %5998  ;;  %v4554_v50 = vand.u32 2147483647, %v10756_v0  ;;  %v4556_v30 = vand.u32 2147483648, %v10756_v0 }
 0x2e8   : > { %v4433_v62 = vsel %vm4432_vm4, %v5989_v1, %v4429_v4  ;;  %6010 = vrcp.f32 %v10765_v45  ;;  %v10787_v49 = vmul.f32 -1.442695, %v10758_v48  ;;  %vm4416_vm6 = vweird.f32 %v5997_v21  ;;  %v10820_v11 = vpop.f32.mrf.mxu3 }
 0x2e9   : > { %v4438_v8 = vsel %vm10743_vm1, %v4437_v18, %v4433_v62  ;;  %v4412_v52 = vsub.f32 1.0, %v4411_v29  ;;  %v6001_v15 = vpop.eup %6000  ;;  %vm10794_vm8 = vcmp.eq.f32.partialorder %v4569_v3, 8.507059e+37  ;;  %v2574_v25 = vand.u32 2147483647, %v10765_v45  ;;  %vm4417_vm10 = vmor %vm4415_vm3, %vm4416_vm6 }
 0x2ea   : > { %v4737_v40 = vmul.f32 %v4438_v8, %v10529_v33  ;;  %v6003_v2 = vpop.eup %6002  ;;  %v4561_v55 = vmul.f32 %v6001_v15, %v10747_v24  ;;  %v2576_v20 = vand.u32 2147483648, %v10765_v45  ;;  %v10801_v10 = vadd.f32 1.0, %v5999_v63  ;;  %v10818_v28 = vpop.f32.mrf.mxu2 }
 0x2eb   : > { %v4413_v5 = vmul.f32 %v5997_v21, %v4412_v52  ;;  %v6005_v33 = vpop.eup %6004  ;;  %6012 = vpow2.f32 %v5275_v31  ;;  %v4572_v1 = vor.u32 1.1754944e-38, %v4571_v19  ;;  %vm4550_vm9 = vweird.f32 %v10756_v0 }
 0x2ec   : > { %4871 = vst [vmem:[%s8663_s10 + $0x1d0] sm:$0xff] %v4737_v40  ;;  %v6007_v35 = vpop.eup %6006  ;;  %v4562_v37 = vsub.f32 1.0, %v4561_v55  ;;  %vm10808_vm11 = vcmp.eq.f32.partialorder %v4554_v50, 8.507059e+37  ;;  %v4557_v57 = vor.u32 1.1754944e-38, %v4556_v30  ;;  %vm2570_vm12 = vweird.f32 %v10765_v45 }
 0x2ed   : > { %v4414_v22 = vadd.f32 %v5997_v21, %v4413_v5  ;;  %v6009_v32 = vpop.eup %6008  ;;  %v4546_v58 = vmul.f32 %v6007_v35, %v10756_v0  ;;  %6014 = vrcp.f32 %v10801_v10  ;;  %v10814_v54 = vadd.f32 1.0, %v6003_v2  ;;  %v10844_v52 = vpop.f32.mrf.mxu1 }
 0x2ee   : > { %v6011_v60 = vpop.eup %6010  ;;  %v4563_v36 = vmul.f32 %v6001_v15, %v4562_v37  ;;  %vm4566_vm13 = vweird.f32 %v6001_v15  ;;  %v10816_v53 = vadd.f32 1.0, %v6005_v33  ;;  %vm10825_vm14 = vcmp.eq.f32.partialorder %v2574_v25, 8.507059e+37  ;;  %v10842_v8 = vpop.f32.mrf.mxu0 }
 0x2ef   : > { %v4418_v7 = vsel %vm4417_vm10, %v5997_v21, %v4414_v22  ;;  %v4547_v41 = vsub.f32 1.0, %v4546_v58  ;;  %v2566_v12 = vmul.f32 %v6011_v60, %v10765_v45  ;;  %v2577_v61 = vor.u32 1.1754944e-38, %v2576_v20  ;;  %vm4567_vm15 = vmor %vm4565_vm7, %vm4566_vm13  ;;  %v10868_v22 = vld [vmem:[#allocation8] ss:$0 sm:$0xff] }
 0x2f0   : > { %v4423_v44 = vsel %vm10771_vm5, %v4422_v16, %v4418_v7  ;;  %v4564_v18 = vadd.f32 %v6001_v15, %v4563_v36  ;;  %v2559_v21 = vand.u32 2147483647, %v10801_v10  ;;  %v2561_v4 = vand.u32 2147483648, %v10801_v10 }
 0x2f1   : > { %v4736_v38 = vmul.f32 %v4423_v44, %v10547_v14  ;;  %v6013_v29 = vpop.eup %6012  ;;  %v4548_v47 = vmul.f32 %v6007_v35, %v4547_v41  ;;  %vm4551_vm0 = vweird.f32 %v6007_v35  ;;  %v2567_v3 = vsub.f32 1.0, %v2566_v12 }
 0x2f2   : > { %6016 = vrcp.f32 %v10814_v54  ;;  %v4568_v62 = vsel %vm4567_vm15, %v6001_v15, %v4564_v18  ;;  %vm2555_vm1 = vweird.f32 %v10801_v10  ;;  %v10838_v14 = vadd.f32 1.0, %v6009_v32  ;;  %vm4552_vm3 = vmor %vm4550_vm9, %vm4551_vm0  ;;  %v10875_v58 = vpop.f32.mrf.mxu2 }
 0x2f3   : > { %4870 = vst [vmem:[%s8663_s10 + $0x1c8] sm:$0xff] %v4736_v38  ;;  %6018 = vrcp.f32 %v10816_v53  ;;  %v6015_v16 = vpop.eup %6014  ;;  %v4573_v31 = vsel %vm10794_vm8, %v4572_v1, %v4568_v62  ;;  %v4549_v24 = vadd.f32 %v6007_v35, %v4548_v47  ;;  %v2568_v63 = vmul.f32 %v6011_v60, %v2567_v3 }
 0x2f4   : > { %vm2571_vm2 = vweird.f32 %v6011_v60  ;;  %v4746_v19 = vmul.f32 %v4573_v31, %v10553_v56  ;;  %v2551_v15 = vmul.f32 %v6015_v16, %v10801_v10  ;;  %vm10851_vm4 = vcmp.eq.f32.partialorder %v2559_v21, 8.507059e+37 }
 0x2f5   : > { %v2562_v50 = vor.u32 1.1754944e-38, %v2561_v4  ;;  %v4553_v30 = vsel %vm4552_vm3, %v6007_v35, %v4549_v24  ;;  %v2569_v2 = vadd.f32 %v6011_v60, %v2568_v63  ;;  %v2709_v5 = vand.u32 2147483647, %v10814_v54  ;;  %vm2572_vm5 = vmor %vm2570_vm12, %vm2571_vm2  ;;  %v10866_v35 = vld [vmem:[#allocation7] ss:$0 sm:$0xff]  ;;  %v10909_v62 = vpop.f32.mrf.mxu1 }
 0x2f6   : > { %v2711_v55 = vand.u32 2147483648, %v10814_v54  ;;  %4875 = vst [vmem:[%s8663_s10 + $0x1f0] sm:$0xff] %v4746_v19  ;;  %v4558_v56 = vsel %vm10808_vm11, %v4557_v57, %v4553_v30  ;;  %v2552_v0 = vsub.f32 1.0, %v2551_v15  ;;  %v2694_v6 = vand.u32 2147483647, %v10816_v53  ;;  %v10907_v3 = vpop.f32.mrf.mxu0 }
 0x2f7   : > { %6020 = vrcp.f32 %v10838_v14  ;;  %v4745_v25 = vmul.f32 %v4558_v56, %v10697_v46  ;;  %v2573_v20 = vsel %vm2572_vm5, %v6011_v60, %v2569_v2  ;;  %vm2705_vm7 = vweird.f32 %v10814_v54  ;;  %v10877_v46 = vpop.f32.mrf.mxu3 }
 0x2f8   : > { %v6017_v33 = vpop.eup %6016  ;;  %vm2690_vm6 = vweird.f32 %v10816_v53  ;;  %v2578_v37 = vsel %vm10825_vm14, %v2577_v61, %v2573_v20  ;;  %v2553_v1 = vmul.f32 %v6015_v16, %v2552_v0  ;;  %vm2556_vm8 = vweird.f32 %v6015_v16 }
 0x2f9   : > { %v6019_v45 = vpop.eup %6018  ;;  %v2701_v32 = vmul.f32 %v6017_v33, %v10814_v54  ;;  %4874 = vst [vmem:[%s8663_s10 + $0x1e8] sm:$0xff] %v4745_v25  ;;  %v4613_v13 = vmul.f32 %v2578_v37, %v10714_v23  ;;  %vm10881_vm9 = vcmp.eq.f32.partialorder %v2709_v5, 8.507059e+37  ;;  %v2712_v60 = vor.u32 1.1754944e-38, %v2711_v55  ;;  %vm2557_vm11 = vmor %vm2555_vm1, %vm2556_vm8 }
 0x2fa   : > { %v2686_v7 = vmul.f32 %v6019_v45, %v10816_v53  ;;  %v2554_v36 = vadd.f32 %v6015_v16, %v2553_v1  ;;  %vm10886_vm10 = vcmp.eq.f32.partialorder %v2694_v6, 8.507059e+37  ;;  %v2696_v12 = vand.u32 2147483648, %v10816_v53 }
 0x2fb   : > { %v2702_v44 = vsub.f32 1.0, %v2701_v32  ;;  %v4881_v27 = vmul.f32 %v10866_v35, %v4613_v13  ;;  %v4917_v23 = vmul.f32 %v10868_v22, %v4613_v13  ;;  %v10896_v38 = vadd.f32 1.0, %v6013_v29 }
 0x2fc   : > { %v2687_v61 = vsub.f32 1.0, %v2686_v7  ;;  %v2558_v21 = vsel %vm2557_vm11, %v6015_v16, %v2554_v36  ;;  %vm2706_vm12 = vweird.f32 %v6017_v33  ;;  %vm2840_vm13 = vweird.f32 %v10838_v14 }
 0x2fd   : > { %v6021_v18 = vpop.eup %6020  ;;  %v2703_v4 = vmul.f32 %v6017_v33, %v2702_v44  ;;  %4897 = vst [vmem:[%s10901_s14] sm:$0xff] %v4881_v27  ;;  %v2563_v47 = vsel %vm10851_vm4, %v2562_v50, %v2558_v21  ;;  %vm2691_vm14 = vweird.f32 %v6019_v45  ;;  %v2846_v24 = vand.u32 2147483648, %v10838_v14  ;;  %vm2707_vm15 = vmor %vm2705_vm7, %vm2706_vm12 }
 0x2fe   : > { %v2688_v10 = vmul.f32 %v6019_v45, %v2687_v61  ;;  %v2836_v29 = vmul.f32 %v6021_v18, %v10838_v14  ;;  %4933 = vst [vmem:[%s10913_s17] sm:$0xff] %v4917_v23  ;;  %v4612_v16 = vmul.f32 %v2563_v47, %v10718_v34  ;;  %6022 = vrcp.f32 %v10896_v38  ;;  %vm2692_vm0 = vmor %vm2690_vm6, %vm2691_vm14  ;;  %v1777_v57 = vpop.f32.mrf.mxu0 }
 0x2ff   : > { %v2704_v31 = vadd.f32 %v6017_v33, %v2703_v4  ;;  %v2697_v19 = vor.u32 1.1754944e-38, %v2696_v12  ;;  %v2844_v40 = vand.u32 2147483647, %v10838_v14  ;;  %6024 = vpow2.f32 %v10787_v49  ;;  %v1709_v56 = vpop.f32.mrf.mxu3 }
 0x300   : > { %v2689_v63 = vadd.f32 %v6019_v45, %v2688_v10  ;;  %v2837_v15 = vsub.f32 1.0, %v2836_v29  ;;  %4816 = vst [vmem:[%s8663_s10 + $0x18] sm:$0xff] %v4612_v16  ;;  %v10930_v34 = vadd.f32 %v10762_v51, %v10760_v17  ;;  %v10934_v54 = vadd.f32 %v10791_v39, %v10789_v42  ;;  %v1644_v51 = vpop.f32.mrf.mxu2 }
 0x301   : > { %v2708_v50 = vsel %vm2707_vm15, %v6017_v33, %v2704_v31  ;;  %vm2841_vm1 = vweird.f32 %v6021_v18  ;;  %v2847_v53 = vor.u32 1.1754944e-38, %v2846_v24  ;;  %v10946_v6 = vadd.f32 %v10820_v11, %v10818_v28 }
 0x302   : > { %v2713_v30 = vsel %vm10881_vm9, %v2712_v60, %v2708_v50  ;;  %v2693_v2 = vsel %vm2692_vm0, %v6019_v45, %v2689_v63  ;;  %v2838_v5 = vmul.f32 %v6021_v18, %v2837_v15  ;;  %v5284_v17 = vmul.f32 -1.442695, %v10930_v34  ;;  %vm2842_vm2 = vmor %vm2840_vm13, %vm2841_vm1  ;;  %v1842_v60 = vpop.f32.mrf.mxu1 }
 0x303   : > { %v4622_v55 = vmul.f32 %v2713_v30, %v10724_v26  ;;  %v2698_v49 = vsel %vm10886_vm10, %v2697_v19, %v2693_v2  ;;  %v5294_v0 = vmul.f32 -1.442695, %v10934_v54  ;;  %vm2845_vm3 = vcmp.eq.f32.partialorder %v2844_v40, 8.507059e+37 }
 0x304   : > { %v4621_v42 = vmul.f32 %v2698_v49, %v10732_v59  ;;  %v2839_v39 = vadd.f32 %v6021_v18, %v2838_v5  ;;  %v6023_v26 = vpop.eup %6022  ;;  %6026 = vpow2.f32 %v5284_v17  ;;  %v10954_v59 = vadd.f32 %v10844_v52, %v10842_v8 }
 0x305   : > { %v4882_v33 = vmul.f32 %v10866_v35, %v4622_v55  ;;  %v4918_v25 = vmul.f32 %v10868_v22, %v4622_v55  ;;  %v2821_v28 = vmul.f32 %v6023_v26, %v10896_v38  ;;  %6028 = vpow2.f32 %v5294_v0  ;;  %v6025_v11 = vpop.eup %6024 }
 0x306   : > { %4820 = vst [vmem:[%s8663_s10 + $0x38] sm:$0xff] %v4621_v42  ;;  %v2843_v20 = vsel %vm2842_vm2, %v6021_v18, %v2839_v39  ;;  %v5293_v37 = vmul.f32 -1.442695, %v10946_v6  ;;  %v5303_v1 = vmul.f32 -1.442695, %v10954_v59  ;;  %v10963_v14 = vadd.f32 %v10877_v46, %v10875_v58  ;;  %v11016_v49 = vpop.f32.mrf.mxu0 }
 0x307   : > { %4898 = vst [vmem:[%s10901_s14 + $0x8] sm:$0xff] %v4882_v33  ;;  %v2848_v45 = vsel %vm2845_vm3, %v2847_v53, %v2843_v20  ;;  %v2822_v52 = vsub.f32 1.0, %v2821_v28  ;;  %v2829_v32 = vand.u32 2147483647, %v10896_v38  ;;  %v10968_v13 = vadd.f32 1.0, %v6025_v11  ;;  %v10989_v4 = vpop.f32.mrf.mxu3 }
 0x308   : > { %4934 = vst [vmem:[%s10913_s17 + $0x8] sm:$0xff] %v4918_v25  ;;  %v4631_v8 = vmul.f32 %v2848_v45, %v10738_v43  ;;  %vm2826_vm4 = vweird.f32 %v6023_v26  ;;  %v2831_v7 = vand.u32 2147483648, %v10896_v38  ;;  %6030 = vpow2.f32 %v5293_v37  ;;  %v10987_v21 = vpop.f32.mrf.mxu2 }
 0x309   : > { %v5302_v36 = vmul.f32 -1.442695, %v10963_v14  ;;  %v2823_v43 = vmul.f32 %v6023_v26, %v2822_v52  ;;  %6032 = vrcp.f32 %v10968_v13  ;;  %vm2825_vm5 = vweird.f32 %v10896_v38 }
 0x30a   : > { %v4883_v58 = vmul.f32 %v10866_v35, %v4631_v8  ;;  %v4919_v46 = vmul.f32 %v10868_v22, %v4631_v8  ;;  %v6027_v44 = vpop.eup %6026  ;;  %6034 = vpow2.f32 %v5303_v1  ;;  %v10981_v23 = vadd.f32 %v10909_v62, %v10907_v3  ;;  %vm2827_vm7 = vmor %vm2825_vm5, %vm2826_vm4  ;;  %v11018_v53 = vpop.f32.mrf.mxu1 }
 0x30b   : > { %v6029_v41 = vpop.eup %6028  ;;  %v2824_v12 = vadd.f32 %v6023_v26, %v2823_v43  ;;  %v10977_v27 = vadd.f32 1.0, %v6027_v44  ;;  %v2832_v61 = vor.u32 1.1754944e-38, %v2831_v7  ;;  %6036 = vpow2.f32 %v5302_v36 }
 0x30c   : > { %4899 = vst [vmem:[%s10901_s14 + $0x10] sm:$0xff] %v4883_v58  ;;  %v10985_v18 = vadd.f32 1.0, %v6029_v41  ;;  %vm2830_vm6 = vcmp.eq.f32.partialorder %v2829_v32, 8.507059e+37  ;;  %v2979_v38 = vand.u32 2147483647, %v10968_v13  ;;  %v2981_v3 = vand.u32 2147483648, %v10968_v13 }
 0x30d   : > { %4935 = vst [vmem:[%s10913_s17 + $0x10] sm:$0xff] %v4919_v46  ;;  %v2828_v47 = vsel %vm2827_vm7, %v6023_v26, %v2824_v12  ;;  %6038 = vrcp.f32 %v10977_v27  ;;  %v10995_v62 = vadd.f32 %v1709_v56, %v1644_v51  ;;  %v2964_v24 = vand.u32 2147483647, %v10977_v27 }
 0x30e   : > { %v6031_v10 = vpop.eup %6030  ;;  %v2833_v29 = vsel %vm2830_vm6, %v2832_v61, %v2828_v47  ;;  %6040 = vrcp.f32 %v10985_v18  ;;  %v5312_v63 = vmul.f32 -1.442695, %v10981_v23  ;;  %v11000_v19 = vadd.f32 %v1842_v60, %v1777_v57 }
 0x30f   : > { %v6033_v16 = vpop.eup %6032  ;;  %v4630_v31 = vmul.f32 %v2833_v29, %v10751_v9  ;;  %v2966_v50 = vand.u32 2147483648, %v10977_v27  ;;  %v3116_v30 = vand.u32 2147483648, %v10985_v18  ;;  %v11005_v2 = vadd.f32 1.0, %v6031_v10  ;;  %v11052_v7 = vpop.f32.mrf.mxu3 }
 0x310   : > { %v6035_v15 = vpop.eup %6034  ;;  %v2971_v40 = vmul.f32 %v6033_v16, %v10968_v13  ;;  %vm2975_vm8 = vweird.f32 %v10968_v13  ;;  %vm11009_vm9 = vcmp.eq.f32.partialorder %v2979_v38, 8.507059e+37  ;;  %v3114_v5 = vand.u32 2147483647, %v10985_v18  ;;  %v11050_v60 = vpop.f32.mrf.mxu2 }
 0x311   : > { %4824 = vst [vmem:[%s8663_s10 + $0x58] sm:$0xff] %v4630_v31  ;;  %v11014_v55 = vadd.f32 1.0, %v6035_v15  ;;  %v6037_v17 = vpop.eup %6036  ;;  %v2982_v56 = vor.u32 1.1754944e-38, %v2981_v3  ;;  %6042 = vrcp.f32 %v11005_v2  ;;  %v5311_v42 = vmul.f32 -1.442695, %v10995_v62 }
 0x312   : > { %v2972_v51 = vsub.f32 1.0, %v2971_v40  ;;  %vm2976_vm10 = vweird.f32 %v6033_v16  ;;  %vm2960_vm11 = vweird.f32 %v10977_v27  ;;  %vm3110_vm12 = vweird.f32 %v10985_v18 }
 0x313   : > { %v11022_v39 = vpop.eup %6038  ;;  %6044 = vrcp.f32 %v11014_v55  ;;  %vm11031_vm13 = vcmp.eq.f32.partialorder %v2964_v24, 8.507059e+37  ;;  %v11035_v20 = vor.u32 1.1754944e-38, %v2966_v50  ;;  %v11037_v28 = vor.u32 1.1754944e-38, %v3116_v30  ;;  %vm2977_vm15 = vmor %vm2975_vm8, %vm2976_vm10  ;;  %v11110_v50 = vpop.f32.mrf.mxu0 }
 0x314   : > { %v11027_v0 = vpop.eup %6040  ;;  %v2973_v26 = vmul.f32 %v6033_v16, %v2972_v51  ;;  %v2956_v33 = vmul.f32 %v11022_v39, %v10977_v27  ;;  %vm11041_vm14 = vcmp.eq.f32.partialorder %v3114_v5, 8.507059e+37  ;;  %v3099_v37 = vand.u32 2147483647, %v11005_v2  ;;  %v11112_v30 = vpop.f32.mrf.mxu1 }
 0x315   : > { %v3106_v11 = vmul.f32 %v11027_v0, %v10985_v18  ;;  %v3101_v1 = vand.u32 2147483648, %v11005_v2  ;;  %6046 = vpow2.f32 %v5312_v63  ;;  %v3249_v32 = vand.u32 2147483647, %v11014_v55 }
 0x316   : > { %v2974_v8 = vadd.f32 %v6033_v16, %v2973_v26  ;;  %v2957_v52 = vsub.f32 1.0, %v2956_v33  ;;  %v11048_v57 = vadd.f32 1.0, %v6037_v17  ;;  %vm2961_vm0 = vweird.f32 %v11022_v39 }
 0x317   : > { %v3107_v36 = vsub.f32 1.0, %v3106_v11  ;;  %vm3095_vm1 = vweird.f32 %v11005_v2  ;;  %6048 = vpow2.f32 %v5311_v42  ;;  %v11060_v58 = vpop.eup %6042  ;;  %vm3111_vm2 = vweird.f32 %v11027_v0  ;;  %vm11098_vm7 = vmor %vm2960_vm11, %vm2961_vm0 }
 0x318   : > { %v2978_v46 = vsel %vm2977_vm15, %v6033_v16, %v2974_v8  ;;  %v2958_v43 = vmul.f32 %v11022_v39, %v2957_v52  ;;  %vm3245_vm3 = vweird.f32 %v11014_v55  ;;  %6050 = vrcp.f32 %v11048_v57  ;;  %vm11123_vm6 = vmor %vm3110_vm12, %vm3111_vm2 }
 0x319   : > { %v11066_v13 = vpop.eup %6044  ;;  %v2983_v44 = vsel %vm11009_vm9, %v2982_v56, %v2978_v46  ;;  %v3108_v41 = vmul.f32 %v11027_v0, %v3107_v36  ;;  %v3091_v12 = vmul.f32 %v11060_v58, %v11005_v2  ;;  %vm11073_vm4 = vcmp.eq.f32.partialorder %v3099_v37, 8.507059e+37 }
 0x31a   : > { %v11077_v47 = vor.u32 1.1754944e-38, %v3101_v1  ;;  %v4640_v38 = vmul.f32 %v2983_v44, %v10758_v48  ;;  %v2959_v10 = vadd.f32 %v11022_v39, %v2958_v43  ;;  %v3241_v29 = vmul.f32 %v11066_v13, %v11014_v55 }
 0x31b   : > { %vm11088_vm5 = vcmp.eq.f32.partialorder %v3249_v32, 8.507059e+37  ;;  %v3251_v16 = vand.u32 2147483648, %v11014_v55  ;;  %v6047_v31 = vpop.eup %6046  ;;  %v3109_v24 = vadd.f32 %v11027_v0, %v3108_v41  ;;  %v3092_v63 = vsub.f32 1.0, %v3091_v12 }
 0x31c   : > { %v11104_v15 = vmul.f32 -1.442695, %v11000_v19  ;;  %v11108_v40 = vadd.f32 %v10989_v4, %v10987_v21  ;;  %v4884_v27 = vmul.f32 %v10866_v35, %v4640_v38  ;;  %v4920_v9 = vmul.f32 %v10868_v22, %v4640_v38 }
 0x31d   : > { %v2963_v5 = vsel %vm11098_vm7, %v11022_v39, %v2959_v10  ;;  %v3242_v4 = vsub.f32 1.0, %v3241_v29 }
 0x31e   : > { %6373 = shalt.err (!%p6370_p10)
}
 0x31f   : > { %s11698_s22 = smov 512   ;;  %s11699_s0 = smov 32   ;;  %v6049_v18 = vpop.eup %6048  ;;  %v2968_v17 = vsel %vm11031_vm13, %v11035_v20, %v2963_v5  ;;  %v3113_v51 = vsel %vm11123_vm6, %v11027_v0, %v3109_v24  ;;  %v3093_v56 = vmul.f32 %v11060_v58, %v3092_v63  ;;  %vm3096_vm8 = vweird.f32 %v11060_v58  ;;  %4900 = vst [vmem:[%s10901_s14 + $0x18] sm:$0xff] %v4884_v27  ;;  %v1653_v1 = vpop.f32.mrf.mxu2 }
 0x320   : > { %5464 = dma.vmem_to_hbm [thread:$0]  (%p6650_p7), %s4979_s13, 8192, %s4981_s15, %s4950_s29, %s11698_s22, %s11698_s22, %s11699_s0   ;;  %v6051_v42 = vpop.eup %6050  ;;  %v4639_v39 = vmul.f32 %v2968_v17, %v10930_v34  ;;  %v3118_v26 = vsel %vm11041_vm14, %v11037_v28, %v3113_v51  ;;  %v3243_v33 = vmul.f32 %v11066_v13, %v3242_v4  ;;  %vm3246_vm9 = vweird.f32 %v11066_v13  ;;  %vm3097_vm10 = vmor %vm3095_vm1, %vm3096_vm8  ;;  %v1786_v12 = vpop.f32.mrf.mxu0 }
 0x321   : > { %4936 = vst [vmem:[%s10913_s17 + $0x18] sm:$0xff] %v4920_v9  ;;  %v4649_v25 = vmul.f32 %v3118_v26, %v10934_v54  ;;  %v3094_v0 = vadd.f32 %v11060_v58, %v3093_v56  ;;  %v3252_v20 = vor.u32 1.1754944e-38, %v3251_v16  ;;  %v3226_v11 = vmul.f32 %v6051_v42, %v11048_v57  ;;  %v1718_v54 = vpop.f32.mrf.mxu3  ;;  %vm3247_vm11 = vmor %vm3245_vm3, %vm3246_vm9  ;;  %v1851_v61 = vpop.f32.mrf.mxu1  ;;  %s5416_s13 = sshll.u32 %s6586_s28, 7  ;;  %s12042_s15 = sshll.u32 %s6586_s28, 9 }
 0x322   : > { %4828 = vst [vmem:[%s8663_s10 + $0x78] sm:$0xff] %v4639_v39  ;;  %v3244_v34 = vadd.f32 %v11066_v13, %v3243_v33  ;;  %v3234_v28 = vand.u32 2147483647, %v11048_v57  ;;  %v11165_v45 = vadd.f32 1.0, %v6047_v31  ;;  %v11167_v37 = vadd.f32 1.0, %v6049_v18  ;;  %s4995_s30 = scalar_lea.hbm %s11693_s5, %s12042_s15  ;;  %s4954_s12 = sand.u32 1, %s6586_s28  }
 0x323   : > { %v4885_v8 = vmul.f32 %v10866_v35, %v4649_v25  ;;  %v4921_v52 = vmul.f32 %v10868_v22, %v4649_v25  ;;  %v3098_v2 = vsel %vm3097_vm10, %v11060_v58, %v3094_v0  ;;  %v3227_v32 = vsub.f32 1.0, %v3226_v11  ;;  %s4996_s16 = sshll.u32 %s8663_s10, 4  ;;  %s5012_s20 = scalar_lea.hbm %s11694_s6, %s5416_s13  ;;  %s11600_s16 = int_to_ptr.vmem [resolvable:$true] %s4996_s16 }
 0x324   : > { %v3103_v36 = vsel %vm11073_vm4, %v11077_v47, %v3098_v2  ;;  %v3248_v46 = vsel %vm3247_vm11, %v11066_v13, %v3244_v34  ;;  %v3236_v43 = vand.u32 2147483648, %v11048_v57  ;;  %6052 = vrcp.f32 %v11165_v45  ;;  %s4998_s22 = sshll.u32 %s4995_s30, 4  ;;  %s5013_s0 = sshll.u32 %s10901_s14, 4  ;;  %s11604_s22 = int_to_ptr.hbm [resolvable:$true] %s4998_s22  ;;  %s11606_s0 = int_to_ptr.vmem [resolvable:$true] %s5013_s0 }
 0x325   : > { %4901 = vst [vmem:[%s10901_s14 + $0x20] sm:$0xff] %v4885_v8  ;;  %v4648_v44 = vmul.f32 %v3103_v36, %v10946_v6  ;;  %v3253_v58 = vsel %vm11088_vm5, %v3252_v20, %v3248_v46  ;;  %v3228_v41 = vmul.f32 %v6051_v42, %v3227_v32  ;;  %vm3231_vm12 = vweird.f32 %v6051_v42  ;;  %s5029_s1 = scalar_lea.hbm %s11695_s7, %s5416_s13  ;;  %s5015_s23 = sshll.u32 %s5012_s20, 4  ;;  %s11611_s23 = int_to_ptr.hbm [resolvable:$true] %s5015_s23 }
 0x326   : > { %4937 = vst [vmem:[%s10913_s17 + $0x20] sm:$0xff] %v4921_v52  ;;  %v4658_v55 = vmul.f32 %v3253_v58, %v10954_v59  ;;  %6054 = vrcp.f32 %v11167_v37  ;;  %vm3230_vm13 = vweird.f32 %v11048_v57  ;;  %v3237_v38 = vor.u32 1.1754944e-38, %v3236_v43  ;;  %s5030_s13 = sshll.u32 %s10913_s17, 4  ;;  %s5032_s30 = sshll.u32 %s5029_s1, 4  ;;  %s11615_s13 = int_to_ptr.vmem [resolvable:$true] %s5030_s13  ;;  %s11617_s30 = int_to_ptr.hbm [resolvable:$true] %s5032_s30 }
 0x327   : > { %4832 = vst [vmem:[%s8663_s10 + $0x98] sm:$0xff] %v4648_v44  ;;  %v3229_v13 = vadd.f32 %v6051_v42, %v3228_v41  ;;  %vm3232_vm14 = vmor %vm3230_vm13, %vm3231_vm12  ;;  %6056 = vpow2.f32 %v11104_v15  ;;  %vm3235_vm15 = vcmp.eq.f32.partialorder %v3234_v28, 8.507059e+37  ;;  %v3384_v59 = vand.u32 2147483647, %v11165_v45  ;;  %s11621_s9 = scalar_lea.sflag [#allocation12], %s4954_s12  ;;  %s6388_s20 = sshra.s32 %s11604_s22, 4  ;;  %s6389_s20 = int_to_ptr.hbm [resolvable:$true] %s6388_s20 }
 0x328   : > { %v4886_v6 = vmul.f32 %v10866_v35, %v4658_v55  ;;  %v4922_v47 = vmul.f32 %v10868_v22, %v4658_v55  ;;  %v5320_v29 = vmul.f32 -1.442695, %v11108_v40  ;;  %v11199_v16 = vadd.f32 %v11018_v53, %v11016_v49  ;;  %v1789_v20 = vpop.f32.mrf.mxu0  ;;  %s6390_s15 = scalar_lea.hbm %s6389_s20, 512  ;;  %s6394_s1 = scalar_lea.hbm %s11693_s5, 1024 }
 0x329   : > { %v3233_v10 = vsel %vm3232_vm14, %v6051_v42, %v3229_v13  ;;  %v11203_v31 = vadd.f32 %v11052_v7, %v11050_v60  ;;  %v11207_v48 = vadd.f32 %v11112_v30, %v11110_v50  ;;  %v3386_v15 = vand.u32 2147483648, %v11165_v45  ;;  %v1656_v7 = vpop.f32.mrf.mxu2  ;;  %v1721_v50 = vpop.f32.mrf.mxu3  ;;  %p6391_p12 = scmp.ne.s32.totalorder %s6389_s20, %s6390_s15  ;;  %p6395_p3 = scmp.lt.s32.totalorder %s6389_s20, %s11693_s5 }
 0x32a   : > { %v6053_v3 = vpop.eup %6052  ;;  %4902 = vst [vmem:[%s10901_s14 + $0x28] sm:$0xff] %v4886_v6  ;;  %v3238_v57 = vsel %vm3235_vm15, %v3237_v38, %v3233_v10  ;;  %6058 = vpow2.f32 %v5320_v29  ;;  %vm3380_vm0 = vweird.f32 %v11165_v45  ;;  %v3369_v49 = vand.u32 2147483647, %v11167_v37  ;;  %v1854_v11 = vpop.f32.mrf.mxu1  ;;  %p6396_p5 = scmp.lt.s32.totalorder %s6394_s1, %s6390_s15 }
 0x32b   : > { %4938 = vst [vmem:[%s10913_s17 + $0x28] sm:$0xff] %v4922_v47  ;;  %v4657_v24 = vmul.f32 %v3238_v57, %v10963_v14  ;;  %v3376_v63 = vmul.f32 %v6053_v3, %v11165_v45  ;;  %v5330_v53 = vmul.f32 -1.442695, %v11199_v16  ;;  %v5329_v60 = vmul.f32 -1.442695, %v11203_v31  ;;  %p6392_p13 = pnand %p6391_p12, %p6650_p7 }
 0x32c   : > { %v6055_v27 = vpop.eup %6054  ;;  %v3371_v9 = vand.u32 2147483648, %v11167_v37  ;;  %v11220_v5 = vadd.f32 %v1718_v54, %v1653_v1  ;;  %vm3381_vm1 = vweird.f32 %v6053_v3  ;;  %v5339_v4 = vmul.f32 -1.442695, %v11207_v48  ;;  %p6397_p1 = por %p6396_p5, %p6395_p3 }
 0x32d   : > { %4836 = vst [vmem:[%s8663_s10 + $0xb8] sm:$0xff] %v4657_v24  ;;  %v3377_v30 = vsub.f32 1.0, %v3376_v63  ;;  %v3361_v14 = vmul.f32 %v6055_v27, %v11167_v37  ;;  %v6057_v21 = vpop.eup %6056  ;;  %6060 = vpow2.f32 %v5330_v53  ;;  %v11223_v18 = vadd.f32 %v1851_v61, %v1786_v12  ;;  %vm3382_vm5 = vmor %vm3380_vm0, %vm3381_vm1  ;;  %p6393_p0 = pneg %p6392_p13 }
 0x32e   : > { %v11225_v56 = vadd.f32 1.0, %v6057_v21  ;;  %6062 = vpow2.f32 %v5329_v60  ;;  %vm11227_vm2 = vcmp.eq.f32.partialorder %v3384_v59, 8.507059e+37  ;;  %vm3365_vm3 = vweird.f32 %v11167_v37 }
 0x32f   : > { %v3378_v17 = vmul.f32 %v6053_v3, %v3377_v30  ;;  %v3362_v51 = vsub.f32 1.0, %v3361_v14  ;;  %vm3366_vm4 = vweird.f32 %v6055_v27  ;;  %v11232_v39 = vadd.f32 %v1721_v50, %v1656_v7  ;;  %p6398_p4 = pnand %p6397_p1, %p6393_p0 }
 0x330   : > { %v6059_v26 = vpop.eup %6058  ;;  %6064 = vrcp.f32 %v11225_v56  ;;  %v5338_v0 = vmul.f32 -1.442695, %v11220_v5  ;;  %v3387_v34 = vor.u32 1.1754944e-38, %v3386_v15  ;;  %vm11239_vm7 = vcmp.eq.f32.partialorder %v3369_v49, 8.507059e+37  ;;  %vm3367_vm6 = vmor %vm3365_vm3, %vm3366_vm4 }
 0x331   : > { %v3379_v33 = vadd.f32 %v6053_v3, %v3378_v17  ;;  %v3363_v25 = vmul.f32 %v6055_v27, %v3362_v51  ;;  %v3372_v1 = vor.u32 1.1754944e-38, %v3371_v9  ;;  %v11243_v54 = vadd.f32 1.0, %v6059_v26  ;;  %v1659_v61 = vpop.f32.mrf.mxu2  ;;  %v1724_v6 = vpop.f32.mrf.mxu3 }
 0x332   : > { %6066 = vpow2.f32 %v5339_v4  ;;  %v5348_v2 = vmul.f32 -1.442695, %v11223_v18  ;;  %v5347_v45 = vmul.f32 -1.442695, %v11232_v39  ;;  %v11253_v46 = vadd.f32 %v1854_v11, %v1789_v20  ;;  %v11298_v26 = vpop.f32.mrf.mxu0 }
 0x333   : > { %v3383_v8 = vsel %vm3382_vm5, %v6053_v3, %v3379_v33  ;;  %v3364_v52 = vadd.f32 %v6055_v27, %v3363_v25  ;;  %v6061_v32 = vpop.eup %6060  ;;  %6068 = vrcp.f32 %v11243_v54  ;;  %v3519_v41 = vand.u32 2147483647, %v11225_v56  ;;  %v11300_v33 = vpop.f32.mrf.mxu1 }
 0x334   : > { %v3388_v36 = vsel %vm11227_vm2, %v3387_v34, %v3383_v8  ;;  %v6063_v43 = vpop.eup %6062  ;;  %6070 = vpow2.f32 %v5338_v0  ;;  %v3521_v37 = vand.u32 2147483648, %v11225_v56  ;;  %v11260_v13 = vadd.f32 1.0, %v6061_v32 }
 0x335   : > { %v4667_v44 = vmul.f32 %v3388_v36, %v10981_v23  ;;  %v3368_v58 = vsel %vm3367_vm6, %v6055_v27, %v3364_v52  ;;  %v11262_v12 = vadd.f32 1.0, %v6063_v43  ;;  %6072 = vpow2.f32 %v5348_v2 }
 0x336   : > { %v3373_v55 = vsel %vm11239_vm7, %v3372_v1, %v3368_v58  ;;  %v6065_v47 = vpop.eup %6064  ;;  %vm3515_vm8 = vweird.f32 %v11225_v56  ;;  %6074 = vrcp.f32 %v11260_v13  ;;  %v11271_v29 = vmul.f32 -1.442695, %v11253_v46 }
 0x337   : > { %v4887_v23 = vmul.f32 %v10866_v35, %v4667_v44  ;;  %v4923_v38 = vmul.f32 %v10868_v22, %v4667_v44  ;;  %v4666_v10 = vmul.f32 %v3373_v55, %v10995_v62  ;;  %v3511_v59 = vmul.f32 %v6065_v47, %v11225_v56 }
 0x338   : > { %v6067_v3 = vpop.eup %6066  ;;  %v3504_v57 = vand.u32 2147483647, %v11243_v54  ;;  %v3506_v24 = vand.u32 2147483648, %v11243_v54  ;;  %6076 = vrcp.f32 %v11262_v12  ;;  %v11277_v62 = vadd.f32 %v1724_v6, %v1659_v61 }
 0x339   : > { %4903 = vst [vmem:[%s10901_s14 + $0x30] sm:$0xff] %v4887_v23  ;;  %v6069_v63 = vpop.eup %6068  ;;  %v3512_v15 = vsub.f32 1.0, %v3511_v59  ;;  %vm11280_vm9 = vcmp.eq.f32.partialorder %v3519_v41, 8.507059e+37  ;;  %v3522_v49 = vor.u32 1.1754944e-38, %v3521_v37  ;;  %vm3500_vm10 = vweird.f32 %v11243_v54  ;;  %v11332_v23 = vpop.f32.mrf.mxu3 }
 0x33a   : > { %4939 = vst [vmem:[%s10913_s17 + $0x30] sm:$0xff] %v4923_v38  ;;  %v6071_v53 = vpop.eup %6070  ;;  %vm3516_vm11 = vweird.f32 %v6065_v47  ;;  %v3496_v60 = vmul.f32 %v6069_v63, %v11243_v54  ;;  %v3654_v7 = vand.u32 2147483647, %v11260_v13  ;;  %v3656_v50 = vand.u32 2147483648, %v11260_v13 }
 0x33b   : > { %4840 = vst [vmem:[%s8663_s10 + $0xd8] sm:$0xff] %v4666_v10  ;;  %v3513_v30 = vmul.f32 %v6065_v47, %v3512_v15  ;;  %v3639_v14 = vand.u32 2147483647, %v11262_v12  ;;  %v3641_v9 = vand.u32 2147483648, %v11262_v12  ;;  %v11291_v21 = vadd.f32 1.0, %v6067_v3  ;;  %v6073_v4 = vpop.eup %6072  ;;  %vm3517_vm0 = vmor %vm3515_vm8, %vm3516_vm11 }
 0x33c   : > { %v3497_v17 = vsub.f32 1.0, %v3496_v60  ;;  %vm11293_vm12 = vcmp.eq.f32.partialorder %v3504_v57, 8.507059e+37  ;;  %v3507_v42 = vor.u32 1.1754944e-38, %v3506_v24  ;;  %vm3650_vm13 = vweird.f32 %v11260_v13  ;;  %v6075_v25 = vpop.eup %6074 }
 0x33d   : > { %v3514_v0 = vadd.f32 %v6065_v47, %v3513_v30  ;;  %vm3501_vm14 = vweird.f32 %v6069_v63  ;;  %vm3635_vm15 = vweird.f32 %v11262_v12  ;;  %6078 = vrcp.f32 %v11291_v21  ;;  %v1860_v30 = vpop.f32.mrf.mxu1 }
 0x33e   : > { %v11304_v20 = vadd.f32 1.0, %v6071_v53  ;;  %v6077_v11 = vpop.eup %6076  ;;  %v3498_v34 = vmul.f32 %v6069_v63, %v3497_v17  ;;  %v3646_v28 = vmul.f32 %v6075_v25, %v11260_v13  ;;  %vm11310_vm1 = vcmp.eq.f32.partialorder %v3654_v7, 8.507059e+37  ;;  %vm3502_vm3 = vmor %vm3500_vm10, %vm3501_vm14 }
 0x33f   : > { %v3657_v8 = vor.u32 1.1754944e-38, %v3656_v50  ;;  %6080 = vpow2.f32 %v5347_v45  ;;  %v3518_v52 = vsel %vm3517_vm0, %v6065_v47, %v3514_v0  ;;  %v3631_v2 = vmul.f32 %v6077_v11, %v11262_v12  ;;  %v11330_v47 = vpop.f32.mrf.mxu2  ;;  %v1795_v50 = vpop.f32.mrf.mxu0 }
 0x340   : > { %vm11315_vm2 = vcmp.eq.f32.partialorder %v3639_v14, 8.507059e+37  ;;  %v3642_v36 = vor.u32 1.1754944e-38, %v3641_v9  ;;  %v11319_v43 = vadd.f32 1.0, %v6073_v4  ;;  %v3523_v56 = vsel %vm11280_vm9, %v3522_v49, %v3518_v52 }
 0x341   : > { %v3499_v44 = vadd.f32 %v6069_v63, %v3498_v34  ;;  %v3647_v58 = vsub.f32 1.0, %v3646_v28  ;;  %v3789_v41 = vand.u32 2147483647, %v11291_v21  ;;  %v4676_v55 = vmul.f32 %v3523_v56, %v11000_v19 }
 0x342   : > { %vm3651_vm4 = vweird.f32 %v6075_v25  ;;  %v3632_v45 = vsub.f32 1.0, %v3631_v2  ;;  %6082 = vrcp.f32 %v11304_v20  ;;  %vm3636_vm5 = vweird.f32 %v6077_v11 }
 0x343   : > { %v3503_v37 = vsel %vm3502_vm3, %v6069_v63, %v3499_v44  ;;  %v3648_v61 = vmul.f32 %v6075_v25, %v3647_v58  ;;  %v3791_v6 = vand.u32 2147483648, %v11291_v21  ;;  %v6079_v38 = vpop.eup %6078  ;;  %v4888_v19 = vmul.f32 %v10866_v35, %v4676_v55  ;;  %vm11345_vm6 = vmor %vm3650_vm13, %vm3651_vm4  ;;  %v1730_v58 = vpop.f32.mrf.mxu3 }
 0x344   : > { %v4924_v54 = vmul.f32 %v10868_v22, %v4676_v55  ;;  %v3508_v10 = vsel %vm11293_vm12, %v3507_v42, %v3503_v37  ;;  %v3633_v59 = vmul.f32 %v6077_v11, %v3632_v45  ;;  %v3781_v63 = vmul.f32 %v6079_v38, %v11291_v21  ;;  %vm3637_vm9 = vmor %vm3635_vm15, %vm3636_vm5 }
 0x345   : > { %v6081_v3 = vpop.eup %6080  ;;  %v4675_v57 = vmul.f32 %v3508_v10, %v11108_v40  ;;  %v3649_v24 = vadd.f32 %v6075_v25, %v3648_v61  ;;  %vm3785_vm7 = vweird.f32 %v11291_v21  ;;  %4904 = vst [vmem:[%s10901_s14 + $0x38] sm:$0xff] %v4888_v19  ;;  %vm11349_vm8 = vcmp.eq.f32.partialorder %v3789_v41, 8.507059e+37 }
 0x346   : > { %v3634_v27 = vadd.f32 %v6077_v11, %v3633_v59  ;;  %v3774_v40 = vand.u32 2147483647, %v11304_v20  ;;  %6084 = vrcp.f32 %v11319_v43  ;;  %4940 = vst [vmem:[%s10913_s17 + $0x38] sm:$0xff] %v4924_v54  ;;  %v3782_v13 = vsub.f32 1.0, %v3781_v63 }
 0x347   : > { %v3653_v53 = vsel %vm11345_vm6, %v6075_v25, %v3649_v24  ;;  %v3792_v60 = vor.u32 1.1754944e-38, %v3791_v6  ;;  %v3776_v7 = vand.u32 2147483648, %v11304_v20  ;;  %4844 = vst [vmem:[%s8663_s10 + $0xf8] sm:$0xff] %v4675_v57  ;;  %vm3786_vm10 = vweird.f32 %v6079_v38  ;;  %v1665_v44 = vpop.f32.mrf.mxu2  ;;  %v1798_v59 = vpop.f32.mrf.mxu0 }
 0x348   : > { %v6083_v14 = vpop.eup %6082  ;;  %v3658_v9 = vsel %vm11310_vm1, %v3657_v8, %v3653_v53  ;;  %v3638_v4 = vsel %vm3637_vm9, %v6077_v11, %v3634_v27  ;;  %v11365_v17 = vadd.f32 1.0, %v6081_v3  ;;  %v3783_v42 = vmul.f32 %v6079_v38, %v3782_v13  ;;  %vm3787_vm13 = vmor %vm3785_vm7, %vm3786_vm10  ;;  %v1863_v3 = vpop.f32.mrf.mxu1 }
 0x349   : > { %v4685_v51 = vmul.f32 %v3658_v9, %v11199_v16  ;;  %v3643_v12 = vsel %vm11315_vm2, %v3642_v36, %v3638_v4  ;;  %v3766_v25 = vmul.f32 %v6083_v14, %v11304_v20  ;;  %vm3770_vm11 = vweird.f32 %v11304_v20 }
 0x34a   : > { %v4684_v0 = vmul.f32 %v3643_v12, %v11203_v31  ;;  %vm11373_vm12 = vcmp.eq.f32.partialorder %v3774_v40, 8.507059e+37  ;;  %v3924_v11 = vand.u32 2147483647, %v11319_v43  ;;  %v3784_v1 = vadd.f32 %v6079_v38, %v3783_v42  ;;  %v11444_v42 = vld [vmem:[#allocation8] ss:$0 sm:$0xff] }
 0x34b   : > { %v4889_v28 = vmul.f32 %v10866_v35, %v4685_v51  ;;  %v4925_v16 = vmul.f32 %v10868_v22, %v4685_v51  ;;  %v3767_v8 = vsub.f32 1.0, %v3766_v25  ;;  %v3777_v31 = vor.u32 1.1754944e-38, %v3776_v7  ;;  %v1733_v4 = vpop.f32.mrf.mxu3  ;;  %v11441_v51 = vld [vmem:[#allocation7] ss:$0 sm:$0xff] }
 0x34c   : > { %v6085_v52 = vpop.eup %6084  ;;  %4848 = vst [vmem:[%s8663_s10 + $0x118] sm:$0xff] %v4684_v0  ;;  %vm3920_vm14 = vweird.f32 %v11319_v43  ;;  %v3926_v2 = vand.u32 2147483648, %v11319_v43  ;;  %6086 = vrcp.f32 %v11365_v17  ;;  %v3788_v32 = vsel %vm3787_vm13, %v6079_v38, %v3784_v1 }
 0x34d   : > { %4905 = vst [vmem:[%s10901_s14 + $0x40] sm:$0xff] %v4889_v28  ;;  %v3768_v36 = vmul.f32 %v6083_v14, %v3767_v8  ;;  %vm3771_vm15 = vweird.f32 %v6083_v14  ;;  %v3916_v56 = vmul.f32 %v6085_v52, %v11319_v43  ;;  %v3793_v21 = vsel %vm11349_vm8, %v3792_v60, %v3788_v32 }
 0x34e   : > { %4941 = vst [vmem:[%s10913_s17 + $0x40] sm:$0xff] %v4925_v16  ;;  %vm3921_vm0 = vweird.f32 %v6085_v52  ;;  %vm11392_vm1 = vcmp.eq.f32.partialorder %v3924_v11, 8.507059e+37  ;;  %6088 = vpow2.f32 %v11271_v29  ;;  %v4694_v55 = vmul.f32 %v3793_v21, %v11207_v48  ;;  %vm3772_vm2 = vmor %vm3770_vm11, %vm3771_vm15 }
 0x34f   : > { %v3769_v45 = vadd.f32 %v6083_v14, %v3768_v36  ;;  %v3917_v37 = vsub.f32 1.0, %v3916_v56  ;;  %v5356_v61 = vmul.f32 -1.442695, %v11277_v62  ;;  %v11403_v6 = vadd.f32 %v11300_v33, %v11298_v26  ;;  %vm3922_vm3 = vmor %vm3920_vm14, %vm3921_vm0  ;;  %v1668_v9 = vpop.f32.mrf.mxu2 }
 0x350   : > { %v11407_v38 = vadd.f32 %v11332_v23, %v11330_v47  ;;  %v11409_v19 = vadd.f32 %v1860_v30, %v1795_v50  ;;  %v11411_v29 = vadd.f32 %v1730_v58, %v1665_v44  ;;  %v4890_v48 = vmul.f32 %v10866_v35, %v4694_v55  ;;  %v1801_v58 = vpop.f32.mrf.mxu0  ;;  %v1866_v21 = vpop.f32.mrf.mxu1 }
 0x351   : > { %v4926_v54 = vmul.f32 %v10868_v22, %v4694_v55  ;;  %v3773_v20 = vsel %vm3772_vm2, %v6083_v14, %v3769_v45  ;;  %v3918_v10 = vmul.f32 %v6085_v52, %v3917_v37  ;;  %6090 = vpow2.f32 %v5356_v61 }
 0x352   : > { %v6087_v57 = vpop.eup %6086  ;;  %v3778_v26 = vsel %vm11373_vm12, %v3777_v31, %v3773_v20  ;;  %v5366_v33 = vmul.f32 -1.442695, %v11403_v6  ;;  %v5365_v47 = vmul.f32 -1.442695, %v11407_v38  ;;  %4906 = vst [vmem:[%s10901_s14 + $0x48] sm:$0xff] %v4890_v48  ;;  %v3927_v22 = vor.u32 1.1754944e-38, %v3926_v2 }
 0x353   : > { %v4693_v35 = vmul.f32 %v3778_v26, %v11220_v5  ;;  %v3919_v23 = vadd.f32 %v6085_v52, %v3918_v10  ;;  %v3901_v24 = vmul.f32 %v6087_v57, %v11365_v17  ;;  %4942 = vst [vmem:[%s10913_s17 + $0x48] sm:$0xff] %v4926_v54  ;;  %v3909_v15 = vand.u32 2147483647, %v11365_v17 }
 0x354   : > { %v6089_v63 = vpop.eup %6088  ;;  %6092 = vpow2.f32 %v5366_v33  ;;  %v5375_v27 = vmul.f32 -1.442695, %v11409_v19  ;;  %v11428_v49 = vadd.f32 %v1863_v3, %v1798_v59  ;;  %v3911_v60 = vand.u32 2147483648, %v11365_v17 }
 0x355   : > { %4852 = vst [vmem:[%s8663_s10 + $0x138] sm:$0xff] %v4693_v35  ;;  %v3923_v40 = vsel %vm3922_vm3, %v6085_v52, %v3919_v23  ;;  %v3902_v5 = vsub.f32 1.0, %v3901_v24  ;;  %v11431_v53 = vadd.f32 1.0, %v6089_v63  ;;  %6094 = vpow2.f32 %v5365_v47 }
 0x356   : > { %v3928_v13 = vsel %vm11392_vm1, %v3927_v22, %v3923_v40  ;;  %6096 = vpow2.f32 %v5375_v27  ;;  %v5374_v43 = vmul.f32 -1.442695, %v11411_v29  ;;  %vm3906_vm4 = vweird.f32 %v6087_v57 }
 0x357   : > { %v4703_v7 = vmul.f32 %v3928_v13, %v11223_v18  ;;  %v3903_v50 = vmul.f32 %v6087_v57, %v3902_v5  ;;  %6098 = vrcp.f32 %v11431_v53  ;;  %v6091_v30 = vpop.eup %6090  ;;  %vm3905_vm5 = vweird.f32 %v11365_v17 }
 0x358   : > { %v5384_v14 = vmul.f32 -1.442695, %v11428_v49  ;;  %v11447_v0 = vadd.f32 1.0, %v6091_v30  ;;  %vm3907_vm7 = vmor %vm3905_vm5, %vm3906_vm4  ;;  %vm3910_vm6 = vcmp.eq.f32.partialorder %v3909_v15, 8.507059e+37  ;;  %v3912_v17 = vor.u32 1.1754944e-38, %v3911_v60 }
 0x359   : > { %v4891_v12 = vmul.f32 %v11441_v51, %v4703_v7  ;;  %v4927_v18 = vmul.f32 %v11444_v42, %v4703_v7  ;;  %v3904_v25 = vadd.f32 %v6087_v57, %v3903_v50  ;;  %6100 = vpow2.f32 %v5374_v43 }
 0x35a   : > { %v6093_v34 = vpop.eup %6092  ;;  %v4059_v16 = vand.u32 2147483647, %v11431_v53  ;;  %6102 = vrcp.f32 %v11447_v0  ;;  %v11452_v1 = vadd.f32 %v1733_v4, %v1668_v9  ;;  %v4061_v31 = vand.u32 2147483648, %v11431_v53 }
 0x35b   : > { %v6095_v11 = vpop.eup %6094  ;;  %4907 = vst [vmem:[%s10901_s14 + $0x50] sm:$0xff] %v4891_v12  ;;  %v3908_v28 = vsel %vm3907_vm7, %v6087_v57, %v3904_v25  ;;  %v11456_v2 = vadd.f32 1.0, %v6093_v34  ;;  %6104 = vpow2.f32 %v5384_v14  ;;  %v4044_v55 = vand.u32 2147483647, %v11447_v0 }
 0x35c   : > { %v6097_v8 = vpop.eup %6096  ;;  %4943 = vst [vmem:[%s10913_s17 + $0x50] sm:$0xff] %v4927_v18  ;;  %v3913_v52 = vsel %vm3910_vm6, %v3912_v17, %v3908_v28  ;;  %v11458_v32 = vadd.f32 1.0, %v6095_v11  ;;  %vm4055_vm8 = vweird.f32 %v11431_v53  ;;  %v4046_v45 = vand.u32 2147483648, %v11447_v0 }
 0x35d   : > { %v6099_v36 = vpop.eup %6098  ;;  %v4702_v56 = vmul.f32 %v3913_v52, %v11232_v39  ;;  %v11461_v44 = vadd.f32 1.0, %v6097_v8  ;;  %6106 = vrcp.f32 %v11456_v2  ;;  %v5383_v39 = vmul.f32 -1.442695, %v11452_v1 }
 0x35e   : > { %v4051_v41 = vmul.f32 %v6099_v36, %v11431_v53  ;;  %6108 = vrcp.f32 %v11458_v32  ;;  %vm11471_vm9 = vcmp.eq.f32.partialorder %v4059_v16, 8.507059e+37  ;;  %v4062_v54 = vor.u32 1.1754944e-38, %v4061_v31 }
 0x35f   : > { %4856 = vst [vmem:[%s8663_s10 + $0x158] sm:$0xff] %v4702_v56  ;;  %v6101_v37 = vpop.eup %6100  ;;  %v11475_v20 = vadd.f32 %v1866_v21, %v1801_v58  ;;  %vm4040_vm10 = vweird.f32 %v11447_v0  ;;  %v4194_v59 = vand.u32 2147483647, %v11456_v2  ;;  %v4196_v3 = vand.u32 2147483648, %v11456_v2 }
 0x360   : > { %v4052_v61 = vsub.f32 1.0, %v4051_v41  ;;  %v6103_v10 = vpop.eup %6102  ;;  %6110 = vrcp.f32 %v11461_v44  ;;  %vm4056_vm11 = vweird.f32 %v6099_v36  ;;  %vm11482_vm12 = vcmp.eq.f32.partialorder %v4044_v55, 8.507059e+37 }
 0x361   : > { %v4036_v26 = vmul.f32 %v6103_v10, %v11447_v0  ;;  %v4179_v47 = vand.u32 2147483647, %v11458_v32  ;;  %v6105_v35 = vpop.eup %6104  ;;  %v4047_v23 = vor.u32 1.1754944e-38, %v4046_v45  ;;  %vm4190_vm13 = vweird.f32 %v11456_v2  ;;  %vm4057_vm15 = vmor %vm4055_vm8, %vm4056_vm11 }
 0x362   : > { %v4053_v57 = vmul.f32 %v6099_v36, %v4052_v61  ;;  %v11488_v22 = vadd.f32 1.0, %v6101_v37  ;;  %6112 = vpow2.f32 %v5383_v39  ;;  %vm4175_vm14 = vweird.f32 %v11458_v32 }
 0x363   : > { %v6107_v24 = vpop.eup %6106  ;;  %v4037_v15 = vsub.f32 1.0, %v4036_v26  ;;  %v4181_v27 = vand.u32 2147483648, %v11458_v32  ;;  %vm4041_vm0 = vweird.f32 %v6103_v10  ;;  %vm11496_vm1 = vcmp.eq.f32.partialorder %v4194_v59, 8.507059e+37 }
 0x364   : > { %v4054_v63 = vadd.f32 %v6099_v36, %v4053_v57  ;;  %v6109_v40 = vpop.eup %6108  ;;  %v4186_v5 = vmul.f32 %v6107_v24, %v11456_v2  ;;  %v4197_v60 = vor.u32 1.1754944e-38, %v4196_v3  ;;  %vm11501_vm2 = vcmp.eq.f32.partialorder %v4179_v47, 8.507059e+37  ;;  %vm4042_vm4 = vmor %vm4040_vm10, %vm4041_vm0 }
 0x365   : > { %v4038_v7 = vmul.f32 %v6103_v10, %v4037_v15  ;;  %v4171_v50 = vmul.f32 %v6109_v40, %v11458_v32  ;;  %vm4325_vm3 = vweird.f32 %v11461_v44  ;;  %6114 = vrcp.f32 %v11488_v22 }
 0x366   : > { %v4058_v43 = vsel %vm4057_vm15, %v6099_v36, %v4054_v63  ;;  %v6111_v14 = vpop.eup %6110  ;;  %v4187_v9 = vsub.f32 1.0, %v4186_v5  ;;  %v11509_v4 = vadd.f32 1.0, %v6105_v35  ;;  %vm4191_vm5 = vweird.f32 %v6107_v24  ;;  %v1671_v35 = vpop.f32.mrf.mxu2 }
 0x367   : > { %v4063_v53 = vsel %vm11471_vm9, %v4062_v54, %v4058_v43  ;;  %v4039_v18 = vadd.f32 %v6103_v10, %v4038_v7  ;;  %v4172_v25 = vsub.f32 1.0, %v4171_v50  ;;  %v4321_v34 = vmul.f32 %v6111_v14, %v11461_v44  ;;  %vm4192_vm6 = vmor %vm4190_vm13, %vm4191_vm5 }
 0x368   : > { %v4712_v12 = vmul.f32 %v4063_v53, %v11253_v46  ;;  %v6113_v17 = vpop.eup %6112  ;;  %v4188_v11 = vmul.f32 %v6107_v24, %v4187_v9  ;;  %vm4176_vm7 = vweird.f32 %v6109_v40  ;;  %v4331_v28 = vand.u32 2147483648, %v11461_v44 }
 0x369   : > { %v4043_v8 = vsel %vm4042_vm4, %v6103_v10, %v4039_v18  ;;  %v4173_v52 = vmul.f32 %v6109_v40, %v4172_v25  ;;  %v4182_v56 = vor.u32 1.1754944e-38, %v4181_v27  ;;  %v4322_v0 = vsub.f32 1.0, %v4321_v34  ;;  %vm4177_vm8 = vmor %vm4175_vm14, %vm4176_vm7 }
 0x36a   : > { %v4892_v16 = vmul.f32 %v11441_v51, %v4712_v12  ;;  %v4928_v46 = vmul.f32 %v11444_v42, %v4712_v12  ;;  %v4048_v31 = vsel %vm11482_vm12, %v4047_v23, %v4043_v8  ;;  %v4189_v36 = vadd.f32 %v6107_v24, %v4188_v11  ;;  %v1736_v23 = vpop.f32.mrf.mxu3 }
 0x36b   : > { %v4711_v58 = vmul.f32 %v4048_v31, %v11277_v62  ;;  %v4174_v21 = vadd.f32 %v6109_v40, %v4173_v52  ;;  %6116 = vrcp.f32 %v11509_v4  ;;  %v11526_v41 = vadd.f32 1.0, %v6113_v17  ;;  %v6115_v55 = vpop.eup %6114 }
 0x36c   : > { %4908 = vst [vmem:[%s10901_s14 + $0x58] sm:$0xff] %v4892_v16  ;;  %v4193_v45 = vsel %vm4192_vm6, %v6107_v24, %v4189_v36  ;;  %v4323_v39 = vmul.f32 %v6111_v14, %v4322_v0  ;;  %vm4326_vm9 = vweird.f32 %v6111_v14  ;;  %v4329_v37 = vand.u32 2147483647, %v11461_v44 }
 0x36d   : > { %4944 = vst [vmem:[%s10913_s17 + $0x58] sm:$0xff] %v4928_v46  ;;  %v4198_v62 = vsel %vm11496_vm1, %v4197_v60, %v4193_v45  ;;  %v4178_v2 = vsel %vm4177_vm8, %v6109_v40, %v4174_v21  ;;  %v4332_v61 = vor.u32 1.1754944e-38, %v4331_v28  ;;  %v4306_v48 = vmul.f32 %v6115_v55, %v11488_v22  ;;  %vm4327_vm10 = vmor %vm4325_vm3, %vm4326_vm9 }
 0x36e   : > { %4860 = vst [vmem:[%s8663_s10 + $0x178] sm:$0xff] %v4711_v58  ;;  %v4721_v54 = vmul.f32 %v4198_v62, %v11403_v6  ;;  %v4183_v10 = vsel %vm11501_vm2, %v4182_v56, %v4178_v2  ;;  %v4324_v32 = vadd.f32 %v6111_v14, %v4323_v39  ;;  %v4314_v59 = vand.u32 2147483647, %v11488_v22 }
 0x36f   : > { %v4720_v3 = vmul.f32 %v4183_v10, %v11407_v38  ;;  %v4307_v57 = vsub.f32 1.0, %v4306_v48  ;;  %v4316_v26 = vand.u32 2147483648, %v11488_v22  ;;  %6118 = vrcp.f32 %v11526_v41 }
 0x370   : > { %v4893_v6 = vmul.f32 %v11441_v51, %v4721_v54  ;;  %v4929_v33 = vmul.f32 %v11444_v42, %v4721_v54  ;;  %v4328_v47 = vsel %vm4327_vm10, %v6111_v14, %v4324_v32  ;;  %vm4330_vm11 = vcmp.eq.f32.partialorder %v4329_v37, 8.507059e+37 }
 0x371   : > { %v6117_v24 = vpop.eup %6116  ;;  %4864 = vst [vmem:[%s8663_s10 + $0x198] sm:$0xff] %v4720_v3  ;;  %v4333_v38 = vsel %vm4330_vm11, %v4332_v61, %v4328_v47  ;;  %v4308_v44 = vmul.f32 %v6115_v55, %v4307_v57  ;;  %vm4311_vm12 = vweird.f32 %v6115_v55  ;;  %vm4310_vm13 = vweird.f32 %v11488_v22 }
 0x372   : > { %4909 = vst [vmem:[%s10901_s14 + $0x60] sm:$0xff] %v4893_v6  ;;  %v4730_v63 = vmul.f32 %v4333_v38, %v11409_v19  ;;  %vm11552_vm14 = vcmp.eq.f32.partialorder %v4314_v59, 8.507059e+37  ;;  %v4456_v27 = vmul.f32 %v6117_v24, %v11509_v4  ;;  %v4317_v5 = vor.u32 1.1754944e-38, %v4316_v26  ;;  %vm4312_vm15 = vmor %vm4310_vm13, %vm4311_vm12 }
 0x373   : > { %4945 = vst [vmem:[%s10913_s17 + $0x60] sm:$0xff] %v4929_v33  ;;  %v4309_v40 = vadd.f32 %v6115_v55, %v4308_v44  ;;  %v5393_v13 = vmul.f32 -1.442695, %v11475_v20  ;;  %v11559_v60 = vadd.f32 %v1736_v23, %v1671_v35  ;;  %v4464_v7 = vand.u32 2147483647, %v11509_v4 }
 0x374   : > { %v4894_v43 = vmul.f32 %v11441_v51, %v4730_v63  ;;  %v4930_v19 = vmul.f32 %v11444_v42, %v4730_v63  ;;  %v4457_v22 = vsub.f32 1.0, %v4456_v27  ;;  %v4466_v14 = vand.u32 2147483648, %v11509_v4 }
 0x375   : > { %v6119_v50 = vpop.eup %6118  ;;  %v4313_v30 = vsel %vm4312_vm15, %v6115_v55, %v4309_v40  ;;  %6120 = vpow2.f32 %v5393_v13  ;;  %v5392_v53 = vmul.f32 -1.442695, %v11559_v60  ;;  %vm4461_vm0 = vweird.f32 %v6117_v24 }
 0x376   : > { %4910 = vst [vmem:[%s10901_s14 + $0x68] sm:$0xff] %v4894_v43  ;;  %v4318_v9 = vsel %vm11552_vm14, %v4317_v5, %v4313_v30  ;;  %v4458_v12 = vmul.f32 %v6117_v24, %v4457_v22  ;;  %v4441_v18 = vmul.f32 %v6119_v50, %v11526_v41  ;;  %vm4460_vm1 = vweird.f32 %v11509_v4 }
 0x377   : > { %4946 = vst [vmem:[%s10913_s17 + $0x68] sm:$0xff] %v4930_v19  ;;  %v4729_v25 = vmul.f32 %v4318_v9, %v11411_v29  ;;  %6122 = vpow2.f32 %v5392_v53  ;;  %vm4462_vm2 = vmor %vm4460_vm1, %vm4461_vm0  ;;  %v4467_v11 = vor.u32 1.1754944e-38, %v4466_v14  ;;  %v4449_v28 = vand.u32 2147483647, %v11526_v41 }
 0x378   : > { %v4459_v34 = vadd.f32 %v6117_v24, %v4458_v12  ;;  %v4442_v17 = vsub.f32 1.0, %v4441_v18  ;;  %v4451_v16 = vand.u32 2147483648, %v11526_v41  ;;  %vm4465_vm3 = vcmp.eq.f32.partialorder %v4464_v7, 8.507059e+37 }
 0x379   : > { %4868 = vst [vmem:[%s8663_s10 + $0x1b8] sm:$0xff] %v4729_v25  ;;  %vm4446_vm4 = vweird.f32 %v6119_v50  ;;  %vm4445_vm5 = vweird.f32 %v11526_v41  ;;  %vm4450_vm6 = vcmp.eq.f32.partialorder %v4449_v28, 8.507059e+37 }
 0x37a   : > { %v4463_v46 = vsel %vm4462_vm2, %v6117_v24, %v4459_v34  ;;  %v4443_v8 = vmul.f32 %v6119_v50, %v4442_v17  ;;  %vm4447_vm7 = vmor %vm4445_vm5, %vm4446_vm4  ;;  %v4452_v0 = vor.u32 1.1754944e-38, %v4451_v16 }
 0x37b   : > { %v6121_v52 = vpop.eup %6120  ;;  %v4468_v31 = vsel %vm4465_vm3, %v4467_v11, %v4463_v46 }
 0x37c   : > { %v4739_v29 = vmul.f32 %v4468_v31, %v11428_v49  ;;  %v4444_v36 = vadd.f32 %v6119_v50, %v4443_v8  ;;  %v2444_v4 = vadd.f32 1.0, %v6121_v52 }
 0x37d   : > { %v6123_v56 = vpop.eup %6122 }
 0x37e   : > { %v4895_v58 = vmul.f32 %v11441_v51, %v4739_v29  ;;  %v4931_v21 = vmul.f32 %v11444_v42, %v4739_v29  ;;  %v4448_v55 = vsel %vm4447_vm7, %v6119_v50, %v4444_v36  ;;  %6124 = vrcp.f32 %v2444_v4 }
 0x37f   : > { %v4453_v45 = vsel %vm4450_vm6, %v4452_v0, %v4448_v55  ;;  %v2443_v39 = vadd.f32 1.0, %v6123_v56  ;;  %v4599_v61 = vand.u32 2147483647, %v2444_v4  ;;  %v4601_v48 = vand.u32 2147483648, %v2444_v4 }
 0x380   : > { %4911 = vst [vmem:[%s10901_s14 + $0x70] sm:$0xff] %v4895_v58  ;;  %v4738_v49 = vmul.f32 %v4453_v45, %v11452_v1  ;;  %vm4595_vm9 = vweird.f32 %v2444_v4 }
 0x381   : > { %4947 = vst [vmem:[%s10913_s17 + $0x70] sm:$0xff] %v4931_v21  ;;  %6126 = vrcp.f32 %v2443_v39  ;;  %vm4600_vm11 = vcmp.eq.f32.partialorder %v4599_v61, 8.507059e+37  ;;  %v4602_v59 = vor.u32 1.1754944e-38, %v4601_v48  ;;  %v4586_v3 = vand.u32 2147483648, %v2443_v39 }
 0x382   : > { %4872 = vst [vmem:[%s8663_s10 + $0x1d8] sm:$0xff] %v4738_v49  ;;  %v4584_v6 = vand.u32 2147483647, %v2443_v39  ;;  %vm4580_vm13 = vweird.f32 %v2443_v39 }
 0x383   : > { %v4587_v23 = vor.u32 1.1754944e-38, %v4586_v3 }
 0x384   : > { %v6125_v41 = vpop.eup %6124  ;;  %vm4585_vm15 = vcmp.eq.f32.partialorder %v4584_v6, 8.507059e+37 }
 0x385   : > { %v4591_v37 = vmul.f32 %v6125_v41, %v2444_v4  ;;  %vm4596_vm8 = vweird.f32 %v6125_v41 }
 0x386   : > { %vm4597_vm10 = vmor %vm4595_vm9, %vm4596_vm8 }
 0x387   : > { %v4592_v62 = vsub.f32 1.0, %v4591_v37  ;;  %v6127_v2 = vpop.eup %6126 }
 0x388   : > { %v4576_v10 = vmul.f32 %v6127_v2, %v2443_v39  ;;  %vm4581_vm12 = vweird.f32 %v6127_v2 }
 0x389   : > { %v4593_v54 = vmul.f32 %v6125_v41, %v4592_v62  ;;  %vm4582_vm14 = vmor %vm4580_vm13, %vm4581_vm12 }
 0x38a   : > { %v4577_v1 = vsub.f32 1.0, %v4576_v10 }
 0x38b   : > { %v4594_v32 = vadd.f32 %v6125_v41, %v4593_v54 }
 0x38c   : > { %v4578_v26 = vmul.f32 %v6127_v2, %v4577_v1 }
 0x38d   : > { %v4598_v57 = vsel %vm4597_vm10, %v6125_v41, %v4594_v32 }
 0x38e   : > { %v4603_v33 = vsel %vm4600_vm11, %v4602_v59, %v4598_v57  ;;  %v4579_v35 = vadd.f32 %v6127_v2, %v4578_v26 }
 0x38f   : > { %v4748_v47 = vmul.f32 %v4603_v33, %v11475_v20 }
 0x390   : > { %v4583_v20 = vsel %vm4582_vm14, %v6127_v2, %v4579_v35 }
 0x391   : > { %v4896_v24 = vmul.f32 %v11441_v51, %v4748_v47  ;;  %v4932_v38 = vmul.f32 %v11444_v42, %v4748_v47  ;;  %v4588_v44 = vsel %vm4585_vm15, %v4587_v23, %v4583_v20 }
 0x392   : > { %v4747_v63 = vmul.f32 %v4588_v44, %v11559_v60 }
 0x393   : > { %4912 = vst [vmem:[%s10901_s14 + $0x78] sm:$0xff] %v4896_v24 }
 0x394   : > { %4948 = vst [vmem:[%s10913_s17 + $0x78] sm:$0xff] %v4932_v38 }
 0x395   : > { %4876 = vst [vmem:[%s8663_s10 + $0x1f8] sm:$0xff] %v4747_v63 }
 0x396   : > { %6401 = shalt.err (!%p6398_p4)
}
 0x397   : > { %s12043_s28 = smov 32   ;;  %s12044_s12 = smov 512  }
 0x398   : > { %5465 = dma.vmem_to_hbm [thread:$0]  (%p6650_p7), %s11600_s16, 8192, %s11604_s22, %s11621_s9, %s12044_s12, %s12044_s12, %s12043_s28  }
 0x399   : > { %s6416_s14 = sshra.s32 %s11611_s23, 4  ;;  %s6422_s1 = scalar_lea.hbm %s11694_s6, 256  ;;  %s6417_s14 = int_to_ptr.hbm [resolvable:$true] %s6416_s14 }
 0x39a   : > { %s6418_s29 = scalar_lea.hbm %s6417_s14, 128  ;;  %p6423_p2 = scmp.lt.s32.totalorder %s6417_s14, %s11694_s6 }
 0x39b   : > { %p6419_p8 = scmp.ne.s32.totalorder %s6417_s14, %s6418_s29  ;;  %p6424_p10 = scmp.lt.s32.totalorder %s6422_s1, %s6418_s29 }
 0x39d   : > { %p6420_p11 = pnand %p6419_p8, %p6650_p7  ;;  %p6425_p12 = por %p6424_p10, %p6423_p2 }
 0x39f   : > { %p6421_p9 = pneg %p6420_p11 }
 0x3a1   : > { %p6426_p13 = pnand %p6425_p12, %p6421_p9 }
 0x3a3   : > { %6429 = shalt.err (!%p6426_p13)
}
 0x3a4   : > { %s6523_s22 = smov 128   ;;  %s6524_s16 = smov 8  }
 0x3a5   : > { %5466 = dma.vmem_to_hbm [thread:$0]  (%p6650_p7), %s11606_s0, 2048, %s11611_s23, %s11621_s9, %s6523_s22, %s6523_s22, %s6524_s16  }
 0x3a6   : > { %s4965_s28 = scalar_lea.sflag [#allocation15], %s6678_s21  ;;  %s6444_s12 = sshra.s32 %s11617_s30, 4  ;;  %s6445_s12 = int_to_ptr.hbm [resolvable:$true] %s6444_s12 }
 0x3a7   : > { %s6446_s20 = scalar_lea.hbm %s6445_s12, 128  ;;  %s6450_s15 = scalar_lea.hbm %s11695_s7, 256 }
 0x3a8   : > { %p6447_p0 = scmp.ne.s32.totalorder %s6445_s12, %s6446_s20  ;;  %p6451_p1 = scmp.lt.s32.totalorder %s6445_s12, %s11695_s7 }
 0x3a9   : > { %p6452_p4 = scmp.lt.s32.totalorder %s6450_s15, %s6446_s20 }
 0x3aa   : > { %p6448_p3 = pnand %p6447_p0, %p6650_p7 }
 0x3ab   : > { %p6453_p8 = por %p6452_p4, %p6451_p1 }
 0x3ac   : > { %p6449_p5 = pneg %p6448_p3 }
 0x3ae   : > { %p6454_p11 = pnand %p6453_p8, %p6449_p5 }
 0x3b0   : > { %6457 = shalt.err (!%p6454_p11)
}
 0x3b1   : > { %5467 = dma.vmem_to_hbm [thread:$0]  (%p6650_p7), %s11615_s13, 2048, %s11617_s30, %s4965_s28, %s6523_s22, %s6523_s22, %s6524_s16  }
 0x3b2 PF: > { %s5047_s0 = sand.u32 1, %s6500_s24   ;;  %p12045_p9 = scmp.ge.s32.totalorder %s6512_s27, 2 }
 0x3b3   : > { %s5048_s21 = scalar_lea.sflag [#allocation4], %s5047_s0 }
 0x3b4   : > { %p5487_p2 = pnand %p12045_p9, %p6602_p6 }
 0x3b6   : > { %p5488_p10 = pneg %p5487_p2 }
 0x3b8   : > { %6487 = dma.done.wait (%p5488_p10), %s5048_s21, 8192  }
 0x3b9   : > { %6489 = vsyncadd (%p5488_p10), %s5048_s21, 4294959104  ;;  %s12046_s23 = sadd.s32 4294967294, %s6512_s27  }
 0x3ba   : > { %s5057_s9 = sand.u32 1, %s12046_s23  }
 0x3bb   : > { %s5058_s10 = scalar_lea.sflag [#allocation12], %s5057_s9 }
 0x3bc   : > { %6491 = dma.done.wait (%p5488_p10), %s5058_s10, 10240  }
 0x3bd   : > { %6493 = vsyncadd (%p5488_p10), %s5058_s10, 4294957056  ;;  %s5078_s18 = scalar_lea.sflag [#allocation15], %s5047_s0 }
 0x3be   : > { %6495 = dma.done.wait (%p5488_p10), %s5078_s18, 2048  }
 0x3bf   : > { %6497 = vsyncadd (%p5488_p10), %s5078_s18, 4294965248  ;;  %p29_p7 = scmp.ge.s32.totalorder %s6634_s11, 4   ;;  %s12047_s24 = smov %s6504_s25 }
 0x3c0   : > { %s12048_s25 = smov %s6508_s26  ;;  %s12049_s26 = smov %s6646_s19 }
 0x3c1   : > { %s12050_s27 = smov %s6634_s11  ;;  %31 = sbr.rel (!%p29_p7) target bundleno = 14 (0xe), region = 142 }
 0x3c6   :  { %5084 = vsyncpa [#allocation3], 1 }
 0x3c7   :  { %5086 = vsyncpa [#allocation3 + $0x1], 1 }
 0x3c8   :  { %5087 = vsyncpa [#allocation6], 1 }
 0x3c9   :  { %5088 = vsyncpa [#allocation9], 1 }
 0x3ca   :  { %5089 = vsyncpa [#allocation4], 1 }
 0x3cb   :  { %5091 = vsyncpa [#allocation4 + $0x1], 1 }
 0x3cc   :  { %5092 = vsyncpa [#allocation12], 1 }
 0x3cd   :  { %5094 = vsyncpa [#allocation12 + $0x1], 1 }
 0x3ce   :  { %5095 = vsyncpa [#allocation15], 1 }
 0x3cf   :  { %5097 = vsyncpa [#allocation15 + $0x1], 1 }

</bundles_post_ra>
